<compile_context>
chip_gen: v7x
topology: tpu7x:2x2x1
jax: 0.10.0
libtpu: 0.0.40
codegen_flags: <defaults>
</compile_context>

<pallas_src>
import functools

import jax
import jax.numpy as jnp
from jax import lax
from jax.experimental import pallas as pl
from jax.experimental.pallas import tpu as pltpu


def _round_up(x, m):
    return ((x + m - 1) // m) * m


# ----------------------------- Pallas kernels ------------------------------

def _gemm_bias_act_kernel(x_ref, w_ref, b_ref, o_ref, *, act):
    """One (tm, Kp) x (Kp, tn) tile: act(x @ w + b)."""
    y = jnp.dot(x_ref[...], w_ref[...], preferred_element_type=jnp.float32)
    y = y + b_ref[...]                       # (1, tn) broadcast over rows
    if act == "relu":
        y = jnp.maximum(y, 0.0)
    elif act == "sigmoid":
        y = 1.0 / (1.0 + jnp.exp(-y))        # EUP exp + divide
    o_ref[...] = y.astype(o_ref.dtype)


def _mlp_fused_kernel(x_ref, w1_ref, b1_ref, w2_ref, b2_ref, w3_ref, b3_ref,
                      o_ref):
    """Fused Linear(3200->embed) -> Linear(->400)+ReLU -> Linear(->4000)+ReLU.

    All intermediates stay VMEM/vreg resident; only the final activation is
    written back.
    """
    h = jnp.dot(x_ref[...], w1_ref[...],
                preferred_element_type=jnp.float32) + b1_ref[...]
    h = jnp.dot(h, w2_ref[...],
                preferred_element_type=jnp.float32) + b2_ref[...]
    h = jnp.maximum(h, 0.0)
    h = jnp.dot(h, w3_ref[...],
                preferred_element_type=jnp.float32) + b3_ref[...]
    o_ref[...] = jnp.maximum(h, 0.0)


# ------------------------------ Pallas wrappers -----------------------------

def gemm_bias_act(x, w, b, *, act="none", tm_max=256, tn_max=512):
    """act(x @ w + b) with zero-padding to aligned tiles and an (M,N) grid.

    x: (M, K)   w: (K, N)   b: (N,)   -> (M, N) float32
    """
    M, K = x.shape
    Kw, N = w.shape
    assert K == Kw
    Kp = _round_up(K, 128)
    tm = min(tm_max, _round_up(M, 8))
    tn = min(tn_max, _round_up(N, 128))
    Mp = _round_up(M, tm)
    Np = _round_up(N, tn)
    xp = jnp.pad(x, ((0, Mp - M), (0, Kp - K)))
    wp = jnp.pad(w, ((0, Kp - K), (0, Np - N)))
    bp = jnp.pad(b, (0, Np - N)).reshape(1, Np)

    out = pl.pallas_call(
        functools.partial(_gemm_bias_act_kernel, act=act),
        out_shape=jax.ShapeDtypeStruct((Mp, Np), jnp.float32),
        grid=(Mp // tm, Np // tn),
        in_specs=[
            pl.BlockSpec((tm, Kp), lambda i, j: (i, 0)),   # activations tile
            pl.BlockSpec((Kp, tn), lambda i, j: (0, j)),   # weight (resident)
            pl.BlockSpec((1, tn), lambda i, j: (0, j)),    # bias
        ],
        out_specs=pl.BlockSpec((tm, tn), lambda i, j: (i, j)),
        compiler_params=pltpu.CompilerParams(
            dimension_semantics=("parallel", "parallel")),
    )(xp, wp, bp)
    return out[:M, :N]


def fused_mlp(flat, w1, b1, w2, b2, w3, b3, n_out):
    """One pallas_call for the whole Linear chain; weights are pre-padded."""
    B, _ = flat.shape
    Bp = _round_up(B, 8)
    xp = jnp.pad(flat, ((0, Bp - B), (0, 0)))
    Np = w3.shape[1]
    out = pl.pallas_call(
        _mlp_fused_kernel,
        out_shape=jax.ShapeDtypeStruct((Bp, Np), jnp.float32),
        in_specs=[
            pl.BlockSpec(xp.shape, lambda: (0, 0)),
            pl.BlockSpec(w1.shape, lambda: (0, 0)),
            pl.BlockSpec(b1.shape, lambda: (0, 0)),
            pl.BlockSpec(w2.shape, lambda: (0, 0)),
            pl.BlockSpec(b2.shape, lambda: (0, 0)),
            pl.BlockSpec(w3.shape, lambda: (0, 0)),
            pl.BlockSpec(b3.shape, lambda: (0, 0)),
        ],
        out_specs=pl.BlockSpec((Bp, Np), lambda: (0, 0)),
        compiler_params=pltpu.CompilerParams(
            vmem_limit_bytes=32 * 1024 * 1024),   # ~11 MiB resident; safe on v5e/v6e/v7x
    )(xp, w1, b1, w2, b2, w3, b3)
    return out[:B, :n_out]


# --------------------------- layout plumbing (JAX) ---------------------------

def _im2col(x, kh, kw):
    """x: (B, C, H, W) -> patches (B*OH*OW, C*kh*kw), K ordered (C, kh, kw)."""
    B, C, H, W = x.shape
    oh, ow = H - kh + 1, W - kw + 1
    cols = []
    for i in range(kh):
        for j in range(kw):
            cols.append(x[:, :, i:i + oh, j:j + ow])       # (B, C, oh, ow)
    p = jnp.stack(cols, axis=0).reshape(kh, kw, B, C, oh, ow)
    p = p.transpose(2, 4, 5, 3, 0, 1)                      # (B, oh, ow, C, kh, kw)
    return p.reshape(B * oh * ow, C * kh * kw), (oh, ow)


# ----------------------------- params & prep -------------------------------

def init_params(key, embed):
    def u(k, shape, fan_in):
        bound = 1.0 / float(fan_in) ** 0.5
        return jax.random.uniform(k, shape, jnp.float32, -bound, bound)

    ks = jax.random.split(key, 15)
    params = {
        "conv1_w": u(ks[0], (4, 1, 5, 5), 1 * 25),
        "conv1_b": u(ks[1], (4,), 1 * 25),
        "conv2_w": u(ks[2], (8, 4, 5, 5), 4 * 25),
        "conv2_b": u(ks[3], (8,), 4 * 25),
        "enc_lin_w": u(ks[4], (embed, 3200), 3200),
        "enc_lin_b": u(ks[5], (embed,), 3200),
        "dec_lin1_w": u(ks[6], (400, embed), embed),
        "dec_lin1_b": u(ks[7], (400,), embed),
        "dec_lin2_w": u(ks[8], (4000, 400), 400),
        "dec_lin2_b": u(ks[9], (4000,), 400),
        "deconv1_w": u(ks[10], (10, 10, 5, 5), 10 * 25),   # ConvT: (Cin, Cout, kh, kw)
        "deconv1_b": u(ks[11], (10,), 10 * 25),
        "deconv2_w": u(ks[12], (10, 1, 5, 5), 10 * 25),
        "deconv2_b": u(ks[13], (1,), 10 * 25),
    }
    return params, ks[14]


def prepare_params(params, embed):
    """One-time: reshape/transpose/pad weights into GEMM-ready matrices."""
    embed_p = _round_up(embed, 128)
    n1, n1_p = 400, _round_up(400, 128)     # 512
    n2, n2_p = 4000, _round_up(4000, 128)   # 4096

    w1 = jnp.pad(params["enc_lin_w"].T, ((0, 0), (0, embed_p - embed)))
    b1 = jnp.pad(params["enc_lin_b"], (0, embed_p - embed))[None, :]
    w2 = jnp.pad(params["dec_lin1_w"].T,
                 ((0, embed_p - embed), (0, n1_p - n1)))
    b2 = jnp.pad(params["dec_lin1_b"], (0, n1_p - n1))[None, :]
    w3 = jnp.pad(params["dec_lin2_w"].T, ((0, n1_p - n1), (0, n2_p - n2)))
    b3 = jnp.pad(params["dec_lin2_b"], (0, n2_p - n2))[None, :]

    # ConvTranspose2d(stride=1, pad=0) -> pad-(k-1) conv with flipped kernel,
    # channels transposed: w_eff[co, ci, i, j] = w[ci, co, k-1-i, k-1-j].
    de1 = jnp.transpose(jnp.flip(params["deconv1_w"], (2, 3)), (1, 0, 2, 3))
    de2 = jnp.transpose(jnp.flip(params["deconv2_w"], (2, 3)), (1, 0, 2, 3))

    return {
        "conv1_wm": params["conv1_w"].reshape(4, -1).T,      # (25, 4)
        "conv1_b": params["conv1_b"],
        "conv2_wm": params["conv2_w"].reshape(8, -1).T,      # (100, 8)
        "conv2_b": params["conv2_b"],
        "mlp_w1": w1, "mlp_b1": b1,
        "mlp_w2": w2, "mlp_b2": b2,
        "mlp_w3": w3, "mlp_b3": b3,
        "deconv1_wm": de1.reshape(10, -1).T,                 # (250, 10)
        "deconv1_b": params["deconv1_b"],
        "deconv2_wm": de2.reshape(1, -1).T,                  # (250, 1)
        "deconv2_b": params["deconv2_b"],
    }


# ------------------------------ forward pass --------------------------------

def cnn_autoencoder_forward(x, pp):
    B = x.shape[0]

    # ---- encoder: Conv2d(1,4,5)+ReLU, Conv2d(4,8,5)+ReLU ----
    p, (oh, ow) = _im2col(x, 5, 5)                                  # (B*576, 25)
    y = gemm_bias_act(p, pp["conv1_wm"], pp["conv1_b"], act="relu")
    h = y.reshape(B, oh, ow, 4).transpose(0, 3, 1, 2)               # (B,4,24,24)

    p, (oh, ow) = _im2col(h, 5, 5)                                  # (B*400, 100)
    y = gemm_bias_act(p, pp["conv2_wm"], pp["conv2_b"], act="relu")
    h = y.reshape(B, oh, ow, 8).transpose(0, 3, 1, 2)               # (B,8,20,20)

    flat = h.reshape(B, 8 * oh * ow)                                # (B, 3200)

    # ---- fused Linear(3200->embed) -> Linear(->400)+ReLU -> Linear(->4000)+ReLU
    dec = fused_mlp(flat, pp["mlp_w1"], pp["mlp_b1"], pp["mlp_w2"], pp["mlp_b2"],
                    pp["mlp_w3"], pp["mlp_b3"], n_out=10 * 20 * 20)
    z = dec.reshape(B, 10, 20, 20)

    # ---- decoder: ConvT(10,10,5), ConvT(10,1,5)+Sigmoid (as padded convs) ----
    zp = jnp.pad(z, ((0, 0), (0, 0), (4, 4), (4, 4)))
    p, (oh, ow) = _im2col(zp, 5, 5)                                 # (B*576, 250)
    y = gemm_bias_act(p, pp["deconv1_wm"], pp["deconv1_b"], act="none")
    h = y.reshape(B, oh, ow, 10).transpose(0, 3, 1, 2)              # (B,10,24,24)

    hp = jnp.pad(h, ((0, 0), (0, 0), (4, 4), (4, 4)))
    p, (oh, ow) = _im2col(hp, 5, 5)                                 # (B*784, 250)
    y = gemm_bias_act(p, pp["deconv2_wm"], pp["deconv2_b"], act="sigmoid")
    out = y.reshape(B, oh, ow, 1).transpose(0, 3, 1, 2)             # (B,1,28,28)
    return out


# ------------------------------ JAX reference --------------------------------

def reference_forward(x, params):
    P = lax.Precision.HIGHEST
    dn = ("NCHW", "OIHW", "NCHW")
    y = lax.conv_general_dilated(x, params["conv1_w"], (1, 1), "VALID",
                                 dimension_numbers=dn, precision=P)
    y = jnp.maximum(y + params["conv1_b"][None, :, None, None], 0.0)
    y = lax.conv_general_dilated(y, params["conv2_w"], (1, 1), "VALID",
                                 dimension_numbers=dn, precision=P)
    y = jnp.maximum(y + params["conv2_b"][None, :, None, None], 0.0)
    flat = y.reshape(y.shape[0], -1)
    h = jnp.dot(flat, params["enc_lin_w"].T, precision=P) + params["enc_lin_b"]
    h = jnp.maximum(jnp.dot(h, params["dec_lin1_w"].T, precision=P)
                    + params["dec_lin1_b"], 0.0)
    h = jnp.maximum(jnp.dot(h, params["dec_lin2_w"].T, precision=P)
                    + params["dec_lin2_b"], 0.0)
    z = h.reshape(-1, 10, 20, 20)
    w_eff = jnp.transpose(jnp.flip(params["deconv1_w"], (2, 3)), (1, 0, 2, 3))
    z = lax.conv_general_dilated(z, w_eff, (1, 1), [(4, 4), (4, 4)],
                                 dimension_numbers=dn, precision=P)
    z = z + params["deconv1_b"][None, :, None, None]
    w_eff = jnp.transpose(jnp.flip(params["deconv2_w"], (2, 3)), (1, 0, 2, 3))
    z = lax.conv_general_dilated(z, w_eff, (1, 1), [(4, 4), (4, 4)],
                                 dimension_numbers=dn, precision=P)
    z = z + params["deconv2_b"][None, :, None, None]
    return jax.nn.sigmoid(z)


# ---------------------------------- main -------------------------------------

if __name__ == "__main__":
    EMBED = 32
    BATCH = 2

    key = jax.random.PRNGKey(0)
    params, key = init_params(key, EMBED)
    x = jax.random.normal(key, (BATCH, 1, 28, 28), jnp.float32)  # MNIST-sized

    prepped = prepare_params(params, EMBED)
    fwd = jax.jit(cnn_autoencoder_forward)
    out = jax.block_until_ready(fwd(x, prepped))
    assert out.shape == (BATCH, 1, 28, 28)

    ref = reference_forward(x, params)
    max_err = float(jnp.max(jnp.abs(out - ref)))
    assert max_err < 1e-3, f"max abs err {max_err}"

    print("KERNEL_OK")
</pallas_src>

<mosaic_0001>
module attributes {stable_mosaic.version = 11 : i64} {
  func.func @_gemm_bias_act_kernel(%arg0: i32, %arg1: i32, %arg2: memref<256x128xf32, #tpu.memory_space<vmem>>, %arg3: memref<128x128xf32, #tpu.memory_space<vmem>>, %arg4: memref<1x128xf32, #tpu.memory_space<vmem>>, %arg5: memref<256x128xf32, #tpu.memory_space<vmem>>) attributes {dimension_semantics = [#tpu.dimension_semantics<parallel>, #tpu.dimension_semantics<parallel>], iteration_bounds = array<i64: 5, 1>, scalar_prefetch = 0 : i64, scratch_operands = 0 : i64, tpu.core_type = #tpu.core_type<tc>, window_params = [{transform_indices = @transform_0, window_bounds = array<i64: 256, 128>}, {transform_indices = @transform_1, window_bounds = array<i64: 128, 128>}, {transform_indices = @transform_2, window_bounds = array<i64: 1, 128>}, {transform_indices = @transform_3, window_bounds = array<i64: 256, 128>}]} {
    %c0 = arith.constant 0 : index
    %c0_0 = arith.constant 0 : index
    %0 = vector.load %arg2[%c0, %c0_0] : memref<256x128xf32, #tpu.memory_space<vmem>>, vector<256x128xf32>
    %c0_1 = arith.constant 0 : index
    %c0_2 = arith.constant 0 : index
    %1 = vector.load %arg3[%c0_1, %c0_2] : memref<128x128xf32, #tpu.memory_space<vmem>>, vector<128x128xf32>
    %cst = arith.constant dense<0.000000e+00> : vector<256x128xf32>
    %2 = tpu.matmul %0, %1, %cst {dimension_numbers = #tpu.dot_dimension_numbers<[1], [0], [0], [1], [0, 0, 1, 1], [], []>} : vector<256x128xf32>, vector<128x128xf32>, vector<256x128xf32> -> vector<256x128xf32>
    %c0_3 = arith.constant 0 : index
    %c0_4 = arith.constant 0 : index
    %3 = vector.load %arg4[%c0_3, %c0_4] : memref<1x128xf32, #tpu.memory_space<vmem>>, vector<1x128xf32>
    %4 = vector.broadcast %3 : vector<1x128xf32> to vector<256x128xf32>
    %5 = arith.addf %2, %4 : vector<256x128xf32>
    %cst_5 = arith.constant 0.000000e+00 : f32
    %6 = vector.broadcast %cst_5 : f32 to vector<256x128xf32>
    %7 = arith.maximumf %5, %6 : vector<256x128xf32>
    %c0_6 = arith.constant 0 : index
    %c0_7 = arith.constant 0 : index
    %8 = vector.load %arg5[%c0_6, %c0_7] : memref<256x128xf32, #tpu.memory_space<vmem>>, vector<256x128xf32>
    tpu.vector_store %arg5[%c0_6, %c0_7], %7 {strides = array<i32>} : memref<256x128xf32, #tpu.memory_space<vmem>>, vector<256x128xf32>,
    return
  }
  func.func @transform_0(%arg0: i32, %arg1: i32) -> (i32, i32) {
    %c0_i32 = arith.constant 0 : i32
    %c0_i32_0 = arith.constant 0 : i32
    return %arg0, %c0_i32 : i32, i32
  }
  func.func @transform_1(%arg0: i32, %arg1: i32) -> (i32, i32) {
    %c0_i32 = arith.constant 0 : i32
    %c0_i32_0 = arith.constant 0 : i32
    return %c0_i32, %arg1 : i32, i32
  }
  func.func @transform_2(%arg0: i32, %arg1: i32) -> (i32, i32) {
    %c0_i32 = arith.constant 0 : i32
    %c0_i32_0 = arith.constant 0 : i32
    return %c0_i32, %arg1 : i32, i32
  }
  func.func @transform_3(%arg0: i32, %arg1: i32) -> (i32, i32) {
    %c0_i32 = arith.constant 0 : i32
    return %arg0, %arg1 : i32, i32
  }
}

module attributes {stable_mosaic.version = 11 : i64} {
  func.func @_gemm_bias_act_kernel(%arg0: i32, %arg1: i32, %arg2: memref<256x128xf32, #tpu.memory_space<vmem>>, %arg3: memref<128x128xf32, #tpu.memory_space<vmem>>, %arg4: memref<1x128xf32, #tpu.memory_space<vmem>>, %arg5: memref<256x128xf32, #tpu.memory_space<vmem>>) attributes {dimension_semantics = [#tpu.dimension_semantics<parallel>, #tpu.dimension_semantics<parallel>], iteration_bounds = array<i64: 4, 1>, scalar_prefetch = 0 : i64, scratch_operands = 0 : i64, tpu.core_type = #tpu.core_type<tc>, window_params = [{transform_indices = @transform_0, window_bounds = array<i64: 256, 128>}, {transform_indices = @transform_1, window_bounds = array<i64: 128, 128>}, {transform_indices = @transform_2, window_bounds = array<i64: 1, 128>}, {transform_indices = @transform_3, window_bounds = array<i64: 256, 128>}]} {
    %c0 = arith.constant 0 : index
    %c0_0 = arith.constant 0 : index
    %0 = vector.load %arg2[%c0, %c0_0] : memref<256x128xf32, #tpu.memory_space<vmem>>, vector<256x128xf32>
    %c0_1 = arith.constant 0 : index
    %c0_2 = arith.constant 0 : index
    %1 = vector.load %arg3[%c0_1, %c0_2] : memref<128x128xf32, #tpu.memory_space<vmem>>, vector<128x128xf32>
    %cst = arith.constant dense<0.000000e+00> : vector<256x128xf32>
    %2 = tpu.matmul %0, %1, %cst {dimension_numbers = #tpu.dot_dimension_numbers<[1], [0], [0], [1], [0, 0, 1, 1], [], []>} : vector<256x128xf32>, vector<128x128xf32>, vector<256x128xf32> -> vector<256x128xf32>
    %c0_3 = arith.constant 0 : index
    %c0_4 = arith.constant 0 : index
    %3 = vector.load %arg4[%c0_3, %c0_4] : memref<1x128xf32, #tpu.memory_space<vmem>>, vector<1x128xf32>
    %4 = vector.broadcast %3 : vector<1x128xf32> to vector<256x128xf32>
    %5 = arith.addf %2, %4 : vector<256x128xf32>
    %cst_5 = arith.constant 0.000000e+00 : f32
    %6 = vector.broadcast %cst_5 : f32 to vector<256x128xf32>
    %7 = arith.maximumf %5, %6 : vector<256x128xf32>
    %c0_6 = arith.constant 0 : index
    %c0_7 = arith.constant 0 : index
    %8 = vector.load %arg5[%c0_6, %c0_7] : memref<256x128xf32, #tpu.memory_space<vmem>>, vector<256x128xf32>
    tpu.vector_store %arg5[%c0_6, %c0_7], %7 {strides = array<i32>} : memref<256x128xf32, #tpu.memory_space<vmem>>, vector<256x128xf32>,
    return
  }
  func.func @transform_0(%arg0: i32, %arg1: i32) -> (i32, i32) {
    %c0_i32 = arith.constant 0 : i32
    %c0_i32_0 = arith.constant 0 : i32
    return %arg0, %c0_i32 : i32, i32
  }
  func.func @transform_1(%arg0: i32, %arg1: i32) -> (i32, i32) {
    %c0_i32 = arith.constant 0 : i32
    %c0_i32_0 = arith.constant 0 : i32
    return %c0_i32, %arg1 : i32, i32
  }
  func.func @transform_2(%arg0: i32, %arg1: i32) -> (i32, i32) {
    %c0_i32 = arith.constant 0 : i32
    %c0_i32_0 = arith.constant 0 : i32
    return %c0_i32, %arg1 : i32, i32
  }
  func.func @transform_3(%arg0: i32, %arg1: i32) -> (i32, i32) {
    %c0_i32 = arith.constant 0 : i32
    return %arg0, %arg1 : i32, i32
  }
}

module attributes {stable_mosaic.version = 11 : i64} {
  func.func @_mlp_fused_kernel(%arg0: memref<8x3200xf32, #tpu.memory_space<vmem>>, %arg1: memref<3200x128xf32, #tpu.memory_space<vmem>>, %arg2: memref<1x128xf32, #tpu.memory_space<vmem>>, %arg3: memref<128x512xf32, #tpu.memory_space<vmem>>, %arg4: memref<1x512xf32, #tpu.memory_space<vmem>>, %arg5: memref<512x4096xf32, #tpu.memory_space<vmem>>, %arg6: memref<1x4096xf32, #tpu.memory_space<vmem>>, %arg7: memref<8x4096xf32, #tpu.memory_space<vmem>>) attributes {dimension_semantics = [], scalar_prefetch = 0 : i64, scratch_operands = 0 : i64, tpu.core_type = #tpu.core_type<tc>} {
    %c0 = arith.constant 0 : index
    %c0_0 = arith.constant 0 : index
    %0 = vector.load %arg0[%c0, %c0_0] : memref<8x3200xf32, #tpu.memory_space<vmem>>, vector<8x3200xf32>
    %c0_1 = arith.constant 0 : index
    %c0_2 = arith.constant 0 : index
    %1 = vector.load %arg1[%c0_1, %c0_2] : memref<3200x128xf32, #tpu.memory_space<vmem>>, vector<3200x128xf32>
    %cst = arith.constant dense<0.000000e+00> : vector<8x128xf32>
    %2 = tpu.matmul %0, %1, %cst {dimension_numbers = #tpu.dot_dimension_numbers<[1], [0], [0], [1], [0, 0, 1, 1], [], []>} : vector<8x3200xf32>, vector<3200x128xf32>, vector<8x128xf32> -> vector<8x128xf32>
    %c0_3 = arith.constant 0 : index
    %c0_4 = arith.constant 0 : index
    %3 = vector.load %arg2[%c0_3, %c0_4] : memref<1x128xf32, #tpu.memory_space<vmem>>, vector<1x128xf32>
    %4 = vector.broadcast %3 : vector<1x128xf32> to vector<8x128xf32>
    %5 = arith.addf %2, %4 : vector<8x128xf32>
    %c0_5 = arith.constant 0 : index
    %c0_6 = arith.constant 0 : index
    %6 = vector.load %arg3[%c0_5, %c0_6] : memref<128x512xf32, #tpu.memory_space<vmem>>, vector<128x512xf32>
    %cst_7 = arith.constant dense<0.000000e+00> : vector<8x512xf32>
    %7 = tpu.matmul %5, %6, %cst_7 {dimension_numbers = #tpu.dot_dimension_numbers<[1], [0], [0], [1], [0, 0, 1, 1], [], []>} : vector<8x128xf32>, vector<128x512xf32>, vector<8x512xf32> -> vector<8x512xf32>
    %c0_8 = arith.constant 0 : index
    %c0_9 = arith.constant 0 : index
    %8 = vector.load %arg4[%c0_8, %c0_9] : memref<1x512xf32, #tpu.memory_space<vmem>>, vector<1x512xf32>
    %9 = vector.broadcast %8 : vector<1x512xf32> to vector<8x512xf32>
    %10 = arith.addf %7, %9 : vector<8x512xf32>
    %cst_10 = arith.constant 0.000000e+00 : f32
    %11 = vector.broadcast %cst_10 : f32 to vector<8x512xf32>
    %12 = arith.maximumf %10, %11 : vector<8x512xf32>
    %c0_11 = arith.constant 0 : index
    %c0_12 = arith.constant 0 : index
    %13 = vector.load %arg5[%c0_11, %c0_12] : memref<512x4096xf32, #tpu.memory_space<vmem>>, vector<512x4096xf32>
    %cst_13 = arith.constant dense<0.000000e+00> : vector<8x4096xf32>
    %14 = tpu.matmul %12, %13, %cst_13 {dimension_numbers = #tpu.dot_dimension_numbers<[1], [0], [0], [1], [0, 0, 1, 1], [], []>} : vector<8x512xf32>, vector<512x4096xf32>, vector<8x4096xf32> -> vector<8x4096xf32>
    %c0_14 = arith.constant 0 : index
    %c0_15 = arith.constant 0 : index
    %15 = vector.load %arg6[%c0_14, %c0_15] : memref<1x4096xf32, #tpu.memory_space<vmem>>, vector<1x4096xf32>
    %16 = vector.broadcast %15 : vector<1x4096xf32> to vector<8x4096xf32>
    %17 = arith.addf %14, %16 : vector<8x4096xf32>
    %cst_16 = arith.constant 0.000000e+00 : f32
    %18 = vector.broadcast %cst_16 : f32 to vector<8x4096xf32>
    %19 = arith.maximumf %17, %18 : vector<8x4096xf32>
    %c0_17 = arith.constant 0 : index
    %c0_18 = arith.constant 0 : index
    %20 = vector.load %arg7[%c0_17, %c0_18] : memref<8x4096xf32, #tpu.memory_space<vmem>>, vector<8x4096xf32>
    tpu.vector_store %arg7[%c0_17, %c0_18], %19 {strides = array<i32>} : memref<8x4096xf32, #tpu.memory_space<vmem>>, vector<8x4096xf32>,
    return
  }
}

module attributes {stable_mosaic.version = 11 : i64} {
  func.func @_gemm_bias_act_kernel(%arg0: i32, %arg1: i32, %arg2: memref<256x256xf32, #tpu.memory_space<vmem>>, %arg3: memref<256x128xf32, #tpu.memory_space<vmem>>, %arg4: memref<1x128xf32, #tpu.memory_space<vmem>>, %arg5: memref<256x128xf32, #tpu.memory_space<vmem>>) attributes {dimension_semantics = [#tpu.dimension_semantics<parallel>, #tpu.dimension_semantics<parallel>], iteration_bounds = array<i64: 5, 1>, scalar_prefetch = 0 : i64, scratch_operands = 0 : i64, tpu.core_type = #tpu.core_type<tc>, window_params = [{transform_indices = @transform_0, window_bounds = array<i64: 256, 256>}, {transform_indices = @transform_1, window_bounds = array<i64: 256, 128>}, {transform_indices = @transform_2, window_bounds = array<i64: 1, 128>}, {transform_indices = @transform_3, window_bounds = array<i64: 256, 128>}]} {
    %c0 = arith.constant 0 : index
    %c0_0 = arith.constant 0 : index
    %0 = vector.load %arg2[%c0, %c0_0] : memref<256x256xf32, #tpu.memory_space<vmem>>, vector<256x256xf32>
    %c0_1 = arith.constant 0 : index
    %c0_2 = arith.constant 0 : index
    %1 = vector.load %arg3[%c0_1, %c0_2] : memref<256x128xf32, #tpu.memory_space<vmem>>, vector<256x128xf32>
    %cst = arith.constant dense<0.000000e+00> : vector<256x128xf32>
    %2 = tpu.matmul %0, %1, %cst {dimension_numbers = #tpu.dot_dimension_numbers<[1], [0], [0], [1], [0, 0, 1, 1], [], []>} : vector<256x256xf32>, vector<256x128xf32>, vector<256x128xf32> -> vector<256x128xf32>
    %c0_3 = arith.constant 0 : index
    %c0_4 = arith.constant 0 : index
    %3 = vector.load %arg4[%c0_3, %c0_4] : memref<1x128xf32, #tpu.memory_space<vmem>>, vector<1x128xf32>
    %4 = vector.broadcast %3 : vector<1x128xf32> to vector<256x128xf32>
    %5 = arith.addf %2, %4 : vector<256x128xf32>
    %c0_5 = arith.constant 0 : index
    %c0_6 = arith.constant 0 : index
    %6 = vector.load %arg5[%c0_5, %c0_6] : memref<256x128xf32, #tpu.memory_space<vmem>>, vector<256x128xf32>
    tpu.vector_store %arg5[%c0_5, %c0_6], %5 {strides = array<i32>} : memref<256x128xf32, #tpu.memory_space<vmem>>, vector<256x128xf32>,
    return
  }
  func.func @transform_0(%arg0: i32, %arg1: i32) -> (i32, i32) {
    %c0_i32 = arith.constant 0 : i32
    %c0_i32_0 = arith.constant 0 : i32
    return %arg0, %c0_i32 : i32, i32
  }
  func.func @transform_1(%arg0: i32, %arg1: i32) -> (i32, i32) {
    %c0_i32 = arith.constant 0 : i32
    %c0_i32_0 = arith.constant 0 : i32
    return %c0_i32, %arg1 : i32, i32
  }
  func.func @transform_2(%arg0: i32, %arg1: i32) -> (i32, i32) {
    %c0_i32 = arith.constant 0 : i32
    %c0_i32_0 = arith.constant 0 : i32
    return %c0_i32, %arg1 : i32, i32
  }
  func.func @transform_3(%arg0: i32, %arg1: i32) -> (i32, i32) {
    %c0_i32 = arith.constant 0 : i32
    return %arg0, %arg1 : i32, i32
  }
}

module attributes {stable_mosaic.version = 11 : i64} {
  func.func @_gemm_bias_act_kernel(%arg0: i32, %arg1: i32, %arg2: memref<256x256xf32, #tpu.memory_space<vmem>>, %arg3: memref<256x128xf32, #tpu.memory_space<vmem>>, %arg4: memref<1x128xf32, #tpu.memory_space<vmem>>, %arg5: memref<256x128xf32, #tpu.memory_space<vmem>>) attributes {dimension_semantics = [#tpu.dimension_semantics<parallel>, #tpu.dimension_semantics<parallel>], iteration_bounds = array<i64: 7, 1>, scalar_prefetch = 0 : i64, scratch_operands = 0 : i64, tpu.core_type = #tpu.core_type<tc>, window_params = [{transform_indices = @transform_0, window_bounds = array<i64: 256, 256>}, {transform_indices = @transform_1, window_bounds = array<i64: 256, 128>}, {transform_indices = @transform_2, window_bounds = array<i64: 1, 128>}, {transform_indices = @transform_3, window_bounds = array<i64: 256, 128>}]} {
    %c0 = arith.constant 0 : index
    %c0_0 = arith.constant 0 : index
    %0 = vector.load %arg2[%c0, %c0_0] : memref<256x256xf32, #tpu.memory_space<vmem>>, vector<256x256xf32>
    %c0_1 = arith.constant 0 : index
    %c0_2 = arith.constant 0 : index
    %1 = vector.load %arg3[%c0_1, %c0_2] : memref<256x128xf32, #tpu.memory_space<vmem>>, vector<256x128xf32>
    %cst = arith.constant dense<0.000000e+00> : vector<256x128xf32>
    %2 = tpu.matmul %0, %1, %cst {dimension_numbers = #tpu.dot_dimension_numbers<[1], [0], [0], [1], [0, 0, 1, 1], [], []>} : vector<256x256xf32>, vector<256x128xf32>, vector<256x128xf32> -> vector<256x128xf32>
    %c0_3 = arith.constant 0 : index
    %c0_4 = arith.constant 0 : index
    %3 = vector.load %arg4[%c0_3, %c0_4] : memref<1x128xf32, #tpu.memory_space<vmem>>, vector<1x128xf32>
    %4 = vector.broadcast %3 : vector<1x128xf32> to vector<256x128xf32>
    %5 = arith.addf %2, %4 : vector<256x128xf32>
    %cst_5 = arith.constant 0.000000e+00 : f32
    %6 = vector.broadcast %cst_5 : f32 to vector<256x128xf32>
    %7 = arith.subf %6, %5 : vector<256x128xf32>
    %8 = math.exp %7 : vector<256x128xf32>
    %cst_6 = arith.constant 1.000000e+00 : f32
    %9 = vector.broadcast %cst_6 : f32 to vector<256x128xf32>
    %10 = arith.addf %9, %8 : vector<256x128xf32>
    %cst_7 = arith.constant 1.000000e+00 : f32
    %11 = vector.broadcast %cst_7 : f32 to vector<256x128xf32>
    %12 = arith.divf %11, %10 : vector<256x128xf32>
    %c0_8 = arith.constant 0 : index
    %c0_9 = arith.constant 0 : index
    %13 = vector.load %arg5[%c0_8, %c0_9] : memref<256x128xf32, #tpu.memory_space<vmem>>, vector<256x128xf32>
    tpu.vector_store %arg5[%c0_8, %c0_9], %12 {strides = array<i32>} : memref<256x128xf32, #tpu.memory_space<vmem>>, vector<256x128xf32>,
    return
  }
  func.func @transform_0(%arg0: i32, %arg1: i32) -> (i32, i32) {
    %c0_i32 = arith.constant 0 : i32
    %c0_i32_0 = arith.constant 0 : i32
    return %arg0, %c0_i32 : i32, i32
  }
  func.func @transform_1(%arg0: i32, %arg1: i32) -> (i32, i32) {
    %c0_i32 = arith.constant 0 : i32
    %c0_i32_0 = arith.constant 0 : i32
    return %c0_i32, %arg1 : i32, i32
  }
  func.func @transform_2(%arg0: i32, %arg1: i32) -> (i32, i32) {
    %c0_i32 = arith.constant 0 : i32
    %c0_i32_0 = arith.constant 0 : i32
    return %c0_i32, %arg1 : i32, i32
  }
  func.func @transform_3(%arg0: i32, %arg1: i32) -> (i32, i32) {
    %c0_i32 = arith.constant 0 : i32
    return %arg0, %arg1 : i32, i32
  }
}

</mosaic_0001>

<bundles_post_ra>
// kernel: cnn_autoencoder_forward.5
= control target key start
LH: loop header
LB: loop body
LE: loop exit
PB: predicated region body
PF: predicated region fallthrough
CT: control target
= control target key end

     0   :  { %s929_s12 = smov 0   ;;  %s931_s13 = smov 0   ;;  %s1122_s0 = inlined_call_operand.vmem [shape: f32[1280,128], index: 0, kind: input, shape index: {}]   ;;  %s1123_s1 = inlined_call_operand.vmem [shape: f32[128,128], index: 1, kind: input, shape index: {}]   ;;  %s1124_s2 = inlined_call_operand.vmem [shape: f32[1,128], index: 2, kind: input, shape index: {}]   ;;  %s1125_s3 = inlined_call_operand.vmem [shape: f32[1280,128], index: 3, kind: output, shape index: {}]  }
   0x1   :  { %s933_s14 = smov 0  }
   0x2 LB: > { %s25_s15 = sadd.s32 1, %s903_s13  ;;  %p677_p0 = scmp.ge.s32.totalorder %s907_s14, 1  ;;  %s907_s14 = sphi %s933_s14, %s13_s14   ;;  %s903_s13 = sphi %s931_s13, %s1127_s13   ;;  %s899_s12 = sphi %s929_s12, %s1126_s12  }
   0x3   : > { %p27_p1 = scmp.ge.s32.totalorder %s25_s15, 5  ;;  %p169_p2 = scmp.lt.s32.totalorder %s907_s14, 6 }
   0x5   : > { %s1129_s15 = smov (%p27_p1, %s25_s15), 0  ;;  %p170_p3 = pnand %p677_p0, %p169_p2 }
   0x6   : > { %v257_v0 = vld [vmem:[%s1123_s1] sm:$0xff] (!%p170_p3)  ;;  %v258_v1 = vld [vmem:[%s1123_s1 + $0x8] sm:$0xff] (!%p170_p3)  ;;  %v259_v2 = vld [vmem:[%s1123_s1 + $0x10] sm:$0xff] (!%p170_p3)  ;;  %s678_s22 = sshll.u32 (!%p170_p3), %s899_s12, 5 }
   0x7   : > { %173 = sbr.rel (%p170_p3) target bundleno = 288 (0x120), region = 32  ;;  %v813_v3 = vpack.c.bf16 (!%p170_p3), %v258_v1, %v257_v0  ;;  %v260_v4 = vld [vmem:[%s1123_s1 + $0x18] sm:$0xff] (!%p170_p3)  ;;  %p204_p4 = scmp.lt.s32.totalorder (!%p170_p3), %s678_s22, 159  ;;  %v261_v6 = vld [vmem:[%s1123_s1 + $0x20] sm:$0xff] (!%p170_p3)  ;;  %v262_v7 = vld [vmem:[%s1123_s1 + $0x28] sm:$0xff] (!%p170_p3) }
   0x8   : > { %v817_v5 = vpack.c.bf16 (!%p170_p3), %v260_v4, %v259_v2  ;;  %v821_v8 = vpack.c.bf16 (!%p170_p3), %v262_v7, %v261_v6  ;;  %v263_v9 = vld [vmem:[%s1123_s1 + $0x30] sm:$0xff] (!%p170_p3)  ;;  %v264_v10 = vld [vmem:[%s1123_s1 + $0x38] sm:$0xff] (!%p170_p3)  ;;  %v265_v14 = vld [vmem:[%s1123_s1 + $0x40] sm:$0xff] (!%p170_p3) }
   0x9   : > { %814 = vmatprep.subr.bf16.mxu0 (!%p170_p3), %v813_v3  ;;  %845 = vmatprep.subr.bf16.mxu1 (!%p170_p3), %v813_v3  ;;  %v825_v13 = vpack.c.bf16 (!%p170_p3), %v264_v10, %v263_v9  ;;  %v266_v15 = vld [vmem:[%s1123_s1 + $0x48] sm:$0xff] (!%p170_p3)  ;;  %v267_v17 = vld [vmem:[%s1123_s1 + $0x50] sm:$0xff] (!%p170_p3)  ;;  %v268_v18 = vld [vmem:[%s1123_s1 + $0x58] sm:$0xff] (!%p170_p3) }
   0xa   : > { %816 = vmatpush3.bf16.msra.mxu0 (!%p170_p3), %v813_v3  ;;  %853 = vmatpush3.bf16.msra.mxu1 (!%p170_p3), %v813_v3  ;;  %v829_v16 = vpack.c.bf16 (!%p170_p3), %v266_v15, %v265_v14  ;;  %v833_v19 = vpack.c.bf16 (!%p170_p3), %v268_v18, %v267_v17  ;;  %v269_v20 = vld [vmem:[%s1123_s1 + $0x60] sm:$0xff] (!%p170_p3)  ;;  %v270_v21 = vld [vmem:[%s1123_s1 + $0x68] sm:$0xff] (!%p170_p3)  ;;  %v271_v23 = vld [vmem:[%s1123_s1 + $0x70] sm:$0xff] (!%p170_p3) }
   0xb   : > { %818 = vmatprep.subr.bf16.mxu0 (!%p170_p3), %v817_v5  ;;  %846 = vmatprep.subr.bf16.mxu1 (!%p170_p3), %v817_v5  ;;  %v837_v22 = vpack.c.bf16 (!%p170_p3), %v270_v21, %v269_v20  ;;  %v272_v24 = vld [vmem:[%s1123_s1 + $0x78] sm:$0xff] (!%p170_p3)  ;;  %v1040_v56 = vld [vmem:[%s1124_s2] ss:$0 sm:$0xff] (!%p170_p3) }
   0xc   : > { %v841_v25 = vpack.c.bf16 (!%p170_p3), %v272_v24, %v271_v23 }
   0xe   : > { %s1131_s22 = smov (!%p204_p4, %s678_s22), 159  ;;  %820 = vmatpush3.bf16.msra.mxu0 %v817_v5  ;;  %854 = vmatpush3.bf16.msra.mxu1 %v817_v5 }
   0xf   : > { %s679_s29 = sshll.u32 %s1131_s22, 3  ;;  %822 = vmatprep.subr.bf16.mxu0 %v821_v8  ;;  %847 = vmatprep.subr.bf16.mxu1 %v821_v8 }
  0x10   : > { %s979_s9 = scalar_lea.vmem %s1122_s0, %s679_s29  ;;  %s1049_s8 = scalar_lea.vmem %s1125_s3, %s679_s29 }
  0x11   : > { %v225_v11 = vld [vmem:[%s979_s9] sm:$0xff]  ;;  %v226_v26 = vld [vmem:[%s979_s9 + $0x8] sm:$0xff]  ;;  %v227_v28 = vld [vmem:[%s979_s9 + $0x10] sm:$0xff] }
  0x12   : > { %v241_v12 = vld [vmem:[%s979_s9 + $0x80] sm:$0xff]  ;;  %765 = vmatprep.mubr.f32.mxu0 %v225_v11  ;;  %824 = vmatpush3.bf16.msra.mxu0 %v821_v8  ;;  %v242_v27 = vld [vmem:[%s979_s9 + $0x88] sm:$0xff]  ;;  %v243_v29 = vld [vmem:[%s979_s9 + $0x90] sm:$0xff] }
  0x13   : > { %789 = vmatprep.mubr.f32.mxu1 %v241_v12  ;;  %855 = vmatpush3.bf16.msra.mxu1 %v821_v8  ;;  %v228_v30 = vld [vmem:[%s979_s9 + $0x18] sm:$0xff]  ;;  %v229_v32 = vld [vmem:[%s979_s9 + $0x20] sm:$0xff]  ;;  %v230_v34 = vld [vmem:[%s979_s9 + $0x28] sm:$0xff] }
  0x14   : > { %826 = vmatprep.subr.bf16.mxu0 %v825_v13  ;;  %848 = vmatprep.subr.bf16.mxu1 %v825_v13  ;;  %v244_v31 = vld [vmem:[%s979_s9 + $0x98] sm:$0xff]  ;;  %v245_v33 = vld [vmem:[%s979_s9 + $0xa0] sm:$0xff]  ;;  %v246_v35 = vld [vmem:[%s979_s9 + $0xa8] sm:$0xff] }
  0x15   : > { %v231_v36 = vld [vmem:[%s979_s9 + $0x30] sm:$0xff]  ;;  %v232_v38 = vld [vmem:[%s979_s9 + $0x38] sm:$0xff]  ;;  %v233_v40 = vld [vmem:[%s979_s9 + $0x40] sm:$0xff] }
  0x16   : > { %828 = vmatpush3.bf16.msra.mxu0 %v825_v13  ;;  %v247_v37 = vld [vmem:[%s979_s9 + $0xb0] sm:$0xff]  ;;  %v248_v39 = vld [vmem:[%s979_s9 + $0xb8] sm:$0xff]  ;;  %v249_v41 = vld [vmem:[%s979_s9 + $0xc0] sm:$0xff] }
  0x17   : > { %856 = vmatpush3.bf16.msra.mxu1 %v825_v13  ;;  %830 = vmatprep.subr.bf16.mxu0 %v829_v16  ;;  %v234_v42 = vld [vmem:[%s979_s9 + $0x48] sm:$0xff]  ;;  %v235_v44 = vld [vmem:[%s979_s9 + $0x50] sm:$0xff]  ;;  %v236_v46 = vld [vmem:[%s979_s9 + $0x58] sm:$0xff] }
  0x18   : > { %849 = vmatprep.subr.bf16.mxu1 %v829_v16  ;;  %v250_v43 = vld [vmem:[%s979_s9 + $0xc8] sm:$0xff]  ;;  %v251_v45 = vld [vmem:[%s979_s9 + $0xd0] sm:$0xff]  ;;  %v252_v47 = vld [vmem:[%s979_s9 + $0xd8] sm:$0xff] }
  0x19   : > { %v237_v48 = vld [vmem:[%s979_s9 + $0x60] sm:$0xff]  ;;  %v238_v50 = vld [vmem:[%s979_s9 + $0x68] sm:$0xff]  ;;  %v239_v52 = vld [vmem:[%s979_s9 + $0x70] sm:$0xff] }
  0x1a   : > { %832 = vmatpush3.bf16.msra.mxu0 %v829_v16  ;;  %v253_v49 = vld [vmem:[%s979_s9 + $0xe0] sm:$0xff]  ;;  %v254_v51 = vld [vmem:[%s979_s9 + $0xe8] sm:$0xff]  ;;  %v255_v53 = vld [vmem:[%s979_s9 + $0xf0] sm:$0xff] }
  0x1b   : > { %857 = vmatpush3.bf16.msra.mxu1 %v829_v16  ;;  %834 = vmatprep.subr.bf16.mxu0 %v833_v19  ;;  %v240_v54 = vld [vmem:[%s979_s9 + $0x78] sm:$0xff] }
  0x1c   : > { %850 = vmatprep.subr.bf16.mxu1 %v833_v19  ;;  %v256_v55 = vld [vmem:[%s979_s9 + $0xf8] sm:$0xff] }
  0x1e   : > { %836 = vmatpush3.bf16.msra.mxu0 %v833_v19 }
  0x1f   : > { %858 = vmatpush3.bf16.msra.mxu1 %v833_v19  ;;  %838 = vmatprep.subr.bf16.mxu0 %v837_v22 }
  0x20   : > { %851 = vmatprep.subr.bf16.mxu1 %v837_v22 }
  0x22   : > { %840 = vmatpush3.bf16.msra.mxu0 %v837_v22 }
  0x23   : > { %859 = vmatpush3.bf16.msra.mxu1 %v837_v22  ;;  %842 = vmatprep.subr.bf16.mxu0 %v841_v25 }
  0x24   : > { %852 = vmatprep.subr.bf16.mxu1 %v841_v25 }
  0x26   : > { %844 = vmatpush3.bf16.msra.mxu0 %v841_v25 }
  0x27   : > { %860 = vmatpush3.bf16.msra.mxu1 %v841_v25 }
  0x29   : > { %766 = vmatmul.mubr.f32.vlgmr.msra.gmra.mrb[0].mxu0 %v226_v26 }
  0x2a   : > { %790 = vmatmul.mubr.f32.vlgmr.msra.gmra.mrb[0].mxu1 %v242_v27  ;;  %768 = vmatprep.mubr.f32.mxu0 %v227_v28 }
  0x2b   : > { %792 = vmatprep.mubr.f32.mxu1 %v243_v29 }
  0x2d   : > { %769 = vmatmul.mubr.f32.gmra.mrb[2].mxu0 %v228_v30 }
  0x2e   : > { %793 = vmatmul.mubr.f32.gmra.mrb[2].mxu1 %v244_v31  ;;  %771 = vmatprep.mubr.f32.mxu0 %v229_v32 }
  0x2f   : > { %795 = vmatprep.mubr.f32.mxu1 %v245_v33 }
  0x31   : > { %772 = vmatmul.mubr.f32.gmra.mrb[4].mxu0 %v230_v34 }
  0x32   : > { %796 = vmatmul.mubr.f32.gmra.mrb[4].mxu1 %v246_v35  ;;  %774 = vmatprep.mubr.f32.mxu0 %v231_v36 }
  0x33   : > { %798 = vmatprep.mubr.f32.mxu1 %v247_v37 }
  0x35   : > { %775 = vmatmul.mubr.f32.gmra.mrb[6].mxu0 %v232_v38 }
  0x36   : > { %799 = vmatmul.mubr.f32.gmra.mrb[6].mxu1 %v248_v39  ;;  %777 = vmatprep.mubr.f32.mxu0 %v233_v40 }
  0x37   : > { %801 = vmatprep.mubr.f32.mxu1 %v249_v41 }
  0x39   : > { %778 = vmatmul.mubr.f32.gmra.mrb[8].mxu0 %v234_v42 }
  0x3a   : > { %802 = vmatmul.mubr.f32.gmra.mrb[8].mxu1 %v250_v43  ;;  %780 = vmatprep.mubr.f32.mxu0 %v235_v44 }
  0x3b   : > { %804 = vmatprep.mubr.f32.mxu1 %v251_v45 }
  0x3d   : > { %781 = vmatmul.mubr.f32.gmra.mrb[10].mxu0 %v236_v46 }
  0x3e   : > { %805 = vmatmul.mubr.f32.gmra.mrb[10].mxu1 %v252_v47  ;;  %783 = vmatprep.mubr.f32.mxu0 %v237_v48 }
  0x3f   : > { %807 = vmatprep.mubr.f32.mxu1 %v253_v49 }
  0x41   : > { %784 = vmatmul.mubr.f32.gmra.mrb[12].mxu0 %v238_v50 }
  0x42   : > { %808 = vmatmul.mubr.f32.gmra.mrb[12].mxu1 %v254_v51  ;;  %786 = vmatprep.mubr.f32.mxu0 %v239_v52 }
  0x43   : > { %810 = vmatprep.mubr.f32.mxu1 %v255_v53 }
  0x45   : > { %787 = vmatmul.mubr.f32.gmra.mrb[14].mxu0 %v240_v54 }
  0x46   : > { %811 = vmatmul.mubr.f32.gmra.mrb[14].mxu1 %v256_v55 }
  0xfc   : > { %v767_v57 = vpop.f32.mrb[0].mxu0 }
  0xfd   : > { %v791_v58 = vpop.f32.mrb[0].mxu1  ;;  %v352_v59 = vadd.f32 %v767_v57, %v1040_v56  ;;  %v346_v61 = vpop.f32.mrb[1].mxu0 }
  0xfe   : > { %v432_v60 = vadd.f32 %v791_v58, %v1040_v56  ;;  %v426_v62 = vpop.f32.mrb[1].mxu1  ;;  %v347_v63 = vadd.f32 %v1040_v56, %v346_v61 }
  0xff   : > { %v427_v0 = vadd.f32 %v1040_v56, %v426_v62  ;;  %v506_v1 = vmax.f32 %v352_v59, 0.0 }
 0x100   : > { %v522_v2 = vmax.f32 %v432_v60, 0.0  ;;  %v505_v3 = vmax.f32 %v347_v63, 0.0  ;;  %v770_v5 = vpop.f32.mrb[2].mxu0 }
 0x101   : > { %v521_v4 = vmax.f32 %v427_v0, 0.0  ;;  %v794_v6 = vpop.f32.mrb[2].mxu1  ;;  %538 = vst [vmem:[%s1049_s8 + $0x8] sm:$0xff] %v506_v1  ;;  %v362_v7 = vadd.f32 %v770_v5, %v1040_v56  ;;  %v356_v9 = vpop.f32.mrb[3].mxu0 }
 0x102   : > { %554 = vst [vmem:[%s1049_s8 + $0x88] sm:$0xff] %v522_v2  ;;  %v442_v8 = vadd.f32 %v794_v6, %v1040_v56  ;;  %v436_v10 = vpop.f32.mrb[3].mxu1  ;;  %537 = vst [vmem:[%s1049_s8] sm:$0xff] %v505_v3  ;;  %v357_v11 = vadd.f32 %v1040_v56, %v356_v9 }
 0x103   : > { %553 = vst [vmem:[%s1049_s8 + $0x80] sm:$0xff] %v521_v4  ;;  %v437_v12 = vadd.f32 %v1040_v56, %v436_v10  ;;  %v508_v13 = vmax.f32 %v362_v7, 0.0 }
 0x104   : > { %v524_v14 = vmax.f32 %v442_v8, 0.0  ;;  %v507_v15 = vmax.f32 %v357_v11, 0.0  ;;  %v773_v17 = vpop.f32.mrb[4].mxu0 }
 0x105   : > { %v523_v16 = vmax.f32 %v437_v12, 0.0  ;;  %v797_v18 = vpop.f32.mrb[4].mxu1  ;;  %540 = vst [vmem:[%s1049_s8 + $0x18] sm:$0xff] %v508_v13  ;;  %v372_v19 = vadd.f32 %v773_v17, %v1040_v56  ;;  %v366_v21 = vpop.f32.mrb[5].mxu0 }
 0x106   : > { %556 = vst [vmem:[%s1049_s8 + $0x98] sm:$0xff] %v524_v14  ;;  %v452_v20 = vadd.f32 %v797_v18, %v1040_v56  ;;  %v446_v22 = vpop.f32.mrb[5].mxu1  ;;  %539 = vst [vmem:[%s1049_s8 + $0x10] sm:$0xff] %v507_v15  ;;  %v367_v23 = vadd.f32 %v1040_v56, %v366_v21 }
 0x107   : > { %555 = vst [vmem:[%s1049_s8 + $0x90] sm:$0xff] %v523_v16  ;;  %v447_v24 = vadd.f32 %v1040_v56, %v446_v22  ;;  %v510_v25 = vmax.f32 %v372_v19, 0.0 }
 0x108   : > { %v526_v26 = vmax.f32 %v452_v20, 0.0  ;;  %v509_v27 = vmax.f32 %v367_v23, 0.0  ;;  %v776_v29 = vpop.f32.mrb[6].mxu0 }
 0x109   : > { %v525_v28 = vmax.f32 %v447_v24, 0.0  ;;  %v800_v30 = vpop.f32.mrb[6].mxu1  ;;  %542 = vst [vmem:[%s1049_s8 + $0x28] sm:$0xff] %v510_v25  ;;  %v382_v31 = vadd.f32 %v776_v29, %v1040_v56  ;;  %v376_v33 = vpop.f32.mrb[7].mxu0 }
 0x10a   : > { %558 = vst [vmem:[%s1049_s8 + $0xa8] sm:$0xff] %v526_v26  ;;  %v462_v32 = vadd.f32 %v800_v30, %v1040_v56  ;;  %v456_v34 = vpop.f32.mrb[7].mxu1  ;;  %541 = vst [vmem:[%s1049_s8 + $0x20] sm:$0xff] %v509_v27  ;;  %v377_v35 = vadd.f32 %v1040_v56, %v376_v33 }
 0x10b   : > { %557 = vst [vmem:[%s1049_s8 + $0xa0] sm:$0xff] %v525_v28  ;;  %v457_v36 = vadd.f32 %v1040_v56, %v456_v34  ;;  %v512_v37 = vmax.f32 %v382_v31, 0.0 }
 0x10c   : > { %v528_v38 = vmax.f32 %v462_v32, 0.0  ;;  %v511_v39 = vmax.f32 %v377_v35, 0.0  ;;  %v779_v41 = vpop.f32.mrb[8].mxu0 }
 0x10d   : > { %v527_v40 = vmax.f32 %v457_v36, 0.0  ;;  %v803_v42 = vpop.f32.mrb[8].mxu1  ;;  %544 = vst [vmem:[%s1049_s8 + $0x38] sm:$0xff] %v512_v37  ;;  %v392_v43 = vadd.f32 %v779_v41, %v1040_v56  ;;  %v386_v45 = vpop.f32.mrb[9].mxu0 }
 0x10e   : > { %560 = vst [vmem:[%s1049_s8 + $0xb8] sm:$0xff] %v528_v38  ;;  %v472_v44 = vadd.f32 %v803_v42, %v1040_v56  ;;  %v466_v46 = vpop.f32.mrb[9].mxu1  ;;  %543 = vst [vmem:[%s1049_s8 + $0x30] sm:$0xff] %v511_v39  ;;  %v387_v47 = vadd.f32 %v1040_v56, %v386_v45 }
 0x10f   : > { %559 = vst [vmem:[%s1049_s8 + $0xb0] sm:$0xff] %v527_v40  ;;  %v467_v48 = vadd.f32 %v1040_v56, %v466_v46  ;;  %v514_v49 = vmax.f32 %v392_v43, 0.0 }
 0x110   : > { %v530_v50 = vmax.f32 %v472_v44, 0.0  ;;  %v513_v51 = vmax.f32 %v387_v47, 0.0  ;;  %v782_v53 = vpop.f32.mrb[10].mxu0 }
 0x111   : > { %v529_v52 = vmax.f32 %v467_v48, 0.0  ;;  %v806_v54 = vpop.f32.mrb[10].mxu1  ;;  %546 = vst [vmem:[%s1049_s8 + $0x48] sm:$0xff] %v514_v49  ;;  %v402_v55 = vadd.f32 %v782_v53, %v1040_v56  ;;  %v396_v58 = vpop.f32.mrb[11].mxu0 }
 0x112   : > { %562 = vst [vmem:[%s1049_s8 + $0xc8] sm:$0xff] %v530_v50  ;;  %v482_v57 = vadd.f32 %v806_v54, %v1040_v56  ;;  %v476_v59 = vpop.f32.mrb[11].mxu1  ;;  %545 = vst [vmem:[%s1049_s8 + $0x40] sm:$0xff] %v513_v51  ;;  %v397_v60 = vadd.f32 %v1040_v56, %v396_v58 }
 0x113   : > { %561 = vst [vmem:[%s1049_s8 + $0xc0] sm:$0xff] %v529_v52  ;;  %v477_v61 = vadd.f32 %v1040_v56, %v476_v59  ;;  %v516_v62 = vmax.f32 %v402_v55, 0.0 }
 0x114   : > { %v532_v63 = vmax.f32 %v482_v57, 0.0  ;;  %v515_v0 = vmax.f32 %v397_v60, 0.0  ;;  %v785_v2 = vpop.f32.mrb[12].mxu0 }
 0x115   : > { %v531_v1 = vmax.f32 %v477_v61, 0.0  ;;  %v809_v3 = vpop.f32.mrb[12].mxu1  ;;  %548 = vst [vmem:[%s1049_s8 + $0x58] sm:$0xff] %v516_v62  ;;  %v412_v4 = vadd.f32 %v785_v2, %v1040_v56  ;;  %v406_v6 = vpop.f32.mrb[13].mxu0 }
 0x116   : > { %564 = vst [vmem:[%s1049_s8 + $0xd8] sm:$0xff] %v532_v63  ;;  %v492_v5 = vadd.f32 %v809_v3, %v1040_v56  ;;  %v486_v7 = vpop.f32.mrb[13].mxu1  ;;  %547 = vst [vmem:[%s1049_s8 + $0x50] sm:$0xff] %v515_v0  ;;  %v407_v8 = vadd.f32 %v1040_v56, %v406_v6 }
 0x117   : > { %563 = vst [vmem:[%s1049_s8 + $0xd0] sm:$0xff] %v531_v1  ;;  %v487_v9 = vadd.f32 %v1040_v56, %v486_v7  ;;  %v518_v10 = vmax.f32 %v412_v4, 0.0 }
 0x118   : > { %v534_v11 = vmax.f32 %v492_v5, 0.0  ;;  %v517_v12 = vmax.f32 %v407_v8, 0.0  ;;  %v788_v14 = vpop.f32.mrb[14].mxu0 }
 0x119   : > { %v533_v13 = vmax.f32 %v487_v9, 0.0  ;;  %v812_v15 = vpop.f32.mrb[14].mxu1  ;;  %550 = vst [vmem:[%s1049_s8 + $0x68] sm:$0xff] %v518_v10  ;;  %v422_v16 = vadd.f32 %v788_v14, %v1040_v56  ;;  %v416_v18 = vpop.f32.mrb[15].mxu0 }
 0x11a   : > { %566 = vst [vmem:[%s1049_s8 + $0xe8] sm:$0xff] %v534_v11  ;;  %v502_v17 = vadd.f32 %v812_v15, %v1040_v56  ;;  %v496_v19 = vpop.f32.mrb[15].mxu1  ;;  %549 = vst [vmem:[%s1049_s8 + $0x60] sm:$0xff] %v517_v12  ;;  %v417_v20 = vadd.f32 %v1040_v56, %v416_v18 }
 0x11b   : > { %565 = vst [vmem:[%s1049_s8 + $0xe0] sm:$0xff] %v533_v13  ;;  %v497_v21 = vadd.f32 %v1040_v56, %v496_v19  ;;  %v520_v22 = vmax.f32 %v422_v16, 0.0 }
 0x11c   : > { %v536_v23 = vmax.f32 %v502_v17, 0.0  ;;  %v519_v24 = vmax.f32 %v417_v20, 0.0 }
 0x11d   : > { %v535_v25 = vmax.f32 %v497_v21, 0.0  ;;  %552 = vst [vmem:[%s1049_s8 + $0x78] sm:$0xff] %v520_v22 }
 0x11e   : > { %568 = vst [vmem:[%s1049_s8 + $0xf8] sm:$0xff] %v536_v23  ;;  %551 = vst [vmem:[%s1049_s8 + $0x70] sm:$0xff] %v519_v24 }
 0x11f   : > { %567 = vst [vmem:[%s1049_s8 + $0xf0] sm:$0xff] %v535_v25 }
 0x120 PF: > { %s13_s14 = sadd.s32 1, %s907_s14   ;;  %s1126_s12 = smov %s903_s13 }
 0x121   : > { %p10_p5 = scmp.ge.s32.totalorder %s13_s14, 7   ;;  %s1127_s13 = smov %s1129_s15 }
 0x123   :  { %12 = sbr.rel (!%p10_p5) target bundleno = 2 (0x2), region = 68 }

// kernel: cnn_autoencoder_forward.6
= control target key start
LH: loop header
LB: loop body
LE: loop exit
PB: predicated region body
PF: predicated region fallthrough
CT: control target
= control target key end

     0   :  { %s929_s12 = smov 0   ;;  %s931_s13 = smov 0   ;;  %s1122_s0 = inlined_call_operand.vmem [shape: f32[1024,128], index: 0, kind: input, shape index: {}]   ;;  %s1123_s1 = inlined_call_operand.vmem [shape: f32[128,128], index: 1, kind: input, shape index: {}]   ;;  %s1124_s2 = inlined_call_operand.vmem [shape: f32[1,128], index: 2, kind: input, shape index: {}]   ;;  %s1125_s3 = inlined_call_operand.vmem [shape: f32[1024,128], index: 3, kind: output, shape index: {}]  }
   0x1   :  { %s933_s14 = smov 0  }
   0x2 LB: > { %s25_s15 = sadd.s32 1, %s903_s13  ;;  %p677_p0 = scmp.ge.s32.totalorder %s907_s14, 1  ;;  %s907_s14 = sphi %s933_s14, %s13_s14   ;;  %s903_s13 = sphi %s931_s13, %s1127_s13   ;;  %s899_s12 = sphi %s929_s12, %s1126_s12  }
   0x3   : > { %p27_p1 = scmp.ge.s32.totalorder %s25_s15, 4  ;;  %p169_p2 = scmp.lt.s32.totalorder %s907_s14, 5 }
   0x5   : > { %s1129_s15 = smov (%p27_p1, %s25_s15), 0  ;;  %p170_p3 = pnand %p677_p0, %p169_p2 }
   0x6   : > { %v257_v0 = vld [vmem:[%s1123_s1] sm:$0xff] (!%p170_p3)  ;;  %v258_v1 = vld [vmem:[%s1123_s1 + $0x8] sm:$0xff] (!%p170_p3)  ;;  %v259_v2 = vld [vmem:[%s1123_s1 + $0x10] sm:$0xff] (!%p170_p3)  ;;  %s678_s22 = sshll.u32 (!%p170_p3), %s899_s12, 5 }
   0x7   : > { %173 = sbr.rel (%p170_p3) target bundleno = 288 (0x120), region = 32  ;;  %v813_v3 = vpack.c.bf16 (!%p170_p3), %v258_v1, %v257_v0  ;;  %v260_v4 = vld [vmem:[%s1123_s1 + $0x18] sm:$0xff] (!%p170_p3)  ;;  %p204_p4 = scmp.lt.s32.totalorder (!%p170_p3), %s678_s22, 127  ;;  %v261_v6 = vld [vmem:[%s1123_s1 + $0x20] sm:$0xff] (!%p170_p3)  ;;  %v262_v7 = vld [vmem:[%s1123_s1 + $0x28] sm:$0xff] (!%p170_p3) }
   0x8   : > { %v817_v5 = vpack.c.bf16 (!%p170_p3), %v260_v4, %v259_v2  ;;  %v821_v8 = vpack.c.bf16 (!%p170_p3), %v262_v7, %v261_v6  ;;  %v263_v9 = vld [vmem:[%s1123_s1 + $0x30] sm:$0xff] (!%p170_p3)  ;;  %v264_v10 = vld [vmem:[%s1123_s1 + $0x38] sm:$0xff] (!%p170_p3)  ;;  %v265_v14 = vld [vmem:[%s1123_s1 + $0x40] sm:$0xff] (!%p170_p3) }
   0x9   : > { %814 = vmatprep.subr.bf16.mxu0 (!%p170_p3), %v813_v3  ;;  %845 = vmatprep.subr.bf16.mxu1 (!%p170_p3), %v813_v3  ;;  %v825_v13 = vpack.c.bf16 (!%p170_p3), %v264_v10, %v263_v9  ;;  %v266_v15 = vld [vmem:[%s1123_s1 + $0x48] sm:$0xff] (!%p170_p3)  ;;  %v267_v17 = vld [vmem:[%s1123_s1 + $0x50] sm:$0xff] (!%p170_p3)  ;;  %v268_v18 = vld [vmem:[%s1123_s1 + $0x58] sm:$0xff] (!%p170_p3) }
   0xa   : > { %816 = vmatpush3.bf16.msra.mxu0 (!%p170_p3), %v813_v3  ;;  %853 = vmatpush3.bf16.msra.mxu1 (!%p170_p3), %v813_v3  ;;  %v829_v16 = vpack.c.bf16 (!%p170_p3), %v266_v15, %v265_v14  ;;  %v833_v19 = vpack.c.bf16 (!%p170_p3), %v268_v18, %v267_v17  ;;  %v269_v20 = vld [vmem:[%s1123_s1 + $0x60] sm:$0xff] (!%p170_p3)  ;;  %v270_v21 = vld [vmem:[%s1123_s1 + $0x68] sm:$0xff] (!%p170_p3)  ;;  %v271_v23 = vld [vmem:[%s1123_s1 + $0x70] sm:$0xff] (!%p170_p3) }
   0xb   : > { %818 = vmatprep.subr.bf16.mxu0 (!%p170_p3), %v817_v5  ;;  %846 = vmatprep.subr.bf16.mxu1 (!%p170_p3), %v817_v5  ;;  %v837_v22 = vpack.c.bf16 (!%p170_p3), %v270_v21, %v269_v20  ;;  %v272_v24 = vld [vmem:[%s1123_s1 + $0x78] sm:$0xff] (!%p170_p3)  ;;  %v1040_v56 = vld [vmem:[%s1124_s2] ss:$0 sm:$0xff] (!%p170_p3) }
   0xc   : > { %v841_v25 = vpack.c.bf16 (!%p170_p3), %v272_v24, %v271_v23 }
   0xe   : > { %s1131_s22 = smov (!%p204_p4, %s678_s22), 127  ;;  %820 = vmatpush3.bf16.msra.mxu0 %v817_v5  ;;  %854 = vmatpush3.bf16.msra.mxu1 %v817_v5 }
   0xf   : > { %s679_s29 = sshll.u32 %s1131_s22, 3  ;;  %822 = vmatprep.subr.bf16.mxu0 %v821_v8  ;;  %847 = vmatprep.subr.bf16.mxu1 %v821_v8 }
  0x10   : > { %s979_s9 = scalar_lea.vmem %s1122_s0, %s679_s29  ;;  %s1049_s8 = scalar_lea.vmem %s1125_s3, %s679_s29 }
  0x11   : > { %v225_v11 = vld [vmem:[%s979_s9] sm:$0xff]  ;;  %v226_v26 = vld [vmem:[%s979_s9 + $0x8] sm:$0xff]  ;;  %v227_v28 = vld [vmem:[%s979_s9 + $0x10] sm:$0xff] }
  0x12   : > { %v241_v12 = vld [vmem:[%s979_s9 + $0x80] sm:$0xff]  ;;  %765 = vmatprep.mubr.f32.mxu0 %v225_v11  ;;  %824 = vmatpush3.bf16.msra.mxu0 %v821_v8  ;;  %v242_v27 = vld [vmem:[%s979_s9 + $0x88] sm:$0xff]  ;;  %v243_v29 = vld [vmem:[%s979_s9 + $0x90] sm:$0xff] }
  0x13   : > { %789 = vmatprep.mubr.f32.mxu1 %v241_v12  ;;  %855 = vmatpush3.bf16.msra.mxu1 %v821_v8  ;;  %v228_v30 = vld [vmem:[%s979_s9 + $0x18] sm:$0xff]  ;;  %v229_v32 = vld [vmem:[%s979_s9 + $0x20] sm:$0xff]  ;;  %v230_v34 = vld [vmem:[%s979_s9 + $0x28] sm:$0xff] }
  0x14   : > { %826 = vmatprep.subr.bf16.mxu0 %v825_v13  ;;  %848 = vmatprep.subr.bf16.mxu1 %v825_v13  ;;  %v244_v31 = vld [vmem:[%s979_s9 + $0x98] sm:$0xff]  ;;  %v245_v33 = vld [vmem:[%s979_s9 + $0xa0] sm:$0xff]  ;;  %v246_v35 = vld [vmem:[%s979_s9 + $0xa8] sm:$0xff] }
  0x15   : > { %v231_v36 = vld [vmem:[%s979_s9 + $0x30] sm:$0xff]  ;;  %v232_v38 = vld [vmem:[%s979_s9 + $0x38] sm:$0xff]  ;;  %v233_v40 = vld [vmem:[%s979_s9 + $0x40] sm:$0xff] }
  0x16   : > { %828 = vmatpush3.bf16.msra.mxu0 %v825_v13  ;;  %v247_v37 = vld [vmem:[%s979_s9 + $0xb0] sm:$0xff]  ;;  %v248_v39 = vld [vmem:[%s979_s9 + $0xb8] sm:$0xff]  ;;  %v249_v41 = vld [vmem:[%s979_s9 + $0xc0] sm:$0xff] }
  0x17   : > { %856 = vmatpush3.bf16.msra.mxu1 %v825_v13  ;;  %830 = vmatprep.subr.bf16.mxu0 %v829_v16  ;;  %v234_v42 = vld [vmem:[%s979_s9 + $0x48] sm:$0xff]  ;;  %v235_v44 = vld [vmem:[%s979_s9 + $0x50] sm:$0xff]  ;;  %v236_v46 = vld [vmem:[%s979_s9 + $0x58] sm:$0xff] }
  0x18   : > { %849 = vmatprep.subr.bf16.mxu1 %v829_v16  ;;  %v250_v43 = vld [vmem:[%s979_s9 + $0xc8] sm:$0xff]  ;;  %v251_v45 = vld [vmem:[%s979_s9 + $0xd0] sm:$0xff]  ;;  %v252_v47 = vld [vmem:[%s979_s9 + $0xd8] sm:$0xff] }
  0x19   : > { %v237_v48 = vld [vmem:[%s979_s9 + $0x60] sm:$0xff]  ;;  %v238_v50 = vld [vmem:[%s979_s9 + $0x68] sm:$0xff]  ;;  %v239_v52 = vld [vmem:[%s979_s9 + $0x70] sm:$0xff] }
  0x1a   : > { %832 = vmatpush3.bf16.msra.mxu0 %v829_v16  ;;  %v253_v49 = vld [vmem:[%s979_s9 + $0xe0] sm:$0xff]  ;;  %v254_v51 = vld [vmem:[%s979_s9 + $0xe8] sm:$0xff]  ;;  %v255_v53 = vld [vmem:[%s979_s9 + $0xf0] sm:$0xff] }
  0x1b   : > { %857 = vmatpush3.bf16.msra.mxu1 %v829_v16  ;;  %834 = vmatprep.subr.bf16.mxu0 %v833_v19  ;;  %v240_v54 = vld [vmem:[%s979_s9 + $0x78] sm:$0xff] }
  0x1c   : > { %850 = vmatprep.subr.bf16.mxu1 %v833_v19  ;;  %v256_v55 = vld [vmem:[%s979_s9 + $0xf8] sm:$0xff] }
  0x1e   : > { %836 = vmatpush3.bf16.msra.mxu0 %v833_v19 }
  0x1f   : > { %858 = vmatpush3.bf16.msra.mxu1 %v833_v19  ;;  %838 = vmatprep.subr.bf16.mxu0 %v837_v22 }
  0x20   : > { %851 = vmatprep.subr.bf16.mxu1 %v837_v22 }
  0x22   : > { %840 = vmatpush3.bf16.msra.mxu0 %v837_v22 }
  0x23   : > { %859 = vmatpush3.bf16.msra.mxu1 %v837_v22  ;;  %842 = vmatprep.subr.bf16.mxu0 %v841_v25 }
  0x24   : > { %852 = vmatprep.subr.bf16.mxu1 %v841_v25 }
  0x26   : > { %844 = vmatpush3.bf16.msra.mxu0 %v841_v25 }
  0x27   : > { %860 = vmatpush3.bf16.msra.mxu1 %v841_v25 }
  0x29   : > { %766 = vmatmul.mubr.f32.vlgmr.msra.gmra.mrb[0].mxu0 %v226_v26 }
  0x2a   : > { %790 = vmatmul.mubr.f32.vlgmr.msra.gmra.mrb[0].mxu1 %v242_v27  ;;  %768 = vmatprep.mubr.f32.mxu0 %v227_v28 }
  0x2b   : > { %792 = vmatprep.mubr.f32.mxu1 %v243_v29 }
  0x2d   : > { %769 = vmatmul.mubr.f32.gmra.mrb[2].mxu0 %v228_v30 }
  0x2e   : > { %793 = vmatmul.mubr.f32.gmra.mrb[2].mxu1 %v244_v31  ;;  %771 = vmatprep.mubr.f32.mxu0 %v229_v32 }
  0x2f   : > { %795 = vmatprep.mubr.f32.mxu1 %v245_v33 }
  0x31   : > { %772 = vmatmul.mubr.f32.gmra.mrb[4].mxu0 %v230_v34 }
  0x32   : > { %796 = vmatmul.mubr.f32.gmra.mrb[4].mxu1 %v246_v35  ;;  %774 = vmatprep.mubr.f32.mxu0 %v231_v36 }
  0x33   : > { %798 = vmatprep.mubr.f32.mxu1 %v247_v37 }
  0x35   : > { %775 = vmatmul.mubr.f32.gmra.mrb[6].mxu0 %v232_v38 }
  0x36   : > { %799 = vmatmul.mubr.f32.gmra.mrb[6].mxu1 %v248_v39  ;;  %777 = vmatprep.mubr.f32.mxu0 %v233_v40 }
  0x37   : > { %801 = vmatprep.mubr.f32.mxu1 %v249_v41 }
  0x39   : > { %778 = vmatmul.mubr.f32.gmra.mrb[8].mxu0 %v234_v42 }
  0x3a   : > { %802 = vmatmul.mubr.f32.gmra.mrb[8].mxu1 %v250_v43  ;;  %780 = vmatprep.mubr.f32.mxu0 %v235_v44 }
  0x3b   : > { %804 = vmatprep.mubr.f32.mxu1 %v251_v45 }
  0x3d   : > { %781 = vmatmul.mubr.f32.gmra.mrb[10].mxu0 %v236_v46 }
  0x3e   : > { %805 = vmatmul.mubr.f32.gmra.mrb[10].mxu1 %v252_v47  ;;  %783 = vmatprep.mubr.f32.mxu0 %v237_v48 }
  0x3f   : > { %807 = vmatprep.mubr.f32.mxu1 %v253_v49 }
  0x41   : > { %784 = vmatmul.mubr.f32.gmra.mrb[12].mxu0 %v238_v50 }
  0x42   : > { %808 = vmatmul.mubr.f32.gmra.mrb[12].mxu1 %v254_v51  ;;  %786 = vmatprep.mubr.f32.mxu0 %v239_v52 }
  0x43   : > { %810 = vmatprep.mubr.f32.mxu1 %v255_v53 }
  0x45   : > { %787 = vmatmul.mubr.f32.gmra.mrb[14].mxu0 %v240_v54 }
  0x46   : > { %811 = vmatmul.mubr.f32.gmra.mrb[14].mxu1 %v256_v55 }
  0xfc   : > { %v767_v57 = vpop.f32.mrb[0].mxu0 }
  0xfd   : > { %v791_v58 = vpop.f32.mrb[0].mxu1  ;;  %v352_v59 = vadd.f32 %v767_v57, %v1040_v56  ;;  %v346_v61 = vpop.f32.mrb[1].mxu0 }
  0xfe   : > { %v432_v60 = vadd.f32 %v791_v58, %v1040_v56  ;;  %v426_v62 = vpop.f32.mrb[1].mxu1  ;;  %v347_v63 = vadd.f32 %v1040_v56, %v346_v61 }
  0xff   : > { %v427_v0 = vadd.f32 %v1040_v56, %v426_v62  ;;  %v506_v1 = vmax.f32 %v352_v59, 0.0 }
 0x100   : > { %v522_v2 = vmax.f32 %v432_v60, 0.0  ;;  %v505_v3 = vmax.f32 %v347_v63, 0.0  ;;  %v770_v5 = vpop.f32.mrb[2].mxu0 }
 0x101   : > { %v521_v4 = vmax.f32 %v427_v0, 0.0  ;;  %v794_v6 = vpop.f32.mrb[2].mxu1  ;;  %538 = vst [vmem:[%s1049_s8 + $0x8] sm:$0xff] %v506_v1  ;;  %v362_v7 = vadd.f32 %v770_v5, %v1040_v56  ;;  %v356_v9 = vpop.f32.mrb[3].mxu0 }
 0x102   : > { %554 = vst [vmem:[%s1049_s8 + $0x88] sm:$0xff] %v522_v2  ;;  %v442_v8 = vadd.f32 %v794_v6, %v1040_v56  ;;  %v436_v10 = vpop.f32.mrb[3].mxu1  ;;  %537 = vst [vmem:[%s1049_s8] sm:$0xff] %v505_v3  ;;  %v357_v11 = vadd.f32 %v1040_v56, %v356_v9 }
 0x103   : > { %553 = vst [vmem:[%s1049_s8 + $0x80] sm:$0xff] %v521_v4  ;;  %v437_v12 = vadd.f32 %v1040_v56, %v436_v10  ;;  %v508_v13 = vmax.f32 %v362_v7, 0.0 }
 0x104   : > { %v524_v14 = vmax.f32 %v442_v8, 0.0  ;;  %v507_v15 = vmax.f32 %v357_v11, 0.0  ;;  %v773_v17 = vpop.f32.mrb[4].mxu0 }
 0x105   : > { %v523_v16 = vmax.f32 %v437_v12, 0.0  ;;  %v797_v18 = vpop.f32.mrb[4].mxu1  ;;  %540 = vst [vmem:[%s1049_s8 + $0x18] sm:$0xff] %v508_v13  ;;  %v372_v19 = vadd.f32 %v773_v17, %v1040_v56  ;;  %v366_v21 = vpop.f32.mrb[5].mxu0 }
 0x106   : > { %556 = vst [vmem:[%s1049_s8 + $0x98] sm:$0xff] %v524_v14  ;;  %v452_v20 = vadd.f32 %v797_v18, %v1040_v56  ;;  %v446_v22 = vpop.f32.mrb[5].mxu1  ;;  %539 = vst [vmem:[%s1049_s8 + $0x10] sm:$0xff] %v507_v15  ;;  %v367_v23 = vadd.f32 %v1040_v56, %v366_v21 }
 0x107   : > { %555 = vst [vmem:[%s1049_s8 + $0x90] sm:$0xff] %v523_v16  ;;  %v447_v24 = vadd.f32 %v1040_v56, %v446_v22  ;;  %v510_v25 = vmax.f32 %v372_v19, 0.0 }
 0x108   : > { %v526_v26 = vmax.f32 %v452_v20, 0.0  ;;  %v509_v27 = vmax.f32 %v367_v23, 0.0  ;;  %v776_v29 = vpop.f32.mrb[6].mxu0 }
 0x109   : > { %v525_v28 = vmax.f32 %v447_v24, 0.0  ;;  %v800_v30 = vpop.f32.mrb[6].mxu1  ;;  %542 = vst [vmem:[%s1049_s8 + $0x28] sm:$0xff] %v510_v25  ;;  %v382_v31 = vadd.f32 %v776_v29, %v1040_v56  ;;  %v376_v33 = vpop.f32.mrb[7].mxu0 }
 0x10a   : > { %558 = vst [vmem:[%s1049_s8 + $0xa8] sm:$0xff] %v526_v26  ;;  %v462_v32 = vadd.f32 %v800_v30, %v1040_v56  ;;  %v456_v34 = vpop.f32.mrb[7].mxu1  ;;  %541 = vst [vmem:[%s1049_s8 + $0x20] sm:$0xff] %v509_v27  ;;  %v377_v35 = vadd.f32 %v1040_v56, %v376_v33 }
 0x10b   : > { %557 = vst [vmem:[%s1049_s8 + $0xa0] sm:$0xff] %v525_v28  ;;  %v457_v36 = vadd.f32 %v1040_v56, %v456_v34  ;;  %v512_v37 = vmax.f32 %v382_v31, 0.0 }
 0x10c   : > { %v528_v38 = vmax.f32 %v462_v32, 0.0  ;;  %v511_v39 = vmax.f32 %v377_v35, 0.0  ;;  %v779_v41 = vpop.f32.mrb[8].mxu0 }
 0x10d   : > { %v527_v40 = vmax.f32 %v457_v36, 0.0  ;;  %v803_v42 = vpop.f32.mrb[8].mxu1  ;;  %544 = vst [vmem:[%s1049_s8 + $0x38] sm:$0xff] %v512_v37  ;;  %v392_v43 = vadd.f32 %v779_v41, %v1040_v56  ;;  %v386_v45 = vpop.f32.mrb[9].mxu0 }
 0x10e   : > { %560 = vst [vmem:[%s1049_s8 + $0xb8] sm:$0xff] %v528_v38  ;;  %v472_v44 = vadd.f32 %v803_v42, %v1040_v56  ;;  %v466_v46 = vpop.f32.mrb[9].mxu1  ;;  %543 = vst [vmem:[%s1049_s8 + $0x30] sm:$0xff] %v511_v39  ;;  %v387_v47 = vadd.f32 %v1040_v56, %v386_v45 }
 0x10f   : > { %559 = vst [vmem:[%s1049_s8 + $0xb0] sm:$0xff] %v527_v40  ;;  %v467_v48 = vadd.f32 %v1040_v56, %v466_v46  ;;  %v514_v49 = vmax.f32 %v392_v43, 0.0 }
 0x110   : > { %v530_v50 = vmax.f32 %v472_v44, 0.0  ;;  %v513_v51 = vmax.f32 %v387_v47, 0.0  ;;  %v782_v53 = vpop.f32.mrb[10].mxu0 }
 0x111   : > { %v529_v52 = vmax.f32 %v467_v48, 0.0  ;;  %v806_v54 = vpop.f32.mrb[10].mxu1  ;;  %546 = vst [vmem:[%s1049_s8 + $0x48] sm:$0xff] %v514_v49  ;;  %v402_v55 = vadd.f32 %v782_v53, %v1040_v56  ;;  %v396_v58 = vpop.f32.mrb[11].mxu0 }
 0x112   : > { %562 = vst [vmem:[%s1049_s8 + $0xc8] sm:$0xff] %v530_v50  ;;  %v482_v57 = vadd.f32 %v806_v54, %v1040_v56  ;;  %v476_v59 = vpop.f32.mrb[11].mxu1  ;;  %545 = vst [vmem:[%s1049_s8 + $0x40] sm:$0xff] %v513_v51  ;;  %v397_v60 = vadd.f32 %v1040_v56, %v396_v58 }
 0x113   : > { %561 = vst [vmem:[%s1049_s8 + $0xc0] sm:$0xff] %v529_v52  ;;  %v477_v61 = vadd.f32 %v1040_v56, %v476_v59  ;;  %v516_v62 = vmax.f32 %v402_v55, 0.0 }
 0x114   : > { %v532_v63 = vmax.f32 %v482_v57, 0.0  ;;  %v515_v0 = vmax.f32 %v397_v60, 0.0  ;;  %v785_v2 = vpop.f32.mrb[12].mxu0 }
 0x115   : > { %v531_v1 = vmax.f32 %v477_v61, 0.0  ;;  %v809_v3 = vpop.f32.mrb[12].mxu1  ;;  %548 = vst [vmem:[%s1049_s8 + $0x58] sm:$0xff] %v516_v62  ;;  %v412_v4 = vadd.f32 %v785_v2, %v1040_v56  ;;  %v406_v6 = vpop.f32.mrb[13].mxu0 }
 0x116   : > { %564 = vst [vmem:[%s1049_s8 + $0xd8] sm:$0xff] %v532_v63  ;;  %v492_v5 = vadd.f32 %v809_v3, %v1040_v56  ;;  %v486_v7 = vpop.f32.mrb[13].mxu1  ;;  %547 = vst [vmem:[%s1049_s8 + $0x50] sm:$0xff] %v515_v0  ;;  %v407_v8 = vadd.f32 %v1040_v56, %v406_v6 }
 0x117   : > { %563 = vst [vmem:[%s1049_s8 + $0xd0] sm:$0xff] %v531_v1  ;;  %v487_v9 = vadd.f32 %v1040_v56, %v486_v7  ;;  %v518_v10 = vmax.f32 %v412_v4, 0.0 }
 0x118   : > { %v534_v11 = vmax.f32 %v492_v5, 0.0  ;;  %v517_v12 = vmax.f32 %v407_v8, 0.0  ;;  %v788_v14 = vpop.f32.mrb[14].mxu0 }
 0x119   : > { %v533_v13 = vmax.f32 %v487_v9, 0.0  ;;  %v812_v15 = vpop.f32.mrb[14].mxu1  ;;  %550 = vst [vmem:[%s1049_s8 + $0x68] sm:$0xff] %v518_v10  ;;  %v422_v16 = vadd.f32 %v788_v14, %v1040_v56  ;;  %v416_v18 = vpop.f32.mrb[15].mxu0 }
 0x11a   : > { %566 = vst [vmem:[%s1049_s8 + $0xe8] sm:$0xff] %v534_v11  ;;  %v502_v17 = vadd.f32 %v812_v15, %v1040_v56  ;;  %v496_v19 = vpop.f32.mrb[15].mxu1  ;;  %549 = vst [vmem:[%s1049_s8 + $0x60] sm:$0xff] %v517_v12  ;;  %v417_v20 = vadd.f32 %v1040_v56, %v416_v18 }
 0x11b   : > { %565 = vst [vmem:[%s1049_s8 + $0xe0] sm:$0xff] %v533_v13  ;;  %v497_v21 = vadd.f32 %v1040_v56, %v496_v19  ;;  %v520_v22 = vmax.f32 %v422_v16, 0.0 }
 0x11c   : > { %v536_v23 = vmax.f32 %v502_v17, 0.0  ;;  %v519_v24 = vmax.f32 %v417_v20, 0.0 }
 0x11d   : > { %v535_v25 = vmax.f32 %v497_v21, 0.0  ;;  %552 = vst [vmem:[%s1049_s8 + $0x78] sm:$0xff] %v520_v22 }
 0x11e   : > { %568 = vst [vmem:[%s1049_s8 + $0xf8] sm:$0xff] %v536_v23  ;;  %551 = vst [vmem:[%s1049_s8 + $0x70] sm:$0xff] %v519_v24 }
 0x11f   : > { %567 = vst [vmem:[%s1049_s8 + $0xf0] sm:$0xff] %v535_v25 }
 0x120 PF: > { %s13_s14 = sadd.s32 1, %s907_s14   ;;  %s1126_s12 = smov %s903_s13 }
 0x121   : > { %p10_p5 = scmp.ge.s32.totalorder %s13_s14, 6   ;;  %s1127_s13 = smov %s1129_s15 }
 0x123   :  { %12 = sbr.rel (!%p10_p5) target bundleno = 2 (0x2), region = 68 }

// kernel: cnn_autoencoder_forward.7
= control target key start
LH: loop header
LB: loop body
LE: loop exit
PB: predicated region body
PF: predicated region fallthrough
CT: control target
= control target key end

     0   :  { %vm9220_vm0 = vmmov 0   ;;  %s17142_s1 = inlined_call_operand.vmem [shape: f32[3200,128], index: 1, kind: input, shape index: {}]   ;;  %s17143_s0 = inlined_call_operand.vmem [shape: f32[8,3200], index: 0, kind: input, shape index: {}]   ;;  %s17144_s2 = inlined_call_operand.vmem [shape: f32[1,128], index: 2, kind: input, shape index: {}]   ;;  %s17145_s3 = inlined_call_operand.vmem [shape: f32[128,512], index: 3, kind: input, shape index: {}]   ;;  %s17146_s5 = inlined_call_operand.vmem [shape: f32[512,4096], index: 5, kind: input, shape index: {}]   ;;  %s17147_s4 = inlined_call_operand.vmem [shape: f32[1,512], index: 4, kind: input, shape index: {}]   ;;  %s17148_s6 = inlined_call_operand.vmem [shape: f32[1,4096], index: 6, kind: input, shape index: {}]   ;;  %s17149_s7 = inlined_call_operand.vmem [shape: f32[8,4096], index: 7, kind: output, shape index: {}]  }
   0x1   :  { %v67_v0 = vld [vmem:[%s17142_s1 + $0x80] sm:$0xff]  ;;  %v68_v1 = vld [vmem:[%s17142_s1 + $0x88] sm:$0xff]  ;;  %v69_v11 = vld [vmem:[%s17142_s1 + $0x90] sm:$0xff] }
   0x2   :  { %v51_v2 = vld [vmem:[%s17142_s1] sm:$0xff]  ;;  %v6629_v3 = vpack.c.bf16 %v68_v1, %v67_v0  ;;  %v52_v4 = vld [vmem:[%s17142_s1 + $0x8] sm:$0xff]  ;;  %v70_v13 = vld [vmem:[%s17142_s1 + $0x98] sm:$0xff] }
   0x3   :  { %v99_v5 = vld [vmem:[%s17142_s1 + $0x180] sm:$0xff]  ;;  %v100_v6 = vld [vmem:[%s17142_s1 + $0x188] sm:$0xff]  ;;  %v6631_v7 = vpack.c.bf16 %v52_v4, %v51_v2  ;;  %v53_v14 = vld [vmem:[%s17142_s1 + $0x10] sm:$0xff]  ;;  %v6633_v16 = vpack.c.bf16 %v70_v13, %v69_v11 }
   0x4   :  { %v6661_v8 = vpack.c.bf16 %v100_v6, %v99_v5  ;;  %v83_v9 = vld [vmem:[%s17142_s1 + $0x100] sm:$0xff]  ;;  %v84_v10 = vld [vmem:[%s17142_s1 + $0x108] sm:$0xff]  ;;  %6630 = vmatprep.subr.bf16.mxu0 %v6629_v3  ;;  %v54_v15 = vld [vmem:[%s17142_s1 + $0x18] sm:$0xff] }
   0x5   :  { %v6663_v12 = vpack.c.bf16 %v84_v10, %v83_v9  ;;  %6632 = vmatpush3.bf16.msra.mxu0 %v6631_v7  ;;  %v6635_v17 = vpack.c.bf16 %v54_v15, %v53_v14  ;;  %v101_v18 = vld [vmem:[%s17142_s1 + $0x190] sm:$0xff]  ;;  %v102_v19 = vld [vmem:[%s17142_s1 + $0x198] sm:$0xff]  ;;  %v71_v23 = vld [vmem:[%s17142_s1 + $0xa0] sm:$0xff] }
   0x6   :  { %6662 = vmatprep.subr.bf16.mxu1 %v6661_v8  ;;  %v85_v20 = vld [vmem:[%s17142_s1 + $0x110] sm:$0xff]  ;;  %v6665_v21 = vpack.c.bf16 %v102_v19, %v101_v18  ;;  %v86_v22 = vld [vmem:[%s17142_s1 + $0x118] sm:$0xff]  ;;  %v72_v24 = vld [vmem:[%s17142_s1 + $0xa8] sm:$0xff]  ;;  %6634 = vmatprep.subr.bf16.mxu0 %v6633_v16 }
   0x7   :  { %6664 = vmatpush3.bf16.msra.mxu1 %v6663_v12  ;;  %v6667_v25 = vpack.c.bf16 %v86_v22, %v85_v20  ;;  %v6637_v26 = vpack.c.bf16 %v72_v24, %v71_v23  ;;  %v55_v27 = vld [vmem:[%s17142_s1 + $0x20] sm:$0xff]  ;;  %v56_v28 = vld [vmem:[%s17142_s1 + $0x28] sm:$0xff]  ;;  %v73_v35 = vld [vmem:[%s17142_s1 + $0xb0] sm:$0xff] }
   0x8   :  { %v103_v29 = vld [vmem:[%s17142_s1 + $0x1a0] sm:$0xff]  ;;  %6666 = vmatprep.subr.bf16.mxu1 %v6665_v21  ;;  %v104_v30 = vld [vmem:[%s17142_s1 + $0x1a8] sm:$0xff]  ;;  %v6639_v33 = vpack.c.bf16 %v56_v28, %v55_v27  ;;  %v74_v36 = vld [vmem:[%s17142_s1 + $0xb8] sm:$0xff] }
   0x9   :  { %v87_v31 = vld [vmem:[%s17142_s1 + $0x120] sm:$0xff]  ;;  %v88_v32 = vld [vmem:[%s17142_s1 + $0x128] sm:$0xff]  ;;  %6636 = vmatpush3.bf16.msra.mxu0 %v6635_v17  ;;  %v6669_v34 = vpack.c.bf16 %v104_v30, %v103_v29  ;;  %v57_v37 = vld [vmem:[%s17142_s1 + $0x30] sm:$0xff]  ;;  %v6641_v39 = vpack.c.bf16 %v74_v36, %v73_v35 }
   0xa   :  { %6638 = vmatprep.subr.bf16.mxu0 %v6637_v26  ;;  %v6671_v38 = vpack.c.bf16 %v88_v32, %v87_v31  ;;  %v58_v40 = vld [vmem:[%s17142_s1 + $0x38] sm:$0xff]  ;;  %v105_v41 = vld [vmem:[%s17142_s1 + $0x1b0] sm:$0xff]  ;;  %v75_v46 = vld [vmem:[%s17142_s1 + $0xc0] sm:$0xff] }
   0xb   :  { %6668 = vmatpush3.bf16.msra.mxu1 %v6667_v25  ;;  %v106_v42 = vld [vmem:[%s17142_s1 + $0x1b8] sm:$0xff]  ;;  %v89_v44 = vld [vmem:[%s17142_s1 + $0x130] sm:$0xff]  ;;  %v76_v47 = vld [vmem:[%s17142_s1 + $0xc8] sm:$0xff]  ;;  %v6643_v48 = vpack.c.bf16 %v58_v40, %v57_v37 }
   0xc   :  { %6670 = vmatprep.subr.bf16.mxu1 %v6669_v34  ;;  %v6673_v43 = vpack.c.bf16 %v106_v42, %v105_v41  ;;  %v90_v45 = vld [vmem:[%s17142_s1 + $0x138] sm:$0xff]  ;;  %v107_v49 = vld [vmem:[%s17142_s1 + $0x1c0] sm:$0xff]  ;;  %v108_v50 = vld [vmem:[%s17142_s1 + $0x1c8] sm:$0xff]  ;;  %v6645_v52 = vpack.c.bf16 %v76_v47, %v75_v46 }
   0xd   :  { %6640 = vmatpush3.bf16.msra.mxu0 %v6639_v33  ;;  %v6675_v51 = vpack.c.bf16 %v90_v45, %v89_v44  ;;  %v59_v53 = vld [vmem:[%s17142_s1 + $0x40] sm:$0xff]  ;;  %v60_v54 = vld [vmem:[%s17142_s1 + $0x48] sm:$0xff]  ;;  %v6677_v56 = vpack.c.bf16 %v108_v50, %v107_v49  ;;  %v77_v58 = vld [vmem:[%s17142_s1 + $0xd0] sm:$0xff] }
   0xe   :  { %6642 = vmatprep.subr.bf16.mxu0 %v6641_v39  ;;  %v91_v55 = vld [vmem:[%s17142_s1 + $0x140] sm:$0xff]  ;;  %v92_v57 = vld [vmem:[%s17142_s1 + $0x148] sm:$0xff]  ;;  %v78_v59 = vld [vmem:[%s17142_s1 + $0xd8] sm:$0xff]  ;;  %v6647_v62 = vpack.c.bf16 %v60_v54, %v59_v53 }
   0xf   :  { %6672 = vmatpush3.bf16.msra.mxu1 %v6671_v38  ;;  %v109_v60 = vld [vmem:[%s17142_s1 + $0x1d0] sm:$0xff]  ;;  %v110_v61 = vld [vmem:[%s17142_s1 + $0x1d8] sm:$0xff]  ;;  %v6679_v63 = vpack.c.bf16 %v92_v57, %v91_v55  ;;  %v6649_v0 = vpack.c.bf16 %v78_v59, %v77_v58  ;;  %v79_v6 = vld [vmem:[%s17142_s1 + $0xe0] sm:$0xff] }
  0x10   :  { %6674 = vmatprep.subr.bf16.mxu1 %v6673_v43  ;;  %v61_v1 = vld [vmem:[%s17142_s1 + $0x50] sm:$0xff]  ;;  %v62_v2 = vld [vmem:[%s17142_s1 + $0x58] sm:$0xff]  ;;  %v6681_v4 = vpack.c.bf16 %v110_v61, %v109_v60  ;;  %v80_v7 = vld [vmem:[%s17142_s1 + $0xe8] sm:$0xff] }
  0x11   :  { %6644 = vmatpush3.bf16.msra.mxu0 %v6643_v48  ;;  %v93_v3 = vld [vmem:[%s17142_s1 + $0x150] sm:$0xff]  ;;  %v94_v5 = vld [vmem:[%s17142_s1 + $0x158] sm:$0xff]  ;;  %v111_v8 = vld [vmem:[%s17142_s1 + $0x1e0] sm:$0xff]  ;;  %v6651_v10 = vpack.c.bf16 %v62_v2, %v61_v1  ;;  %v6653_v14 = vpack.c.bf16 %v80_v7, %v79_v6 }
  0x12   :  { %6646 = vmatprep.subr.bf16.mxu0 %v6645_v52  ;;  %v112_v9 = vld [vmem:[%s17142_s1 + $0x1e8] sm:$0xff]  ;;  %v63_v11 = vld [vmem:[%s17142_s1 + $0x60] sm:$0xff]  ;;  %v6683_v13 = vpack.c.bf16 %v94_v5, %v93_v3  ;;  %v81_v19 = vld [vmem:[%s17142_s1 + $0xf0] sm:$0xff] }
  0x13   :  { %6676 = vmatpush3.bf16.msra.mxu1 %v6675_v51  ;;  %v27_v12 = vld [vmem:[%s17143_s0 + $0x8] sm:$0xff]  ;;  %v95_v16 = vld [vmem:[%s17142_s1 + $0x160] sm:$0xff]  ;;  %v6685_v18 = vpack.c.bf16 %v112_v9, %v111_v8  ;;  %v82_v20 = vld [vmem:[%s17142_s1 + $0xf8] sm:$0xff] }
  0x14   :  { %6678 = vmatprep.subr.bf16.mxu1 %v6677_v56  ;;  %v64_v15 = vld [vmem:[%s17142_s1 + $0x68] sm:$0xff]  ;;  %522 = vmatprep.mubr.f32.mxu0 %v27_v12  ;;  %v29_v21 = vld [vmem:[%s17143_s0 + $0x18] sm:$0xff]  ;;  %v113_v22 = vld [vmem:[%s17142_s1 + $0x1f0] sm:$0xff]  ;;  %v6657_v26 = vpack.c.bf16 %v82_v20, %v81_v19 }
  0x15   :  { %6648 = vmatpush3.bf16.msra.mxu0 %v6647_v62  ;;  %v96_v17 = vld [vmem:[%s17142_s1 + $0x168] sm:$0xff]  ;;  %v114_v23 = vld [vmem:[%s17142_s1 + $0x1f8] sm:$0xff]  ;;  %592 = vmatprep.mubr.f32.mxu1 %v29_v21  ;;  %v6655_v24 = vpack.c.bf16 %v64_v15, %v63_v11  ;;  %v65_v27 = vld [vmem:[%s17142_s1 + $0x70] sm:$0xff] }
  0x16   :  { %6650 = vmatprep.subr.bf16.mxu0 %v6649_v0  ;;  %v6687_v25 = vpack.c.bf16 %v96_v17, %v95_v16  ;;  %v66_v28 = vld [vmem:[%s17142_s1 + $0x78] sm:$0xff]  ;;  %v97_v29 = vld [vmem:[%s17142_s1 + $0x170] sm:$0xff]  ;;  %v6689_v30 = vpack.c.bf16 %v114_v23, %v113_v22  ;;  %v131_v32 = vld [vmem:[%s17142_s1 + $0x280] sm:$0xff] }
  0x17   :  { %6680 = vmatpush3.bf16.msra.mxu1 %v6679_v63  ;;  %v98_v31 = vld [vmem:[%s17142_s1 + $0x178] sm:$0xff]  ;;  %v132_v33 = vld [vmem:[%s17142_s1 + $0x288] sm:$0xff]  ;;  %v163_v34 = vld [vmem:[%s17142_s1 + $0x380] sm:$0xff]  ;;  %v6659_v36 = vpack.c.bf16 %v66_v28, %v65_v27 }
  0x18   :  { %6682 = vmatprep.subr.bf16.mxu1 %v6681_v4  ;;  %v164_v35 = vld [vmem:[%s17142_s1 + $0x388] sm:$0xff]  ;;  %v6691_v37 = vpack.c.bf16 %v98_v31, %v97_v29  ;;  %v6693_v38 = vpack.c.bf16 %v132_v33, %v131_v32  ;;  %v115_v39 = vld [vmem:[%s17142_s1 + $0x200] sm:$0xff]  ;;  %v133_v44 = vld [vmem:[%s17142_s1 + $0x290] sm:$0xff] }
  0x19   :  { %6652 = vmatpush3.bf16.msra.mxu0 %v6651_v10  ;;  %v116_v40 = vld [vmem:[%s17142_s1 + $0x208] sm:$0xff]  ;;  %v147_v41 = vld [vmem:[%s17142_s1 + $0x300] sm:$0xff]  ;;  %v6725_v42 = vpack.c.bf16 %v164_v35, %v163_v34  ;;  %v134_v45 = vld [vmem:[%s17142_s1 + $0x298] sm:$0xff] }
  0x1a   :  { %6654 = vmatprep.subr.bf16.mxu0 %v6653_v14  ;;  %v148_v43 = vld [vmem:[%s17142_s1 + $0x308] sm:$0xff]  ;;  %v165_v46 = vld [vmem:[%s17142_s1 + $0x390] sm:$0xff]  ;;  %v166_v47 = vld [vmem:[%s17142_s1 + $0x398] sm:$0xff]  ;;  %v6695_v49 = vpack.c.bf16 %v116_v40, %v115_v39  ;;  %v6697_v52 = vpack.c.bf16 %v134_v45, %v133_v44 }
  0x1b   :  { %6684 = vmatpush3.bf16.msra.mxu1 %v6683_v13  ;;  %v26_v48 = vld [vmem:[%s17143_s0] sm:$0xff]  ;;  %v28_v50 = vld [vmem:[%s17143_s0 + $0x10] sm:$0xff]  ;;  %v6727_v51 = vpack.c.bf16 %v148_v43, %v147_v41  ;;  %v118_v54 = vld [vmem:[%s17142_s1 + $0x218] sm:$0xff]  ;;  %v6729_v56 = vpack.c.bf16 %v166_v47, %v165_v46 }
  0x1c   :  { %6686 = vmatprep.subr.bf16.mxu1 %v6685_v18  ;;  %v117_v53 = vld [vmem:[%s17142_s1 + $0x210] sm:$0xff]  ;;  %v150_v57 = vld [vmem:[%s17142_s1 + $0x318] sm:$0xff]  ;;  %v135_v58 = vld [vmem:[%s17142_s1 + $0x2a0] sm:$0xff] }
  0x1d   :  { %6656 = vmatpush3.bf16.msra.mxu0 %v6655_v24  ;;  %v149_v55 = vld [vmem:[%s17142_s1 + $0x310] sm:$0xff]  ;;  %v136_v59 = vld [vmem:[%s17142_s1 + $0x2a8] sm:$0xff]  ;;  %v167_v60 = vld [vmem:[%s17142_s1 + $0x3a0] sm:$0xff]  ;;  %v6699_v62 = vpack.c.bf16 %v118_v54, %v117_v53 }
  0x1e   :  { %6658 = vmatprep.subr.bf16.mxu0 %v6657_v26  ;;  %v168_v61 = vld [vmem:[%s17142_s1 + $0x3a8] sm:$0xff]  ;;  %v6731_v63 = vpack.c.bf16 %v150_v57, %v149_v55  ;;  %v6701_v0 = vpack.c.bf16 %v136_v59, %v135_v58  ;;  %v119_v1 = vld [vmem:[%s17142_s1 + $0x220] sm:$0xff]  ;;  %v137_v6 = vld [vmem:[%s17142_s1 + $0x2b0] sm:$0xff] }
  0x1f   :  { %6688 = vmatpush3.bf16.msra.mxu1 %v6687_v25  ;;  %v120_v2 = vld [vmem:[%s17142_s1 + $0x228] sm:$0xff]  ;;  %v151_v3 = vld [vmem:[%s17142_s1 + $0x320] sm:$0xff]  ;;  %v6733_v4 = vpack.c.bf16 %v168_v61, %v167_v60  ;;  %v138_v7 = vld [vmem:[%s17142_s1 + $0x2b8] sm:$0xff] }
  0x20   :  { %6690 = vmatprep.subr.bf16.mxu1 %v6689_v30  ;;  %v152_v5 = vld [vmem:[%s17142_s1 + $0x328] sm:$0xff]  ;;  %v169_v8 = vld [vmem:[%s17142_s1 + $0x3b0] sm:$0xff]  ;;  %v170_v9 = vld [vmem:[%s17142_s1 + $0x3b8] sm:$0xff]  ;;  %v6703_v10 = vpack.c.bf16 %v120_v2, %v119_v1  ;;  %v6705_v12 = vpack.c.bf16 %v138_v7, %v137_v6 }
  0x21   :  { %6660 = vmatpush3.bf16.msra.mxu0 %v6659_v36  ;;  %v6735_v11 = vpack.c.bf16 %v152_v5, %v151_v3  ;;  %v121_v13 = vld [vmem:[%s17142_s1 + $0x230] sm:$0xff]  ;;  %v122_v14 = vld [vmem:[%s17142_s1 + $0x238] sm:$0xff]  ;;  %v6737_v16 = vpack.c.bf16 %v170_v9, %v169_v8  ;;  %v139_v18 = vld [vmem:[%s17142_s1 + $0x2c0] sm:$0xff] }
  0x22   :  { %6694 = vmatprep.subr.bf16.mxu0 %v6693_v38  ;;  %v153_v15 = vld [vmem:[%s17142_s1 + $0x330] sm:$0xff]  ;;  %v154_v17 = vld [vmem:[%s17142_s1 + $0x338] sm:$0xff]  ;;  %v140_v19 = vld [vmem:[%s17142_s1 + $0x2c8] sm:$0xff]  ;;  %v6707_v23 = vpack.c.bf16 %v122_v14, %v121_v13 }
  0x23   :  { %6692 = vmatpush3.bf16.msra.mxu1 %v6691_v37  ;;  %v171_v20 = vld [vmem:[%s17142_s1 + $0x3c0] sm:$0xff]  ;;  %v172_v21 = vld [vmem:[%s17142_s1 + $0x3c8] sm:$0xff]  ;;  %v6739_v25 = vpack.c.bf16 %v154_v17, %v153_v15  ;;  %v6709_v26 = vpack.c.bf16 %v140_v19, %v139_v18  ;;  %v33_v29 = vld [vmem:[%s17143_s0 + $0x38] sm:$0xff] }
  0x24   :  { %6726 = vmatprep.subr.bf16.mxu1 %v6725_v42  ;;  %523 = vmatmul.mubr.f32.vlgmr.msra.gmra.mrb[0].mxu0 %v26_v48  ;;  %v31_v22 = vld [vmem:[%s17143_s0 + $0x28] sm:$0xff]  ;;  %v123_v24 = vld [vmem:[%s17142_s1 + $0x240] sm:$0xff]  ;;  %v6741_v30 = vpack.c.bf16 %v172_v21, %v171_v20  ;;  %v141_v32 = vld [vmem:[%s17142_s1 + $0x2d0] sm:$0xff] }
  0x25   :  { %6696 = vmatpush3.bf16.msra.mxu0 %v6695_v49  ;;  %662 = vmatprep.mubr.f32.mxu0 %v31_v22  ;;  %v124_v27 = vld [vmem:[%s17142_s1 + $0x248] sm:$0xff]  ;;  %v155_v28 = vld [vmem:[%s17142_s1 + $0x340] sm:$0xff]  ;;  %v142_v33 = vld [vmem:[%s17142_s1 + $0x2d8] sm:$0xff] }
  0x26   :  { %593 = vmatmul.mubr.f32.vlgmr.msra.gmra.mrb[0].mxu1 %v28_v50  ;;  %6698 = vmatprep.subr.bf16.mxu0 %v6697_v52  ;;  %v156_v31 = vld [vmem:[%s17142_s1 + $0x348] sm:$0xff]  ;;  %v173_v34 = vld [vmem:[%s17142_s1 + $0x3d0] sm:$0xff]  ;;  %v174_v35 = vld [vmem:[%s17142_s1 + $0x3d8] sm:$0xff]  ;;  %v6711_v36 = vpack.c.bf16 %v124_v27, %v123_v24  ;;  %v6713_v38 = vpack.c.bf16 %v142_v33, %v141_v32 }
  0x27   :  { %6728 = vmatpush3.bf16.msra.mxu1 %v6727_v51  ;;  %732 = vmatprep.mubr.f32.mxu1 %v33_v29  ;;  %v6743_v37 = vpack.c.bf16 %v156_v31, %v155_v28  ;;  %v125_v39 = vld [vmem:[%s17142_s1 + $0x250] sm:$0xff]  ;;  %v126_v40 = vld [vmem:[%s17142_s1 + $0x258] sm:$0xff]  ;;  %v6745_v42 = vpack.c.bf16 %v174_v35, %v173_v34  ;;  %v143_v44 = vld [vmem:[%s17142_s1 + $0x2e0] sm:$0xff] }
  0x28   :  { %6730 = vmatprep.subr.bf16.mxu1 %v6729_v56  ;;  %v157_v41 = vld [vmem:[%s17142_s1 + $0x350] sm:$0xff]  ;;  %v158_v43 = vld [vmem:[%s17142_s1 + $0x358] sm:$0xff]  ;;  %v144_v45 = vld [vmem:[%s17142_s1 + $0x2e8] sm:$0xff]  ;;  %v6715_v48 = vpack.c.bf16 %v126_v40, %v125_v39 }
  0x29   :  { %6700 = vmatpush3.bf16.msra.mxu0 %v6699_v62  ;;  %v175_v46 = vld [vmem:[%s17142_s1 + $0x3e0] sm:$0xff]  ;;  %v176_v47 = vld [vmem:[%s17142_s1 + $0x3e8] sm:$0xff]  ;;  %v6747_v49 = vpack.c.bf16 %v158_v43, %v157_v41  ;;  %v6717_v50 = vpack.c.bf16 %v144_v45, %v143_v44  ;;  %v145_v56 = vld [vmem:[%s17142_s1 + $0x2f0] sm:$0xff] }
  0x2a   :  { %6702 = vmatprep.subr.bf16.mxu0 %v6701_v0  ;;  %v127_v51 = vld [vmem:[%s17142_s1 + $0x260] sm:$0xff]  ;;  %v128_v52 = vld [vmem:[%s17142_s1 + $0x268] sm:$0xff]  ;;  %v6749_v54 = vpack.c.bf16 %v176_v47, %v175_v46  ;;  %v146_v57 = vld [vmem:[%s17142_s1 + $0x2f8] sm:$0xff] }
  0x2b   :  { %6732 = vmatpush3.bf16.msra.mxu1 %v6731_v63  ;;  %v159_v53 = vld [vmem:[%s17142_s1 + $0x360] sm:$0xff]  ;;  %v160_v55 = vld [vmem:[%s17142_s1 + $0x368] sm:$0xff]  ;;  %v177_v58 = vld [vmem:[%s17142_s1 + $0x3f0] sm:$0xff]  ;;  %v6719_v60 = vpack.c.bf16 %v128_v52, %v127_v51  ;;  %v6721_v62 = vpack.c.bf16 %v146_v57, %v145_v56 }
  0x2c   :  { %6734 = vmatprep.subr.bf16.mxu1 %v6733_v4  ;;  %v178_v59 = vld [vmem:[%s17142_s1 + $0x3f8] sm:$0xff]  ;;  %v6751_v61 = vpack.c.bf16 %v160_v55, %v159_v53  ;;  %v129_v63 = vld [vmem:[%s17142_s1 + $0x270] sm:$0xff]  ;;  %v195_v4 = vld [vmem:[%s17142_s1 + $0x480] sm:$0xff] }
  0x2d   :  { %6704 = vmatpush3.bf16.msra.mxu0 %v6703_v10  ;;  %v130_v0 = vld [vmem:[%s17142_s1 + $0x278] sm:$0xff]  ;;  %v161_v1 = vld [vmem:[%s17142_s1 + $0x370] sm:$0xff]  ;;  %v6753_v2 = vpack.c.bf16 %v178_v59, %v177_v58  ;;  %v196_v5 = vld [vmem:[%s17142_s1 + $0x488] sm:$0xff] }
  0x2e   :  { %6706 = vmatprep.subr.bf16.mxu0 %v6705_v12  ;;  %v162_v3 = vld [vmem:[%s17142_s1 + $0x378] sm:$0xff]  ;;  %v227_v6 = vld [vmem:[%s17142_s1 + $0x580] sm:$0xff]  ;;  %v228_v7 = vld [vmem:[%s17142_s1 + $0x588] sm:$0xff]  ;;  %v6723_v8 = vpack.c.bf16 %v130_v0, %v129_v63  ;;  %v6757_v10 = vpack.c.bf16 %v196_v5, %v195_v4 }
  0x2f   :  { %6736 = vmatpush3.bf16.msra.mxu1 %v6735_v11  ;;  %v6755_v9 = vpack.c.bf16 %v162_v3, %v161_v1  ;;  %v179_v11 = vld [vmem:[%s17142_s1 + $0x400] sm:$0xff]  ;;  %v180_v12 = vld [vmem:[%s17142_s1 + $0x408] sm:$0xff]  ;;  %v6789_v14 = vpack.c.bf16 %v228_v7, %v227_v6  ;;  %v198_v17 = vld [vmem:[%s17142_s1 + $0x498] sm:$0xff] }
  0x30   :  { %6738 = vmatprep.subr.bf16.mxu1 %v6737_v16  ;;  %v211_v13 = vld [vmem:[%s17142_s1 + $0x500] sm:$0xff]  ;;  %v212_v15 = vld [vmem:[%s17142_s1 + $0x508] sm:$0xff]  ;;  %v197_v16 = vld [vmem:[%s17142_s1 + $0x490] sm:$0xff]  ;;  %v6759_v21 = vpack.c.bf16 %v180_v12, %v179_v11 }
  0x31   :  { %6708 = vmatpush3.bf16.msra.mxu0 %v6707_v23  ;;  %v229_v18 = vld [vmem:[%s17142_s1 + $0x590] sm:$0xff]  ;;  %v230_v19 = vld [vmem:[%s17142_s1 + $0x598] sm:$0xff]  ;;  %v30_v20 = vld [vmem:[%s17143_s0 + $0x20] sm:$0xff]  ;;  %v6791_v23 = vpack.c.bf16 %v212_v15, %v211_v13  ;;  %v6761_v24 = vpack.c.bf16 %v198_v17, %v197_v16 }
  0x32   :  { %6710 = vmatprep.subr.bf16.mxu0 %v6709_v26  ;;  %v32_v22 = vld [vmem:[%s17143_s0 + $0x30] sm:$0xff]  ;;  %v182_v26 = vld [vmem:[%s17142_s1 + $0x418] sm:$0xff]  ;;  %v6793_v28 = vpack.c.bf16 %v230_v19, %v229_v18  ;;  %v200_v31 = vld [vmem:[%s17142_s1 + $0x4a8] sm:$0xff] }
  0x33   :  { %6740 = vmatpush3.bf16.msra.mxu1 %v6739_v25  ;;  %v181_v25 = vld [vmem:[%s17142_s1 + $0x410] sm:$0xff]  ;;  %v214_v29 = vld [vmem:[%s17142_s1 + $0x518] sm:$0xff]  ;;  %v231_v32 = vld [vmem:[%s17142_s1 + $0x5a0] sm:$0xff] }
  0x34   :  { %6742 = vmatprep.subr.bf16.mxu1 %v6741_v30  ;;  %v213_v27 = vld [vmem:[%s17142_s1 + $0x510] sm:$0xff]  ;;  %v199_v30 = vld [vmem:[%s17142_s1 + $0x4a0] sm:$0xff]  ;;  %v232_v33 = vld [vmem:[%s17142_s1 + $0x5a8] sm:$0xff]  ;;  %v6763_v35 = vpack.c.bf16 %v182_v26, %v181_v25 }
  0x35   :  { %6712 = vmatpush3.bf16.msra.mxu0 %v6711_v36  ;;  %v35_v34 = vld [vmem:[%s17143_s0 + $0x48] sm:$0xff]  ;;  %v37_v36 = vld [vmem:[%s17143_s0 + $0x58] sm:$0xff]  ;;  %v183_v39 = vld [vmem:[%s17142_s1 + $0x420] sm:$0xff] }
  0x36   :  { %6714 = vmatprep.subr.bf16.mxu0 %v6713_v38  ;;  %v6765_v38 = vpack.c.bf16 %v200_v31, %v199_v30  ;;  %v184_v40 = vld [vmem:[%s17142_s1 + $0x428] sm:$0xff]  ;;  %v215_v41 = vld [vmem:[%s17142_s1 + $0x520] sm:$0xff]  ;;  %v201_v44 = vld [vmem:[%s17142_s1 + $0x4b0] sm:$0xff] }
  0x37   :  { %6744 = vmatpush3.bf16.msra.mxu1 %v6743_v37  ;;  %v6795_v37 = vpack.c.bf16 %v214_v29, %v213_v27  ;;  %v216_v43 = vld [vmem:[%s17142_s1 + $0x528] sm:$0xff]  ;;  %v202_v45 = vld [vmem:[%s17142_s1 + $0x4b8] sm:$0xff]  ;;  %v233_v46 = vld [vmem:[%s17142_s1 + $0x5b0] sm:$0xff] }
  0x38   :  { %6746 = vmatprep.subr.bf16.mxu1 %v6745_v42  ;;  %v6797_v42 = vpack.c.bf16 %v232_v33, %v231_v32  ;;  %v234_v47 = vld [vmem:[%s17142_s1 + $0x5b8] sm:$0xff]  ;;  %v185_v51 = vld [vmem:[%s17142_s1 + $0x430] sm:$0xff]  ;;  %v203_v56 = vld [vmem:[%s17142_s1 + $0x4c0] sm:$0xff] }
  0x39   :  { %6716 = vmatpush3.bf16.msra.mxu0 %v6715_v48  ;;  %v6767_v48 = vpack.c.bf16 %v184_v40, %v183_v39  ;;  %v186_v52 = vld [vmem:[%s17142_s1 + $0x438] sm:$0xff]  ;;  %v217_v53 = vld [vmem:[%s17142_s1 + $0x530] sm:$0xff]  ;;  %v204_v57 = vld [vmem:[%s17142_s1 + $0x4c8] sm:$0xff] }
  0x3a   :  { %6718 = vmatprep.subr.bf16.mxu0 %v6717_v50  ;;  %v6769_v50 = vpack.c.bf16 %v202_v45, %v201_v44  ;;  %v218_v55 = vld [vmem:[%s17142_s1 + $0x538] sm:$0xff]  ;;  %v235_v58 = vld [vmem:[%s17142_s1 + $0x5c0] sm:$0xff]  ;;  %v236_v59 = vld [vmem:[%s17142_s1 + $0x5c8] sm:$0xff] }
  0x3b   :  { %6748 = vmatpush3.bf16.msra.mxu1 %v6747_v49  ;;  %v6799_v49 = vpack.c.bf16 %v216_v43, %v215_v41  ;;  %v187_v63 = vld [vmem:[%s17142_s1 + $0x440] sm:$0xff]  ;;  %v188_v0 = vld [vmem:[%s17142_s1 + $0x448] sm:$0xff]  ;;  %v205_v4 = vld [vmem:[%s17142_s1 + $0x4d0] sm:$0xff] }
  0x3c   :  { %6750 = vmatprep.subr.bf16.mxu1 %v6749_v54  ;;  %v6801_v54 = vpack.c.bf16 %v234_v47, %v233_v46  ;;  %v219_v1 = vld [vmem:[%s17142_s1 + $0x540] sm:$0xff]  ;;  %v220_v3 = vld [vmem:[%s17142_s1 + $0x548] sm:$0xff]  ;;  %v206_v5 = vld [vmem:[%s17142_s1 + $0x4d8] sm:$0xff] }
  0x3d   :  { %6720 = vmatpush3.bf16.msra.mxu0 %v6719_v60  ;;  %v6771_v60 = vpack.c.bf16 %v186_v52, %v185_v51  ;;  %v237_v6 = vld [vmem:[%s17142_s1 + $0x5d0] sm:$0xff]  ;;  %v238_v7 = vld [vmem:[%s17142_s1 + $0x5d8] sm:$0xff]  ;;  %v207_v16 = vld [vmem:[%s17142_s1 + $0x4e0] sm:$0xff] }
  0x3e   :  { %6722 = vmatprep.subr.bf16.mxu0 %v6721_v62  ;;  %v6773_v62 = vpack.c.bf16 %v204_v57, %v203_v56  ;;  %v189_v11 = vld [vmem:[%s17142_s1 + $0x450] sm:$0xff]  ;;  %v190_v12 = vld [vmem:[%s17142_s1 + $0x458] sm:$0xff]  ;;  %v208_v17 = vld [vmem:[%s17142_s1 + $0x4e8] sm:$0xff] }
  0x3f   :  { %6752 = vmatpush3.bf16.msra.mxu1 %v6751_v61  ;;  %v6803_v61 = vpack.c.bf16 %v218_v55, %v217_v53  ;;  %v221_v13 = vld [vmem:[%s17142_s1 + $0x550] sm:$0xff]  ;;  %v222_v15 = vld [vmem:[%s17142_s1 + $0x558] sm:$0xff]  ;;  %v239_v18 = vld [vmem:[%s17142_s1 + $0x5e0] sm:$0xff] }
  0x40   :  { %6754 = vmatprep.subr.bf16.mxu1 %v6753_v2  ;;  %v6805_v2 = vpack.c.bf16 %v236_v59, %v235_v58  ;;  %v240_v19 = vld [vmem:[%s17142_s1 + $0x5e8] sm:$0xff]  ;;  %v223_v25 = vld [vmem:[%s17142_s1 + $0x560] sm:$0xff]  ;;  %v210_v29 = vld [vmem:[%s17142_s1 + $0x4f8] sm:$0xff] }
  0x41   :  { %6724 = vmatpush3.bf16.msra.mxu0 %v6723_v8  ;;  %v6775_v8 = vpack.c.bf16 %v188_v0, %v187_v63  ;;  %v6813_v26 = vpack.c.bf16 %v240_v19, %v239_v18  ;;  %v224_v27 = vld [vmem:[%s17142_s1 + $0x568] sm:$0xff]  ;;  %v241_v30 = vld [vmem:[%s17142_s1 + $0x5f0] sm:$0xff]  ;;  %v242_v31 = vld [vmem:[%s17142_s1 + $0x5f8] sm:$0xff] }
  0x42   :  { %6758 = vmatprep.subr.bf16.mxu0 %v6757_v10  ;;  %v6777_v10 = vpack.c.bf16 %v206_v5, %v205_v4  ;;  %v6815_v33 = vpack.c.bf16 %v224_v27, %v223_v25  ;;  %v226_v39 = vld [vmem:[%s17142_s1 + $0x578] sm:$0xff]  ;;  %v259_v40 = vld [vmem:[%s17142_s1 + $0x680] sm:$0xff]  ;;  %v260_v41 = vld [vmem:[%s17142_s1 + $0x688] sm:$0xff] }
  0x43   :  { %6756 = vmatpush3.bf16.msra.mxu1 %v6755_v9  ;;  %v6807_v9 = vpack.c.bf16 %v220_v3, %v219_v1  ;;  %v292_v43 = vld [vmem:[%s17142_s1 + $0x788] sm:$0xff]  ;;  %v6821_v46 = vpack.c.bf16 %v260_v41, %v259_v40  ;;  %v243_v47 = vld [vmem:[%s17142_s1 + $0x600] sm:$0xff]  ;;  %v261_v52 = vld [vmem:[%s17142_s1 + $0x690] sm:$0xff] }
  0x44   :  { %6790 = vmatprep.subr.bf16.mxu1 %v6789_v14  ;;  %663 = vmatmul.mubr.f32.vlgmr.msra.gmra.mrb[2].mxu0 %v30_v20  ;;  %v6809_v14 = vpack.c.bf16 %v238_v7, %v237_v6  ;;  %v6779_v20 = vpack.c.bf16 %v190_v12, %v189_v11  ;;  %v276_v51 = vld [vmem:[%s17142_s1 + $0x708] sm:$0xff]  ;;  %v262_v53 = vld [vmem:[%s17142_s1 + $0x698] sm:$0xff]  ;;  %v34_v56 = vld [vmem:[%s17143_s0 + $0x40] sm:$0xff] }
  0x45   :  { %6760 = vmatpush3.bf16.msra.mxu0 %v6759_v21  ;;  %802 = vmatprep.mubr.f32.mxu0 %v35_v34  ;;  %v6811_v21 = vpack.c.bf16 %v222_v15, %v221_v13  ;;  %v294_v55 = vld [vmem:[%s17142_s1 + $0x798] sm:$0xff]  ;;  %v36_v58 = vld [vmem:[%s17143_s0 + $0x50] sm:$0xff]  ;;  %v264_v3 = vld [vmem:[%s17142_s1 + $0x6a8] sm:$0xff] }
  0x46   :  { %733 = vmatmul.mubr.f32.vlgmr.msra.gmra.mrb[2].mxu1 %v32_v22  ;;  %6762 = vmatprep.subr.bf16.mxu0 %v6761_v24  ;;  %v6781_v22 = vpack.c.bf16 %v208_v17, %v207_v16  ;;  %v192_v24 = vld [vmem:[%s17142_s1 + $0x468] sm:$0xff]  ;;  %v277_v63 = vld [vmem:[%s17142_s1 + $0x710] sm:$0xff]  ;;  %v278_v1 = vld [vmem:[%s17142_s1 + $0x718] sm:$0xff] }
  0x47   :  { %6792 = vmatpush3.bf16.msra.mxu1 %v6791_v23  ;;  %872 = vmatprep.mubr.f32.mxu1 %v37_v36  ;;  %v191_v23 = vld [vmem:[%s17142_s1 + $0x460] sm:$0xff]  ;;  %v194_v36 = vld [vmem:[%s17142_s1 + $0x478] sm:$0xff]  ;;  %v296_v5 = vld [vmem:[%s17142_s1 + $0x7a8] sm:$0xff] }
  0x48   :  { %6794 = vmatprep.subr.bf16.mxu1 %v6793_v28  ;;  %v209_v28 = vld [vmem:[%s17142_s1 + $0x4f0] sm:$0xff]  ;;  %v6783_v32 = vpack.c.bf16 %v192_v24, %v191_v23  ;;  %v295_v4 = vld [vmem:[%s17142_s1 + $0x7a0] sm:$0xff]  ;;  %v39_v6 = vld [vmem:[%s17143_s0 + $0x68] sm:$0xff] }
  0x49   :  { %6764 = vmatpush3.bf16.msra.mxu0 %v6763_v35  ;;  %v6785_v34 = vpack.c.bf16 %v210_v29, %v209_v28  ;;  %v193_v35 = vld [vmem:[%s17142_s1 + $0x470] sm:$0xff]  ;;  %v247_v11 = vld [vmem:[%s17142_s1 + $0x620] sm:$0xff]  ;;  %v248_v12 = vld [vmem:[%s17142_s1 + $0x628] sm:$0xff] }
  0x4a   :  { %6766 = vmatprep.subr.bf16.mxu0 %v6765_v38  ;;  %v6817_v38 = vpack.c.bf16 %v242_v31, %v241_v30  ;;  %v6787_v44 = vpack.c.bf16 %v194_v36, %v193_v35  ;;  %v279_v13 = vld [vmem:[%s17142_s1 + $0x720] sm:$0xff]  ;;  %v280_v15 = vld [vmem:[%s17142_s1 + $0x728] sm:$0xff]  ;;  %v265_v16 = vld [vmem:[%s17142_s1 + $0x6b0] sm:$0xff] }
  0x4b   :  { %6796 = vmatpush3.bf16.msra.mxu1 %v6795_v37  ;;  %v225_v37 = vld [vmem:[%s17142_s1 + $0x570] sm:$0xff]  ;;  %v266_v17 = vld [vmem:[%s17142_s1 + $0x6b8] sm:$0xff]  ;;  %v267_v28 = vld [vmem:[%s17142_s1 + $0x6c0] sm:$0xff] }
  0x4c   :  { %6798 = vmatprep.subr.bf16.mxu1 %v6797_v42  ;;  %v291_v42 = vld [vmem:[%s17142_s1 + $0x780] sm:$0xff]  ;;  %v6819_v45 = vpack.c.bf16 %v226_v39, %v225_v37  ;;  %v297_v18 = vld [vmem:[%s17142_s1 + $0x7b0] sm:$0xff]  ;;  %v298_v19 = vld [vmem:[%s17142_s1 + $0x7b8] sm:$0xff] }
  0x4d   :  { %6768 = vmatpush3.bf16.msra.mxu0 %v6767_v48  ;;  %v244_v48 = vld [vmem:[%s17142_s1 + $0x608] sm:$0xff]  ;;  %v249_v23 = vld [vmem:[%s17142_s1 + $0x630] sm:$0xff]  ;;  %v250_v24 = vld [vmem:[%s17142_s1 + $0x638] sm:$0xff] }
  0x4e   :  { %6770 = vmatprep.subr.bf16.mxu0 %v6769_v50  ;;  %v6853_v50 = vpack.c.bf16 %v292_v43, %v291_v42  ;;  %v6823_v57 = vpack.c.bf16 %v244_v48, %v243_v47  ;;  %v281_v25 = vld [vmem:[%s17142_s1 + $0x730] sm:$0xff]  ;;  %v282_v27 = vld [vmem:[%s17142_s1 + $0x738] sm:$0xff]  ;;  %v268_v29 = vld [vmem:[%s17142_s1 + $0x6c8] sm:$0xff] }
  0x4f   :  { %6800 = vmatpush3.bf16.msra.mxu1 %v6799_v49  ;;  %v275_v49 = vld [vmem:[%s17142_s1 + $0x700] sm:$0xff]  ;;  %v300_v31 = vld [vmem:[%s17142_s1 + $0x7c8] sm:$0xff]  ;;  %v269_v40 = vld [vmem:[%s17142_s1 + $0x6d0] sm:$0xff] }
  0x50   :  { %6802 = vmatprep.subr.bf16.mxu1 %v6801_v54  ;;  %v293_v54 = vld [vmem:[%s17142_s1 + $0x790] sm:$0xff]  ;;  %v6855_v59 = vpack.c.bf16 %v276_v51, %v275_v49  ;;  %v299_v30 = vld [vmem:[%s17142_s1 + $0x7c0] sm:$0xff]  ;;  %v252_v36 = vld [vmem:[%s17142_s1 + $0x648] sm:$0xff] }
  0x51   :  { %6772 = vmatpush3.bf16.msra.mxu0 %v6771_v60  ;;  %v6825_v60 = vpack.c.bf16 %v262_v53, %v261_v52  ;;  %v6857_v0 = vpack.c.bf16 %v294_v55, %v293_v54  ;;  %v251_v35 = vld [vmem:[%s17142_s1 + $0x640] sm:$0xff]  ;;  %v284_v39 = vld [vmem:[%s17142_s1 + $0x748] sm:$0xff]  ;;  %v270_v41 = vld [vmem:[%s17142_s1 + $0x6d8] sm:$0xff] }
  0x52   :  { %6774 = vmatprep.subr.bf16.mxu0 %v6773_v62  ;;  %v246_v62 = vld [vmem:[%s17142_s1 + $0x618] sm:$0xff]  ;;  %v283_v37 = vld [vmem:[%s17142_s1 + $0x740] sm:$0xff]  ;;  %v301_v42 = vld [vmem:[%s17142_s1 + $0x7d0] sm:$0xff] }
  0x53   :  { %6804 = vmatpush3.bf16.msra.mxu1 %v6803_v61  ;;  %v245_v61 = vld [vmem:[%s17142_s1 + $0x610] sm:$0xff]  ;;  %v302_v43 = vld [vmem:[%s17142_s1 + $0x7d8] sm:$0xff]  ;;  %v271_v52 = vld [vmem:[%s17142_s1 + $0x6e0] sm:$0xff] }
  0x54   :  { %6806 = vmatprep.subr.bf16.mxu1 %v6805_v2  ;;  %v263_v2 = vld [vmem:[%s17142_s1 + $0x6a0] sm:$0xff]  ;;  %v6827_v7 = vpack.c.bf16 %v246_v62, %v245_v61  ;;  %v253_v47 = vld [vmem:[%s17142_s1 + $0x650] sm:$0xff]  ;;  %v254_v48 = vld [vmem:[%s17142_s1 + $0x658] sm:$0xff] }
  0x55   :  { %6776 = vmatpush3.bf16.msra.mxu0 %v6775_v8  ;;  %v41_v8 = vld [vmem:[%s17143_s0 + $0x78] sm:$0xff]  ;;  %v285_v49 = vld [vmem:[%s17142_s1 + $0x750] sm:$0xff]  ;;  %v272_v53 = vld [vmem:[%s17142_s1 + $0x6e8] sm:$0xff] }
  0x56   :  { %6778 = vmatprep.subr.bf16.mxu0 %v6777_v10  ;;  %v6829_v10 = vpack.c.bf16 %v264_v3, %v263_v2  ;;  %v286_v51 = vld [vmem:[%s17142_s1 + $0x758] sm:$0xff]  ;;  %v303_v54 = vld [vmem:[%s17142_s1 + $0x7e0] sm:$0xff]  ;;  %v304_v55 = vld [vmem:[%s17142_s1 + $0x7e8] sm:$0xff] }
  0x57   :  { %6808 = vmatpush3.bf16.msra.mxu1 %v6807_v9  ;;  %v6859_v9 = vpack.c.bf16 %v278_v1, %v277_v63  ;;  %v287_v61 = vld [vmem:[%s17142_s1 + $0x760] sm:$0xff]  ;;  %v6877_v62 = vpack.c.bf16 %v304_v55, %v303_v54  ;;  %v288_v63 = vld [vmem:[%s17142_s1 + $0x768] sm:$0xff]  ;;  %v274_v1 = vld [vmem:[%s17142_s1 + $0x6f8] sm:$0xff] }
  0x58   :  { %6810 = vmatprep.subr.bf16.mxu1 %v6809_v14  ;;  %v6861_v14 = vpack.c.bf16 %v296_v5, %v295_v4  ;;  %v305_v2 = vld [vmem:[%s17142_s1 + $0x7f0] sm:$0xff]  ;;  %v306_v3 = vld [vmem:[%s17142_s1 + $0x7f8] sm:$0xff]  ;;  %v6879_v5 = vpack.c.bf16 %v288_v63, %v287_v61 }
  0x59   :  { %6780 = vmatpush3.bf16.msra.mxu0 %v6779_v20  ;;  %v6831_v20 = vpack.c.bf16 %v248_v12, %v247_v11  ;;  %v290_v11 = vld [vmem:[%s17142_s1 + $0x778] sm:$0xff]  ;;  %v323_v12 = vld [vmem:[%s17142_s1 + $0x880] sm:$0xff]  ;;  %v361_v54 = vld [vmem:[%s17142_s1 + $0x9b0] sm:$0xff] }
  0x5a   :  { %6782 = vmatprep.subr.bf16.mxu0 %v6781_v22  ;;  %v6833_v22 = vpack.c.bf16 %v266_v17, %v265_v16  ;;  %v362_v55 = vld [vmem:[%s17142_s1 + $0x9b8] sm:$0xff]  ;;  %v345_v61 = vld [vmem:[%s17142_s1 + $0x930] sm:$0xff] }
  0x5b   :  { %6812 = vmatpush3.bf16.msra.mxu1 %v6811_v21  ;;  %v6863_v21 = vpack.c.bf16 %v280_v15, %v279_v13  ;;  %v324_v13 = vld [vmem:[%s17142_s1 + $0x888] sm:$0xff]  ;;  %v346_v63 = vld [vmem:[%s17142_s1 + $0x938] sm:$0xff] }
  0x5c   :  { %6814 = vmatprep.subr.bf16.mxu1 %v6813_v26  ;;  %v6865_v26 = vpack.c.bf16 %v298_v19, %v297_v18  ;;  %v356_v15 = vld [vmem:[%s17142_s1 + $0x988] sm:$0xff]  ;;  %v6885_v18 = vpack.c.bf16 %v324_v13, %v323_v12  ;;  %v307_v19 = vld [vmem:[%s17142_s1 + $0x800] sm:$0xff]  ;;  %v333_v12 = vld [vmem:[%s17142_s1 + $0x8d0] sm:$0xff] }
  0x5d   :  { %6784 = vmatpush3.bf16.msra.mxu0 %v6783_v32  ;;  %v6835_v32 = vpack.c.bf16 %v250_v24, %v249_v23  ;;  %v340_v23 = vld [vmem:[%s17142_s1 + $0x908] sm:$0xff]  ;;  %v325_v24 = vld [vmem:[%s17142_s1 + $0x890] sm:$0xff]  ;;  %v334_v13 = vld [vmem:[%s17142_s1 + $0x8d8] sm:$0xff] }
  0x5e   :  { %6786 = vmatprep.subr.bf16.mxu0 %v6785_v34  ;;  %v6837_v34 = vpack.c.bf16 %v268_v29, %v267_v28  ;;  %v38_v28 = vld [vmem:[%s17143_s0 + $0x60] sm:$0xff] }
  0x5f   :  { %6816 = vmatpush3.bf16.msra.mxu1 %v6815_v33  ;;  %v6867_v33 = vpack.c.bf16 %v282_v27, %v281_v25  ;;  %v326_v25 = vld [vmem:[%s17142_s1 + $0x898] sm:$0xff] }
  0x60   :  { %6818 = vmatprep.subr.bf16.mxu1 %v6817_v38  ;;  %v6869_v38 = vpack.c.bf16 %v300_v31, %v299_v30  ;;  %v358_v27 = vld [vmem:[%s17142_s1 + $0x998] sm:$0xff]  ;;  %v40_v30 = vld [vmem:[%s17143_s0 + $0x70] sm:$0xff] }
  0x61   :  { %6788 = vmatpush3.bf16.msra.mxu0 %v6787_v44  ;;  %v6839_v44 = vpack.c.bf16 %v252_v36, %v251_v35  ;;  %v341_v35 = vld [vmem:[%s17142_s1 + $0x910] sm:$0xff] }
  0x62   :  { %6822 = vmatprep.subr.bf16.mxu0 %v6821_v46  ;;  %v6841_v46 = vpack.c.bf16 %v270_v41, %v269_v40  ;;  %v359_v40 = vld [vmem:[%s17142_s1 + $0x9a0] sm:$0xff]  ;;  %v360_v41 = vld [vmem:[%s17142_s1 + $0x9a8] sm:$0xff] }
  0x63   :  { %6820 = vmatpush3.bf16.msra.mxu1 %v6819_v45  ;;  %v6871_v45 = vpack.c.bf16 %v284_v39, %v283_v37  ;;  %v342_v37 = vld [vmem:[%s17142_s1 + $0x918] sm:$0xff]  ;;  %v328_v39 = vld [vmem:[%s17142_s1 + $0x8a8] sm:$0xff] }
  0x64   :  { %6854 = vmatprep.subr.bf16.mxu1 %v6853_v50  ;;  %803 = vmatmul.mubr.f32.vlgmr.msra.gmra.mrb[4].mxu0 %v34_v56  ;;  %v6873_v50 = vpack.c.bf16 %v302_v43, %v301_v42  ;;  %v6843_v56 = vpack.c.bf16 %v254_v48, %v253_v47  ;;  %v43_v42 = vld [vmem:[%s17143_s0 + $0x88] sm:$0xff]  ;;  %v311_v47 = vld [vmem:[%s17142_s1 + $0x820] sm:$0xff] }
  0x65   :  { %6824 = vmatpush3.bf16.msra.mxu0 %v6823_v57  ;;  %942 = vmatprep.mubr.f32.mxu0 %v39_v6  ;;  %v6875_v57 = vpack.c.bf16 %v286_v51, %v285_v49  ;;  %v312_v48 = vld [vmem:[%s17142_s1 + $0x828] sm:$0xff]  ;;  %v343_v49 = vld [vmem:[%s17142_s1 + $0x920] sm:$0xff] }
  0x66   :  { %873 = vmatmul.mubr.f32.vlgmr.msra.gmra.mrb[4].mxu1 %v36_v58  ;;  %6826 = vmatprep.subr.bf16.mxu0 %v6825_v60  ;;  %v6845_v58 = vpack.c.bf16 %v272_v53, %v271_v52  ;;  %v256_v60 = vld [vmem:[%s17142_s1 + $0x668] sm:$0xff]  ;;  %v329_v52 = vld [vmem:[%s17142_s1 + $0x8b0] sm:$0xff]  ;;  %v330_v53 = vld [vmem:[%s17142_s1 + $0x8b8] sm:$0xff] }
  0x67   :  { %6856 = vmatpush3.bf16.msra.mxu1 %v6855_v59  ;;  %1012 = vmatprep.mubr.f32.mxu1 %v41_v8  ;;  %v255_v59 = vld [vmem:[%s17142_s1 + $0x660] sm:$0xff]  ;;  %v258_v8 = vld [vmem:[%s17142_s1 + $0x678] sm:$0xff]  ;;  %v344_v51 = vld [vmem:[%s17142_s1 + $0x928] sm:$0xff] }
  0x68   :  { %6858 = vmatprep.subr.bf16.mxu1 %v6857_v0  ;;  %v273_v0 = vld [vmem:[%s17142_s1 + $0x6f0] sm:$0xff]  ;;  %v6847_v4 = vpack.c.bf16 %v256_v60, %v255_v59  ;;  %v314_v60 = vld [vmem:[%s17142_s1 + $0x838] sm:$0xff] }
  0x69   :  { %6828 = vmatpush3.bf16.msra.mxu0 %v6827_v7  ;;  %v6849_v6 = vpack.c.bf16 %v274_v1, %v273_v0  ;;  %v257_v7 = vld [vmem:[%s17142_s1 + $0x670] sm:$0xff]  ;;  %v331_v0 = vld [vmem:[%s17142_s1 + $0x8c0] sm:$0xff]  ;;  %v332_v1 = vld [vmem:[%s17142_s1 + $0x8c8] sm:$0xff] }
  0x6a   :  { %6830 = vmatprep.subr.bf16.mxu0 %v6829_v10  ;;  %v6881_v10 = vpack.c.bf16 %v306_v3, %v305_v2  ;;  %v6851_v16 = vpack.c.bf16 %v258_v8, %v257_v7  ;;  %v313_v59 = vld [vmem:[%s17142_s1 + $0x830] sm:$0xff]  ;;  %v363_v2 = vld [vmem:[%s17142_s1 + $0x9c0] sm:$0xff]  ;;  %v364_v3 = vld [vmem:[%s17142_s1 + $0x9c8] sm:$0xff] }
  0x6b   :  { %6860 = vmatpush3.bf16.msra.mxu1 %v6859_v9  ;;  %v289_v9 = vld [vmem:[%s17142_s1 + $0x770] sm:$0xff]  ;;  %v315_v7 = vld [vmem:[%s17142_s1 + $0x840] sm:$0xff]  ;;  %v316_v8 = vld [vmem:[%s17142_s1 + $0x848] sm:$0xff] }
  0x6c   :  { %6862 = vmatprep.subr.bf16.mxu1 %v6861_v14  ;;  %v355_v14 = vld [vmem:[%s17142_s1 + $0x980] sm:$0xff]  ;;  %v6883_v17 = vpack.c.bf16 %v290_v11, %v289_v9  ;;  %v348_v11 = vld [vmem:[%s17142_s1 + $0x948] sm:$0xff] }
  0x6d   :  { %6832 = vmatpush3.bf16.msra.mxu0 %v6831_v20  ;;  %v308_v20 = vld [vmem:[%s17142_s1 + $0x808] sm:$0xff]  ;;  %v347_v9 = vld [vmem:[%s17142_s1 + $0x940] sm:$0xff] }
  0x6e   :  { %6834 = vmatprep.subr.bf16.mxu0 %v6833_v22  ;;  %v6917_v22 = vpack.c.bf16 %v356_v15, %v355_v14  ;;  %v6887_v29 = vpack.c.bf16 %v308_v20, %v307_v19  ;;  %v365_v14 = vld [vmem:[%s17142_s1 + $0x9d0] sm:$0xff]  ;;  %v366_v15 = vld [vmem:[%s17142_s1 + $0x9d8] sm:$0xff] }
  0x6f   :  { %6864 = vmatpush3.bf16.msra.mxu1 %v6863_v21  ;;  %v339_v21 = vld [vmem:[%s17142_s1 + $0x900] sm:$0xff]  ;;  %v317_v19 = vld [vmem:[%s17142_s1 + $0x850] sm:$0xff]  ;;  %v318_v20 = vld [vmem:[%s17142_s1 + $0x858] sm:$0xff] }
  0x70   :  { %6866 = vmatprep.subr.bf16.mxu1 %v6865_v26  ;;  %v357_v26 = vld [vmem:[%s17142_s1 + $0x990] sm:$0xff]  ;;  %v6919_v31 = vpack.c.bf16 %v340_v23, %v339_v21  ;;  %v350_v23 = vld [vmem:[%s17142_s1 + $0x958] sm:$0xff] }
  0x71   :  { %6836 = vmatpush3.bf16.msra.mxu0 %v6835_v32  ;;  %v6889_v32 = vpack.c.bf16 %v326_v25, %v325_v24  ;;  %v6921_v36 = vpack.c.bf16 %v358_v27, %v357_v26  ;;  %v349_v21 = vld [vmem:[%s17142_s1 + $0x950] sm:$0xff]  ;;  %v335_v24 = vld [vmem:[%s17142_s1 + $0x8e0] sm:$0xff]  ;;  %v336_v25 = vld [vmem:[%s17142_s1 + $0x8e8] sm:$0xff] }
  0x72   :  { %6838 = vmatprep.subr.bf16.mxu0 %v6837_v34  ;;  %v310_v34 = vld [vmem:[%s17142_s1 + $0x818] sm:$0xff]  ;;  %v367_v26 = vld [vmem:[%s17142_s1 + $0x9e0] sm:$0xff]  ;;  %v368_v27 = vld [vmem:[%s17142_s1 + $0x9e8] sm:$0xff] }
  0x73   :  { %6868 = vmatpush3.bf16.msra.mxu1 %v6867_v33  ;;  %v309_v33 = vld [vmem:[%s17142_s1 + $0x810] sm:$0xff] }
  0x74   :  { %6870 = vmatprep.subr.bf16.mxu1 %v6869_v38  ;;  %v327_v38 = vld [vmem:[%s17142_s1 + $0x8a0] sm:$0xff]  ;;  %v6891_v43 = vpack.c.bf16 %v310_v34, %v309_v33  ;;  %v6941_v34 = vpack.c.bf16 %v368_v27, %v367_v26  ;;  %v425_v26 = vld [vmem:[%s17142_s1 + $0xbb0] sm:$0xff]  ;;  %v426_v27 = vld [vmem:[%s17142_s1 + $0xbb8] sm:$0xff] }
  0x75   :  { %6840 = vmatpush3.bf16.msra.mxu0 %v6839_v44  ;;  %v45_v44 = vld [vmem:[%s17143_s0 + $0x98] sm:$0xff]  ;;  %v351_v33 = vld [vmem:[%s17142_s1 + $0x960] sm:$0xff] }
  0x76   :  { %6842 = vmatprep.subr.bf16.mxu0 %v6841_v46  ;;  %v6893_v46 = vpack.c.bf16 %v328_v39, %v327_v38  ;;  %v369_v38 = vld [vmem:[%s17142_s1 + $0x9f0] sm:$0xff]  ;;  %v370_v39 = vld [vmem:[%s17142_s1 + $0x9f8] sm:$0xff] }
  0x77   :  { %6872 = vmatpush3.bf16.msra.mxu1 %v6871_v45  ;;  %v6923_v45 = vpack.c.bf16 %v342_v37, %v341_v35  ;;  %v352_v35 = vld [vmem:[%s17142_s1 + $0x968] sm:$0xff]  ;;  %v338_v37 = vld [vmem:[%s17142_s1 + $0x8f8] sm:$0xff] }
  0x78   :  { %6874 = vmatprep.subr.bf16.mxu1 %v6873_v50  ;;  %v6925_v50 = vpack.c.bf16 %v360_v41, %v359_v40  ;;  %v6943_v41 = vpack.c.bf16 %v352_v35, %v351_v33  ;;  %v409_v33 = vld [vmem:[%s17142_s1 + $0xb30] sm:$0xff]  ;;  %v410_v35 = vld [vmem:[%s17142_s1 + $0xb38] sm:$0xff] }
  0x79   :  { %6844 = vmatpush3.bf16.msra.mxu0 %v6843_v56  ;;  %v6895_v56 = vpack.c.bf16 %v312_v48, %v311_v47  ;;  %v354_v47 = vld [vmem:[%s17142_s1 + $0x978] sm:$0xff]  ;;  %v387_v48 = vld [vmem:[%s17142_s1 + $0xa80] sm:$0xff] }
  0x7a   :  { %6846 = vmatprep.subr.bf16.mxu0 %v6845_v58  ;;  %v6897_v58 = vpack.c.bf16 %v330_v53, %v329_v52 }
  0x7b   :  { %6876 = vmatpush3.bf16.msra.mxu1 %v6875_v57  ;;  %v6927_v57 = vpack.c.bf16 %v344_v51, %v343_v49  ;;  %v388_v49 = vld [vmem:[%s17142_s1 + $0xa88] sm:$0xff] }
  0x7c   :  { %6878 = vmatprep.subr.bf16.mxu1 %v6877_v62  ;;  %v6929_v62 = vpack.c.bf16 %v362_v55, %v361_v54  ;;  %v420_v51 = vld [vmem:[%s17142_s1 + $0xb88] sm:$0xff]  ;;  %v6949_v54 = vpack.c.bf16 %v388_v49, %v387_v48  ;;  %v371_v55 = vld [vmem:[%s17142_s1 + $0xa00] sm:$0xff]  ;;  %v397_v48 = vld [vmem:[%s17142_s1 + $0xad0] sm:$0xff] }
  0x7d   :  { %6848 = vmatpush3.bf16.msra.mxu0 %v6847_v4  ;;  %v6899_v4 = vpack.c.bf16 %v314_v60, %v313_v59  ;;  %v404_v59 = vld [vmem:[%s17142_s1 + $0xb08] sm:$0xff]  ;;  %v389_v60 = vld [vmem:[%s17142_s1 + $0xa90] sm:$0xff]  ;;  %v398_v49 = vld [vmem:[%s17142_s1 + $0xad8] sm:$0xff] }
  0x7e   :  { %6850 = vmatprep.subr.bf16.mxu0 %v6849_v6  ;;  %v6901_v6 = vpack.c.bf16 %v332_v1, %v331_v0  ;;  %v42_v0 = vld [vmem:[%s17143_s0 + $0x80] sm:$0xff] }
  0x7f   :  { %6880 = vmatpush3.bf16.msra.mxu1 %v6879_v5  ;;  %v6931_v5 = vpack.c.bf16 %v346_v63, %v345_v61  ;;  %v390_v61 = vld [vmem:[%s17142_s1 + $0xa98] sm:$0xff] }
  0x80   :  { %6882 = vmatprep.subr.bf16.mxu1 %v6881_v10  ;;  %v6933_v10 = vpack.c.bf16 %v364_v3, %v363_v2  ;;  %v422_v63 = vld [vmem:[%s17142_s1 + $0xb98] sm:$0xff]  ;;  %v44_v2 = vld [vmem:[%s17143_s0 + $0x90] sm:$0xff] }
  0x81   :  { %6852 = vmatpush3.bf16.msra.mxu0 %v6851_v16  ;;  %v6903_v16 = vpack.c.bf16 %v316_v8, %v315_v7  ;;  %v405_v7 = vld [vmem:[%s17142_s1 + $0xb10] sm:$0xff] }
  0x82   :  { %6886 = vmatprep.subr.bf16.mxu0 %v6885_v18  ;;  %v6905_v18 = vpack.c.bf16 %v334_v13, %v333_v12  ;;  %v423_v12 = vld [vmem:[%s17142_s1 + $0xba0] sm:$0xff]  ;;  %v424_v13 = vld [vmem:[%s17142_s1 + $0xba8] sm:$0xff] }
  0x83   :  { %6884 = vmatpush3.bf16.msra.mxu1 %v6883_v17  ;;  %v6935_v17 = vpack.c.bf16 %v348_v11, %v347_v9  ;;  %v406_v9 = vld [vmem:[%s17142_s1 + $0xb18] sm:$0xff]  ;;  %v392_v11 = vld [vmem:[%s17142_s1 + $0xaa8] sm:$0xff] }
  0x84   :  { %6918 = vmatprep.subr.bf16.mxu1 %v6917_v22  ;;  %943 = vmatmul.mubr.f32.vlgmr.msra.gmra.mrb[6].mxu0 %v38_v28  ;;  %v6937_v22 = vpack.c.bf16 %v366_v15, %v365_v14  ;;  %v6907_v28 = vpack.c.bf16 %v318_v20, %v317_v19  ;;  %v47_v14 = vld [vmem:[%s17143_s0 + $0xa8] sm:$0xff]  ;;  %v375_v19 = vld [vmem:[%s17142_s1 + $0xa20] sm:$0xff] }
  0x85   :  { %6888 = vmatpush3.bf16.msra.mxu0 %v6887_v29  ;;  %1082 = vmatprep.mubr.f32.mxu0 %v43_v42  ;;  %v6939_v29 = vpack.c.bf16 %v350_v23, %v349_v21  ;;  %v376_v20 = vld [vmem:[%s17142_s1 + $0xa28] sm:$0xff]  ;;  %v407_v21 = vld [vmem:[%s17142_s1 + $0xb20] sm:$0xff] }
  0x86   :  { %1013 = vmatmul.mubr.f32.vlgmr.msra.gmra.mrb[6].mxu1 %v40_v30  ;;  %6890 = vmatprep.subr.bf16.mxu0 %v6889_v32  ;;  %v6909_v30 = vpack.c.bf16 %v336_v25, %v335_v24  ;;  %v320_v32 = vld [vmem:[%s17142_s1 + $0x868] sm:$0xff]  ;;  %v393_v24 = vld [vmem:[%s17142_s1 + $0xab0] sm:$0xff]  ;;  %v394_v25 = vld [vmem:[%s17142_s1 + $0xab8] sm:$0xff] }
  0x87   :  { %6920 = vmatpush3.bf16.msra.mxu1 %v6919_v31  ;;  %1152 = vmatprep.mubr.f32.mxu1 %v45_v44  ;;  %v319_v31 = vld [vmem:[%s17142_s1 + $0x860] sm:$0xff]  ;;  %v322_v44 = vld [vmem:[%s17142_s1 + $0x878] sm:$0xff]  ;;  %v408_v23 = vld [vmem:[%s17142_s1 + $0xb28] sm:$0xff] }
  0x88   :  { %6922 = vmatprep.subr.bf16.mxu1 %v6921_v36  ;;  %v337_v36 = vld [vmem:[%s17142_s1 + $0x8f0] sm:$0xff]  ;;  %v6911_v40 = vpack.c.bf16 %v320_v32, %v319_v31  ;;  %v378_v32 = vld [vmem:[%s17142_s1 + $0xa38] sm:$0xff] }
  0x89   :  { %6892 = vmatpush3.bf16.msra.mxu0 %v6891_v43  ;;  %v6913_v42 = vpack.c.bf16 %v338_v37, %v337_v36  ;;  %v321_v43 = vld [vmem:[%s17142_s1 + $0x870] sm:$0xff]  ;;  %v395_v36 = vld [vmem:[%s17142_s1 + $0xac0] sm:$0xff]  ;;  %v396_v37 = vld [vmem:[%s17142_s1 + $0xac8] sm:$0xff] }
  0x8a   :  { %6894 = vmatprep.subr.bf16.mxu0 %v6893_v46  ;;  %v6945_v46 = vpack.c.bf16 %v370_v39, %v369_v38  ;;  %v6915_v52 = vpack.c.bf16 %v322_v44, %v321_v43  ;;  %v377_v31 = vld [vmem:[%s17142_s1 + $0xa30] sm:$0xff]  ;;  %v427_v38 = vld [vmem:[%s17142_s1 + $0xbc0] sm:$0xff]  ;;  %v428_v39 = vld [vmem:[%s17142_s1 + $0xbc8] sm:$0xff] }
  0x8b   :  { %6924 = vmatpush3.bf16.msra.mxu1 %v6923_v45  ;;  %v353_v45 = vld [vmem:[%s17142_s1 + $0x970] sm:$0xff]  ;;  %v379_v43 = vld [vmem:[%s17142_s1 + $0xa40] sm:$0xff]  ;;  %v380_v44 = vld [vmem:[%s17142_s1 + $0xa48] sm:$0xff] }
  0x8c   :  { %6926 = vmatprep.subr.bf16.mxu1 %v6925_v50  ;;  %v419_v50 = vld [vmem:[%s17142_s1 + $0xb80] sm:$0xff]  ;;  %v6947_v53 = vpack.c.bf16 %v354_v47, %v353_v45  ;;  %v412_v47 = vld [vmem:[%s17142_s1 + $0xb48] sm:$0xff] }
  0x8d   :  { %6896 = vmatpush3.bf16.msra.mxu0 %v6895_v56  ;;  %v372_v56 = vld [vmem:[%s17142_s1 + $0xa08] sm:$0xff]  ;;  %v411_v45 = vld [vmem:[%s17142_s1 + $0xb40] sm:$0xff] }
  0x8e   :  { %6898 = vmatprep.subr.bf16.mxu0 %v6897_v58  ;;  %v6981_v58 = vpack.c.bf16 %v420_v51, %v419_v50  ;;  %v6951_v1 = vpack.c.bf16 %v372_v56, %v371_v55  ;;  %v429_v50 = vld [vmem:[%s17142_s1 + $0xbd0] sm:$0xff]  ;;  %v430_v51 = vld [vmem:[%s17142_s1 + $0xbd8] sm:$0xff] }
  0x8f   :  { %6928 = vmatpush3.bf16.msra.mxu1 %v6927_v57  ;;  %v403_v57 = vld [vmem:[%s17142_s1 + $0xb00] sm:$0xff]  ;;  %v381_v55 = vld [vmem:[%s17142_s1 + $0xa50] sm:$0xff]  ;;  %v382_v56 = vld [vmem:[%s17142_s1 + $0xa58] sm:$0xff] }
  0x90   :  { %6930 = vmatprep.subr.bf16.mxu1 %v6929_v62  ;;  %v421_v62 = vld [vmem:[%s17142_s1 + $0xb90] sm:$0xff]  ;;  %v6983_v3 = vpack.c.bf16 %v404_v59, %v403_v57  ;;  %v414_v59 = vld [vmem:[%s17142_s1 + $0xb58] sm:$0xff] }
  0x91   :  { %6900 = vmatpush3.bf16.msra.mxu0 %v6899_v4  ;;  %v6953_v4 = vpack.c.bf16 %v390_v61, %v389_v60  ;;  %v6985_v8 = vpack.c.bf16 %v422_v63, %v421_v62  ;;  %v413_v57 = vld [vmem:[%s17142_s1 + $0xb50] sm:$0xff]  ;;  %v399_v60 = vld [vmem:[%s17142_s1 + $0xae0] sm:$0xff]  ;;  %v400_v61 = vld [vmem:[%s17142_s1 + $0xae8] sm:$0xff] }
  0x92   :  { %6902 = vmatprep.subr.bf16.mxu0 %v6901_v6  ;;  %v374_v6 = vld [vmem:[%s17142_s1 + $0xa18] sm:$0xff]  ;;  %v431_v62 = vld [vmem:[%s17142_s1 + $0xbe0] sm:$0xff]  ;;  %v432_v63 = vld [vmem:[%s17142_s1 + $0xbe8] sm:$0xff] }
  0x93   :  { %6932 = vmatpush3.bf16.msra.mxu1 %v6931_v5  ;;  %v373_v5 = vld [vmem:[%s17142_s1 + $0xa10] sm:$0xff] }
  0x94   :  { %6934 = vmatprep.subr.bf16.mxu1 %v6933_v10  ;;  %v391_v10 = vld [vmem:[%s17142_s1 + $0xaa0] sm:$0xff]  ;;  %v6955_v15 = vpack.c.bf16 %v374_v6, %v373_v5  ;;  %v7005_v6 = vpack.c.bf16 %v432_v63, %v431_v62  ;;  %v1373_v62 = vld [vmem:[%s17145_s3 + $0x28] sm:$0xff]  ;;  %v1371_v63 = vld [vmem:[%s17145_s3 + $0x18] sm:$0xff] }
  0x95   :  { %6904 = vmatpush3.bf16.msra.mxu0 %v6903_v16  ;;  %v49_v16 = vld [vmem:[%s17143_s0 + $0xb8] sm:$0xff]  ;;  %v415_v5 = vld [vmem:[%s17142_s1 + $0xb60] sm:$0xff] }
  0x96   :  { %6906 = vmatprep.subr.bf16.mxu0 %v6905_v18  ;;  %v6957_v18 = vpack.c.bf16 %v392_v11, %v391_v10  ;;  %v433_v10 = vld [vmem:[%s17142_s1 + $0xbf0] sm:$0xff]  ;;  %v434_v11 = vld [vmem:[%s17142_s1 + $0xbf8] sm:$0xff] }
  0x97   :  { %6936 = vmatpush3.bf16.msra.mxu1 %v6935_v17  ;;  %v6987_v17 = vpack.c.bf16 %v406_v9, %v405_v7  ;;  %v416_v7 = vld [vmem:[%s17142_s1 + $0xb68] sm:$0xff]  ;;  %v402_v9 = vld [vmem:[%s17142_s1 + $0xaf8] sm:$0xff] }
  0x98   :  { %6938 = vmatprep.subr.bf16.mxu1 %v6937_v22  ;;  %v6989_v22 = vpack.c.bf16 %v424_v13, %v423_v12  ;;  %v7007_v13 = vpack.c.bf16 %v416_v7, %v415_v5  ;;  %v1372_v5 = vld [vmem:[%s17145_s3 + $0x20] sm:$0xff] }
  0x99   :  { %6908 = vmatpush3.bf16.msra.mxu0 %v6907_v28  ;;  %v6959_v28 = vpack.c.bf16 %v376_v20, %v375_v19  ;;  %v418_v19 = vld [vmem:[%s17142_s1 + $0xb78] sm:$0xff] }
  0x9a   :  { %6910 = vmatprep.subr.bf16.mxu0 %v6909_v30  ;;  %v6961_v30 = vpack.c.bf16 %v394_v25, %v393_v24  ;;  %v46_v24 = vld [vmem:[%s17143_s0 + $0xa0] sm:$0xff] }
  0x9b   :  { %6940 = vmatpush3.bf16.msra.mxu1 %v6939_v29  ;;  %v6991_v29 = vpack.c.bf16 %v408_v23, %v407_v21  ;;  %v436_v23 = vld [vmem:[%s17142_s1 + $0xc08] sm:$0xff] }
  0x9c   :  { %6942 = vmatprep.subr.bf16.mxu1 %v6941_v34  ;;  %v6993_v34 = vpack.c.bf16 %v426_v27, %v425_v26  ;;  %v9219_v26 = vmov 0.0|0.0   ;;  %v48_v27 = vld [vmem:[%s17143_s0 + $0xb0] sm:$0xff] }
  0x9d   :  { %6912 = vmatpush3.bf16.msra.mxu0 %v6911_v40  ;;  %v6963_v40 = vpack.c.bf16 %v378_v32, %v377_v31  ;;  %v439_v31 = vld [vmem:[%s17142_s1 + $0xc20] sm:$0xff]  ;;  %v440_v32 = vld [vmem:[%s17142_s1 + $0xc28] sm:$0xff] }
  0x9e   :  { %6914 = vmatprep.subr.bf16.mxu0 %v6913_v42  ;;  %v6965_v42 = vpack.c.bf16 %v396_v37, %v395_v36  ;;  %v442_v36 = vld [vmem:[%s17142_s1 + $0xc38] sm:$0xff] }
  0x9f   :  { %6944 = vmatpush3.bf16.msra.mxu1 %v6943_v41  ;;  %v6995_v41 = vpack.c.bf16 %v410_v35, %v409_v33  ;;  %v9221_v33 = vmov 0.0   ;;  %v441_v35 = vld [vmem:[%s17142_s1 + $0xc30] sm:$0xff] }
  0xa0   :  { %6946 = vmatprep.subr.bf16.mxu1 %v6945_v46  ;;  %v6997_v46 = vpack.c.bf16 %v428_v39, %v427_v38  ;;  %v7023_v37 = vpack.c.bf16 %v442_v36, %v441_v35  ;;  %v443_v38 = vld [vmem:[%s17142_s1 + $0xc40] sm:$0xff]  ;;  %v444_v39 = vld [vmem:[%s17142_s1 + $0xc48] sm:$0xff]  ;;  %v1386_v36 = vld [vmem:[%s17145_s3 + $0x90] sm:$0xff] }
  0xa1   :  { %6916 = vmatpush3.bf16.msra.mxu0 %v6915_v52  ;;  %v6967_v52 = vpack.c.bf16 %v380_v44, %v379_v43  ;;  %v447_v44 = vld [vmem:[%s17142_s1 + $0xc60] sm:$0xff] }
  0xa2   :  { %6950 = vmatprep.subr.bf16.mxu0 %v6949_v54  ;;  %v6969_v54 = vpack.c.bf16 %v398_v49, %v397_v48  ;;  %v450_v48 = vld [vmem:[%s17142_s1 + $0xc78] sm:$0xff]  ;;  %v1388_v35 = vld [vmem:[%s17145_s3 + $0xa0] sm:$0xff] }
  0xa3   :  { %6948 = vmatpush3.bf16.msra.mxu1 %v6947_v53  ;;  %v6999_v53 = vpack.c.bf16 %v412_v47, %v411_v45  ;;  %v448_v45 = vld [vmem:[%s17142_s1 + $0xc68] sm:$0xff]  ;;  %v449_v47 = vld [vmem:[%s17142_s1 + $0xc70] sm:$0xff] }
  0xa4   :  { %6982 = vmatprep.subr.bf16.mxu1 %v6981_v58  ;;  %1083 = vmatmul.mubr.f32.vlgmr.msra.gmra.mrb[8].mxu0 %v42_v0  ;;  %v7001_v58 = vpack.c.bf16 %v430_v51, %v429_v50  ;;  %v6971_v0 = vpack.c.bf16 %v382_v56, %v381_v55  ;;  %v7035_v49 = vpack.c.bf16 %v450_v48, %v449_v47  ;;  %v50_v50 = vld [vmem:[%s17143_s0 + $0xc0] sm:$0xff]  ;;  %v1394_v48 = vld [vmem:[%s17145_s3 + $0xd0] sm:$0xff] }
  0xa5   :  { %6952 = vmatpush3.bf16.msra.mxu0 %v6951_v1  ;;  %1222 = vmatprep.mubr.f32.mxu0 %v47_v14  ;;  %v7003_v1 = vpack.c.bf16 %v414_v59, %v413_v57  ;;  %v1396_v47 = vld [vmem:[%s17145_s3 + $0xe0] sm:$0xff] }
  0xa6   :  { %1153 = vmatmul.mubr.f32.vlgmr.msra.gmra.mrb[8].mxu1 %v44_v2  ;;  %6954 = vmatprep.subr.bf16.mxu0 %v6953_v4  ;;  %v6973_v2 = vpack.c.bf16 %v400_v61, %v399_v60  ;;  %v384_v4 = vld [vmem:[%s17142_s1 + $0xa68] sm:$0xff] }
  0xa7   :  { %6984 = vmatpush3.bf16.msra.mxu1 %v6983_v3  ;;  %1292 = vmatprep.mubr.f32.mxu1 %v49_v16  ;;  %v383_v3 = vld [vmem:[%s17142_s1 + $0xa60] sm:$0xff]  ;;  %v386_v16 = vld [vmem:[%s17142_s1 + $0xa78] sm:$0xff]  ;;  %v1369_v61 = vld [vmem:[%s17145_s3 + $0x8] sm:$0xff] }
  0xa8   :  { %6986 = vmatprep.subr.bf16.mxu1 %v6985_v8  ;;  %v401_v8 = vld [vmem:[%s17142_s1 + $0xaf0] sm:$0xff]  ;;  %v6975_v12 = vpack.c.bf16 %v384_v4, %v383_v3  ;;  %v1375_v3 = vld [vmem:[%s17145_s3 + $0x38] sm:$0xff]  ;;  %v1368_v4 = vld [vmem:[%s17145_s3] sm:$0xff] }
  0xa9   :  { %6956 = vmatpush3.bf16.msra.mxu0 %v6955_v15  ;;  %v6977_v14 = vpack.c.bf16 %v402_v9, %v401_v8  ;;  %v385_v15 = vld [vmem:[%s17142_s1 + $0xa70] sm:$0xff]  ;;  %v7069_v8 = vpack.c.bf16 %v1375_v3, %v1371_v63  ;;  %v7039_v9 = vpack.c.bf16 %v1372_v5, %v1368_v4  ;;  %v1413_v63 = vld [vmem:[%s17145_s3 + $0x168] sm:$0xff]  ;;  %v1408_v5 = vld [vmem:[%s17145_s3 + $0x140] sm:$0xff] }
  0xaa   :  { %6958 = vmatprep.subr.bf16.mxu0 %v6957_v18  ;;  %v417_v18 = vld [vmem:[%s17142_s1 + $0xb70] sm:$0xff]  ;;  %v6979_v20 = vpack.c.bf16 %v386_v16, %v385_v15  ;;  %v1377_v15 = vld [vmem:[%s17145_s3 + $0x48] sm:$0xff] }
  0xab   :  { %6988 = vmatpush3.bf16.msra.mxu1 %v6987_v17  ;;  %v7009_v17 = vpack.c.bf16 %v434_v11, %v433_v10  ;;  %v7011_v21 = vpack.c.bf16 %v418_v19, %v417_v18  ;;  %v1370_v10 = vld [vmem:[%s17145_s3 + $0x10] sm:$0xff]  ;;  %v1381_v16 = vld [vmem:[%s17145_s3 + $0x68] sm:$0xff]  ;;  %v1383_v19 = vld [vmem:[%s17145_s3 + $0x78] sm:$0xff] }
  0xac   :  { %6990 = vmatprep.subr.bf16.mxu1 %v6989_v22  ;;  %v435_v22 = vld [vmem:[%s17142_s1 + $0xc00] sm:$0xff]  ;;  %v1374_v11 = vld [vmem:[%s17145_s3 + $0x30] sm:$0xff]  ;;  %v7041_v18 = vpack.c.bf16 %v1381_v16, %v1377_v15 }
  0xad   :  { %6960 = vmatpush3.bf16.msra.mxu0 %v6959_v28  ;;  %v7014_v25 = vpack.c.bf16 %v436_v23, %v435_v22  ;;  %v437_v28 = vld [vmem:[%s17142_s1 + $0xc10] sm:$0xff] }
  0xae   :  { %6962 = vmatprep.subr.bf16.mxu0 %v6961_v30 }
  0xaf   :  { %6992 = vmatpush3.bf16.msra.mxu1 %v6991_v29  ;;  %v438_v29 = vld [vmem:[%s17142_s1 + $0xc18] sm:$0xff] }
  0xb0   :  { %6994 = vmatprep.subr.bf16.mxu1 %v6993_v34  ;;  %v7017_v30 = vpack.c.bf16 %v438_v29, %v437_v28  ;;  %v7020_v34 = vpack.c.bf16 %v440_v32, %v439_v31  ;;  %v1389_v29 = vld [vmem:[%s17145_s3 + $0xa8] sm:$0xff]  ;;  %v1391_v31 = vld [vmem:[%s17145_s3 + $0xb8] sm:$0xff] }
  0xb1   :  { %6964 = vmatpush3.bf16.msra.mxu0 %v6963_v40  ;;  %v7026_v40 = vpack.c.bf16 %v444_v39, %v443_v38  ;;  %v1390_v38 = vld [vmem:[%s17145_s3 + $0xb0] sm:$0xff]  ;;  %v1393_v39 = vld [vmem:[%s17145_s3 + $0xc8] sm:$0xff] }
  0xb2   :  { %6966 = vmatprep.subr.bf16.mxu0 %v6965_v42  ;;  %v446_v42 = vld [vmem:[%s17142_s1 + $0xc58] sm:$0xff] }
  0xb3   :  { %6996 = vmatpush3.bf16.msra.mxu1 %v6995_v41  ;;  %v445_v41 = vld [vmem:[%s17142_s1 + $0xc50] sm:$0xff] }
  0xb4   :  { %6998 = vmatprep.subr.bf16.mxu1 %v6997_v46  ;;  %v7029_v43 = vpack.c.bf16 %v446_v42, %v445_v41  ;;  %v7032_v46 = vpack.c.bf16 %v448_v45, %v447_v44  ;;  %v7079_v41 = vpack.c.bf16 %v1390_v38, %v1386_v36  ;;  %v1399_v44 = vld [vmem:[%s17145_s3 + $0xf8] sm:$0xff]  ;;  %v1392_v45 = vld [vmem:[%s17145_s3 + $0xc0] sm:$0xff] }
  0xb5   :  { %6968 = vmatpush3.bf16.msra.mxu0 %v6967_v52  ;;  %v6156_v52 = vld [vmem:[%s17144_s2] ss:$0 sm:$0xff] }
  0xb6   :  { %6970 = vmatprep.subr.bf16.mxu0 %v6969_v54 }
  0xb7   :  { %7000 = vmatpush3.bf16.msra.mxu1 %v6999_v53 }
  0xb8   :  { %7002 = vmatprep.subr.bf16.mxu1 %v7001_v58 }
  0xb9   :  { %6972 = vmatpush3.bf16.msra.mxu0 %v6971_v0 }
  0xba   :  { %6974 = vmatprep.subr.bf16.mxu0 %v6973_v2  ;;  %v7037_v2 = vpack.c.bf16 %v1373_v62, %v1369_v61  ;;  %v1406_v61 = vld [vmem:[%s17145_s3 + $0x130] sm:$0xff]  ;;  %v1409_v62 = vld [vmem:[%s17145_s3 + $0x148] sm:$0xff] }
  0xbb   :  { %7004 = vmatpush3.bf16.msra.mxu1 %v7003_v1  ;;  %v7057_v4 = vpack.c.bf16 %v1413_v63, %v1409_v62 }
  0xbc   :  { %7006 = vmatprep.subr.bf16.mxu1 %v7005_v6 }
  0xbd   :  { %6976 = vmatpush3.bf16.msra.mxu0 %v6975_v12 }
  0xbe   :  { %6978 = vmatprep.subr.bf16.mxu0 %v6977_v14 }
  0xbf   :  { %7008 = vmatpush3.bf16.msra.mxu1 %v7007_v13  ;;  %v7071_v13 = vpack.c.bf16 %v1374_v11, %v1370_v10  ;;  %v1417_v10 = vld [vmem:[%s17145_s3 + $0x188] sm:$0xff] }
  0xc0   :  { %7010 = vmatprep.subr.bf16.mxu1 %v7009_v17  ;;  %v1379_v17 = vld [vmem:[%s17145_s3 + $0x58] sm:$0xff]  ;;  %v1421_v11 = vld [vmem:[%s17145_s3 + $0x1a8] sm:$0xff] }
  0xc1   :  { %6980 = vmatpush3.bf16.msra.mxu0 %v6979_v20  ;;  %v1376_v20 = vld [vmem:[%s17145_s3 + $0x40] sm:$0xff]  ;;  %v7073_v23 = vpack.c.bf16 %v1383_v19, %v1379_v17  ;;  %v7061_v16 = vpack.c.bf16 %v1421_v11, %v1417_v10  ;;  %v1418_v19 = vld [vmem:[%s17145_s3 + $0x190] sm:$0xff] }
  0xc2   :  { %7013 = vmatprep.subr.bf16.mxu0 %v9219_v26  ;;  %v1416_v17 = vld [vmem:[%s17145_s3 + $0x180] sm:$0xff] }
  0xc3   :  { %7012 = vmatpush3.bf16.msra.mxu1 %v7011_v21  ;;  %v1380_v21 = vld [vmem:[%s17145_s3 + $0x60] sm:$0xff] }
  0xc4   :  { %1223 = vmatmul.mubr.f32.vlgmr.msra.gmra.mrb[10].mxu0 %v46_v24  ;;  %7038 = vmatprep.subr.bf16.mxu1 %v7037_v2  ;;  %v7043_v24 = vpack.c.bf16 %v1380_v21, %v1376_v20  ;;  %v1422_v21 = vld [vmem:[%s17145_s3 + $0x1b0] sm:$0xff]  ;;  %v1600_v10 = vld [vmem:[%s17146_s5] sm:$0xff] }
  0xc5   :  { %7015 = vmatpush3.bf16.msra.mxu0 %v7014_v25  ;;  %6626 = vmatprep.mubr.msk.f32.mxu0 %vm9220_vm0, %v9221_v33  ;;  %v1378_v25 = vld [vmem:[%s17145_s3 + $0x50] sm:$0xff]  ;;  %v1632_v11 = vld [vmem:[%s17146_s5 + $0x100] sm:$0xff] }
  0xc6   :  { %1293 = vmatmul.mubr.f32.vlgmr.msra.gmra.mrb[10].mxu1 %v48_v27  ;;  %7016 = vmatprep.subr.bf16.mxu0 %v9219_v26  ;;  %v1385_v27 = vld [vmem:[%s17145_s3 + $0x88] sm:$0xff] }
  0xc7   :  { %1518 = vmatprep.mubr.f32.mxu1 %v9221_v33  ;;  %7040 = vmatpush1.bf16.msra.mxu1 %v7039_v9  ;;  %v7045_v32 = vpack.c.bf16 %v1389_v29, %v1385_v27  ;;  %v1414_v9 = vld [vmem:[%s17145_s3 + $0x170] sm:$0xff] }
  0xc8   :  { %7042 = vmatprep.subr.bf16.mxu1 %v7041_v18  ;;  %v1420_v18 = vld [vmem:[%s17145_s3 + $0x1a0] sm:$0xff] }
  0xc9   :  { %7018 = vmatpush3.bf16.msra.mxu0 %v7017_v30  ;;  %v1387_v30 = vld [vmem:[%s17145_s3 + $0x98] sm:$0xff]  ;;  %v7063_v27 = vpack.c.bf16 %v1420_v18, %v1416_v17 }
  0xca   :  { %7019 = vmatprep.subr.bf16.mxu0 %v9219_v26  ;;  %v1699_v17 = vld [vmem:[%s17146_s5 + $0x318] sm:$0xff] }
  0xcb   :  { %7044 = vmatpush1.bf16.msra.mxu1 %v7043_v24  ;;  %v1429_v24 = vld [vmem:[%s17145_s3 + $0x1e8] sm:$0xff] }
  0xcc   :  { %7046 = vmatprep.subr.bf16.mxu1 %v7045_v32  ;;  %v1428_v32 = vld [vmem:[%s17145_s3 + $0x1e0] sm:$0xff] }
  0xcd   :  { %7021 = vmatpush3.bf16.msra.mxu0 %v7020_v34  ;;  %v1384_v34 = vld [vmem:[%s17145_s3 + $0x80] sm:$0xff] }
  0xce   :  { %7022 = vmatprep.subr.bf16.mxu0 %v9219_v26 }
  0xd1   :  { %7024 = vmatpush3.bf16.msra.mxu0 %v7023_v37  ;;  %v7047_v37 = vpack.c.bf16 %v1388_v35, %v1384_v34  ;;  %v1430_v35 = vld [vmem:[%s17145_s3 + $0x1f0] sm:$0xff] }
  0xd2   :  { %7025 = vmatprep.subr.bf16.mxu0 %v9219_v26 }
  0xd3   :  { %7048 = vmatpush1.bf16.msra.mxu1 %v7047_v37 }
  0xd5   :  { %7027 = vmatpush3.bf16.msra.mxu0 %v7026_v40  ;;  %v1397_v40 = vld [vmem:[%s17145_s3 + $0xe8] sm:$0xff] }
  0xd6   :  { %7028 = vmatprep.subr.bf16.mxu0 %v9219_v26  ;;  %v7049_v42 = vpack.c.bf16 %v1397_v40, %v1393_v39 }
  0xd8   :  { %7050 = vmatprep.subr.bf16.mxu1 %v7049_v42 }
  0xd9   :  { %7030 = vmatpush3.bf16.msra.mxu0 %v7029_v43  ;;  %v1395_v43 = vld [vmem:[%s17145_s3 + $0xd8] sm:$0xff] }
  0xda   :  { %7031 = vmatprep.subr.bf16.mxu0 %v9219_v26 }
  0xdd   :  { %7033 = vmatpush3.bf16.msra.mxu0 %v7032_v46  ;;  %v7081_v46 = vpack.c.bf16 %v1399_v44, %v1395_v43  ;;  %v1601_v44 = vld [vmem:[%s17146_s5 + $0x8] sm:$0xff] }
  0xde   :  { %7034 = vmatprep.subr.bf16.mxu0 %v9219_v26  ;;  %v1382_v26 = vld [vmem:[%s17145_s3 + $0x70] sm:$0xff] }
  0xdf   :  { %v7075_v28 = vpack.c.bf16 %v1382_v26, %v1378_v25  ;;  %v1427_v25 = vld [vmem:[%s17145_s3 + $0x1d8] sm:$0xff] }
  0xe0   :  { %v1431_v26 = vld [vmem:[%s17145_s3 + $0x1f8] sm:$0xff] }
  0xe1   :  { %7036 = vmatpush3.bf16.msra.mxu0 %v7035_v49  ;;  %v1398_v49 = vld [vmem:[%s17145_s3 + $0xf0] sm:$0xff] }
  0xe2   :  { %7070 = vmatprep.subr.bf16.mxu0 %v7069_v8 }
  0xe4   :  { %6627 = vmatmul.mubr.f32.vlgmr.msra.gmra.mrb[12].mxu0 %v50_v50  ;;  %v7051_v50 = vpack.c.bf16 %v1396_v47, %v1392_v45  ;;  %v1633_v45 = vld [vmem:[%s17146_s5 + $0x108] sm:$0xff] }
  0xe5   :  { %1589 = vmatprep.mubr.f32.mxu0 %v9221_v33  ;;  %7072 = vmatpush1.bf16.msra.mxu0 %v7071_v13  ;;  %v7077_v33 = vpack.c.bf16 %v1391_v31, %v1387_v30  ;;  %v1423_v13 = vld [vmem:[%s17145_s3 + $0x1b8] sm:$0xff]  ;;  %v7097_v30 = vpack.c.bf16 %v1431_v26, %v1427_v25  ;;  %v1424_v31 = vld [vmem:[%s17145_s3 + $0x1c0] sm:$0xff]  ;;  %v7101_v47 = vpack.c.bf16 %v1633_v45, %v1601_v44 }
  0xe6   :  { %7074 = vmatprep.subr.bf16.mxu0 %v7073_v23  ;;  %7052 = vmatpush1.bf16.msra.mxu1 %v7051_v50  ;;  %v1425_v23 = vld [vmem:[%s17145_s3 + $0x1c8] sm:$0xff]  ;;  %v7067_v34 = vpack.c.bf16 %v1428_v32, %v1424_v31  ;;  %v1731_v32 = vld [vmem:[%s17146_s5 + $0x418] sm:$0xff] }
  0xe7   :  { %v7065_v29 = vpack.c.bf16 %v1429_v24, %v1425_v23  ;;  %v1696_v23 = vld [vmem:[%s17146_s5 + $0x300] sm:$0xff]  ;;  %v1761_v31 = vld [vmem:[%s17146_s5 + $0x508] sm:$0xff]  ;;  %v1795_v44 = vld [vmem:[%s17146_s5 + $0x618] sm:$0xff] }
  0xe8   :  { %v1827_v45 = vld [vmem:[%s17146_s5 + $0x718] sm:$0xff] }
  0xe9   :  { %7076 = vmatpush1.bf16.msra.mxu0 %v7075_v28  ;;  %v7095_v28 = vpack.c.bf16 %v1422_v21, %v1418_v19  ;;  %v7103_v19 = vpack.c.bf16 %v1632_v11, %v1600_v10  ;;  %v1664_v21 = vld [vmem:[%s17146_s5 + $0x200] sm:$0xff]  ;;  %v1922_v11 = vld [vmem:[%s17146_s5 + $0xa10] sm:$0xff] }
  0xea   :  { %7078 = vmatprep.subr.bf16.mxu0 %v7077_v33  ;;  %v1426_v33 = vld [vmem:[%s17145_s3 + $0x1d0] sm:$0xff] }
  0xeb   :  { %v7099_v36 = vpack.c.bf16 %v1430_v35, %v1426_v33  ;;  %v1763_v33 = vld [vmem:[%s17146_s5 + $0x518] sm:$0xff] }
  0xed   :  { %7080 = vmatpush1.bf16.msra.mxu0 %v7079_v41 }
  0xee   :  { %7082 = vmatprep.subr.bf16.mxu0 %v7081_v46  ;;  %v1603_v46 = vld [vmem:[%s17146_s5 + $0x18] sm:$0xff] }
  0xf7   :  { %v6189_v51 = vpop.f32.mrb[0].mxu0 }
  0xf8   :  { %v6190_v53 = vpop.f32.mrb[1].mxu0 }
  0xf9   :  { %v6224_v54 = vpop.f32.mrb[0].mxu1  ;;  %v6191_v55 = vadd.f32 %v6190_v53, %v6189_v51  ;;  %v1401_v51 = vld [vmem:[%s17145_s3 + $0x108] sm:$0xff]  ;;  %v1403_v53 = vld [vmem:[%s17145_s3 + $0x118] sm:$0xff] }
  0xfa   :  { %v6225_v56 = vpop.f32.mrb[1].mxu1 }
  0xfb   :  { %v6226_v57 = vadd.f32 %v6225_v56, %v6224_v54  ;;  %v525_v58 = vadd.f32 %v6191_v55, %v6156_v52  ;;  %v1405_v52 = vld [vmem:[%s17145_s3 + $0x128] sm:$0xff]  ;;  %v7083_v54 = vpack.c.bf16 %v1398_v49, %v1394_v48  ;;  %v1407_v56 = vld [vmem:[%s17145_s3 + $0x138] sm:$0xff] }
  0xfc   :  { %v7053_v55 = vpack.c.bf16 %v1405_v52, %v1401_v51  ;;  %v1635_v48 = vld [vmem:[%s17146_s5 + $0x118] sm:$0xff] }
  0xfd   :  { %v595_v59 = vadd.f32 %v6226_v57, %v525_v58  ;;  %v1400_v57 = vld [vmem:[%s17145_s3 + $0x100] sm:$0xff]  ;;  %7084 = vmatpush1.bf16.msra.mxu0 %v7083_v54  ;;  %v7229_v50 = vpack.c.bf16 %v1635_v48, %v1603_v46 }
  0xfe   :  { %v1404_v58 = vld [vmem:[%s17145_s3 + $0x120] sm:$0xff]  ;;  %7054 = vmatprep.subr.bf16.mxu1 %v7053_v55 }
  0xff   :  { %v7055_v2 = vpack.c.bf16 %v1404_v58, %v1400_v57  ;;  %v1792_v48 = vld [vmem:[%s17146_s5 + $0x600] sm:$0xff] }
 0x101   :  { %7056 = vmatpush1.bf16.msra.mxu1 %v7055_v2 }
 0x102   :  { %7058 = vmatprep.subr.bf16.mxu1 %v7057_v4 }
 0x117   :  { %v6259_v60 = vpop.f32.mrb[2].mxu0 }
 0x118   :  { %v6260_v0 = vpop.f32.mrb[3].mxu0 }
 0x119   :  { %v6294_v1 = vpop.f32.mrb[2].mxu1  ;;  %v6261_v6 = vadd.f32 %v6260_v0, %v6259_v60  ;;  %v1402_v60 = vld [vmem:[%s17145_s3 + $0x110] sm:$0xff]  ;;  %v1411_v0 = vld [vmem:[%s17145_s3 + $0x158] sm:$0xff] }
 0x11a   :  { %v6295_v7 = vpop.f32.mrb[3].mxu1  ;;  %v7087_v3 = vpack.c.bf16 %v1406_v61, %v1402_v60 }
 0x11b   :  { %v6296_v12 = vadd.f32 %v6295_v7, %v6294_v1  ;;  %v665_v14 = vadd.f32 %v6261_v6, %v595_v59  ;;  %v7085_v59 = vpack.c.bf16 %v1407_v56, %v1403_v53  ;;  %v1415_v1 = vld [vmem:[%s17145_s3 + $0x178] sm:$0xff]  ;;  %v1412_v6 = vld [vmem:[%s17145_s3 + $0x160] sm:$0xff]  ;;  %v1410_v7 = vld [vmem:[%s17145_s3 + $0x150] sm:$0xff] }
 0x11c   :  { %v7089_v8 = vpack.c.bf16 %v1415_v1, %v1411_v0  ;;  %v7091_v15 = vpack.c.bf16 %v1414_v9, %v1410_v7 }
 0x11d   :  { %v10582_v22 = vadd.f32 %v6296_v12, %v665_v14  ;;  %7086 = vmatprep.subr.bf16.mxu0 %v7085_v59  ;;  %v1419_v12 = vld [vmem:[%s17145_s3 + $0x198] sm:$0xff]  ;;  %v7059_v14 = vpack.c.bf16 %v1412_v6, %v1408_v5 }
 0x11e   :  { %7088 = vmatpush1.bf16.msra.mxu0 %v7087_v3  ;;  %v7093_v20 = vpack.c.bf16 %v1423_v13, %v1419_v12  ;;  %v1602_v12 = vld [vmem:[%s17146_s5 + $0x10] sm:$0xff] }
 0x11f   :  { %7090 = vmatprep.subr.bf16.mxu0 %v7089_v8  ;;  %7060 = vmatpush1.bf16.msra.mxu1 %v7059_v14  ;;  %v1634_v13 = vld [vmem:[%s17146_s5 + $0x110] sm:$0xff]  ;;  %v1665_v14 = vld [vmem:[%s17146_s5 + $0x208] sm:$0xff] }
 0x120   :  { %7062 = vmatprep.subr.bf16.mxu1 %v7061_v16  ;;  %v1667_v16 = vld [vmem:[%s17146_s5 + $0x218] sm:$0xff] }
 0x122   :  { %7092 = vmatpush1.bf16.msra.mxu0 %v7091_v15  ;;  %v1697_v15 = vld [vmem:[%s17146_s5 + $0x308] sm:$0xff] }
 0x123   :  { %7094 = vmatprep.subr.bf16.mxu0 %v7093_v20  ;;  %7064 = vmatpush1.bf16.msra.mxu1 %v7063_v27  ;;  %v7231_v20 = vpack.c.bf16 %v1634_v13, %v1602_v12  ;;  %v7105_v26 = vpack.c.bf16 %v1697_v15, %v1665_v14  ;;  %v7233_v27 = vpack.c.bf16 %v1699_v17, %v1667_v16  ;;  %v1954_v12 = vld [vmem:[%s17146_s5 + $0xb10] sm:$0xff]  ;;  %v1985_v13 = vld [vmem:[%s17146_s5 + $0xc08] sm:$0xff]  ;;  %v1987_v15 = vld [vmem:[%s17146_s5 + $0xc18] sm:$0xff] }
 0x124   :  { %7066 = vmatprep.subr.bf16.mxu1 %v7065_v29  ;;  %v1698_v29 = vld [vmem:[%s17146_s5 + $0x310] sm:$0xff]  ;;  %v2017_v14 = vld [vmem:[%s17146_s5 + $0xd08] sm:$0xff]  ;;  %v2019_v16 = vld [vmem:[%s17146_s5 + $0xd18] sm:$0xff] }
 0x126   :  { %7096 = vmatpush1.bf16.msra.mxu0 %v7095_v28  ;;  %v1666_v28 = vld [vmem:[%s17146_s5 + $0x210] sm:$0xff] }
 0x127   :  { %7098 = vmatprep.subr.bf16.mxu0 %v7097_v30  ;;  %7068 = vmatpush1.bf16.msra.mxu1 %v7067_v34  ;;  %v1729_v30 = vld [vmem:[%s17146_s5 + $0x408] sm:$0xff]  ;;  %v7107_v34 = vpack.c.bf16 %v1696_v23, %v1664_v21  ;;  %v7235_v35 = vpack.c.bf16 %v1698_v29, %v1666_v28  ;;  %v7125_v21 = vpack.c.bf16 %v2017_v14, %v1985_v13  ;;  %v2051_v28 = vld [vmem:[%s17146_s5 + $0xe18] sm:$0xff] }
 0x128   :  { %7102 = vmatprep.subr.bf16.mxu1 %v7101_v47  ;;  %v7253_v23 = vpack.c.bf16 %v2019_v16, %v1987_v15  ;;  %v2083_v29 = vld [vmem:[%s17146_s5 + $0xf18] sm:$0xff]  ;;  %v2304_v15 = vld [vmem:[%s17146_s5 + $0x1600] sm:$0xff] }
 0x129   :  { %v2336_v16 = vld [vmem:[%s17146_s5 + $0x1700] sm:$0xff] }
 0x12a   :  { %7100 = vmatpush1.bf16.msra.mxu0 %v7099_v36  ;;  %v1728_v36 = vld [vmem:[%s17146_s5 + $0x400] sm:$0xff] }
 0x12b   :  { %7230 = vmatprep.subr.bf16.mxu0 %v7229_v50 }
 0x137   :  { %v6329_v37 = vpop.f32.mrb[4].mxu0 }
 0x138   :  { %v6330_v38 = vpop.f32.mrb[5].mxu0 }
 0x139   :  { %v6364_v39 = vpop.f32.mrb[4].mxu1  ;;  %v6331_v40 = vadd.f32 %v6330_v38, %v6329_v37  ;;  %v1760_v37 = vld [vmem:[%s17146_s5 + $0x500] sm:$0xff]  ;;  %v7109_v38 = vpack.c.bf16 %v1761_v31, %v1729_v30 }
 0x13a   :  { %v6365_v41 = vpop.f32.mrb[5].mxu1  ;;  %v7111_v46 = vpack.c.bf16 %v1760_v37, %v1728_v36  ;;  %v2050_v36 = vld [vmem:[%s17146_s5 + $0xe10] sm:$0xff] }
 0x13b   :  { %v6366_v42 = vadd.f32 %v6365_v41, %v6364_v39  ;;  %v805_v43 = vadd.f32 %v6331_v40, %v10582_v22  ;;  %v7237_v39 = vpack.c.bf16 %v1763_v33, %v1731_v32  ;;  %v1730_v40 = vld [vmem:[%s17146_s5 + $0x410] sm:$0xff]  ;;  %v2048_v32 = vld [vmem:[%s17146_s5 + $0xe00] sm:$0xff] }
 0x13c   :  { %v1762_v41 = vld [vmem:[%s17146_s5 + $0x510] sm:$0xff]  ;;  %v2080_v33 = vld [vmem:[%s17146_s5 + $0xf00] sm:$0xff] }
 0x13d   :  { %v875_v49 = vadd.f32 %v6366_v42, %v805_v43  ;;  %v1793_v42 = vld [vmem:[%s17146_s5 + $0x608] sm:$0xff]  ;;  %v7239_v47 = vpack.c.bf16 %v1762_v41, %v1730_v40  ;;  %v2082_v37 = vld [vmem:[%s17146_s5 + $0xf10] sm:$0xff]  ;;  %v2115_v40 = vld [vmem:[%s17146_s5 + $0x1018] sm:$0xff] }
 0x13e   :  { %v1825_v43 = vld [vmem:[%s17146_s5 + $0x708] sm:$0xff]  ;;  %v2147_v41 = vld [vmem:[%s17146_s5 + $0x1118] sm:$0xff] }
 0x13f   :  { %v7113_v50 = vpack.c.bf16 %v1825_v43, %v1793_v42  ;;  %v7131_v42 = vpack.c.bf16 %v2080_v33, %v2048_v32  ;;  %v7259_v43 = vpack.c.bf16 %v2082_v37, %v2050_v36  ;;  %v2370_v32 = vld [vmem:[%s17146_s5 + $0x1810] sm:$0xff]  ;;  %v2435_v36 = vld [vmem:[%s17146_s5 + $0x1a18] sm:$0xff] }
 0x140   :  { %v2402_v33 = vld [vmem:[%s17146_s5 + $0x1910] sm:$0xff]  ;;  %v2467_v37 = vld [vmem:[%s17146_s5 + $0x1b18] sm:$0xff] }
 0x157   :  { %v6399_v22 = vpop.f32.mrb[6].mxu0 }
 0x158   :  { %v6400_v51 = vpop.f32.mrb[7].mxu0 }
 0x159   :  { %v6434_v52 = vpop.f32.mrb[6].mxu1  ;;  %v6401_v53 = vadd.f32 %v6400_v51, %v6399_v22  ;;  %v7241_v22 = vpack.c.bf16 %v1827_v45, %v1795_v44  ;;  %v1794_v51 = vld [vmem:[%s17146_s5 + $0x610] sm:$0xff]  ;;  %v2112_v44 = vld [vmem:[%s17146_s5 + $0x1000] sm:$0xff] }
 0x15a   :  { %v6435_v54 = vpop.f32.mrb[7].mxu1  ;;  %v2144_v45 = vld [vmem:[%s17146_s5 + $0x1100] sm:$0xff] }
 0x15b   :  { %v6436_v55 = vadd.f32 %v6435_v54, %v6434_v52  ;;  %v945_v56 = vadd.f32 %v6401_v53, %v875_v49  ;;  %v1824_v49 = vld [vmem:[%s17146_s5 + $0x700] sm:$0xff]  ;;  %v1826_v52 = vld [vmem:[%s17146_s5 + $0x710] sm:$0xff]  ;;  %v1857_v53 = vld [vmem:[%s17146_s5 + $0x808] sm:$0xff] }
 0x15c   :  { %v1889_v54 = vld [vmem:[%s17146_s5 + $0x908] sm:$0xff] }
 0x15d   :  { %v1015_v57 = vadd.f32 %v6436_v55, %v945_v56  ;;  %v1859_v55 = vld [vmem:[%s17146_s5 + $0x818] sm:$0xff] }
 0x15e   :  { %v1891_v56 = vld [vmem:[%s17146_s5 + $0x918] sm:$0xff] }
 0x177   :  { %v6469_v58 = vpop.f32.mrb[8].mxu0 }
 0x178   :  { %v6470_v59 = vpop.f32.mrb[9].mxu0 }
 0x179   :  { %v6504_v60 = vpop.f32.mrb[8].mxu1  ;;  %v6471_v61 = vadd.f32 %v6470_v59, %v6469_v58  ;;  %v7243_v58 = vpack.c.bf16 %v1826_v52, %v1794_v51  ;;  %v1856_v59 = vld [vmem:[%s17146_s5 + $0x800] sm:$0xff]  ;;  %v2179_v51 = vld [vmem:[%s17146_s5 + $0x1218] sm:$0xff] }
 0x17a   :  { %v6505_v62 = vpop.f32.mrb[9].mxu1  ;;  %v2211_v52 = vld [vmem:[%s17146_s5 + $0x1318] sm:$0xff] }
 0x17b   :  { %v6506_v63 = vadd.f32 %v6505_v62, %v6504_v60  ;;  %v1085_v0 = vadd.f32 %v6471_v61, %v1015_v57  ;;  %v7115_v57 = vpack.c.bf16 %v1824_v49, %v1792_v48  ;;  %v1888_v60 = vld [vmem:[%s17146_s5 + $0x900] sm:$0xff]  ;;  %v7117_v61 = vpack.c.bf16 %v1889_v54, %v1857_v53  ;;  %v2114_v48 = vld [vmem:[%s17146_s5 + $0x1010] sm:$0xff] }
 0x17c   :  { %v7245_v62 = vpack.c.bf16 %v1891_v56, %v1859_v55  ;;  %v2146_v49 = vld [vmem:[%s17146_s5 + $0x1110] sm:$0xff]  ;;  %v7135_v53 = vpack.c.bf16 %v2144_v45, %v2112_v44  ;;  %v2176_v55 = vld [vmem:[%s17146_s5 + $0x1200] sm:$0xff] }
 0x17d   :  { %v1155_v1 = vadd.f32 %v6506_v63, %v1085_v0  ;;  %v1858_v63 = vld [vmem:[%s17146_s5 + $0x810] sm:$0xff]  ;;  %v7263_v54 = vpack.c.bf16 %v2146_v49, %v2114_v48  ;;  %v2208_v56 = vld [vmem:[%s17146_s5 + $0x1300] sm:$0xff]  ;;  %v2499_v48 = vld [vmem:[%s17146_s5 + $0x1c18] sm:$0xff] }
 0x17e   :  { %v1890_v0 = vld [vmem:[%s17146_s5 + $0x910] sm:$0xff]  ;;  %v2531_v49 = vld [vmem:[%s17146_s5 + $0x1d18] sm:$0xff] }
 0x17f   :  { %v2434_v44 = vld [vmem:[%s17146_s5 + $0x1a10] sm:$0xff] }
 0x180   :  { %v2466_v45 = vld [vmem:[%s17146_s5 + $0x1b10] sm:$0xff] }
 0x197   :  { %v6539_v2 = vpop.f32.mrb[10].mxu0 }
 0x198   :  { %v6540_v3 = vpop.f32.mrb[11].mxu0 }
 0x199   :  { %v6574_v4 = vpop.f32.mrb[10].mxu1  ;;  %v6541_v5 = vadd.f32 %v6540_v3, %v6539_v2  ;;  %v1953_v2 = vld [vmem:[%s17146_s5 + $0xb08] sm:$0xff]  ;;  %v1923_v3 = vld [vmem:[%s17146_s5 + $0xa18] sm:$0xff] }
 0x19a   :  { %v6575_v6 = vpop.f32.mrb[11].mxu1 }
 0x19b   :  { %v6576_v7 = vadd.f32 %v6575_v6, %v6574_v4  ;;  %v1225_v8 = vadd.f32 %v6541_v5, %v1155_v1  ;;  %v1921_v1 = vld [vmem:[%s17146_s5 + $0xa08] sm:$0xff]  ;;  %v1955_v4 = vld [vmem:[%s17146_s5 + $0xb18] sm:$0xff]  ;;  %v7119_v5 = vpack.c.bf16 %v1888_v60, %v1856_v59  ;;  %v7247_v6 = vpack.c.bf16 %v1890_v0, %v1858_v63  ;;  %v2178_v59 = vld [vmem:[%s17146_s5 + $0x1210] sm:$0xff] }
 0x19c   :  { %v7249_v10 = vpack.c.bf16 %v1955_v4, %v1923_v3  ;;  %v2210_v60 = vld [vmem:[%s17146_s5 + $0x1310] sm:$0xff]  ;;  %v2243_v63 = vld [vmem:[%s17146_s5 + $0x1418] sm:$0xff]  ;;  %v2240_v3 = vld [vmem:[%s17146_s5 + $0x1400] sm:$0xff] }
 0x19d   :  { %v1295_v9 = vadd.f32 %v6576_v7, %v1225_v8  ;;  %v1920_v7 = vld [vmem:[%s17146_s5 + $0xa00] sm:$0xff]  ;;  %v2275_v0 = vld [vmem:[%s17146_s5 + $0x1518] sm:$0xff] }
 0x19e   :  { %v1952_v8 = vld [vmem:[%s17146_s5 + $0xb00] sm:$0xff] }
 0x19f   :  { %v7123_v17 = vpack.c.bf16 %v1952_v8, %v1920_v7  ;;  %v2272_v4 = vld [vmem:[%s17146_s5 + $0x1500] sm:$0xff]  ;;  %v2242_v7 = vld [vmem:[%s17146_s5 + $0x1410] sm:$0xff] }
 0x1a0   :  { %v2274_v8 = vld [vmem:[%s17146_s5 + $0x1510] sm:$0xff]  ;;  %v7143_v13 = vpack.c.bf16 %v2272_v4, %v2240_v3 }
 0x1a1   :  { %v7271_v14 = vpack.c.bf16 %v2274_v8, %v2242_v7  ;;  %v2562_v4 = vld [vmem:[%s17146_s5 + $0x1e10] sm:$0xff]  ;;  %v2625_v7 = vld [vmem:[%s17146_s5 + $0x2008] sm:$0xff] }
 0x1a2   :  { %v2657_v8 = vld [vmem:[%s17146_s5 + $0x2108] sm:$0xff] }
 0x1b7   :  { %v1364_v18 = vpop.f32.mrb[12].mxu0 }
 0x1b8   :  { %v1365_v24 = vadd.f32 %v1364_v18, %v1295_v9  ;;  %v6628_v25 = vpop.f32.mrb[13].mxu0  ;;  %v7121_v9 = vpack.c.bf16 %v1953_v2, %v1921_v1  ;;  %v7251_v18 = vpack.c.bf16 %v1954_v12, %v1922_v11  ;;  %v7139_v1 = vpack.c.bf16 %v2208_v56, %v2176_v55  ;;  %v2307_v11 = vld [vmem:[%s17146_s5 + $0x1618] sm:$0xff]  ;;  %v2498_v55 = vld [vmem:[%s17146_s5 + $0x1c10] sm:$0xff] }
 0x1b9   :  { %v2018_v25 = vld [vmem:[%s17146_s5 + $0xd10] sm:$0xff]  ;;  %v7267_v2 = vpack.c.bf16 %v2210_v60, %v2178_v59  ;;  %v2339_v12 = vld [vmem:[%s17146_s5 + $0x1718] sm:$0xff]  ;;  %v2561_v59 = vld [vmem:[%s17146_s5 + $0x1e08] sm:$0xff] }
 0x1ba   :  { %1519 = vmatmul.mubr.f32.vlgmr.msra.gmra.mrb[12].mxu1 %v1365_v24  ;;  %1590 = vmatmul.mubr.f32.vlgmr.msra.gmra.mrb[14].mxu0 %v1365_v24  ;;  %v1986_v24 = vld [vmem:[%s17146_s5 + $0xc10] sm:$0xff]  ;;  %v2593_v60 = vld [vmem:[%s17146_s5 + $0x1f08] sm:$0xff] }
 0x1bb   :  { %7104 = vmatpush1.bf16.msra.mxu1 %v7103_v19  ;;  %7232 = vmatpush1.bf16.msra.mxu0 %v7231_v20  ;;  %v1984_v19 = vld [vmem:[%s17146_s5 + $0xc00] sm:$0xff]  ;;  %v7255_v31 = vpack.c.bf16 %v2018_v25, %v1986_v24  ;;  %v2371_v24 = vld [vmem:[%s17146_s5 + $0x1818] sm:$0xff]  ;;  %v2530_v56 = vld [vmem:[%s17146_s5 + $0x1d10] sm:$0xff] }
 0x1bc   :  { %7106 = vmatprep.subr.bf16.mxu1 %v7105_v26  ;;  %7234 = vmatprep.subr.bf16.mxu0 %v7233_v27  ;;  %v2016_v20 = vld [vmem:[%s17146_s5 + $0xd00] sm:$0xff]  ;;  %v2049_v26 = vld [vmem:[%s17146_s5 + $0xe08] sm:$0xff]  ;;  %v2403_v25 = vld [vmem:[%s17146_s5 + $0x1918] sm:$0xff] }
 0x1bd   :  { %v2081_v27 = vld [vmem:[%s17146_s5 + $0xf08] sm:$0xff]  ;;  %v7127_v30 = vpack.c.bf16 %v2016_v20, %v1984_v19  ;;  %v2306_v19 = vld [vmem:[%s17146_s5 + $0x1610] sm:$0xff] }
 0x1be   :  { %v2338_v20 = vld [vmem:[%s17146_s5 + $0x1710] sm:$0xff] }
 0x1bf   :  { %7108 = vmatpush1.bf16.msra.mxu1 %v7107_v34  ;;  %7236 = vmatpush1.bf16.msra.mxu0 %v7235_v35  ;;  %v7129_v34 = vpack.c.bf16 %v2081_v27, %v2049_v26  ;;  %v7257_v35 = vpack.c.bf16 %v2083_v29, %v2051_v28  ;;  %v7147_v26 = vpack.c.bf16 %v2336_v16, %v2304_v15  ;;  %v2368_v28 = vld [vmem:[%s17146_s5 + $0x1800] sm:$0xff] }
 0x1c0   :  { %7110 = vmatprep.subr.bf16.mxu1 %v7109_v38  ;;  %7238 = vmatprep.subr.bf16.mxu0 %v7237_v39  ;;  %v2113_v38 = vld [vmem:[%s17146_s5 + $0x1008] sm:$0xff]  ;;  %v7275_v27 = vpack.c.bf16 %v2338_v20, %v2306_v19  ;;  %v2400_v29 = vld [vmem:[%s17146_s5 + $0x1900] sm:$0xff] }
 0x1c1   :  { %v2145_v39 = vld [vmem:[%s17146_s5 + $0x1108] sm:$0xff]  ;;  %v11139_v16 = vld [vmem:[%s17147_s4] sm:$0xf] }
 0x1c3   :  { %7112 = vmatpush1.bf16.msra.mxu1 %v7111_v46  ;;  %7240 = vmatpush1.bf16.msra.mxu0 %v7239_v47  ;;  %v7133_v46 = vpack.c.bf16 %v2145_v39, %v2113_v38  ;;  %v7261_v47 = vpack.c.bf16 %v2147_v41, %v2115_v40  ;;  %v7151_v38 = vpack.c.bf16 %v2400_v29, %v2368_v28  ;;  %v2432_v40 = vld [vmem:[%s17146_s5 + $0x1a00] sm:$0xff] }
 0x1c4   :  { %7114 = vmatprep.subr.bf16.mxu1 %v7113_v50  ;;  %7242 = vmatprep.subr.bf16.mxu0 %v7241_v22  ;;  %v2177_v50 = vld [vmem:[%s17146_s5 + $0x1208] sm:$0xff]  ;;  %v7279_v39 = vpack.c.bf16 %v2402_v33, %v2370_v32  ;;  %v2464_v41 = vld [vmem:[%s17146_s5 + $0x1b00] sm:$0xff] }
 0x1c5   :  { %v2209_v22 = vld [vmem:[%s17146_s5 + $0x1308] sm:$0xff]  ;;  %v2656_v29 = vld [vmem:[%s17146_s5 + $0x2100] sm:$0xff] }
 0x1c6   :  { %v2689_v33 = vld [vmem:[%s17146_s5 + $0x2208] sm:$0xff] }
 0x1c7   :  { %7116 = vmatpush1.bf16.msra.mxu1 %v7115_v57  ;;  %7244 = vmatpush1.bf16.msra.mxu0 %v7243_v58  ;;  %v7137_v57 = vpack.c.bf16 %v2209_v22, %v2177_v50  ;;  %v7265_v58 = vpack.c.bf16 %v2211_v52, %v2179_v51  ;;  %v7155_v50 = vpack.c.bf16 %v2464_v41, %v2432_v40  ;;  %v2496_v51 = vld [vmem:[%s17146_s5 + $0x1c00] sm:$0xff] }
 0x1c8   :  { %7118 = vmatprep.subr.bf16.mxu1 %v7117_v61  ;;  %7246 = vmatprep.subr.bf16.mxu0 %v7245_v62  ;;  %v2241_v61 = vld [vmem:[%s17146_s5 + $0x1408] sm:$0xff]  ;;  %v7283_v22 = vpack.c.bf16 %v2466_v45, %v2434_v44  ;;  %v2688_v41 = vld [vmem:[%s17146_s5 + $0x2200] sm:$0xff]  ;;  %v2690_v44 = vld [vmem:[%s17146_s5 + $0x2210] sm:$0xff] }
 0x1c9   :  { %v2273_v62 = vld [vmem:[%s17146_s5 + $0x1508] sm:$0xff]  ;;  %v2722_v45 = vld [vmem:[%s17146_s5 + $0x2310] sm:$0xff] }
 0x1cb   :  { %7120 = vmatpush1.bf16.msra.mxu1 %v7119_v5  ;;  %7248 = vmatpush1.bf16.msra.mxu0 %v7247_v6  ;;  %v7141_v5 = vpack.c.bf16 %v2273_v62, %v2241_v61  ;;  %v7269_v6 = vpack.c.bf16 %v2275_v0, %v2243_v63  ;;  %v2563_v61 = vld [vmem:[%s17146_s5 + $0x1e18] sm:$0xff]  ;;  %v7161_v62 = vpack.c.bf16 %v2593_v60, %v2561_v59  ;;  %v2560_v0 = vld [vmem:[%s17146_s5 + $0x1e00] sm:$0xff]  ;;  %v2786_v59 = vld [vmem:[%s17146_s5 + $0x2510] sm:$0xff] }
 0x1cc   :  { %7122 = vmatprep.subr.bf16.mxu1 %v7121_v9  ;;  %7250 = vmatprep.subr.bf16.mxu0 %v7249_v10  ;;  %v2305_v9 = vld [vmem:[%s17146_s5 + $0x1608] sm:$0xff]  ;;  %v2595_v63 = vld [vmem:[%s17146_s5 + $0x1f18] sm:$0xff] }
 0x1cd   :  { %v2337_v10 = vld [vmem:[%s17146_s5 + $0x1708] sm:$0xff] }
 0x1ce   :  { %v2817_v60 = vld [vmem:[%s17146_s5 + $0x2608] sm:$0xff] }
 0x1cf   :  { %7124 = vmatpush1.bf16.msra.mxu1 %v7123_v17  ;;  %7252 = vmatpush1.bf16.msra.mxu0 %v7251_v18  ;;  %v7145_v17 = vpack.c.bf16 %v2337_v10, %v2305_v9  ;;  %v7273_v18 = vpack.c.bf16 %v2339_v12, %v2307_v11  ;;  %v2627_v9 = vld [vmem:[%s17146_s5 + $0x2018] sm:$0xff]  ;;  %v7165_v10 = vpack.c.bf16 %v2657_v8, %v2625_v7  ;;  %v2850_v7 = vld [vmem:[%s17146_s5 + $0x2710] sm:$0xff]  ;;  %v2881_v8 = vld [vmem:[%s17146_s5 + $0x2808] sm:$0xff] }
 0x1d0   :  { %7126 = vmatprep.subr.bf16.mxu1 %v7125_v21  ;;  %7254 = vmatprep.subr.bf16.mxu0 %v7253_v23  ;;  %v2369_v21 = vld [vmem:[%s17146_s5 + $0x1808] sm:$0xff]  ;;  %v2659_v11 = vld [vmem:[%s17146_s5 + $0x2118] sm:$0xff] }
 0x1d1   :  { %v2401_v23 = vld [vmem:[%s17146_s5 + $0x1908] sm:$0xff]  ;;  %v7293_v12 = vpack.c.bf16 %v2659_v11, %v2627_v9  ;;  %v2915_v11 = vld [vmem:[%s17146_s5 + $0x2918] sm:$0xff] }
 0x1d2   :  { %v2913_v9 = vld [vmem:[%s17146_s5 + $0x2908] sm:$0xff] }
 0x1d3   :  { %7128 = vmatpush1.bf16.msra.mxu1 %v7127_v30  ;;  %7256 = vmatpush1.bf16.msra.mxu0 %v7255_v31  ;;  %v7149_v30 = vpack.c.bf16 %v2401_v23, %v2369_v21  ;;  %v7277_v31 = vpack.c.bf16 %v2403_v25, %v2371_v24  ;;  %v2624_v25 = vld [vmem:[%s17146_s5 + $0x2000] sm:$0xff] }
 0x1d4   :  { %7130 = vmatprep.subr.bf16.mxu1 %v7129_v34  ;;  %7258 = vmatprep.subr.bf16.mxu0 %v7257_v35  ;;  %v2433_v34 = vld [vmem:[%s17146_s5 + $0x1a08] sm:$0xff] }
 0x1d5   :  { %v2465_v35 = vld [vmem:[%s17146_s5 + $0x1b08] sm:$0xff] }
 0x1d7   :  { %7132 = vmatpush1.bf16.msra.mxu1 %v7131_v42  ;;  %7260 = vmatpush1.bf16.msra.mxu0 %v7259_v43  ;;  %v7153_v42 = vpack.c.bf16 %v2465_v35, %v2433_v34  ;;  %v7281_v43 = vpack.c.bf16 %v2467_v37, %v2435_v36  ;;  %v2721_v35 = vld [vmem:[%s17146_s5 + $0x2308] sm:$0xff]  ;;  %v2691_v36 = vld [vmem:[%s17146_s5 + $0x2218] sm:$0xff] }
 0x1d8   :  { %7134 = vmatprep.subr.bf16.mxu1 %v7133_v46  ;;  %7262 = vmatprep.subr.bf16.mxu0 %v7261_v47  ;;  %v2497_v46 = vld [vmem:[%s17146_s5 + $0x1c08] sm:$0xff]  ;;  %v2723_v37 = vld [vmem:[%s17146_s5 + $0x2318] sm:$0xff] }
 0x1d9   :  { %v2529_v47 = vld [vmem:[%s17146_s5 + $0x1d08] sm:$0xff] }
 0x1da   :  { %v7157_v52 = vpack.c.bf16 %v2529_v47, %v2497_v46  ;;  %v2753_v46 = vld [vmem:[%s17146_s5 + $0x2408] sm:$0xff]  ;;  %v7169_v47 = vpack.c.bf16 %v2721_v35, %v2689_v33  ;;  %v2944_v33 = vld [vmem:[%s17146_s5 + $0x2a00] sm:$0xff] }
 0x1db   :  { %7136 = vmatpush1.bf16.msra.mxu1 %v7135_v53  ;;  %7264 = vmatpush1.bf16.msra.mxu0 %v7263_v54  ;;  %v7285_v53 = vpack.c.bf16 %v2531_v49, %v2499_v48  ;;  %v2528_v54 = vld [vmem:[%s17146_s5 + $0x1d00] sm:$0xff]  ;;  %v7297_v48 = vpack.c.bf16 %v2723_v37, %v2691_v36  ;;  %v2785_v49 = vld [vmem:[%s17146_s5 + $0x2508] sm:$0xff]  ;;  %v2946_v37 = vld [vmem:[%s17146_s5 + $0x2a10] sm:$0xff] }
 0x1dc   :  { %7138 = vmatprep.subr.bf16.mxu1 %v7137_v57  ;;  %7266 = vmatprep.subr.bf16.mxu0 %v7265_v58  ;;  %v7159_v57 = vpack.c.bf16 %v2528_v54, %v2496_v51  ;;  %v7287_v58 = vpack.c.bf16 %v2530_v56, %v2498_v55  ;;  %v2752_v54 = vld [vmem:[%s17146_s5 + $0x2400] sm:$0xff]  ;;  %v7173_v56 = vpack.c.bf16 %v2785_v49, %v2753_v46 }
 0x1dd   :  { %v2784_v55 = vld [vmem:[%s17146_s5 + $0x2500] sm:$0xff] }
 0x1df   :  { %7140 = vmatpush1.bf16.msra.mxu1 %v7139_v1  ;;  %7268 = vmatpush1.bf16.msra.mxu0 %v7267_v2  ;;  %v2592_v1 = vld [vmem:[%s17146_s5 + $0x1f00] sm:$0xff]  ;;  %v7289_v2 = vpack.c.bf16 %v2595_v63, %v2563_v61  ;;  %v2849_v61 = vld [vmem:[%s17146_s5 + $0x2708] sm:$0xff]  ;;  %v2851_v63 = vld [vmem:[%s17146_s5 + $0x2718] sm:$0xff] }
 0x1e0   :  { %7142 = vmatprep.subr.bf16.mxu1 %v7141_v5  ;;  %7270 = vmatprep.subr.bf16.mxu0 %v7269_v6  ;;  %v7163_v3 = vpack.c.bf16 %v2592_v1, %v2560_v0  ;;  %v2594_v5 = vld [vmem:[%s17146_s5 + $0x1f10] sm:$0xff]  ;;  %v7175_v0 = vpack.c.bf16 %v2784_v55, %v2752_v54  ;;  %v3105_v54 = vld [vmem:[%s17146_s5 + $0x2f08] sm:$0xff]  ;;  %v3075_v55 = vld [vmem:[%s17146_s5 + $0x2e18] sm:$0xff] }
 0x1e1   :  { %v7291_v6 = vpack.c.bf16 %v2594_v5, %v2562_v4  ;;  %v7177_v4 = vpack.c.bf16 %v2849_v61, %v2817_v60  ;;  %v3104_v60 = vld [vmem:[%s17146_s5 + $0x2f00] sm:$0xff] }
 0x1e3   :  { %7144 = vmatpush1.bf16.msra.mxu1 %v7143_v13  ;;  %7272 = vmatpush1.bf16.msra.mxu0 %v7271_v14  ;;  %v1434_v13 = vlaneseq }
 0x1e4   :  { %7146 = vmatprep.subr.bf16.mxu1 %v7145_v17  ;;  %7274 = vmatprep.subr.bf16.mxu0 %v7273_v18 }
 0x1e5   :  { %v11131_v14 = vshrl.u32 %v1434_v13, 7 }
 0x1e7   :  { %7148 = vmatpush1.bf16.msra.mxu1 %v7147_v26  ;;  %7276 = vmatpush1.bf16.msra.mxu0 %v7275_v27  ;;  %v11134_v15 = vsub.s32 0, %v11131_v14  ;;  %v11142_v17 = vsub.s32 1, %v11131_v14  ;;  %v11145_v18 = vsub.s32 3, %v11131_v14 }
 0x1e8   :  { %7150 = vmatprep.subr.bf16.mxu1 %v7149_v30  ;;  %7278 = vmatprep.subr.bf16.mxu0 %v7277_v31  ;;  %v2626_v30 = vld [vmem:[%s17146_s5 + $0x2010] sm:$0xff] }
 0x1e9   :  { %v1437_v19 = vrot.slane %v11139_v16, %v11134_v15  ;;  %v1441_v20 = vrot.slane %v11139_v16, %v11142_v17  ;;  %v1449_v21 = vrot.slane %v11139_v16, %v11145_v18  ;;  %v2658_v31 = vld [vmem:[%s17146_s5 + $0x2110] sm:$0xff] }
 0x1ea   :  { %v7295_v40 = vpack.c.bf16 %v2658_v31, %v2626_v30  ;;  %v2979_v30 = vld [vmem:[%s17146_s5 + $0x2b18] sm:$0xff] }
 0x1eb   :  { %7152 = vmatpush1.bf16.msra.mxu1 %v7151_v38  ;;  %7280 = vmatpush1.bf16.msra.mxu0 %v7279_v39  ;;  %v7167_v39 = vpack.c.bf16 %v2656_v29, %v2624_v25  ;;  %v2882_v25 = vld [vmem:[%s17146_s5 + $0x2810] sm:$0xff]  ;;  %v2947_v29 = vld [vmem:[%s17146_s5 + $0x2a18] sm:$0xff] }
 0x1ec   :  { %7154 = vmatprep.subr.bf16.mxu1 %v7153_v42  ;;  %7282 = vmatprep.subr.bf16.mxu0 %v7281_v43  ;;  %v2720_v42 = vld [vmem:[%s17146_s5 + $0x2300] sm:$0xff]  ;;  %v7313_v36 = vpack.c.bf16 %v2979_v30, %v2947_v29  ;;  %v3202_v30 = vld [vmem:[%s17146_s5 + $0x3210] sm:$0xff] }
 0x1ef   :  { %7156 = vmatpush1.bf16.msra.mxu1 %v7155_v50  ;;  %7284 = vmatpush1.bf16.msra.mxu0 %v7283_v22  ;;  %v2755_v50 = vld [vmem:[%s17146_s5 + $0x2418] sm:$0xff] }
 0x1f0   :  { %7158 = vmatprep.subr.bf16.mxu1 %v7157_v52  ;;  %7286 = vmatprep.subr.bf16.mxu0 %v7285_v53  ;;  %v2787_v22 = vld [vmem:[%s17146_s5 + $0x2518] sm:$0xff]  ;;  %v7171_v52 = vpack.c.bf16 %v2720_v42, %v2688_v41  ;;  %v7299_v53 = vpack.c.bf16 %v2722_v45, %v2690_v44  ;;  %v3041_v41 = vld [vmem:[%s17146_s5 + $0x2d08] sm:$0xff] }
 0x1f1   :  { %v3011_v42 = vld [vmem:[%s17146_s5 + $0x2c18] sm:$0xff] }
 0x1f2   :  { %v3043_v44 = vld [vmem:[%s17146_s5 + $0x2d18] sm:$0xff] }
 0x1f3   :  { %7160 = vmatpush1.bf16.msra.mxu1 %v7159_v57  ;;  %7288 = vmatpush1.bf16.msra.mxu0 %v7287_v58  ;;  %v7301_v57 = vpack.c.bf16 %v2787_v22, %v2755_v50  ;;  %v2754_v58 = vld [vmem:[%s17146_s5 + $0x2410] sm:$0xff]  ;;  %v7317_v50 = vpack.c.bf16 %v3043_v44, %v3011_v42 }
 0x1f4   :  { %7162 = vmatprep.subr.bf16.mxu1 %v7161_v62  ;;  %7290 = vmatprep.subr.bf16.mxu0 %v7289_v2  ;;  %v2819_v62 = vld [vmem:[%s17146_s5 + $0x2618] sm:$0xff]  ;;  %v7303_v1 = vpack.c.bf16 %v2786_v59, %v2754_v58  ;;  %v2816_v2 = vld [vmem:[%s17146_s5 + $0x2600] sm:$0xff]  ;;  %v3010_v22 = vld [vmem:[%s17146_s5 + $0x2c10] sm:$0xff] }
 0x1f5   :  { %v7305_v5 = vpack.c.bf16 %v2851_v63, %v2819_v62  ;;  %v3072_v59 = vld [vmem:[%s17146_s5 + $0x2e00] sm:$0xff]  ;;  %v3074_v63 = vld [vmem:[%s17146_s5 + $0x2e10] sm:$0xff] }
 0x1f6   :  { %v3266_v44 = vld [vmem:[%s17146_s5 + $0x3410] sm:$0xff] }
 0x1f7   :  { %7164 = vmatpush1.bf16.msra.mxu1 %v7163_v3  ;;  %7292 = vmatpush1.bf16.msra.mxu0 %v7291_v6  ;;  %v2848_v3 = vld [vmem:[%s17146_s5 + $0x2700] sm:$0xff]  ;;  %v2818_v6 = vld [vmem:[%s17146_s5 + $0x2610] sm:$0xff] }
 0x1f8   :  { %7166 = vmatprep.subr.bf16.mxu1 %v7165_v10  ;;  %7294 = vmatprep.subr.bf16.mxu0 %v7293_v12  ;;  %v2883_v10 = vld [vmem:[%s17146_s5 + $0x2818] sm:$0xff]  ;;  %v7179_v12 = vpack.c.bf16 %v2848_v3, %v2816_v2  ;;  %v7307_v13 = vpack.c.bf16 %v2850_v7, %v2818_v6  ;;  %v3169_v2 = vld [vmem:[%s17146_s5 + $0x3108] sm:$0xff]  ;;  %v3136_v7 = vld [vmem:[%s17146_s5 + $0x3000] sm:$0xff] }
 0x1f9   :  { %v3139_v3 = vld [vmem:[%s17146_s5 + $0x3018] sm:$0xff] }
 0x28d   :  { %v1520_v23 = vpop.f32.mrb[12].mxu1  ;;  %v11153_v24 = vpop.f32.mrb[14].mxu0 }
 0x28e   :  { %v1521_v26 = vadd.f32 %v1520_v23, %v1437_v19  ;;  %v1522_v27 = vpop.f32.mrb[13].mxu1  ;;  %v1593_v28 = vpop.f32.mrb[15].mxu0  ;;  %v2880_v19 = vld [vmem:[%s17146_s5 + $0x2800] sm:$0xff]  ;;  %v7309_v23 = vpack.c.bf16 %v2915_v11, %v2883_v10  ;;  %v3138_v11 = vld [vmem:[%s17146_s5 + $0x3010] sm:$0xff] }
 0x28f   :  { %v1523_v32 = vadd.f32 %v1522_v27, %v1441_v20  ;;  %v1594_v34 = vadd.f32 %v1593_v28, %v1449_v21  ;;  %v2912_v20 = vld [vmem:[%s17146_s5 + $0x2900] sm:$0xff]  ;;  %v7181_v21 = vpack.c.bf16 %v2913_v9, %v2881_v8  ;;  %v2945_v27 = vld [vmem:[%s17146_s5 + $0x2a08] sm:$0xff] }
 0x290   :  { %v11187_v43 = vmax.f32 %v1521_v26, 0.0  ;;  %v2914_v26 = vld [vmem:[%s17146_s5 + $0x2910] sm:$0xff]  ;;  %v2977_v28 = vld [vmem:[%s17146_s5 + $0x2b08] sm:$0xff]  ;;  %v7183_v31 = vpack.c.bf16 %v2912_v20, %v2880_v19  ;;  %v3168_v8 = vld [vmem:[%s17146_s5 + $0x3100] sm:$0xff] }
 0x291   :  { %v11179_v38 = vmax.f32 %v1523_v32, 0.0  ;;  %v11209_v51 = vmax.f32 %v1594_v34, 0.0  ;;  %v7311_v32 = vpack.c.bf16 %v2914_v26, %v2882_v25  ;;  %v2976_v34 = vld [vmem:[%s17146_s5 + $0x2b00] sm:$0xff]  ;;  %v7185_v35 = vpack.c.bf16 %v2977_v28, %v2945_v27  ;;  %v3233_v19 = vld [vmem:[%s17146_s5 + $0x3308] sm:$0xff]  ;;  %v3203_v20 = vld [vmem:[%s17146_s5 + $0x3218] sm:$0xff] }
 0x292   :  { %v7187_v45 = vpack.c.bf16 %v2976_v34, %v2944_v33  ;;  %v3200_v26 = vld [vmem:[%s17146_s5 + $0x3200] sm:$0xff]  ;;  %v3297_v33 = vld [vmem:[%s17146_s5 + $0x3508] sm:$0xff]  ;;  %v3267_v34 = vld [vmem:[%s17146_s5 + $0x3418] sm:$0xff] }
 0x293   :  { %3880 = vmatprep.mubr.f32.mxu1 %v11179_v38  ;;  %4022 = vmatprep.mubr.f32.mxu0 %v11179_v38  ;;  %v3232_v27 = vld [vmem:[%s17146_s5 + $0x3300] sm:$0xff] }
 0x294   :  { %3881 = vmatmul.mubr.f32.vlgmr.msra.gmra.mrb[14].mxu1 %v11187_v43  ;;  %4023 = vmatmul.mubr.f32.vlgmr.msra.gmra.mrb[16].mxu0 %v11187_v43 }
 0x295   :  { %7168 = vmatpush1.bf16.msra.mxu1 %v7167_v39  ;;  %7296 = vmatpush1.bf16.msra.mxu0 %v7295_v40  ;;  %v2978_v39 = vld [vmem:[%s17146_s5 + $0x2b10] sm:$0xff]  ;;  %v3009_v40 = vld [vmem:[%s17146_s5 + $0x2c08] sm:$0xff] }
 0x296   :  { %3951 = vmatprep.mubr.f32.mxu1 %v11209_v51  ;;  %4093 = vmatprep.mubr.f32.mxu0 %v11209_v51  ;;  %v7315_v46 = vpack.c.bf16 %v2978_v39, %v2946_v37  ;;  %v7189_v49 = vpack.c.bf16 %v3041_v41, %v3009_v40  ;;  %v3264_v39 = vld [vmem:[%s17146_s5 + $0x3400] sm:$0xff] }
 0x297   :  { %7170 = vmatprep.subr.bf16.mxu1 %v7169_v47  ;;  %7298 = vmatprep.subr.bf16.mxu0 %v7297_v48  ;;  %v3008_v47 = vld [vmem:[%s17146_s5 + $0x2c00] sm:$0xff] }
 0x298   :  { %v3040_v48 = vld [vmem:[%s17146_s5 + $0x2d00] sm:$0xff] }
 0x299   :  { %7172 = vmatpush1.bf16.msra.mxu1 %v7171_v52  ;;  %7300 = vmatpush1.bf16.msra.mxu0 %v7299_v53  ;;  %v3042_v52 = vld [vmem:[%s17146_s5 + $0x2d10] sm:$0xff]  ;;  %v3073_v53 = vld [vmem:[%s17146_s5 + $0x2e08] sm:$0xff]  ;;  %v3296_v40 = vld [vmem:[%s17146_s5 + $0x3500] sm:$0xff] }
 0x29a   :  { %7174 = vmatprep.subr.bf16.mxu1 %v7173_v56  ;;  %7302 = vmatprep.subr.bf16.mxu0 %v7301_v57  ;;  %v3107_v56 = vld [vmem:[%s17146_s5 + $0x2f18] sm:$0xff]  ;;  %v7191_v57 = vpack.c.bf16 %v3040_v48, %v3008_v47  ;;  %v7319_v58 = vpack.c.bf16 %v3042_v52, %v3010_v22  ;;  %v7193_v61 = vpack.c.bf16 %v3105_v54, %v3073_v53  ;;  %v3361_v47 = vld [vmem:[%s17146_s5 + $0x3708] sm:$0xff]  ;;  %v3328_v52 = vld [vmem:[%s17146_s5 + $0x3600] sm:$0xff] }
 0x29b   :  { %v7321_v62 = vpack.c.bf16 %v3107_v56, %v3075_v55  ;;  %v3331_v48 = vld [vmem:[%s17146_s5 + $0x3618] sm:$0xff]  ;;  %v3360_v53 = vld [vmem:[%s17146_s5 + $0x3700] sm:$0xff]  ;;  %v3330_v56 = vld [vmem:[%s17146_s5 + $0x3610] sm:$0xff] }
 0x29d   :  { %7176 = vmatpush1.bf16.msra.mxu1 %v7175_v0  ;;  %7304 = vmatpush1.bf16.msra.mxu0 %v7303_v1  ;;  %v3106_v0 = vld [vmem:[%s17146_s5 + $0x2f10] sm:$0xff]  ;;  %v3137_v1 = vld [vmem:[%s17146_s5 + $0x3008] sm:$0xff] }
 0x29e   :  { %7178 = vmatprep.subr.bf16.mxu1 %v7177_v4  ;;  %7306 = vmatprep.subr.bf16.mxu0 %v7305_v5  ;;  %v3171_v4 = vld [vmem:[%s17146_s5 + $0x3118] sm:$0xff]  ;;  %v7195_v5 = vpack.c.bf16 %v3104_v60, %v3072_v59  ;;  %v7323_v6 = vpack.c.bf16 %v3106_v0, %v3074_v63  ;;  %v7197_v9 = vpack.c.bf16 %v3169_v2, %v3137_v1  ;;  %v3425_v59 = vld [vmem:[%s17146_s5 + $0x3908] sm:$0xff]  ;;  %v3392_v0 = vld [vmem:[%s17146_s5 + $0x3800] sm:$0xff] }
 0x29f   :  { %v7325_v10 = vpack.c.bf16 %v3171_v4, %v3139_v3  ;;  %v3395_v60 = vld [vmem:[%s17146_s5 + $0x3818] sm:$0xff]  ;;  %v3424_v1 = vld [vmem:[%s17146_s5 + $0x3900] sm:$0xff]  ;;  %v3394_v4 = vld [vmem:[%s17146_s5 + $0x3810] sm:$0xff] }
 0x2a1   :  { %7180 = vmatpush1.bf16.msra.mxu1 %v7179_v12  ;;  %7308 = vmatpush1.bf16.msra.mxu0 %v7307_v13  ;;  %v3170_v12 = vld [vmem:[%s17146_s5 + $0x3110] sm:$0xff]  ;;  %v3201_v13 = vld [vmem:[%s17146_s5 + $0x3208] sm:$0xff] }
 0x2a2   :  { %7182 = vmatprep.subr.bf16.mxu1 %v7181_v21  ;;  %7310 = vmatprep.subr.bf16.mxu0 %v7309_v23  ;;  %v3235_v21 = vld [vmem:[%s17146_s5 + $0x3318] sm:$0xff]  ;;  %v7199_v23 = vpack.c.bf16 %v3168_v8, %v3136_v7  ;;  %v7327_v25 = vpack.c.bf16 %v3170_v12, %v3138_v11  ;;  %v7201_v28 = vpack.c.bf16 %v3233_v19, %v3201_v13  ;;  %v3489_v7 = vld [vmem:[%s17146_s5 + $0x3b08] sm:$0xff]  ;;  %v3456_v12 = vld [vmem:[%s17146_s5 + $0x3a00] sm:$0xff] }
 0x2a3   :  { %v7329_v29 = vpack.c.bf16 %v3235_v21, %v3203_v20  ;;  %v3459_v8 = vld [vmem:[%s17146_s5 + $0x3a18] sm:$0xff]  ;;  %v3488_v13 = vld [vmem:[%s17146_s5 + $0x3b00] sm:$0xff]  ;;  %v3458_v21 = vld [vmem:[%s17146_s5 + $0x3a10] sm:$0xff] }
 0x2a5   :  { %7184 = vmatpush1.bf16.msra.mxu1 %v7183_v31  ;;  %7312 = vmatpush1.bf16.msra.mxu0 %v7311_v32  ;;  %v3234_v31 = vld [vmem:[%s17146_s5 + $0x3310] sm:$0xff]  ;;  %v3265_v32 = vld [vmem:[%s17146_s5 + $0x3408] sm:$0xff] }
 0x2a6   :  { %7186 = vmatprep.subr.bf16.mxu1 %v7185_v35  ;;  %7314 = vmatprep.subr.bf16.mxu0 %v7313_v36  ;;  %v3299_v35 = vld [vmem:[%s17146_s5 + $0x3518] sm:$0xff]  ;;  %v7203_v36 = vpack.c.bf16 %v3232_v27, %v3200_v26  ;;  %v7331_v37 = vpack.c.bf16 %v3234_v31, %v3202_v30  ;;  %v7205_v41 = vpack.c.bf16 %v3297_v33, %v3265_v32  ;;  %v3553_v26 = vld [vmem:[%s17146_s5 + $0x3d08] sm:$0xff]  ;;  %v3520_v31 = vld [vmem:[%s17146_s5 + $0x3c00] sm:$0xff]  ;;  %v11510_v33 = vsub.s32 2, %v11131_v14 }
 0x2a7   :  { %v7333_v42 = vpack.c.bf16 %v3299_v35, %v3267_v34  ;;  %v3523_v27 = vld [vmem:[%s17146_s5 + $0x3c18] sm:$0xff]  ;;  %v3552_v32 = vld [vmem:[%s17146_s5 + $0x3d00] sm:$0xff] }
 0x2a9   :  { %7188 = vmatpush1.bf16.msra.mxu1 %v7187_v45  ;;  %7316 = vmatpush1.bf16.msra.mxu0 %v7315_v46  ;;  %v3298_v45 = vld [vmem:[%s17146_s5 + $0x3510] sm:$0xff]  ;;  %v3329_v46 = vld [vmem:[%s17146_s5 + $0x3608] sm:$0xff] }
 0x2aa   :  { %7190 = vmatprep.subr.bf16.mxu1 %v7189_v49  ;;  %7318 = vmatprep.subr.bf16.mxu0 %v7317_v50  ;;  %v3363_v49 = vld [vmem:[%s17146_s5 + $0x3718] sm:$0xff]  ;;  %v7207_v50 = vpack.c.bf16 %v3296_v40, %v3264_v39  ;;  %v7335_v22 = vpack.c.bf16 %v3298_v45, %v3266_v44  ;;  %v7209_v54 = vpack.c.bf16 %v3361_v47, %v3329_v46  ;;  %v3585_v39 = vld [vmem:[%s17146_s5 + $0x3e08] sm:$0xff]  ;;  %v3584_v46 = vld [vmem:[%s17146_s5 + $0x3e00] sm:$0xff] }
 0x2ab   :  { %v7337_v55 = vpack.c.bf16 %v3363_v49, %v3331_v48  ;;  %v3617_v40 = vld [vmem:[%s17146_s5 + $0x3f08] sm:$0xff]  ;;  %v7223_v44 = vpack.c.bf16 %v3552_v32, %v3520_v31  ;;  %v3616_v47 = vld [vmem:[%s17146_s5 + $0x3f00] sm:$0xff]  ;;  %v1445_v48 = vrot.slane %v11139_v16, %v11510_v33  ;;  %v1766_v31 = vld [vmem:[%s17146_s5 + $0x530] sm:$0xff] }
 0x2ac   :  { %v7225_v49 = vpack.c.bf16 %v3617_v40, %v3585_v39  ;;  %v1637_v16 = vld [vmem:[%s17146_s5 + $0x128] sm:$0xff] }
 0x2ad   :  { %7192 = vmatpush1.bf16.msra.mxu1 %v7191_v57  ;;  %7320 = vmatpush1.bf16.msra.mxu0 %v7319_v58  ;;  %v3362_v57 = vld [vmem:[%s17146_s5 + $0x3710] sm:$0xff]  ;;  %v3393_v58 = vld [vmem:[%s17146_s5 + $0x3808] sm:$0xff] }
 0x2ae   :  { %7194 = vmatprep.subr.bf16.mxu1 %v7193_v61  ;;  %7322 = vmatprep.subr.bf16.mxu0 %v7321_v62  ;;  %v3427_v61 = vld [vmem:[%s17146_s5 + $0x3918] sm:$0xff]  ;;  %v7211_v62 = vpack.c.bf16 %v3360_v53, %v3328_v52  ;;  %v7339_v63 = vpack.c.bf16 %v3362_v57, %v3330_v56  ;;  %v7213_v2 = vpack.c.bf16 %v3425_v59, %v3393_v58  ;;  %v3618_v52 = vld [vmem:[%s17146_s5 + $0x3f10] sm:$0xff]  ;;  %v1605_v53 = vld [vmem:[%s17146_s5 + $0x28] sm:$0xff] }
 0x2af   :  { %v7341_v3 = vpack.c.bf16 %v3427_v61, %v3395_v60  ;;  %v7227_v56 = vpack.c.bf16 %v3616_v47, %v3584_v46  ;;  %v1592_v58 = vadd.f32 %v11153_v24, %v1445_v48  ;;  %v7357_v59 = vpack.c.bf16 %v1637_v16, %v1605_v53  ;;  %v1604_v61 = vld [vmem:[%s17146_s5 + $0x20] sm:$0xff]  ;;  %v1638_v24 = vld [vmem:[%s17146_s5 + $0x130] sm:$0xff]  ;;  %v1797_v32 = vld [vmem:[%s17146_s5 + $0x628] sm:$0xff] }
 0x2b0   :  { %v1830_v46 = vld [vmem:[%s17146_s5 + $0x730] sm:$0xff]  ;;  %v1861_v47 = vld [vmem:[%s17146_s5 + $0x828] sm:$0xff]  ;;  %v1860_v16 = vld [vmem:[%s17146_s5 + $0x820] sm:$0xff] }
 0x2b1   :  { %7196 = vmatpush1.bf16.msra.mxu1 %v7195_v5  ;;  %7324 = vmatpush1.bf16.msra.mxu0 %v7323_v6  ;;  %v3426_v5 = vld [vmem:[%s17146_s5 + $0x3910] sm:$0xff]  ;;  %v3457_v6 = vld [vmem:[%s17146_s5 + $0x3a08] sm:$0xff] }
 0x2b2   :  { %7198 = vmatprep.subr.bf16.mxu1 %v7197_v9  ;;  %7326 = vmatprep.subr.bf16.mxu0 %v7325_v10  ;;  %v3491_v9 = vld [vmem:[%s17146_s5 + $0x3b18] sm:$0xff]  ;;  %v7215_v10 = vpack.c.bf16 %v3424_v1, %v3392_v0  ;;  %v7343_v11 = vpack.c.bf16 %v3426_v5, %v3394_v4  ;;  %v7217_v19 = vpack.c.bf16 %v3489_v7, %v3457_v6  ;;  %v1669_v0 = vld [vmem:[%s17146_s5 + $0x228] sm:$0xff]  ;;  %v11581_v5 = vmax.f32 %v1592_v58, 0.0  ;;  %v1668_v7 = vld [vmem:[%s17146_s5 + $0x220] sm:$0xff] }
 0x2b3   :  { %v7345_v20 = vpack.c.bf16 %v3491_v9, %v3459_v8  ;;  %v1701_v1 = vld [vmem:[%s17146_s5 + $0x328] sm:$0xff]  ;;  %v1700_v8 = vld [vmem:[%s17146_s5 + $0x320] sm:$0xff]  ;;  %v1670_v9 = vld [vmem:[%s17146_s5 + $0x230] sm:$0xff] }
 0x2b4   :  { %v1893_v48 = vld [vmem:[%s17146_s5 + $0x928] sm:$0xff] }
 0x2b5   :  { %7200 = vmatpush1.bf16.msra.mxu1 %v7199_v23  ;;  %7328 = vmatpush1.bf16.msra.mxu0 %v7327_v25  ;;  %v3490_v23 = vld [vmem:[%s17146_s5 + $0x3b10] sm:$0xff]  ;;  %v3521_v25 = vld [vmem:[%s17146_s5 + $0x3c08] sm:$0xff]  ;;  %v7373_v53 = vpack.c.bf16 %v1893_v48, %v1861_v47  ;;  %v2116_v47 = vld [vmem:[%s17146_s5 + $0x1020] sm:$0xff] }
 0x2b6   :  { %7202 = vmatprep.subr.bf16.mxu1 %v7201_v28  ;;  %7330 = vmatprep.subr.bf16.mxu0 %v7329_v29  ;;  %v3555_v28 = vld [vmem:[%s17146_s5 + $0x3d18] sm:$0xff]  ;;  %v7219_v29 = vpack.c.bf16 %v3488_v13, %v3456_v12  ;;  %v7347_v30 = vpack.c.bf16 %v3490_v23, %v3458_v21  ;;  %v7221_v34 = vpack.c.bf16 %v3553_v26, %v3521_v25  ;;  %v1702_v12 = vld [vmem:[%s17146_s5 + $0x330] sm:$0xff]  ;;  %v1733_v13 = vld [vmem:[%s17146_s5 + $0x428] sm:$0xff] }
 0x2b7   :  { %v7349_v35 = vpack.c.bf16 %v3555_v28, %v3523_v27  ;;  %v1767_v21 = vld [vmem:[%s17146_s5 + $0x538] sm:$0xff]  ;;  %v7363_v23 = vpack.c.bf16 %v1700_v8, %v1668_v7  ;;  %v7491_v25 = vpack.c.bf16 %v1702_v12, %v1670_v9  ;;  %v1732_v27 = vld [vmem:[%s17146_s5 + $0x420] sm:$0xff]  ;;  %v1925_v58 = vld [vmem:[%s17146_s5 + $0xa28] sm:$0xff] }
 0x2b8   :  { %v1764_v28 = vld [vmem:[%s17146_s5 + $0x520] sm:$0xff]  ;;  %v2021_v7 = vld [vmem:[%s17146_s5 + $0xd28] sm:$0xff]  ;;  %v1991_v8 = vld [vmem:[%s17146_s5 + $0xc38] sm:$0xff] }
 0x2b9   :  { %7204 = vmatpush1.bf16.msra.mxu1 %v7203_v36  ;;  %7332 = vmatpush1.bf16.msra.mxu0 %v7331_v37  ;;  %v3522_v36 = vld [vmem:[%s17146_s5 + $0x3c10] sm:$0xff]  ;;  %v2023_v9 = vld [vmem:[%s17146_s5 + $0xd38] sm:$0xff]  ;;  %v2148_v48 = vld [vmem:[%s17146_s5 + $0x1120] sm:$0xff] }
 0x2ba   :  { %7206 = vmatprep.subr.bf16.mxu1 %v7205_v41  ;;  %7334 = vmatprep.subr.bf16.mxu0 %v7333_v42  ;;  %v3554_v37 = vld [vmem:[%s17146_s5 + $0x3d10] sm:$0xff]  ;;  %v3587_v41 = vld [vmem:[%s17146_s5 + $0x3e18] sm:$0xff] }
 0x2bb   :  { %v3619_v42 = vld [vmem:[%s17146_s5 + $0x3f18] sm:$0xff]  ;;  %v7351_v45 = vpack.c.bf16 %v3554_v37, %v3522_v36  ;;  %v7367_v37 = vpack.c.bf16 %v1764_v28, %v1732_v27 }
 0x2bc   :  { %v1831_v36 = vld [vmem:[%s17146_s5 + $0x738] sm:$0xff] }
 0x2bd   :  { %7208 = vmatpush1.bf16.msra.mxu1 %v7207_v50  ;;  %7336 = vmatpush1.bf16.msra.mxu0 %v7335_v22  ;;  %v7353_v50 = vpack.c.bf16 %v3619_v42, %v3587_v41  ;;  %v3586_v22 = vld [vmem:[%s17146_s5 + $0x3e10] sm:$0xff]  ;;  %v1796_v41 = vld [vmem:[%s17146_s5 + $0x620] sm:$0xff]  ;;  %v2055_v27 = vld [vmem:[%s17146_s5 + $0xe38] sm:$0xff] }
 0x2be   :  { %7210 = vmatprep.subr.bf16.mxu1 %v7209_v54  ;;  %7338 = vmatprep.subr.bf16.mxu0 %v7337_v55  ;;  %v1607_v54 = vld [vmem:[%s17146_s5 + $0x38] sm:$0xff]  ;;  %v7355_v57 = vpack.c.bf16 %v3618_v52, %v3586_v22  ;;  %v1828_v42 = vld [vmem:[%s17146_s5 + $0x720] sm:$0xff] }
 0x2bf   :  { %v1639_v55 = vld [vmem:[%s17146_s5 + $0x138] sm:$0xff]  ;;  %v7371_v22 = vpack.c.bf16 %v1828_v42, %v1796_v41 }
 0x2c0   :  { %v7485_v60 = vpack.c.bf16 %v1639_v55, %v1607_v54  ;;  %v1892_v54 = vld [vmem:[%s17146_s5 + $0x920] sm:$0xff]  ;;  %v1862_v55 = vld [vmem:[%s17146_s5 + $0x830] sm:$0xff]  ;;  %v2087_v28 = vld [vmem:[%s17146_s5 + $0xf38] sm:$0xff] }
 0x2c1   :  { %7212 = vmatpush1.bf16.msra.mxu1 %v7211_v62  ;;  %7340 = vmatpush1.bf16.msra.mxu0 %v7339_v63  ;;  %v1636_v62 = vld [vmem:[%s17146_s5 + $0x120] sm:$0xff]  ;;  %v1606_v63 = vld [vmem:[%s17146_s5 + $0x30] sm:$0xff]  ;;  %v2119_v41 = vld [vmem:[%s17146_s5 + $0x1038] sm:$0xff] }
 0x2c2   :  { %7214 = vmatprep.subr.bf16.mxu1 %v7213_v2  ;;  %7342 = vmatprep.subr.bf16.mxu0 %v7341_v3  ;;  %v1671_v2 = vld [vmem:[%s17146_s5 + $0x238] sm:$0xff]  ;;  %v7359_v4 = vpack.c.bf16 %v1636_v62, %v1604_v61  ;;  %v7487_v6 = vpack.c.bf16 %v1638_v24, %v1606_v63  ;;  %v7375_v62 = vpack.c.bf16 %v1892_v54, %v1860_v16 }
 0x2c3   :  { %v1703_v3 = vld [vmem:[%s17146_s5 + $0x338] sm:$0xff] }
 0x2c4   :  { %v1959_v61 = vld [vmem:[%s17146_s5 + $0xb38] sm:$0xff] }
 0x2c5   :  { %7216 = vmatpush1.bf16.msra.mxu1 %v7215_v10  ;;  %7344 = vmatpush1.bf16.msra.mxu0 %v7343_v11  ;;  %v7361_v10 = vpack.c.bf16 %v1701_v1, %v1669_v0  ;;  %v7489_v11 = vpack.c.bf16 %v1703_v3, %v1671_v2  ;;  %v1924_v0 = vld [vmem:[%s17146_s5 + $0xa20] sm:$0xff]  ;;  %v1926_v2 = vld [vmem:[%s17146_s5 + $0xa30] sm:$0xff]  ;;  %v2151_v42 = vld [vmem:[%s17146_s5 + $0x1138] sm:$0xff] }
 0x2c6   :  { %7218 = vmatprep.subr.bf16.mxu1 %v7217_v19  ;;  %7346 = vmatprep.subr.bf16.mxu0 %v7345_v20  ;;  %v1765_v19 = vld [vmem:[%s17146_s5 + $0x528] sm:$0xff]  ;;  %v1735_v20 = vld [vmem:[%s17146_s5 + $0x438] sm:$0xff]  ;;  %v1956_v1 = vld [vmem:[%s17146_s5 + $0xb20] sm:$0xff] }
 0x2c7   :  { %v7365_v26 = vpack.c.bf16 %v1765_v19, %v1733_v13  ;;  %v1988_v13 = vld [vmem:[%s17146_s5 + $0xc20] sm:$0xff]  ;;  %v2183_v16 = vld [vmem:[%s17146_s5 + $0x1238] sm:$0xff] }
 0x2c8   :  { %v2020_v19 = vld [vmem:[%s17146_s5 + $0xd20] sm:$0xff]  ;;  %v2215_v54 = vld [vmem:[%s17146_s5 + $0x1338] sm:$0xff] }
 0x2c9   :  { %7220 = vmatpush1.bf16.msra.mxu1 %v7219_v29  ;;  %7348 = vmatpush1.bf16.msra.mxu0 %v7347_v30  ;;  %v1734_v29 = vld [vmem:[%s17146_s5 + $0x430] sm:$0xff]  ;;  %v7493_v30 = vpack.c.bf16 %v1767_v21, %v1735_v20  ;;  %v7509_v21 = vpack.c.bf16 %v2023_v9, %v1991_v8 }
 0x2ca   :  { %7222 = vmatprep.subr.bf16.mxu1 %v7221_v34  ;;  %7350 = vmatprep.subr.bf16.mxu0 %v7349_v35  ;;  %v1829_v34 = vld [vmem:[%s17146_s5 + $0x728] sm:$0xff]  ;;  %v1799_v35 = vld [vmem:[%s17146_s5 + $0x638] sm:$0xff]  ;;  %v7495_v39 = vpack.c.bf16 %v1766_v31, %v1734_v29  ;;  %v1990_v20 = vld [vmem:[%s17146_s5 + $0xc30] sm:$0xff]  ;;  %v7383_v29 = vpack.c.bf16 %v2020_v19, %v1988_v13 }
 0x2cb   :  { %v7369_v40 = vpack.c.bf16 %v1829_v34, %v1797_v32  ;;  %v2052_v32 = vld [vmem:[%s17146_s5 + $0xe20] sm:$0xff]  ;;  %v2246_v8 = vld [vmem:[%s17146_s5 + $0x1430] sm:$0xff]  ;;  %v2311_v13 = vld [vmem:[%s17146_s5 + $0x1638] sm:$0xff] }
 0x2cc   :  { %v2084_v34 = vld [vmem:[%s17146_s5 + $0xf20] sm:$0xff]  ;;  %v2343_v19 = vld [vmem:[%s17146_s5 + $0x1738] sm:$0xff] }
 0x2cd   :  { %7224 = vmatpush1.bf16.msra.mxu1 %v7223_v44  ;;  %7352 = vmatpush1.bf16.msra.mxu0 %v7351_v45  ;;  %v1798_v44 = vld [vmem:[%s17146_s5 + $0x630] sm:$0xff]  ;;  %v7497_v45 = vpack.c.bf16 %v1831_v36, %v1799_v35  ;;  %v7513_v36 = vpack.c.bf16 %v2087_v28, %v2055_v27  ;;  %v7529_v28 = vpack.c.bf16 %v2343_v19, %v2311_v13 }
 0x2ce   :  { %7226 = vmatprep.subr.bf16.mxu1 %v7225_v49  ;;  %7354 = vmatprep.subr.bf16.mxu0 %v7353_v50  ;;  %v1863_v49 = vld [vmem:[%s17146_s5 + $0x838] sm:$0xff]  ;;  %v7499_v52 = vpack.c.bf16 %v1830_v46, %v1798_v44  ;;  %v2054_v35 = vld [vmem:[%s17146_s5 + $0xe30] sm:$0xff]  ;;  %v7387_v44 = vpack.c.bf16 %v2084_v34, %v2052_v32 }
 0x2cf   :  { %v1895_v50 = vld [vmem:[%s17146_s5 + $0x938] sm:$0xff]  ;;  %v2310_v27 = vld [vmem:[%s17146_s5 + $0x1630] sm:$0xff] }
 0x2d0   :  { %v2375_v32 = vld [vmem:[%s17146_s5 + $0x1838] sm:$0xff]  ;;  %v2566_v13 = vld [vmem:[%s17146_s5 + $0x1e30] sm:$0xff] }
 0x2d1   :  { %7228 = vmatpush1.bf16.msra.mxu1 %v7227_v56  ;;  %7356 = vmatpush1.bf16.msra.mxu0 %v7355_v57  ;;  %v7501_v56 = vpack.c.bf16 %v1895_v50, %v1863_v49  ;;  %v1894_v57 = vld [vmem:[%s17146_s5 + $0x930] sm:$0xff]  ;;  %v7517_v50 = vpack.c.bf16 %v2151_v42, %v2119_v41  ;;  %v2407_v34 = vld [vmem:[%s17146_s5 + $0x1938] sm:$0xff] }
 0x2d2   :  { %7358 = vmatprep.subr.bf16.mxu1 %v7357_v59  ;;  %7486 = vmatprep.subr.bf16.mxu0 %v7485_v60  ;;  %v1957_v59 = vld [vmem:[%s17146_s5 + $0xb28] sm:$0xff]  ;;  %v1927_v60 = vld [vmem:[%s17146_s5 + $0xa38] sm:$0xff]  ;;  %v7503_v63 = vpack.c.bf16 %v1894_v57, %v1862_v55  ;;  %v2118_v49 = vld [vmem:[%s17146_s5 + $0x1030] sm:$0xff]  ;;  %v7391_v55 = vpack.c.bf16 %v2148_v48, %v2116_v47  ;;  %v7533_v42 = vpack.c.bf16 %v2407_v34, %v2375_v32 }
 0x2d3   :  { %v7377_v24 = vpack.c.bf16 %v1957_v59, %v1925_v58  ;;  %v7505_v3 = vpack.c.bf16 %v1959_v61, %v1927_v60  ;;  %v2180_v58 = vld [vmem:[%s17146_s5 + $0x1220] sm:$0xff]  ;;  %v2182_v60 = vld [vmem:[%s17146_s5 + $0x1230] sm:$0xff]  ;;  %v7521_v61 = vpack.c.bf16 %v2215_v54, %v2183_v16  ;;  %v2439_v47 = vld [vmem:[%s17146_s5 + $0x1a38] sm:$0xff] }
 0x2d4   :  { %3952 = vmatmul.mubr.f32.vlgmr.msra.gmra.mrb[14].mxu1 %v11581_v5  ;;  %4094 = vmatmul.mubr.f32.vlgmr.msra.gmra.mrb[16].mxu0 %v11581_v5  ;;  %v2212_v59 = vld [vmem:[%s17146_s5 + $0x1320] sm:$0xff]  ;;  %v2374_v41 = vld [vmem:[%s17146_s5 + $0x1830] sm:$0xff]  ;;  %v2471_v48 = vld [vmem:[%s17146_s5 + $0x1b38] sm:$0xff] }
 0x2d5   :  { %7360 = vmatpush1.bf16.msra.mxu1 %v7359_v4  ;;  %4164 = vmatprep.mubr.f32.mxu1 %v11179_v38  ;;  %v1958_v4 = vld [vmem:[%s17146_s5 + $0xb30] sm:$0xff]  ;;  %v7537_v54 = vpack.c.bf16 %v2471_v48, %v2439_v47 }
 0x2d6   :  { %7488 = vmatpush1.bf16.msra.mxu0 %v7487_v6  ;;  %4306 = vmatprep.mubr.f32.mxu0 %v11179_v38  ;;  %v1989_v6 = vld [vmem:[%s17146_s5 + $0xc28] sm:$0xff]  ;;  %v2438_v16 = vld [vmem:[%s17146_s5 + $0x1a30] sm:$0xff] }
 0x2d7   :  { %7362 = vmatprep.subr.bf16.mxu1 %v7361_v10  ;;  %7490 = vmatprep.subr.bf16.mxu0 %v7489_v11  ;;  %v7379_v10 = vpack.c.bf16 %v1956_v1, %v1924_v0  ;;  %v7507_v11 = vpack.c.bf16 %v1958_v4, %v1926_v2  ;;  %v7381_v12 = vpack.c.bf16 %v2021_v7, %v1989_v6  ;;  %v2247_v0 = vld [vmem:[%s17146_s5 + $0x1438] sm:$0xff]  ;;  %v2244_v6 = vld [vmem:[%s17146_s5 + $0x1420] sm:$0xff]  ;;  %v2630_v34 = vld [vmem:[%s17146_s5 + $0x2030] sm:$0xff] }
 0x2d8   :  { %v2279_v1 = vld [vmem:[%s17146_s5 + $0x1538] sm:$0xff]  ;;  %v7395_v2 = vpack.c.bf16 %v2212_v59, %v2180_v58  ;;  %v2276_v7 = vld [vmem:[%s17146_s5 + $0x1520] sm:$0xff]  ;;  %v2726_v48 = vld [vmem:[%s17146_s5 + $0x2330] sm:$0xff] }
 0x2d9   :  { %7364 = vmatpush1.bf16.msra.mxu1 %v7363_v23  ;;  %v2022_v23 = vld [vmem:[%s17146_s5 + $0xd30] sm:$0xff]  ;;  %v7525_v9 = vpack.c.bf16 %v2279_v1, %v2247_v0  ;;  %v2503_v58 = vld [vmem:[%s17146_s5 + $0x1c38] sm:$0xff] }
 0x2da   :  { %7492 = vmatpush1.bf16.msra.mxu0 %v7491_v25  ;;  %7366 = vmatprep.subr.bf16.mxu1 %v7365_v26  ;;  %v2053_v25 = vld [vmem:[%s17146_s5 + $0xe28] sm:$0xff]  ;;  %v2535_v59 = vld [vmem:[%s17146_s5 + $0x1d38] sm:$0xff]  ;;  %v2502_v0 = vld [vmem:[%s17146_s5 + $0x1c30] sm:$0xff] }
 0x2db   :  { %7494 = vmatprep.subr.bf16.mxu0 %v7493_v30  ;;  %v2085_v26 = vld [vmem:[%s17146_s5 + $0xf28] sm:$0xff]  ;;  %v7511_v30 = vpack.c.bf16 %v2022_v23, %v1990_v20  ;;  %v7399_v20 = vpack.c.bf16 %v2276_v7, %v2244_v6  ;;  %v7541_v1 = vpack.c.bf16 %v2535_v59, %v2503_v58  ;;  %v2567_v6 = vld [vmem:[%s17146_s5 + $0x1e38] sm:$0xff]  ;;  %v2758_v58 = vld [vmem:[%s17146_s5 + $0x2430] sm:$0xff] }
 0x2dc   :  { %v7385_v31 = vpack.c.bf16 %v2085_v26, %v2053_v25  ;;  %v2308_v25 = vld [vmem:[%s17146_s5 + $0x1620] sm:$0xff]  ;;  %v2599_v7 = vld [vmem:[%s17146_s5 + $0x1f38] sm:$0xff] }
 0x2dd   :  { %7368 = vmatpush1.bf16.msra.mxu1 %v7367_v37  ;;  %v2086_v37 = vld [vmem:[%s17146_s5 + $0xf30] sm:$0xff]  ;;  %v2340_v26 = vld [vmem:[%s17146_s5 + $0x1720] sm:$0xff]  ;;  %v7545_v19 = vpack.c.bf16 %v2599_v7, %v2567_v6 }
 0x2de   :  { %7496 = vmatpush1.bf16.msra.mxu0 %v7495_v39  ;;  %7370 = vmatprep.subr.bf16.mxu1 %v7369_v40  ;;  %v2117_v39 = vld [vmem:[%s17146_s5 + $0x1028] sm:$0xff]  ;;  %v2822_v6 = vld [vmem:[%s17146_s5 + $0x2630] sm:$0xff] }
 0x2df   :  { %7498 = vmatprep.subr.bf16.mxu0 %v7497_v45  ;;  %v2149_v40 = vld [vmem:[%s17146_s5 + $0x1128] sm:$0xff]  ;;  %v7515_v45 = vpack.c.bf16 %v2086_v37, %v2054_v35  ;;  %v7403_v35 = vpack.c.bf16 %v2340_v26, %v2308_v25  ;;  %v2631_v25 = vld [vmem:[%s17146_s5 + $0x2038] sm:$0xff] }
 0x2e0   :  { %v7389_v46 = vpack.c.bf16 %v2149_v40, %v2117_v39  ;;  %v2372_v39 = vld [vmem:[%s17146_s5 + $0x1820] sm:$0xff]  ;;  %v2663_v26 = vld [vmem:[%s17146_s5 + $0x2138] sm:$0xff] }
 0x2e1   :  { %7372 = vmatpush1.bf16.msra.mxu1 %v7371_v22  ;;  %v2150_v22 = vld [vmem:[%s17146_s5 + $0x1130] sm:$0xff]  ;;  %v2404_v40 = vld [vmem:[%s17146_s5 + $0x1920] sm:$0xff]  ;;  %v7549_v32 = vpack.c.bf16 %v2663_v26, %v2631_v25 }
 0x2e2   :  { %7500 = vmatpush1.bf16.msra.mxu0 %v7499_v52  ;;  %7374 = vmatprep.subr.bf16.mxu1 %v7373_v53  ;;  %v2181_v52 = vld [vmem:[%s17146_s5 + $0x1228] sm:$0xff]  ;;  %v2886_v25 = vld [vmem:[%s17146_s5 + $0x2830] sm:$0xff] }
 0x2e3   :  { %7502 = vmatprep.subr.bf16.mxu0 %v7501_v56  ;;  %v2213_v53 = vld [vmem:[%s17146_s5 + $0x1328] sm:$0xff]  ;;  %v7519_v56 = vpack.c.bf16 %v2150_v22, %v2118_v49  ;;  %v7407_v49 = vpack.c.bf16 %v2404_v40, %v2372_v39  ;;  %v2695_v40 = vld [vmem:[%s17146_s5 + $0x2238] sm:$0xff] }
 0x2e4   :  { %v7393_v57 = vpack.c.bf16 %v2213_v53, %v2181_v52  ;;  %v2436_v52 = vld [vmem:[%s17146_s5 + $0x1a20] sm:$0xff] }
 0x2e5   :  { %7376 = vmatpush1.bf16.msra.mxu1 %v7375_v62  ;;  %v2214_v62 = vld [vmem:[%s17146_s5 + $0x1330] sm:$0xff]  ;;  %v2468_v53 = vld [vmem:[%s17146_s5 + $0x1b20] sm:$0xff] }
 0x2e6   :  { %7504 = vmatpush1.bf16.msra.mxu0 %v7503_v63  ;;  %7378 = vmatprep.subr.bf16.mxu1 %v7377_v24  ;;  %v2245_v63 = vld [vmem:[%s17146_s5 + $0x1428] sm:$0xff] }
 0x2e7   :  { %7506 = vmatprep.subr.bf16.mxu0 %v7505_v3  ;;  %v2277_v24 = vld [vmem:[%s17146_s5 + $0x1528] sm:$0xff]  ;;  %v7523_v3 = vpack.c.bf16 %v2214_v62, %v2182_v60  ;;  %v7411_v60 = vpack.c.bf16 %v2468_v53, %v2436_v52  ;;  %v2759_v52 = vld [vmem:[%s17146_s5 + $0x2438] sm:$0xff] }
 0x2e8   :  { %v7397_v4 = vpack.c.bf16 %v2277_v24, %v2245_v63  ;;  %v2500_v63 = vld [vmem:[%s17146_s5 + $0x1c20] sm:$0xff]  ;;  %v2791_v53 = vld [vmem:[%s17146_s5 + $0x2538] sm:$0xff] }
 0x2e9   :  { %7380 = vmatpush1.bf16.msra.mxu1 %v7379_v10  ;;  %v2278_v10 = vld [vmem:[%s17146_s5 + $0x1530] sm:$0xff]  ;;  %v2532_v24 = vld [vmem:[%s17146_s5 + $0x1d20] sm:$0xff]  ;;  %v7557_v59 = vpack.c.bf16 %v2791_v53, %v2759_v52 }
 0x2ea   :  { %7508 = vmatpush1.bf16.msra.mxu0 %v7507_v11  ;;  %7382 = vmatprep.subr.bf16.mxu1 %v7381_v12  ;;  %v2309_v11 = vld [vmem:[%s17146_s5 + $0x1628] sm:$0xff]  ;;  %v3014_v52 = vld [vmem:[%s17146_s5 + $0x2c30] sm:$0xff] }
 0x2eb   :  { %7510 = vmatprep.subr.bf16.mxu0 %v7509_v21  ;;  %v2341_v12 = vld [vmem:[%s17146_s5 + $0x1728] sm:$0xff]  ;;  %v7527_v21 = vpack.c.bf16 %v2278_v10, %v2246_v8  ;;  %v7415_v8 = vpack.c.bf16 %v2532_v24, %v2500_v63  ;;  %v2823_v63 = vld [vmem:[%s17146_s5 + $0x2638] sm:$0xff] }
 0x2ec   :  { %v7401_v23 = vpack.c.bf16 %v2341_v12, %v2309_v11  ;;  %v2564_v11 = vld [vmem:[%s17146_s5 + $0x1e20] sm:$0xff]  ;;  %v2855_v24 = vld [vmem:[%s17146_s5 + $0x2738] sm:$0xff] }
 0x2ed   :  { %7384 = vmatpush1.bf16.msra.mxu1 %v7383_v29  ;;  %v2342_v29 = vld [vmem:[%s17146_s5 + $0x1730] sm:$0xff]  ;;  %v2596_v12 = vld [vmem:[%s17146_s5 + $0x1f20] sm:$0xff]  ;;  %v7561_v7 = vpack.c.bf16 %v2855_v24, %v2823_v63 }
 0x2ee   :  { %7512 = vmatpush1.bf16.msra.mxu0 %v7511_v30  ;;  %7386 = vmatprep.subr.bf16.mxu1 %v7385_v31  ;;  %v2373_v30 = vld [vmem:[%s17146_s5 + $0x1828] sm:$0xff]  ;;  %v3078_v63 = vld [vmem:[%s17146_s5 + $0x2e30] sm:$0xff] }
 0x2ef   :  { %7514 = vmatprep.subr.bf16.mxu0 %v7513_v36  ;;  %v2405_v31 = vld [vmem:[%s17146_s5 + $0x1928] sm:$0xff]  ;;  %v7531_v36 = vpack.c.bf16 %v2342_v29, %v2310_v27  ;;  %v7419_v27 = vpack.c.bf16 %v2596_v12, %v2564_v11  ;;  %v2887_v11 = vld [vmem:[%s17146_s5 + $0x2838] sm:$0xff] }
 0x2f0   :  { %v7405_v37 = vpack.c.bf16 %v2405_v31, %v2373_v30  ;;  %v2628_v30 = vld [vmem:[%s17146_s5 + $0x2020] sm:$0xff]  ;;  %v2919_v12 = vld [vmem:[%s17146_s5 + $0x2938] sm:$0xff] }
 0x2f1   :  { %7388 = vmatpush1.bf16.msra.mxu1 %v7387_v44  ;;  %v2406_v44 = vld [vmem:[%s17146_s5 + $0x1930] sm:$0xff]  ;;  %v2660_v31 = vld [vmem:[%s17146_s5 + $0x2120] sm:$0xff]  ;;  %v7565_v26 = vpack.c.bf16 %v2919_v12, %v2887_v11 }
 0x2f2   :  { %7516 = vmatpush1.bf16.msra.mxu0 %v7515_v45  ;;  %7390 = vmatprep.subr.bf16.mxu1 %v7389_v46  ;;  %v2437_v45 = vld [vmem:[%s17146_s5 + $0x1a28] sm:$0xff]  ;;  %v7423_v39 = vpack.c.bf16 %v2660_v31, %v2628_v30  ;;  %v2951_v30 = vld [vmem:[%s17146_s5 + $0x2a38] sm:$0xff]  ;;  %v3142_v11 = vld [vmem:[%s17146_s5 + $0x3030] sm:$0xff] }
 0x2f3   :  { %7518 = vmatprep.subr.bf16.mxu0 %v7517_v50  ;;  %v2469_v46 = vld [vmem:[%s17146_s5 + $0x1b28] sm:$0xff]  ;;  %v7535_v50 = vpack.c.bf16 %v2406_v44, %v2374_v41  ;;  %v2727_v41 = vld [vmem:[%s17146_s5 + $0x2338] sm:$0xff]  ;;  %v2692_v44 = vld [vmem:[%s17146_s5 + $0x2220] sm:$0xff] }
 0x2f4   :  { %v7409_v22 = vpack.c.bf16 %v2469_v46, %v2437_v45  ;;  %v2724_v45 = vld [vmem:[%s17146_s5 + $0x2320] sm:$0xff]  ;;  %v2694_v46 = vld [vmem:[%s17146_s5 + $0x2230] sm:$0xff]  ;;  %v2983_v31 = vld [vmem:[%s17146_s5 + $0x2b38] sm:$0xff] }
 0x2f5   :  { %7392 = vmatpush1.bf16.msra.mxu1 %v7391_v55  ;;  %v2470_v55 = vld [vmem:[%s17146_s5 + $0x1b30] sm:$0xff] }
 0x2f6   :  { %7520 = vmatpush1.bf16.msra.mxu0 %v7519_v56  ;;  %7394 = vmatprep.subr.bf16.mxu1 %v7393_v57  ;;  %v2501_v56 = vld [vmem:[%s17146_s5 + $0x1c28] sm:$0xff] }
 0x2f7   :  { %7522 = vmatprep.subr.bf16.mxu0 %v7521_v61  ;;  %v2533_v57 = vld [vmem:[%s17146_s5 + $0x1d28] sm:$0xff]  ;;  %v7539_v61 = vpack.c.bf16 %v2470_v55, %v2438_v16  ;;  %v7427_v16 = vpack.c.bf16 %v2724_v45, %v2692_v44  ;;  %v3015_v45 = vld [vmem:[%s17146_s5 + $0x2c38] sm:$0xff] }
 0x2f8   :  { %v7413_v62 = vpack.c.bf16 %v2533_v57, %v2501_v56  ;;  %v2756_v56 = vld [vmem:[%s17146_s5 + $0x2420] sm:$0xff]  ;;  %v3045_v44 = vld [vmem:[%s17146_s5 + $0x2d28] sm:$0xff] }
 0x2f9   :  { %7396 = vmatpush1.bf16.msra.mxu1 %v7395_v2  ;;  %v2534_v2 = vld [vmem:[%s17146_s5 + $0x1d30] sm:$0xff]  ;;  %v2788_v57 = vld [vmem:[%s17146_s5 + $0x2520] sm:$0xff] }
 0x2fa   :  { %7524 = vmatpush1.bf16.msra.mxu0 %v7523_v3  ;;  %7398 = vmatprep.subr.bf16.mxu1 %v7397_v4  ;;  %v2565_v3 = vld [vmem:[%s17146_s5 + $0x1e28] sm:$0xff] }
 0x2fb   :  { %7526 = vmatprep.subr.bf16.mxu0 %v7525_v9  ;;  %v2597_v4 = vld [vmem:[%s17146_s5 + $0x1f28] sm:$0xff]  ;;  %v7543_v9 = vpack.c.bf16 %v2534_v2, %v2502_v0  ;;  %v7431_v0 = vpack.c.bf16 %v2788_v57, %v2756_v56  ;;  %v3079_v56 = vld [vmem:[%s17146_s5 + $0x2e38] sm:$0xff] }
 0x2fc   :  { %v7417_v10 = vpack.c.bf16 %v2597_v4, %v2565_v3  ;;  %v2820_v3 = vld [vmem:[%s17146_s5 + $0x2620] sm:$0xff]  ;;  %v3111_v57 = vld [vmem:[%s17146_s5 + $0x2f38] sm:$0xff] }
 0x2fd   :  { %7400 = vmatpush1.bf16.msra.mxu1 %v7399_v20  ;;  %v2598_v20 = vld [vmem:[%s17146_s5 + $0x1f30] sm:$0xff]  ;;  %v2852_v4 = vld [vmem:[%s17146_s5 + $0x2720] sm:$0xff]  ;;  %v7577_v24 = vpack.c.bf16 %v3111_v57, %v3079_v56 }
 0x2fe   :  { %7528 = vmatpush1.bf16.msra.mxu0 %v7527_v21  ;;  %7402 = vmatprep.subr.bf16.mxu1 %v7401_v23  ;;  %v2629_v21 = vld [vmem:[%s17146_s5 + $0x2028] sm:$0xff]  ;;  %v3334_v56 = vld [vmem:[%s17146_s5 + $0x3630] sm:$0xff] }
 0x2ff   :  { %7530 = vmatprep.subr.bf16.mxu0 %v7529_v28  ;;  %v2661_v23 = vld [vmem:[%s17146_s5 + $0x2128] sm:$0xff]  ;;  %v7547_v28 = vpack.c.bf16 %v2598_v20, %v2566_v13  ;;  %v7435_v13 = vpack.c.bf16 %v2852_v4, %v2820_v3  ;;  %v3143_v3 = vld [vmem:[%s17146_s5 + $0x3038] sm:$0xff] }
 0x300   :  { %v7421_v29 = vpack.c.bf16 %v2661_v23, %v2629_v21  ;;  %v2884_v21 = vld [vmem:[%s17146_s5 + $0x2820] sm:$0xff]  ;;  %v3175_v4 = vld [vmem:[%s17146_s5 + $0x3138] sm:$0xff] }
 0x301   :  { %7404 = vmatpush1.bf16.msra.mxu1 %v7403_v35  ;;  %v2662_v35 = vld [vmem:[%s17146_s5 + $0x2130] sm:$0xff]  ;;  %v2916_v23 = vld [vmem:[%s17146_s5 + $0x2920] sm:$0xff]  ;;  %v7581_v12 = vpack.c.bf16 %v3175_v4, %v3143_v3 }
 0x302   :  { %7532 = vmatpush1.bf16.msra.mxu0 %v7531_v36  ;;  %7406 = vmatprep.subr.bf16.mxu1 %v7405_v37  ;;  %v2693_v36 = vld [vmem:[%s17146_s5 + $0x2228] sm:$0xff]  ;;  %v3398_v3 = vld [vmem:[%s17146_s5 + $0x3830] sm:$0xff] }
 0x303   :  { %7534 = vmatprep.subr.bf16.mxu0 %v7533_v42  ;;  %v2725_v37 = vld [vmem:[%s17146_s5 + $0x2328] sm:$0xff]  ;;  %v7551_v42 = vpack.c.bf16 %v2662_v35, %v2630_v34 }
 0x304   :  { %v7425_v47 = vpack.c.bf16 %v2725_v37, %v2693_v36  ;;  %v2948_v36 = vld [vmem:[%s17146_s5 + $0x2a20] sm:$0xff] }
 0x305   :  { %7408 = vmatpush1.bf16.msra.mxu1 %v7407_v49  ;;  %v2757_v49 = vld [vmem:[%s17146_s5 + $0x2428] sm:$0xff]  ;;  %v2980_v37 = vld [vmem:[%s17146_s5 + $0x2b20] sm:$0xff] }
 0x306   :  { %7536 = vmatpush1.bf16.msra.mxu0 %v7535_v50  ;;  %7410 = vmatprep.subr.bf16.mxu1 %v7409_v22  ;;  %v2789_v50 = vld [vmem:[%s17146_s5 + $0x2528] sm:$0xff]  ;;  %v7553_v22 = vpack.c.bf16 %v2727_v41, %v2695_v40  ;;  %v7569_v40 = vpack.c.bf16 %v2983_v31, %v2951_v30  ;;  %v2982_v41 = vld [vmem:[%s17146_s5 + $0x2b30] sm:$0xff] }
 0x307   :  { %7538 = vmatprep.subr.bf16.mxu0 %v7537_v54  ;;  %v7555_v54 = vpack.c.bf16 %v2726_v48, %v2694_v46  ;;  %v7429_v55 = vpack.c.bf16 %v2789_v50, %v2757_v49  ;;  %v3047_v46 = vld [vmem:[%s17146_s5 + $0x2d38] sm:$0xff]  ;;  %v3012_v50 = vld [vmem:[%s17146_s5 + $0x2c20] sm:$0xff]  ;;  %v3206_v30 = vld [vmem:[%s17146_s5 + $0x3230] sm:$0xff] }
 0x308   :  { %v7573_v53 = vpack.c.bf16 %v3047_v46, %v3015_v45  ;;  %v3270_v45 = vld [vmem:[%s17146_s5 + $0x3430] sm:$0xff] }
 0x309   :  { %7412 = vmatpush1.bf16.msra.mxu1 %v7411_v60  ;;  %v2790_v60 = vld [vmem:[%s17146_s5 + $0x2530] sm:$0xff] }
 0x30a   :  { %7540 = vmatpush1.bf16.msra.mxu0 %v7539_v61  ;;  %7414 = vmatprep.subr.bf16.mxu1 %v7413_v62  ;;  %v2821_v61 = vld [vmem:[%s17146_s5 + $0x2628] sm:$0xff] }
 0x30b   :  { %7542 = vmatprep.subr.bf16.mxu0 %v7541_v1  ;;  %v2853_v62 = vld [vmem:[%s17146_s5 + $0x2728] sm:$0xff]  ;;  %v7559_v1 = vpack.c.bf16 %v2790_v60, %v2758_v58 }
 0x30c   :  { %v7433_v2 = vpack.c.bf16 %v2853_v62, %v2821_v61  ;;  %v3076_v61 = vld [vmem:[%s17146_s5 + $0x2e20] sm:$0xff] }
 0x30d   :  { %7416 = vmatpush1.bf16.msra.mxu1 %v7415_v8  ;;  %v2854_v8 = vld [vmem:[%s17146_s5 + $0x2730] sm:$0xff]  ;;  %v3108_v62 = vld [vmem:[%s17146_s5 + $0x2f20] sm:$0xff] }
 0x30e   :  { %7544 = vmatpush1.bf16.msra.mxu0 %v7543_v9  ;;  %7418 = vmatprep.subr.bf16.mxu1 %v7417_v10  ;;  %v2885_v9 = vld [vmem:[%s17146_s5 + $0x2828] sm:$0xff] }
 0x30f   :  { %7546 = vmatprep.subr.bf16.mxu0 %v7545_v19  ;;  %v2917_v10 = vld [vmem:[%s17146_s5 + $0x2928] sm:$0xff]  ;;  %v7563_v19 = vpack.c.bf16 %v2854_v8, %v2822_v6  ;;  %v7451_v6 = vpack.c.bf16 %v3108_v62, %v3076_v61  ;;  %v3399_v61 = vld [vmem:[%s17146_s5 + $0x3838] sm:$0xff] }
 0x310   :  { %v7437_v20 = vpack.c.bf16 %v2917_v10, %v2885_v9  ;;  %v3140_v9 = vld [vmem:[%s17146_s5 + $0x3020] sm:$0xff]  ;;  %v3431_v62 = vld [vmem:[%s17146_s5 + $0x3938] sm:$0xff] }
 0x311   :  { %7420 = vmatpush1.bf16.msra.mxu1 %v7419_v27  ;;  %v2918_v27 = vld [vmem:[%s17146_s5 + $0x2930] sm:$0xff]  ;;  %v3172_v10 = vld [vmem:[%s17146_s5 + $0x3120] sm:$0xff]  ;;  %v7597_v4 = vpack.c.bf16 %v3431_v62, %v3399_v61 }
 0x312   :  { %7548 = vmatpush1.bf16.msra.mxu0 %v7547_v28  ;;  %7422 = vmatprep.subr.bf16.mxu1 %v7421_v29  ;;  %v2949_v28 = vld [vmem:[%s17146_s5 + $0x2a28] sm:$0xff]  ;;  %v7567_v34 = vpack.c.bf16 %v2918_v27, %v2886_v25  ;;  %v7455_v25 = vpack.c.bf16 %v3172_v10, %v3140_v9  ;;  %v3463_v9 = vld [vmem:[%s17146_s5 + $0x3a38] sm:$0xff]  ;;  %v1610_v62 = vld [vmem:[%s17146_s5 + $0x50] sm:$0xff] }
 0x313   :  { %7550 = vmatprep.subr.bf16.mxu0 %v7549_v32  ;;  %v2981_v29 = vld [vmem:[%s17146_s5 + $0x2b28] sm:$0xff]  ;;  %v7439_v32 = vpack.c.bf16 %v2916_v23, %v2884_v21  ;;  %v3207_v21 = vld [vmem:[%s17146_s5 + $0x3238] sm:$0xff] }
 0x314   :  { %4165 = vmatmul.mubr.f32.vlgmr.msra.gmra.mrb[16].mxu1 %v11187_v43  ;;  %v7441_v35 = vpack.c.bf16 %v2981_v29, %v2949_v28  ;;  %v3239_v23 = vld [vmem:[%s17146_s5 + $0x3338] sm:$0xff]  ;;  %v3204_v28 = vld [vmem:[%s17146_s5 + $0x3220] sm:$0xff] }
 0x315   :  { %4307 = vmatmul.mubr.f32.vlgmr.msra.gmra.mrb[18].mxu0 %v11187_v43  ;;  %7424 = vmatpush1.bf16.msra.mxu1 %v7423_v39  ;;  %v2950_v39 = vld [vmem:[%s17146_s5 + $0x2a30] sm:$0xff]  ;;  %v3236_v29 = vld [vmem:[%s17146_s5 + $0x3320] sm:$0xff]  ;;  %v7585_v31 = vpack.c.bf16 %v3239_v23, %v3207_v21  ;;  %v3495_v10 = vld [vmem:[%s17146_s5 + $0x3b38] sm:$0xff] }
 0x316   :  { %4235 = vmatprep.mubr.f32.mxu1 %v11209_v51  ;;  %7552 = vmatpush1.bf16.msra.mxu0 %v7551_v42  ;;  %v3013_v42 = vld [vmem:[%s17146_s5 + $0x2c28] sm:$0xff]  ;;  %v7571_v48 = vpack.c.bf16 %v2982_v41, %v2950_v39  ;;  %v7459_v39 = vpack.c.bf16 %v3236_v29, %v3204_v28  ;;  %v3462_v21 = vld [vmem:[%s17146_s5 + $0x3a30] sm:$0xff]  ;;  %v7601_v23 = vpack.c.bf16 %v3495_v10, %v3463_v9  ;;  %v3527_v28 = vld [vmem:[%s17146_s5 + $0x3c38] sm:$0xff] }
 0x317   :  { %4377 = vmatprep.mubr.f32.mxu0 %v11209_v51  ;;  %7426 = vmatprep.subr.bf16.mxu1 %v7425_v47  ;;  %v7443_v47 = vpack.c.bf16 %v2980_v37, %v2948_v36  ;;  %v7445_v49 = vpack.c.bf16 %v3045_v44, %v3013_v42  ;;  %v3271_v36 = vld [vmem:[%s17146_s5 + $0x3438] sm:$0xff]  ;;  %v3268_v42 = vld [vmem:[%s17146_s5 + $0x3420] sm:$0xff]  ;;  %v1706_v10 = vld [vmem:[%s17146_s5 + $0x350] sm:$0xff] }
 0x318   :  { %7554 = vmatprep.subr.bf16.mxu0 %v7553_v22  ;;  %v3044_v22 = vld [vmem:[%s17146_s5 + $0x2d20] sm:$0xff]  ;;  %v3303_v37 = vld [vmem:[%s17146_s5 + $0x3538] sm:$0xff] }
 0x319   :  { %7428 = vmatpush1.bf16.msra.mxu1 %v7427_v16  ;;  %v3046_v16 = vld [vmem:[%s17146_s5 + $0x2d30] sm:$0xff]  ;;  %v7447_v58 = vpack.c.bf16 %v3044_v22, %v3012_v50  ;;  %v3300_v44 = vld [vmem:[%s17146_s5 + $0x3520] sm:$0xff]  ;;  %v7589_v46 = vpack.c.bf16 %v3303_v37, %v3271_v36  ;;  %v3335_v50 = vld [vmem:[%s17146_s5 + $0x3638] sm:$0xff] }
 0x31a   :  { %7556 = vmatpush1.bf16.msra.mxu0 %v7555_v54  ;;  %7430 = vmatprep.subr.bf16.mxu1 %v7429_v55  ;;  %v3077_v54 = vld [vmem:[%s17146_s5 + $0x2e28] sm:$0xff]  ;;  %v3367_v22 = vld [vmem:[%s17146_s5 + $0x3738] sm:$0xff]  ;;  %v3526_v36 = vld [vmem:[%s17146_s5 + $0x3c30] sm:$0xff] }
 0x31b   :  { %7558 = vmatprep.subr.bf16.mxu0 %v7557_v59  ;;  %v3109_v55 = vld [vmem:[%s17146_s5 + $0x2f28] sm:$0xff]  ;;  %v7575_v59 = vpack.c.bf16 %v3046_v16, %v3014_v52  ;;  %v7463_v52 = vpack.c.bf16 %v3300_v44, %v3268_v42  ;;  %v7593_v57 = vpack.c.bf16 %v3367_v22, %v3335_v50  ;;  %v3559_v29 = vld [vmem:[%s17146_s5 + $0x3d38] sm:$0xff]  ;;  %v3590_v50 = vld [vmem:[%s17146_s5 + $0x3e30] sm:$0xff] }
 0x31c   :  { %v7449_v60 = vpack.c.bf16 %v3109_v55, %v3077_v54  ;;  %v3332_v54 = vld [vmem:[%s17146_s5 + $0x3620] sm:$0xff]  ;;  %v7605_v37 = vpack.c.bf16 %v3559_v29, %v3527_v28  ;;  %v3591_v42 = vld [vmem:[%s17146_s5 + $0x3e38] sm:$0xff]  ;;  %v1738_v28 = vld [vmem:[%s17146_s5 + $0x450] sm:$0xff] }
 0x31d   :  { %7432 = vmatpush1.bf16.msra.mxu1 %v7431_v0  ;;  %v3110_v0 = vld [vmem:[%s17146_s5 + $0x2f30] sm:$0xff]  ;;  %v3364_v55 = vld [vmem:[%s17146_s5 + $0x3720] sm:$0xff]  ;;  %v3623_v44 = vld [vmem:[%s17146_s5 + $0x3f38] sm:$0xff] }
 0x31e   :  { %7560 = vmatpush1.bf16.msra.mxu0 %v7559_v1  ;;  %7434 = vmatprep.subr.bf16.mxu1 %v7433_v2  ;;  %v3141_v1 = vld [vmem:[%s17146_s5 + $0x3028] sm:$0xff]  ;;  %v7609_v22 = vpack.c.bf16 %v3623_v44, %v3591_v42  ;;  %v1802_v42 = vld [vmem:[%s17146_s5 + $0x650] sm:$0xff] }
 0x31f   :  { %7562 = vmatprep.subr.bf16.mxu0 %v7561_v7  ;;  %v3173_v2 = vld [vmem:[%s17146_s5 + $0x3128] sm:$0xff]  ;;  %v7579_v7 = vpack.c.bf16 %v3110_v0, %v3078_v63  ;;  %v7467_v63 = vpack.c.bf16 %v3364_v55, %v3332_v54  ;;  %v1611_v54 = vld [vmem:[%s17146_s5 + $0x58] sm:$0xff] }
 0x320   :  { %v7453_v8 = vpack.c.bf16 %v3173_v2, %v3141_v1  ;;  %v3396_v1 = vld [vmem:[%s17146_s5 + $0x3820] sm:$0xff]  ;;  %v1643_v55 = vld [vmem:[%s17146_s5 + $0x158] sm:$0xff] }
 0x321   :  { %7436 = vmatpush1.bf16.msra.mxu1 %v7435_v13  ;;  %v3174_v13 = vld [vmem:[%s17146_s5 + $0x3130] sm:$0xff]  ;;  %v3428_v2 = vld [vmem:[%s17146_s5 + $0x3920] sm:$0xff]  ;;  %v7741_v61 = vpack.c.bf16 %v1643_v55, %v1611_v54 }
 0x322   :  { %7564 = vmatpush1.bf16.msra.mxu0 %v7563_v19  ;;  %7438 = vmatprep.subr.bf16.mxu1 %v7437_v20  ;;  %v3205_v19 = vld [vmem:[%s17146_s5 + $0x3228] sm:$0xff]  ;;  %v1866_v54 = vld [vmem:[%s17146_s5 + $0x850] sm:$0xff] }
 0x323   :  { %7566 = vmatprep.subr.bf16.mxu0 %v7565_v26  ;;  %v3237_v20 = vld [vmem:[%s17146_s5 + $0x3328] sm:$0xff]  ;;  %v7583_v26 = vpack.c.bf16 %v3174_v13, %v3142_v11  ;;  %v7471_v11 = vpack.c.bf16 %v3428_v2, %v3396_v1  ;;  %v1675_v2 = vld [vmem:[%s17146_s5 + $0x258] sm:$0xff] }
 0x324   :  { %v7457_v27 = vpack.c.bf16 %v3237_v20, %v3205_v19  ;;  %v3460_v19 = vld [vmem:[%s17146_s5 + $0x3a20] sm:$0xff] }
 0x325   :  { %7440 = vmatpush1.bf16.msra.mxu1 %v7439_v32  ;;  %v3238_v32 = vld [vmem:[%s17146_s5 + $0x3330] sm:$0xff]  ;;  %v3492_v20 = vld [vmem:[%s17146_s5 + $0x3b20] sm:$0xff] }
 0x326   :  { %7568 = vmatpush1.bf16.msra.mxu0 %v7567_v34  ;;  %7442 = vmatprep.subr.bf16.mxu1 %v7441_v35  ;;  %v3269_v34 = vld [vmem:[%s17146_s5 + $0x3428] sm:$0xff] }
 0x327   :  { %7570 = vmatprep.subr.bf16.mxu0 %v7569_v40  ;;  %v3301_v35 = vld [vmem:[%s17146_s5 + $0x3528] sm:$0xff]  ;;  %v7587_v40 = vpack.c.bf16 %v3238_v32, %v3206_v30  ;;  %v7475_v30 = vpack.c.bf16 %v3492_v20, %v3460_v19  ;;  %v1739_v19 = vld [vmem:[%s17146_s5 + $0x458] sm:$0xff] }
 0x328   :  { %v7461_v41 = vpack.c.bf16 %v3301_v35, %v3269_v34  ;;  %v3524_v34 = vld [vmem:[%s17146_s5 + $0x3c20] sm:$0xff]  ;;  %v1771_v20 = vld [vmem:[%s17146_s5 + $0x558] sm:$0xff] }
 0x329   :  { %7444 = vmatpush1.bf16.msra.mxu1 %v7443_v47  ;;  %v3302_v47 = vld [vmem:[%s17146_s5 + $0x3530] sm:$0xff]  ;;  %v3556_v35 = vld [vmem:[%s17146_s5 + $0x3d20] sm:$0xff]  ;;  %v7749_v29 = vpack.c.bf16 %v1771_v20, %v1739_v19 }
 0x32a   :  { %7572 = vmatpush1.bf16.msra.mxu0 %v7571_v48  ;;  %7446 = vmatprep.subr.bf16.mxu1 %v7445_v49  ;;  %v3333_v48 = vld [vmem:[%s17146_s5 + $0x3628] sm:$0xff]  ;;  %v1994_v19 = vld [vmem:[%s17146_s5 + $0xc50] sm:$0xff] }
 0x32b   :  { %7574 = vmatprep.subr.bf16.mxu0 %v7573_v53  ;;  %v3365_v49 = vld [vmem:[%s17146_s5 + $0x3728] sm:$0xff]  ;;  %v7591_v53 = vpack.c.bf16 %v3302_v47, %v3270_v45  ;;  %v7479_v45 = vpack.c.bf16 %v3556_v35, %v3524_v34  ;;  %v1803_v34 = vld [vmem:[%s17146_s5 + $0x658] sm:$0xff] }
 0x32c   :  { %v7465_v16 = vpack.c.bf16 %v3365_v49, %v3333_v48  ;;  %v3588_v48 = vld [vmem:[%s17146_s5 + $0x3e20] sm:$0xff]  ;;  %v1835_v35 = vld [vmem:[%s17146_s5 + $0x758] sm:$0xff] }
 0x32d   :  { %7448 = vmatpush1.bf16.msra.mxu1 %v7447_v58  ;;  %v3366_v58 = vld [vmem:[%s17146_s5 + $0x3730] sm:$0xff]  ;;  %v3620_v49 = vld [vmem:[%s17146_s5 + $0x3f20] sm:$0xff]  ;;  %v7753_v44 = vpack.c.bf16 %v1835_v35, %v1803_v34 }
 0x32e   :  { %7576 = vmatpush1.bf16.msra.mxu0 %v7575_v59  ;;  %7450 = vmatprep.subr.bf16.mxu1 %v7449_v60  ;;  %v3397_v59 = vld [vmem:[%s17146_s5 + $0x3828] sm:$0xff]  ;;  %v2058_v34 = vld [vmem:[%s17146_s5 + $0xe50] sm:$0xff] }
 0x32f   :  { %7578 = vmatprep.subr.bf16.mxu0 %v7577_v24  ;;  %v3429_v60 = vld [vmem:[%s17146_s5 + $0x3928] sm:$0xff]  ;;  %v7595_v24 = vpack.c.bf16 %v3366_v58, %v3334_v56  ;;  %v7483_v56 = vpack.c.bf16 %v3620_v49, %v3588_v48  ;;  %v1867_v48 = vld [vmem:[%s17146_s5 + $0x858] sm:$0xff] }
 0x330   :  { %v7469_v0 = vpack.c.bf16 %v3429_v60, %v3397_v59  ;;  %v1608_v59 = vld [vmem:[%s17146_s5 + $0x40] sm:$0xff]  ;;  %v1899_v49 = vld [vmem:[%s17146_s5 + $0x958] sm:$0xff] }
 0x331   :  { %7452 = vmatpush1.bf16.msra.mxu1 %v7451_v6  ;;  %v3430_v6 = vld [vmem:[%s17146_s5 + $0x3930] sm:$0xff]  ;;  %v1640_v60 = vld [vmem:[%s17146_s5 + $0x140] sm:$0xff]  ;;  %v7757_v55 = vpack.c.bf16 %v1899_v49, %v1867_v48 }
 0x332   :  { %7580 = vmatpush1.bf16.msra.mxu0 %v7579_v7  ;;  %7454 = vmatprep.subr.bf16.mxu1 %v7453_v8  ;;  %v3461_v7 = vld [vmem:[%s17146_s5 + $0x3a28] sm:$0xff]  ;;  %v7615_v1 = vpack.c.bf16 %v1640_v60, %v1608_v59  ;;  %v1931_v59 = vld [vmem:[%s17146_s5 + $0xa58] sm:$0xff]  ;;  %v2122_v48 = vld [vmem:[%s17146_s5 + $0x1050] sm:$0xff] }
 0x333   :  { %7582 = vmatprep.subr.bf16.mxu0 %v7581_v12  ;;  %v3493_v8 = vld [vmem:[%s17146_s5 + $0x3b28] sm:$0xff]  ;;  %v7599_v12 = vpack.c.bf16 %v3430_v6, %v3398_v3  ;;  %v1707_v3 = vld [vmem:[%s17146_s5 + $0x358] sm:$0xff]  ;;  %v1672_v6 = vld [vmem:[%s17146_s5 + $0x240] sm:$0xff] }
 0x334   :  { %v7473_v13 = vpack.c.bf16 %v3493_v8, %v3461_v7  ;;  %v1704_v7 = vld [vmem:[%s17146_s5 + $0x340] sm:$0xff]  ;;  %v1674_v8 = vld [vmem:[%s17146_s5 + $0x250] sm:$0xff]  ;;  %v1963_v60 = vld [vmem:[%s17146_s5 + $0xb58] sm:$0xff] }
 0x335   :  { %7456 = vmatpush1.bf16.msra.mxu1 %v7455_v25  ;;  %v3494_v25 = vld [vmem:[%s17146_s5 + $0x3b30] sm:$0xff] }
 0x336   :  { %7584 = vmatpush1.bf16.msra.mxu0 %v7583_v26  ;;  %7458 = vmatprep.subr.bf16.mxu1 %v7457_v27  ;;  %v3525_v26 = vld [vmem:[%s17146_s5 + $0x3c28] sm:$0xff] }
 0x337   :  { %7586 = vmatprep.subr.bf16.mxu0 %v7585_v31  ;;  %v3557_v27 = vld [vmem:[%s17146_s5 + $0x3d28] sm:$0xff]  ;;  %v7603_v31 = vpack.c.bf16 %v3494_v25, %v3462_v21  ;;  %v7619_v21 = vpack.c.bf16 %v1704_v7, %v1672_v6  ;;  %v1995_v7 = vld [vmem:[%s17146_s5 + $0xc58] sm:$0xff] }
 0x338   :  { %v7477_v32 = vpack.c.bf16 %v3557_v27, %v3525_v26  ;;  %v1736_v26 = vld [vmem:[%s17146_s5 + $0x440] sm:$0xff]  ;;  %v2025_v6 = vld [vmem:[%s17146_s5 + $0xd48] sm:$0xff] }
 0x339   :  { %7460 = vmatpush1.bf16.msra.mxu1 %v7459_v39  ;;  %v3558_v39 = vld [vmem:[%s17146_s5 + $0x3d30] sm:$0xff]  ;;  %v1768_v27 = vld [vmem:[%s17146_s5 + $0x540] sm:$0xff] }
 0x33a   :  { %7588 = vmatpush1.bf16.msra.mxu0 %v7587_v40  ;;  %7462 = vmatprep.subr.bf16.mxu1 %v7461_v41  ;;  %v3589_v40 = vld [vmem:[%s17146_s5 + $0x3e28] sm:$0xff] }
 0x33b   :  { %7590 = vmatprep.subr.bf16.mxu0 %v7589_v46  ;;  %v3621_v41 = vld [vmem:[%s17146_s5 + $0x3f28] sm:$0xff]  ;;  %v7607_v46 = vpack.c.bf16 %v3558_v39, %v3526_v36  ;;  %v7623_v36 = vpack.c.bf16 %v1768_v27, %v1736_v26  ;;  %v2059_v26 = vld [vmem:[%s17146_s5 + $0xe58] sm:$0xff] }
 0x33c   :  { %v7481_v47 = vpack.c.bf16 %v3621_v41, %v3589_v40  ;;  %v1800_v40 = vld [vmem:[%s17146_s5 + $0x640] sm:$0xff]  ;;  %v2091_v27 = vld [vmem:[%s17146_s5 + $0xf58] sm:$0xff] }
 0x33d   :  { %7464 = vmatpush1.bf16.msra.mxu1 %v7463_v52  ;;  %v3622_v52 = vld [vmem:[%s17146_s5 + $0x3f30] sm:$0xff]  ;;  %v1832_v41 = vld [vmem:[%s17146_s5 + $0x740] sm:$0xff]  ;;  %v7769_v35 = vpack.c.bf16 %v2091_v27, %v2059_v26 }
 0x33e   :  { %7592 = vmatpush1.bf16.msra.mxu0 %v7591_v53  ;;  %7466 = vmatprep.subr.bf16.mxu1 %v7465_v16  ;;  %v1609_v53 = vld [vmem:[%s17146_s5 + $0x48] sm:$0xff]  ;;  %v2314_v26 = vld [vmem:[%s17146_s5 + $0x1650] sm:$0xff] }
 0x33f   :  { %7594 = vmatprep.subr.bf16.mxu0 %v7593_v57  ;;  %v1641_v16 = vld [vmem:[%s17146_s5 + $0x148] sm:$0xff]  ;;  %v7611_v57 = vpack.c.bf16 %v3622_v52, %v3590_v50  ;;  %v7627_v50 = vpack.c.bf16 %v1832_v41, %v1800_v40  ;;  %v2123_v40 = vld [vmem:[%s17146_s5 + $0x1058] sm:$0xff] }
 0x340   :  { %v7613_v58 = vpack.c.bf16 %v1641_v16, %v1609_v53  ;;  %v1864_v53 = vld [vmem:[%s17146_s5 + $0x840] sm:$0xff]  ;;  %v2155_v41 = vld [vmem:[%s17146_s5 + $0x1158] sm:$0xff] }
 0x341   :  { %7468 = vmatpush1.bf16.msra.mxu1 %v7467_v63  ;;  %v1642_v63 = vld [vmem:[%s17146_s5 + $0x150] sm:$0xff]  ;;  %v1896_v16 = vld [vmem:[%s17146_s5 + $0x940] sm:$0xff]  ;;  %v7773_v49 = vpack.c.bf16 %v2155_v41, %v2123_v40 }
 0x342   :  { %7596 = vmatpush1.bf16.msra.mxu0 %v7595_v24  ;;  %7470 = vmatprep.subr.bf16.mxu1 %v7469_v0  ;;  %v1673_v24 = vld [vmem:[%s17146_s5 + $0x248] sm:$0xff]  ;;  %v2378_v40 = vld [vmem:[%s17146_s5 + $0x1850] sm:$0xff] }
 0x343   :  { %7598 = vmatprep.subr.bf16.mxu0 %v7597_v4  ;;  %v1705_v0 = vld [vmem:[%s17146_s5 + $0x348] sm:$0xff]  ;;  %v7743_v4 = vpack.c.bf16 %v1642_v63, %v1610_v62 }
 0x344   :  { %v7617_v9 = vpack.c.bf16 %v1705_v0, %v1673_v24  ;;  %v1928_v24 = vld [vmem:[%s17146_s5 + $0xa40] sm:$0xff] }
 0x345   :  { %7472 = vmatpush1.bf16.msra.mxu1 %v7471_v11  ;;  %v1737_v11 = vld [vmem:[%s17146_s5 + $0x448] sm:$0xff]  ;;  %v1960_v0 = vld [vmem:[%s17146_s5 + $0xb40] sm:$0xff] }
 0x346   :  { %7600 = vmatpush1.bf16.msra.mxu0 %v7599_v12  ;;  %7474 = vmatprep.subr.bf16.mxu1 %v7473_v13  ;;  %v1769_v12 = vld [vmem:[%s17146_s5 + $0x548] sm:$0xff]  ;;  %v7745_v13 = vpack.c.bf16 %v1707_v3, %v1675_v2  ;;  %v7761_v2 = vpack.c.bf16 %v1963_v60, %v1931_v59  ;;  %v1962_v3 = vld [vmem:[%s17146_s5 + $0xb50] sm:$0xff] }
 0x347   :  { %7602 = vmatprep.subr.bf16.mxu0 %v7601_v23  ;;  %v7747_v23 = vpack.c.bf16 %v1706_v10, %v1674_v8  ;;  %v7621_v25 = vpack.c.bf16 %v1769_v12, %v1737_v11  ;;  %v2027_v8 = vld [vmem:[%s17146_s5 + $0xd58] sm:$0xff]  ;;  %v1992_v12 = vld [vmem:[%s17146_s5 + $0xc40] sm:$0xff]  ;;  %v2186_v59 = vld [vmem:[%s17146_s5 + $0x1250] sm:$0xff] }
 0x348   :  { %v7765_v20 = vpack.c.bf16 %v2027_v8, %v1995_v7  ;;  %v2250_v7 = vld [vmem:[%s17146_s5 + $0x1450] sm:$0xff] }
 0x349   :  { %7476 = vmatpush1.bf16.msra.mxu1 %v7475_v30  ;;  %v1770_v30 = vld [vmem:[%s17146_s5 + $0x550] sm:$0xff] }
 0x34a   :  { %7604 = vmatpush1.bf16.msra.mxu0 %v7603_v31  ;;  %7478 = vmatprep.subr.bf16.mxu1 %v7477_v32  ;;  %v1801_v31 = vld [vmem:[%s17146_s5 + $0x648] sm:$0xff] }
 0x34b   :  { %7606 = vmatprep.subr.bf16.mxu0 %v7605_v37  ;;  %v1833_v32 = vld [vmem:[%s17146_s5 + $0x748] sm:$0xff]  ;;  %v7751_v37 = vpack.c.bf16 %v1770_v30, %v1738_v28 }
 0x34c   :  { %v7625_v39 = vpack.c.bf16 %v1833_v32, %v1801_v31  ;;  %v2056_v31 = vld [vmem:[%s17146_s5 + $0xe40] sm:$0xff] }
 0x34d   :  { %7480 = vmatpush1.bf16.msra.mxu1 %v7479_v45  ;;  %v1834_v45 = vld [vmem:[%s17146_s5 + $0x750] sm:$0xff]  ;;  %v2088_v32 = vld [vmem:[%s17146_s5 + $0xf40] sm:$0xff] }
 0x34e   :  { %7608 = vmatpush1.bf16.msra.mxu0 %v7607_v46  ;;  %7482 = vmatprep.subr.bf16.mxu1 %v7481_v47  ;;  %v1865_v46 = vld [vmem:[%s17146_s5 + $0x848] sm:$0xff] }
 0x34f   :  { %7610 = vmatprep.subr.bf16.mxu0 %v7609_v22  ;;  %v1897_v47 = vld [vmem:[%s17146_s5 + $0x948] sm:$0xff]  ;;  %v7755_v22 = vpack.c.bf16 %v1834_v45, %v1802_v42  ;;  %v7643_v42 = vpack.c.bf16 %v2088_v32, %v2056_v31  ;;  %v2379_v31 = vld [vmem:[%s17146_s5 + $0x1858] sm:$0xff] }
 0x350   :  { %v7629_v52 = vpack.c.bf16 %v1897_v47, %v1865_v46  ;;  %v2120_v46 = vld [vmem:[%s17146_s5 + $0x1040] sm:$0xff]  ;;  %v2411_v32 = vld [vmem:[%s17146_s5 + $0x1958] sm:$0xff] }
 0x351   :  { %7484 = vmatpush1.bf16.msra.mxu1 %v7483_v56  ;;  %v1898_v56 = vld [vmem:[%s17146_s5 + $0x950] sm:$0xff]  ;;  %v2152_v47 = vld [vmem:[%s17146_s5 + $0x1140] sm:$0xff]  ;;  %v7789_v41 = vpack.c.bf16 %v2411_v32, %v2379_v31 }
 0x352   :  { %7612 = vmatpush1.bf16.msra.mxu0 %v7611_v57  ;;  %7614 = vmatprep.subr.bf16.mxu1 %v7613_v58  ;;  %v1929_v57 = vld [vmem:[%s17146_s5 + $0xa48] sm:$0xff]  ;;  %v7759_v62 = vpack.c.bf16 %v1898_v56, %v1866_v54  ;;  %v7647_v54 = vpack.c.bf16 %v2152_v47, %v2120_v46  ;;  %v2443_v46 = vld [vmem:[%s17146_s5 + $0x1a58] sm:$0xff]  ;;  %v2634_v32 = vld [vmem:[%s17146_s5 + $0x2050] sm:$0xff] }
 0x353   :  { %7742 = vmatprep.subr.bf16.mxu0 %v7741_v61  ;;  %v1961_v58 = vld [vmem:[%s17146_s5 + $0xb48] sm:$0xff]  ;;  %v7631_v61 = vpack.c.bf16 %v1896_v16, %v1864_v53  ;;  %v2187_v53 = vld [vmem:[%s17146_s5 + $0x1258] sm:$0xff] }
 0x354   :  { %4236 = vmatmul.mubr.f32.vlgmr.msra.gmra.mrb[16].mxu1 %v11581_v5  ;;  %v7633_v63 = vpack.c.bf16 %v1961_v58, %v1929_v57  ;;  %v2219_v16 = vld [vmem:[%s17146_s5 + $0x1358] sm:$0xff]  ;;  %v2184_v57 = vld [vmem:[%s17146_s5 + $0x1240] sm:$0xff] }
 0x355   :  { %4378 = vmatmul.mubr.f32.vlgmr.msra.gmra.mrb[18].mxu0 %v11581_v5  ;;  %7616 = vmatpush1.bf16.msra.mxu1 %v7615_v1  ;;  %v1930_v1 = vld [vmem:[%s17146_s5 + $0xa50] sm:$0xff]  ;;  %v2216_v58 = vld [vmem:[%s17146_s5 + $0x1340] sm:$0xff]  ;;  %v7777_v60 = vpack.c.bf16 %v2219_v16, %v2187_v53  ;;  %v2475_v47 = vld [vmem:[%s17146_s5 + $0x1b58] sm:$0xff] }
 0x356   :  { %4448 = vmatprep.mubr.f32.mxu1 %v11179_v38  ;;  %7744 = vmatpush1.bf16.msra.mxu0 %v7743_v4  ;;  %v1993_v4 = vld [vmem:[%s17146_s5 + $0xc48] sm:$0xff]  ;;  %v7763_v10 = vpack.c.bf16 %v1962_v3, %v1930_v1  ;;  %v7651_v1 = vpack.c.bf16 %v2216_v58, %v2184_v57  ;;  %v2442_v53 = vld [vmem:[%s17146_s5 + $0x1a50] sm:$0xff]  ;;  %v7793_v16 = vpack.c.bf16 %v2475_v47, %v2443_v46  ;;  %v2507_v57 = vld [vmem:[%s17146_s5 + $0x1c58] sm:$0xff] }
 0x357   :  { %4590 = vmatprep.mubr.f32.mxu0 %v11179_v38  ;;  %7618 = vmatprep.subr.bf16.mxu1 %v7617_v9  ;;  %v7635_v9 = vpack.c.bf16 %v1960_v0, %v1928_v24  ;;  %v7637_v11 = vpack.c.bf16 %v2025_v6, %v1993_v4  ;;  %v2251_v24 = vld [vmem:[%s17146_s5 + $0x1458] sm:$0xff]  ;;  %v2248_v4 = vld [vmem:[%s17146_s5 + $0x1440] sm:$0xff]  ;;  %v2730_v47 = vld [vmem:[%s17146_s5 + $0x2350] sm:$0xff] }
 0x358   :  { %7746 = vmatprep.subr.bf16.mxu0 %v7745_v13  ;;  %v2024_v13 = vld [vmem:[%s17146_s5 + $0xd40] sm:$0xff]  ;;  %v2283_v0 = vld [vmem:[%s17146_s5 + $0x1558] sm:$0xff] }
 0x359   :  { %7620 = vmatpush1.bf16.msra.mxu1 %v7619_v21  ;;  %v2026_v21 = vld [vmem:[%s17146_s5 + $0xd50] sm:$0xff]  ;;  %v7639_v28 = vpack.c.bf16 %v2024_v13, %v1992_v12  ;;  %v2280_v6 = vld [vmem:[%s17146_s5 + $0x1540] sm:$0xff]  ;;  %v7781_v8 = vpack.c.bf16 %v2283_v0, %v2251_v24  ;;  %v2315_v12 = vld [vmem:[%s17146_s5 + $0x1658] sm:$0xff] }
 0x35a   :  { %7748 = vmatpush1.bf16.msra.mxu0 %v7747_v23  ;;  %7622 = vmatprep.subr.bf16.mxu1 %v7621_v25  ;;  %v2057_v23 = vld [vmem:[%s17146_s5 + $0xe48] sm:$0xff]  ;;  %v2347_v13 = vld [vmem:[%s17146_s5 + $0x1758] sm:$0xff]  ;;  %v2506_v24 = vld [vmem:[%s17146_s5 + $0x1c50] sm:$0xff] }
 0x35b   :  { %7750 = vmatprep.subr.bf16.mxu0 %v7749_v29  ;;  %v2089_v25 = vld [vmem:[%s17146_s5 + $0xf48] sm:$0xff]  ;;  %v7767_v29 = vpack.c.bf16 %v2026_v21, %v1994_v19  ;;  %v7655_v19 = vpack.c.bf16 %v2280_v6, %v2248_v4  ;;  %v7785_v27 = vpack.c.bf16 %v2347_v13, %v2315_v12  ;;  %v2539_v58 = vld [vmem:[%s17146_s5 + $0x1d58] sm:$0xff]  ;;  %v2570_v12 = vld [vmem:[%s17146_s5 + $0x1e50] sm:$0xff] }
 0x35c   :  { %v7641_v30 = vpack.c.bf16 %v2089_v25, %v2057_v23  ;;  %v2312_v23 = vld [vmem:[%s17146_s5 + $0x1640] sm:$0xff]  ;;  %v7797_v0 = vpack.c.bf16 %v2539_v58, %v2507_v57  ;;  %v2571_v4 = vld [vmem:[%s17146_s5 + $0x1e58] sm:$0xff]  ;;  %v2762_v57 = vld [vmem:[%s17146_s5 + $0x2450] sm:$0xff] }
 0x35d   :  { %7624 = vmatpush1.bf16.msra.mxu1 %v7623_v36  ;;  %v2090_v36 = vld [vmem:[%s17146_s5 + $0xf50] sm:$0xff]  ;;  %v2344_v25 = vld [vmem:[%s17146_s5 + $0x1740] sm:$0xff]  ;;  %v2603_v6 = vld [vmem:[%s17146_s5 + $0x1f58] sm:$0xff] }
 0x35e   :  { %7752 = vmatpush1.bf16.msra.mxu0 %v7751_v37  ;;  %7626 = vmatprep.subr.bf16.mxu1 %v7625_v39  ;;  %v2121_v37 = vld [vmem:[%s17146_s5 + $0x1048] sm:$0xff]  ;;  %v7801_v13 = vpack.c.bf16 %v2603_v6, %v2571_v4  ;;  %v2826_v4 = vld [vmem:[%s17146_s5 + $0x2650] sm:$0xff] }
 0x35f   :  { %7754 = vmatprep.subr.bf16.mxu0 %v7753_v44  ;;  %v2153_v39 = vld [vmem:[%s17146_s5 + $0x1148] sm:$0xff]  ;;  %v7771_v44 = vpack.c.bf16 %v2090_v36, %v2058_v34  ;;  %v7659_v34 = vpack.c.bf16 %v2344_v25, %v2312_v23  ;;  %v2635_v23 = vld [vmem:[%s17146_s5 + $0x2058] sm:$0xff] }
 0x360   :  { %v7645_v45 = vpack.c.bf16 %v2153_v39, %v2121_v37  ;;  %v2376_v37 = vld [vmem:[%s17146_s5 + $0x1840] sm:$0xff]  ;;  %v2667_v25 = vld [vmem:[%s17146_s5 + $0x2158] sm:$0xff] }
 0x361   :  { %7628 = vmatpush1.bf16.msra.mxu1 %v7627_v50  ;;  %v2154_v50 = vld [vmem:[%s17146_s5 + $0x1150] sm:$0xff]  ;;  %v2408_v39 = vld [vmem:[%s17146_s5 + $0x1940] sm:$0xff]  ;;  %v7805_v31 = vpack.c.bf16 %v2667_v25, %v2635_v23 }
 0x362   :  { %7756 = vmatpush1.bf16.msra.mxu0 %v7755_v22  ;;  %7630 = vmatprep.subr.bf16.mxu1 %v7629_v52  ;;  %v2185_v22 = vld [vmem:[%s17146_s5 + $0x1248] sm:$0xff]  ;;  %v2890_v23 = vld [vmem:[%s17146_s5 + $0x2850] sm:$0xff] }
 0x363   :  { %7758 = vmatprep.subr.bf16.mxu0 %v7757_v55  ;;  %v2217_v52 = vld [vmem:[%s17146_s5 + $0x1348] sm:$0xff]  ;;  %v7775_v55 = vpack.c.bf16 %v2154_v50, %v2122_v48  ;;  %v7663_v48 = vpack.c.bf16 %v2408_v39, %v2376_v37  ;;  %v2699_v39 = vld [vmem:[%s17146_s5 + $0x2258] sm:$0xff] }
 0x364   :  { %v7649_v56 = vpack.c.bf16 %v2217_v52, %v2185_v22  ;;  %v2440_v22 = vld [vmem:[%s17146_s5 + $0x1a40] sm:$0xff] }
 0x365   :  { %7632 = vmatpush1.bf16.msra.mxu1 %v7631_v61  ;;  %v2218_v61 = vld [vmem:[%s17146_s5 + $0x1350] sm:$0xff]  ;;  %v2472_v52 = vld [vmem:[%s17146_s5 + $0x1b40] sm:$0xff] }
 0x366   :  { %7760 = vmatpush1.bf16.msra.mxu0 %v7759_v62  ;;  %7634 = vmatprep.subr.bf16.mxu1 %v7633_v63  ;;  %v2249_v62 = vld [vmem:[%s17146_s5 + $0x1448] sm:$0xff] }
 0x367   :  { %7762 = vmatprep.subr.bf16.mxu0 %v7761_v2  ;;  %v2281_v63 = vld [vmem:[%s17146_s5 + $0x1548] sm:$0xff]  ;;  %v7779_v2 = vpack.c.bf16 %v2218_v61, %v2186_v59  ;;  %v7667_v59 = vpack.c.bf16 %v2472_v52, %v2440_v22  ;;  %v2763_v22 = vld [vmem:[%s17146_s5 + $0x2458] sm:$0xff] }
 0x368   :  { %v7653_v3 = vpack.c.bf16 %v2281_v63, %v2249_v62  ;;  %v2504_v62 = vld [vmem:[%s17146_s5 + $0x1c40] sm:$0xff]  ;;  %v2795_v52 = vld [vmem:[%s17146_s5 + $0x2558] sm:$0xff] }
 0x369   :  { %7636 = vmatpush1.bf16.msra.mxu1 %v7635_v9  ;;  %v2282_v9 = vld [vmem:[%s17146_s5 + $0x1550] sm:$0xff]  ;;  %v2536_v63 = vld [vmem:[%s17146_s5 + $0x1d40] sm:$0xff]  ;;  %v7813_v58 = vpack.c.bf16 %v2795_v52, %v2763_v22 }
 0x36a   :  { %7764 = vmatpush1.bf16.msra.mxu0 %v7763_v10  ;;  %7638 = vmatprep.subr.bf16.mxu1 %v7637_v11  ;;  %v2313_v10 = vld [vmem:[%s17146_s5 + $0x1648] sm:$0xff] }
 0x36b   :  { %7766 = vmatprep.subr.bf16.mxu0 %v7765_v20  ;;  %v2345_v11 = vld [vmem:[%s17146_s5 + $0x1748] sm:$0xff]  ;;  %v7783_v20 = vpack.c.bf16 %v2282_v9, %v2250_v7  ;;  %v7671_v7 = vpack.c.bf16 %v2536_v63, %v2504_v62  ;;  %v2827_v62 = vld [vmem:[%s17146_s5 + $0x2658] sm:$0xff] }
 0x36c   :  { %v7657_v21 = vpack.c.bf16 %v2345_v11, %v2313_v10  ;;  %v2568_v10 = vld [vmem:[%s17146_s5 + $0x1e40] sm:$0xff]  ;;  %v2859_v63 = vld [vmem:[%s17146_s5 + $0x2758] sm:$0xff] }
 0x36d   :  { %7640 = vmatpush1.bf16.msra.mxu1 %v7639_v28  ;;  %v2346_v28 = vld [vmem:[%s17146_s5 + $0x1750] sm:$0xff]  ;;  %v2600_v11 = vld [vmem:[%s17146_s5 + $0x1f40] sm:$0xff]  ;;  %v7817_v6 = vpack.c.bf16 %v2859_v63, %v2827_v62 }
 0x36e   :  { %7768 = vmatpush1.bf16.msra.mxu0 %v7767_v29  ;;  %7642 = vmatprep.subr.bf16.mxu1 %v7641_v30  ;;  %v2377_v29 = vld [vmem:[%s17146_s5 + $0x1848] sm:$0xff] }
 0x36f   :  { %7770 = vmatprep.subr.bf16.mxu0 %v7769_v35  ;;  %v2409_v30 = vld [vmem:[%s17146_s5 + $0x1948] sm:$0xff]  ;;  %v7787_v35 = vpack.c.bf16 %v2346_v28, %v2314_v26  ;;  %v7675_v26 = vpack.c.bf16 %v2600_v11, %v2568_v10  ;;  %v2891_v10 = vld [vmem:[%s17146_s5 + $0x2858] sm:$0xff] }
 0x370   :  { %v7661_v36 = vpack.c.bf16 %v2409_v30, %v2377_v29  ;;  %v2632_v29 = vld [vmem:[%s17146_s5 + $0x2040] sm:$0xff]  ;;  %v2923_v11 = vld [vmem:[%s17146_s5 + $0x2958] sm:$0xff] }
 0x371   :  { %7644 = vmatpush1.bf16.msra.mxu1 %v7643_v42  ;;  %v2410_v42 = vld [vmem:[%s17146_s5 + $0x1950] sm:$0xff]  ;;  %v2664_v30 = vld [vmem:[%s17146_s5 + $0x2140] sm:$0xff]  ;;  %v7821_v25 = vpack.c.bf16 %v2923_v11, %v2891_v10 }
 0x372   :  { %7772 = vmatpush1.bf16.msra.mxu0 %v7771_v44  ;;  %7646 = vmatprep.subr.bf16.mxu1 %v7645_v45  ;;  %v2441_v44 = vld [vmem:[%s17146_s5 + $0x1a48] sm:$0xff]  ;;  %v7679_v37 = vpack.c.bf16 %v2664_v30, %v2632_v29  ;;  %v2955_v29 = vld [vmem:[%s17146_s5 + $0x2a58] sm:$0xff]  ;;  %v3080_v11 = vld [vmem:[%s17146_s5 + $0x2e40] sm:$0xff] }
 0x373   :  { %7774 = vmatprep.subr.bf16.mxu0 %v7773_v49  ;;  %v2473_v45 = vld [vmem:[%s17146_s5 + $0x1b48] sm:$0xff]  ;;  %v7791_v49 = vpack.c.bf16 %v2410_v42, %v2378_v40  ;;  %v2731_v40 = vld [vmem:[%s17146_s5 + $0x2358] sm:$0xff]  ;;  %v2696_v42 = vld [vmem:[%s17146_s5 + $0x2240] sm:$0xff] }
 0x374   :  { %v7665_v50 = vpack.c.bf16 %v2473_v45, %v2441_v44  ;;  %v2728_v44 = vld [vmem:[%s17146_s5 + $0x2340] sm:$0xff]  ;;  %v2698_v45 = vld [vmem:[%s17146_s5 + $0x2250] sm:$0xff]  ;;  %v2987_v30 = vld [vmem:[%s17146_s5 + $0x2b58] sm:$0xff] }
 0x375   :  { %7648 = vmatpush1.bf16.msra.mxu1 %v7647_v54  ;;  %v2474_v54 = vld [vmem:[%s17146_s5 + $0x1b50] sm:$0xff] }
 0x376   :  { %7776 = vmatpush1.bf16.msra.mxu0 %v7775_v55  ;;  %7650 = vmatprep.subr.bf16.mxu1 %v7649_v56  ;;  %v2505_v55 = vld [vmem:[%s17146_s5 + $0x1c48] sm:$0xff] }
 0x377   :  { %7778 = vmatprep.subr.bf16.mxu0 %v7777_v60  ;;  %v2537_v56 = vld [vmem:[%s17146_s5 + $0x1d48] sm:$0xff]  ;;  %v7795_v60 = vpack.c.bf16 %v2474_v54, %v2442_v53  ;;  %v7683_v53 = vpack.c.bf16 %v2728_v44, %v2696_v42 }
 0x378   :  { %v7669_v61 = vpack.c.bf16 %v2537_v56, %v2505_v55  ;;  %v2760_v55 = vld [vmem:[%s17146_s5 + $0x2440] sm:$0xff]  ;;  %v3017_v42 = vld [vmem:[%s17146_s5 + $0x2c48] sm:$0xff] }
 0x379   :  { %7652 = vmatpush1.bf16.msra.mxu1 %v7651_v1  ;;  %v2538_v1 = vld [vmem:[%s17146_s5 + $0x1d50] sm:$0xff]  ;;  %v2792_v56 = vld [vmem:[%s17146_s5 + $0x2540] sm:$0xff]  ;;  %v3049_v44 = vld [vmem:[%s17146_s5 + $0x2d48] sm:$0xff] }
 0x37a   :  { %7780 = vmatpush1.bf16.msra.mxu0 %v7779_v2  ;;  %7654 = vmatprep.subr.bf16.mxu1 %v7653_v3  ;;  %v2569_v2 = vld [vmem:[%s17146_s5 + $0x1e48] sm:$0xff] }
 0x37b   :  { %7782 = vmatprep.subr.bf16.mxu0 %v7781_v8  ;;  %v2601_v3 = vld [vmem:[%s17146_s5 + $0x1f48] sm:$0xff]  ;;  %v7799_v8 = vpack.c.bf16 %v2538_v1, %v2506_v24  ;;  %v7687_v24 = vpack.c.bf16 %v2792_v56, %v2760_v55  ;;  %v3018_v55 = vld [vmem:[%s17146_s5 + $0x2c50] sm:$0xff] }
 0x37c   :  { %v7673_v9 = vpack.c.bf16 %v2601_v3, %v2569_v2  ;;  %v2824_v2 = vld [vmem:[%s17146_s5 + $0x2640] sm:$0xff] }
 0x37d   :  { %7656 = vmatpush1.bf16.msra.mxu1 %v7655_v19  ;;  %v2602_v19 = vld [vmem:[%s17146_s5 + $0x1f50] sm:$0xff]  ;;  %v2856_v3 = vld [vmem:[%s17146_s5 + $0x2740] sm:$0xff] }
 0x37e   :  { %7784 = vmatpush1.bf16.msra.mxu0 %v7783_v20  ;;  %7658 = vmatprep.subr.bf16.mxu1 %v7657_v21  ;;  %v2633_v20 = vld [vmem:[%s17146_s5 + $0x2048] sm:$0xff] }
 0x37f   :  { %7786 = vmatprep.subr.bf16.mxu0 %v7785_v27  ;;  %v2665_v21 = vld [vmem:[%s17146_s5 + $0x2148] sm:$0xff]  ;;  %v7803_v27 = vpack.c.bf16 %v2602_v19, %v2570_v12  ;;  %v7691_v12 = vpack.c.bf16 %v2856_v3, %v2824_v2  ;;  %v3115_v2 = vld [vmem:[%s17146_s5 + $0x2f58] sm:$0xff] }
 0x380   :  { %v7677_v28 = vpack.c.bf16 %v2665_v21, %v2633_v20  ;;  %v2888_v20 = vld [vmem:[%s17146_s5 + $0x2840] sm:$0xff] }
 0x381   :  { %7660 = vmatpush1.bf16.msra.mxu1 %v7659_v34  ;;  %v2666_v34 = vld [vmem:[%s17146_s5 + $0x2150] sm:$0xff]  ;;  %v2920_v21 = vld [vmem:[%s17146_s5 + $0x2940] sm:$0xff] }
 0x382   :  { %7788 = vmatpush1.bf16.msra.mxu0 %v7787_v35  ;;  %7662 = vmatprep.subr.bf16.mxu1 %v7661_v36  ;;  %v2697_v35 = vld [vmem:[%s17146_s5 + $0x2248] sm:$0xff] }
 0x383   :  { %7790 = vmatprep.subr.bf16.mxu0 %v7789_v41  ;;  %v2729_v36 = vld [vmem:[%s17146_s5 + $0x2348] sm:$0xff]  ;;  %v7807_v41 = vpack.c.bf16 %v2666_v34, %v2634_v32  ;;  %v3648_v32 = vld [vmem:[%s17148_s6] sm:$0xff] }
 0x384   :  { %v7681_v46 = vpack.c.bf16 %v2729_v36, %v2697_v35  ;;  %v2952_v36 = vld [vmem:[%s17146_s5 + $0x2a40] sm:$0xff] }
 0x385   :  { %7664 = vmatpush1.bf16.msra.mxu1 %v7663_v48  ;;  %v2761_v48 = vld [vmem:[%s17146_s5 + $0x2448] sm:$0xff] }
 0x386   :  { %7792 = vmatpush1.bf16.msra.mxu0 %v7791_v49  ;;  %7666 = vmatprep.subr.bf16.mxu1 %v7665_v50  ;;  %v2793_v49 = vld [vmem:[%s17146_s5 + $0x2548] sm:$0xff]  ;;  %v7809_v50 = vpack.c.bf16 %v2731_v40, %v2699_v39  ;;  %v2954_v39 = vld [vmem:[%s17146_s5 + $0x2a50] sm:$0xff]  ;;  %v7825_v40 = vpack.c.bf16 %v2987_v30, %v2955_v29 }
 0x387   :  { %7794 = vmatprep.subr.bf16.mxu0 %v7793_v16  ;;  %v7811_v16 = vpack.c.bf16 %v2730_v47, %v2698_v45  ;;  %v7685_v54 = vpack.c.bf16 %v2793_v49, %v2761_v48  ;;  %v3659_v45 = vrot.slane %v3648_v32, %v11134_v15  ;;  %v3019_v47 = vld [vmem:[%s17146_s5 + $0x2c58] sm:$0xff]  ;;  %v3663_v49 = vrot.slane %v3648_v32, %v11142_v17 }
 0x388   :  { %v3051_v48 = vld [vmem:[%s17146_s5 + $0x2d58] sm:$0xff] }
 0x389   :  { %7668 = vmatpush1.bf16.msra.mxu1 %v7667_v59  ;;  %v2794_v59 = vld [vmem:[%s17146_s5 + $0x2550] sm:$0xff] }
 0x38a   :  { %7796 = vmatpush1.bf16.msra.mxu0 %v7795_v60  ;;  %7670 = vmatprep.subr.bf16.mxu1 %v7669_v61  ;;  %v2825_v60 = vld [vmem:[%s17146_s5 + $0x2648] sm:$0xff] }
 0x38b   :  { %7798 = vmatprep.subr.bf16.mxu0 %v7797_v0  ;;  %v2857_v61 = vld [vmem:[%s17146_s5 + $0x2748] sm:$0xff]  ;;  %v7815_v0 = vpack.c.bf16 %v2794_v59, %v2762_v57  ;;  %v3050_v59 = vld [vmem:[%s17146_s5 + $0x2d50] sm:$0xff] }
 0x38c   :  { %v7689_v1 = vpack.c.bf16 %v2857_v61, %v2825_v60  ;;  %v3081_v60 = vld [vmem:[%s17146_s5 + $0x2e48] sm:$0xff] }
 0x38d   :  { %7672 = vmatpush1.bf16.msra.mxu1 %v7671_v7  ;;  %v2858_v7 = vld [vmem:[%s17146_s5 + $0x2750] sm:$0xff]  ;;  %v3113_v61 = vld [vmem:[%s17146_s5 + $0x2f48] sm:$0xff] }
 0x38e   :  { %7800 = vmatpush1.bf16.msra.mxu0 %v7799_v8  ;;  %7674 = vmatprep.subr.bf16.mxu1 %v7673_v9  ;;  %v2889_v8 = vld [vmem:[%s17146_s5 + $0x2848] sm:$0xff]  ;;  %v7705_v10 = vpack.c.bf16 %v3113_v61, %v3081_v60  ;;  %v3274_v60 = vld [vmem:[%s17146_s5 + $0x3450] sm:$0xff] }
 0x38f   :  { %7802 = vmatprep.subr.bf16.mxu0 %v7801_v13  ;;  %v2921_v9 = vld [vmem:[%s17146_s5 + $0x2948] sm:$0xff]  ;;  %v7819_v13 = vpack.c.bf16 %v2858_v7, %v2826_v4 }
 0x390   :  { %v7693_v19 = vpack.c.bf16 %v2921_v9, %v2889_v8  ;;  %v7831_v9 = vpack.c.bf16 %v3050_v59, %v3018_v55  ;;  %v3304_v59 = vld [vmem:[%s17146_s5 + $0x3540] sm:$0xff] }
 0x391   :  { %7676 = vmatpush1.bf16.msra.mxu1 %v7675_v26  ;;  %v2922_v26 = vld [vmem:[%s17146_s5 + $0x2950] sm:$0xff] }
 0x392   :  { %7804 = vmatpush1.bf16.msra.mxu0 %v7803_v27  ;;  %7678 = vmatprep.subr.bf16.mxu1 %v7677_v28  ;;  %v2953_v27 = vld [vmem:[%s17146_s5 + $0x2a48] sm:$0xff]  ;;  %v7823_v34 = vpack.c.bf16 %v2922_v26, %v2890_v23  ;;  %v3114_v23 = vld [vmem:[%s17146_s5 + $0x2f50] sm:$0xff] }
 0x393   :  { %7806 = vmatprep.subr.bf16.mxu0 %v7805_v31  ;;  %v2985_v28 = vld [vmem:[%s17146_s5 + $0x2b48] sm:$0xff]  ;;  %v7695_v31 = vpack.c.bf16 %v2920_v21, %v2888_v20 }
 0x394   :  { %4449 = vmatmul.mubr.f32.vlgmr.msra.gmra.mrb[18].mxu1 %v11187_v43  ;;  %v7697_v35 = vpack.c.bf16 %v2985_v28, %v2953_v27  ;;  %v3177_v26 = vld [vmem:[%s17146_s5 + $0x3148] sm:$0xff]  ;;  %v3147_v27 = vld [vmem:[%s17146_s5 + $0x3058] sm:$0xff] }
 0x395   :  { %4591 = vmatmul.mubr.f32.vlgmr.msra.gmra.mrb[20].mxu0 %v11187_v43  ;;  %7680 = vmatpush1.bf16.msra.mxu1 %v7679_v37  ;;  %v2984_v37 = vld [vmem:[%s17146_s5 + $0x2b40] sm:$0xff]  ;;  %v3179_v28 = vld [vmem:[%s17146_s5 + $0x3158] sm:$0xff] }
 0x396   :  { %4519 = vmatprep.mubr.f32.mxu1 %v11209_v51  ;;  %7808 = vmatpush1.bf16.msra.mxu0 %v7807_v41  ;;  %v2986_v41 = vld [vmem:[%s17146_s5 + $0x2b50] sm:$0xff]  ;;  %v7699_v22 = vpack.c.bf16 %v2984_v37, %v2952_v36  ;;  %v7837_v36 = vpack.c.bf16 %v3179_v28, %v3147_v27 }
 0x397   :  { %4661 = vmatprep.mubr.f32.mxu0 %v11209_v51  ;;  %7682 = vmatprep.subr.bf16.mxu1 %v7681_v46  ;;  %v3667_v46 = vrot.slane %v3648_v32, %v11510_v33  ;;  %v7827_v52 = vpack.c.bf16 %v2986_v41, %v2954_v39  ;;  %v3178_v37 = vld [vmem:[%s17146_s5 + $0x3150] sm:$0xff]  ;;  %v3209_v39 = vld [vmem:[%s17146_s5 + $0x3248] sm:$0xff]  ;;  %v3211_v41 = vld [vmem:[%s17146_s5 + $0x3258] sm:$0xff] }
 0x398   :  { %7810 = vmatprep.subr.bf16.mxu0 %v7809_v50  ;;  %v3671_v50 = vrot.slane %v3648_v32, %v11145_v18  ;;  %v3144_v32 = vld [vmem:[%s17146_s5 + $0x3040] sm:$0xff]  ;;  %v3402_v27 = vld [vmem:[%s17146_s5 + $0x3850] sm:$0xff] }
 0x399   :  { %7684 = vmatpush1.bf16.msra.mxu1 %v7683_v53  ;;  %v7701_v53 = vpack.c.bf16 %v3049_v44, %v3017_v42  ;;  %v3243_v42 = vld [vmem:[%s17146_s5 + $0x3358] sm:$0xff] }
 0x39a   :  { %7812 = vmatpush1.bf16.msra.mxu0 %v7811_v16  ;;  %7686 = vmatprep.subr.bf16.mxu1 %v7685_v54  ;;  %v3016_v16 = vld [vmem:[%s17146_s5 + $0x2c40] sm:$0xff] }
 0x39b   :  { %7814 = vmatprep.subr.bf16.mxu0 %v7813_v58  ;;  %v3048_v54 = vld [vmem:[%s17146_s5 + $0x2d40] sm:$0xff]  ;;  %v7829_v58 = vpack.c.bf16 %v3051_v48, %v3019_v47 }
 0x39c   :  { %v3208_v47 = vld [vmem:[%s17146_s5 + $0x3240] sm:$0xff] }
 0x39d   :  { %7688 = vmatpush1.bf16.msra.mxu1 %v7687_v24  ;;  %v3240_v48 = vld [vmem:[%s17146_s5 + $0x3340] sm:$0xff] }
 0x39e   :  { %7816 = vmatpush1.bf16.msra.mxu0 %v7815_v0  ;;  %7690 = vmatprep.subr.bf16.mxu1 %v7689_v1  ;;  %v3083_v1 = vld [vmem:[%s17146_s5 + $0x2e58] sm:$0xff]  ;;  %v7715_v55 = vpack.c.bf16 %v3240_v48, %v3208_v47 }
 0x39f   :  { %7818 = vmatprep.subr.bf16.mxu0 %v7817_v6  ;;  %v7703_v6 = vpack.c.bf16 %v3048_v54, %v3016_v16  ;;  %v7833_v21 = vpack.c.bf16 %v3115_v2, %v3083_v1  ;;  %v3275_v16 = vld [vmem:[%s17146_s5 + $0x3458] sm:$0xff] }
 0x3a0   :  { %v3307_v54 = vld [vmem:[%s17146_s5 + $0x3558] sm:$0xff] }
 0x3a1   :  { %7692 = vmatpush1.bf16.msra.mxu1 %v7691_v12  ;;  %v3112_v12 = vld [vmem:[%s17146_s5 + $0x2f40] sm:$0xff]  ;;  %v7845_v61 = vpack.c.bf16 %v3307_v54, %v3275_v16  ;;  %v3371_v1 = vld [vmem:[%s17146_s5 + $0x3758] sm:$0xff]  ;;  %v3530_v16 = vld [vmem:[%s17146_s5 + $0x3c50] sm:$0xff] }
 0x3a2   :  { %7820 = vmatpush1.bf16.msra.mxu0 %v7819_v13  ;;  %7694 = vmatprep.subr.bf16.mxu1 %v7693_v19  ;;  %v3082_v13 = vld [vmem:[%s17146_s5 + $0x2e50] sm:$0xff]  ;;  %v7707_v29 = vpack.c.bf16 %v3112_v12, %v3080_v11  ;;  %v3401_v11 = vld [vmem:[%s17146_s5 + $0x3848] sm:$0xff]  ;;  %v3531_v47 = vld [vmem:[%s17146_s5 + $0x3c58] sm:$0xff] }
 0x3a3   :  { %7822 = vmatprep.subr.bf16.mxu0 %v7821_v25  ;;  %v3145_v25 = vld [vmem:[%s17146_s5 + $0x3048] sm:$0xff]  ;;  %v7835_v30 = vpack.c.bf16 %v3114_v23, %v3082_v13  ;;  %v3403_v13 = vld [vmem:[%s17146_s5 + $0x3858] sm:$0xff] }
 0x3a4   :  { %v3433_v12 = vld [vmem:[%s17146_s5 + $0x3948] sm:$0xff]  ;;  %v3563_v48 = vld [vmem:[%s17146_s5 + $0x3d58] sm:$0xff] }
 0x3a5   :  { %7696 = vmatpush1.bf16.msra.mxu1 %v7695_v31  ;;  %v7709_v31 = vpack.c.bf16 %v3177_v26, %v3145_v25  ;;  %v7725_v23 = vpack.c.bf16 %v3433_v12, %v3401_v11  ;;  %v3400_v25 = vld [vmem:[%s17146_s5 + $0x3840] sm:$0xff]  ;;  %v7861_v54 = vpack.c.bf16 %v3563_v48, %v3531_v47  ;;  %v1742_v47 = vld [vmem:[%s17146_s5 + $0x470] sm:$0xff] }
 0x3a6   :  { %7824 = vmatpush1.bf16.msra.mxu0 %v7823_v34  ;;  %7698 = vmatprep.subr.bf16.mxu1 %v7697_v35  ;;  %v3176_v34 = vld [vmem:[%s17146_s5 + $0x3140] sm:$0xff]  ;;  %v3146_v35 = vld [vmem:[%s17146_s5 + $0x3050] sm:$0xff] }
 0x3a7   :  { %v3953_v56 = vpop.f32.mrb[14].mxu1  ;;  %v4095_v57 = vpop.f32.mrb[16].mxu0  ;;  %7826 = vmatprep.subr.bf16.mxu0 %v7825_v40  ;;  %v3241_v40 = vld [vmem:[%s17146_s5 + $0x3348] sm:$0xff]  ;;  %v7711_v44 = vpack.c.bf16 %v3176_v34, %v3144_v32  ;;  %v3432_v26 = vld [vmem:[%s17146_s5 + $0x3940] sm:$0xff]  ;;  %v3467_v32 = vld [vmem:[%s17146_s5 + $0x3a58] sm:$0xff] }
 0x3a8   :  { %v9149_v62 = vadd.f32 %v3953_v56, %v3659_v45  ;;  %v9151_v63 = vadd.f32 %v4095_v57, %v3667_v46  ;;  %v3955_v24 = vpop.f32.mrb[15].mxu1  ;;  %v4097_v0 = vpop.f32.mrb[17].mxu0  ;;  %v7839_v45 = vpack.c.bf16 %v3178_v37, %v3146_v35  ;;  %v7713_v46 = vpack.c.bf16 %v3241_v40, %v3209_v39  ;;  %v3499_v34 = vld [vmem:[%s17146_s5 + $0x3b58] sm:$0xff]  ;;  %v3464_v39 = vld [vmem:[%s17146_s5 + $0x3a40] sm:$0xff] }
 0x3a9   :  { %v9150_v3 = vadd.f32 %v3955_v24, %v3663_v49  ;;  %v9152_v4 = vadd.f32 %v4097_v0, %v3671_v50  ;;  %7700 = vmatpush1.bf16.msra.mxu1 %v7699_v22  ;;  %v3210_v49 = vld [vmem:[%s17146_s5 + $0x3250] sm:$0xff]  ;;  %v7841_v50 = vpack.c.bf16 %v3243_v42, %v3211_v41  ;;  %v3369_v24 = vld [vmem:[%s17146_s5 + $0x3748] sm:$0xff]  ;;  %v3339_v0 = vld [vmem:[%s17146_s5 + $0x3658] sm:$0xff]  ;;  %v7727_v35 = vpack.c.bf16 %v3432_v26, %v3400_v25 }
 0x3aa   :  { %v6088_v7 = vmax.f32 %v9149_v62, 0.0  ;;  %v6090_v8 = vmax.f32 %v9151_v63, 0.0  ;;  %7828 = vmatpush1.bf16.msra.mxu0 %v7827_v52  ;;  %7702 = vmatprep.subr.bf16.mxu1 %v7701_v53  ;;  %v3242_v22 = vld [vmem:[%s17146_s5 + $0x3350] sm:$0xff]  ;;  %v3273_v52 = vld [vmem:[%s17146_s5 + $0x3448] sm:$0xff]  ;;  %v3496_v40 = vld [vmem:[%s17146_s5 + $0x3b40] sm:$0xff]  ;;  %v7857_v42 = vpack.c.bf16 %v3499_v34, %v3467_v32 }
 0x3ab   :  { %v6089_v19 = vmax.f32 %v9150_v3, 0.0  ;;  %v6091_v20 = vmax.f32 %v9152_v4, 0.0  ;;  %7830 = vmatprep.subr.bf16.mxu0 %v7829_v58  ;;  %v3305_v53 = vld [vmem:[%s17146_s5 + $0x3548] sm:$0xff]  ;;  %v7843_v56 = vpack.c.bf16 %v3242_v22, %v3210_v49  ;;  %v3272_v58 = vld [vmem:[%s17146_s5 + $0x3440] sm:$0xff]  ;;  %v3306_v62 = vld [vmem:[%s17146_s5 + $0x3550] sm:$0xff]  ;;  %v7731_v49 = vpack.c.bf16 %v3496_v40, %v3464_v39 }
 0x3ac   :  { %6120 = vst [vmem:[%s17149_s7] sm:$0xff] %v6088_v7  ;;  %6122 = vst [vmem:[%s17149_s7 + $0x10] sm:$0xff] %v6090_v8  ;;  %v7717_v57 = vpack.c.bf16 %v3305_v53, %v3273_v52  ;;  %v3337_v63 = vld [vmem:[%s17146_s5 + $0x3648] sm:$0xff]  ;;  %v7719_v2 = vpack.c.bf16 %v3304_v59, %v3272_v58  ;;  %v7847_v3 = vpack.c.bf16 %v3306_v62, %v3274_v60  ;;  %v3368_v7 = vld [vmem:[%s17146_s5 + $0x3740] sm:$0xff] }
 0x3ad   :  { %6121 = vst [vmem:[%s17149_s7 + $0x8] sm:$0xff] %v6089_v19  ;;  %6123 = vst [vmem:[%s17149_s7 + $0x18] sm:$0xff] %v6091_v20  ;;  %7704 = vmatpush1.bf16.msra.mxu1 %v7703_v6  ;;  %v7721_v4 = vpack.c.bf16 %v3369_v24, %v3337_v63  ;;  %v3336_v6 = vld [vmem:[%s17146_s5 + $0x3640] sm:$0xff]  ;;  %v3338_v8 = vld [vmem:[%s17146_s5 + $0x3650] sm:$0xff] }
 0x3ae   :  { %7832 = vmatpush1.bf16.msra.mxu0 %v7831_v9  ;;  %7706 = vmatprep.subr.bf16.mxu1 %v7705_v10  ;;  %v7849_v9 = vpack.c.bf16 %v3371_v1, %v3339_v0  ;;  %v3370_v10 = vld [vmem:[%s17146_s5 + $0x3750] sm:$0xff]  ;;  %v3435_v19 = vld [vmem:[%s17146_s5 + $0x3958] sm:$0xff]  ;;  %v7723_v20 = vpack.c.bf16 %v3368_v7, %v3336_v6  ;;  %v3528_v52 = vld [vmem:[%s17146_s5 + $0x3c40] sm:$0xff] }
 0x3af   :  { %7834 = vmatprep.subr.bf16.mxu0 %v7833_v21  ;;  %v7851_v21 = vpack.c.bf16 %v3370_v10, %v3338_v8  ;;  %v7853_v28 = vpack.c.bf16 %v3435_v19, %v3403_v13  ;;  %v3466_v41 = vld [vmem:[%s17146_s5 + $0x3a50] sm:$0xff]  ;;  %v3560_v53 = vld [vmem:[%s17146_s5 + $0x3d40] sm:$0xff]  ;;  %v3595_v58 = vld [vmem:[%s17146_s5 + $0x3e58] sm:$0xff] }
 0x3b0   :  { %v3627_v59 = vld [vmem:[%s17146_s5 + $0x3f58] sm:$0xff]  ;;  %v7735_v60 = vpack.c.bf16 %v3560_v53, %v3528_v52  ;;  %v3592_v63 = vld [vmem:[%s17146_s5 + $0x3e40] sm:$0xff]  ;;  %v3594_v0 = vld [vmem:[%s17146_s5 + $0x3e50] sm:$0xff] }
 0x3b1   :  { %7708 = vmatpush1.bf16.msra.mxu1 %v7707_v29  ;;  %v3434_v29 = vld [vmem:[%s17146_s5 + $0x3950] sm:$0xff]  ;;  %v3624_v24 = vld [vmem:[%s17146_s5 + $0x3f40] sm:$0xff]  ;;  %v7865_v1 = vpack.c.bf16 %v3627_v59, %v3595_v58  ;;  %v1615_v6 = vld [vmem:[%s17146_s5 + $0x78] sm:$0xff] }
 0x3b2   :  { %7836 = vmatpush1.bf16.msra.mxu0 %v7835_v30  ;;  %7710 = vmatprep.subr.bf16.mxu1 %v7709_v31  ;;  %v3465_v30 = vld [vmem:[%s17146_s5 + $0x3a48] sm:$0xff]  ;;  %v1647_v7 = vld [vmem:[%s17146_s5 + $0x178] sm:$0xff]  ;;  %v7739_v8 = vpack.c.bf16 %v3624_v24, %v3592_v63  ;;  %v1612_v11 = vld [vmem:[%s17146_s5 + $0x60] sm:$0xff] }
 0x3b3   :  { %7838 = vmatprep.subr.bf16.mxu0 %v7837_v36  ;;  %v3497_v31 = vld [vmem:[%s17146_s5 + $0x3b48] sm:$0xff]  ;;  %v7855_v36 = vpack.c.bf16 %v3434_v29, %v3402_v27  ;;  %v1644_v12 = vld [vmem:[%s17146_s5 + $0x160] sm:$0xff]  ;;  %v7997_v13 = vpack.c.bf16 %v1647_v7, %v1615_v6  ;;  %v1614_v19 = vld [vmem:[%s17146_s5 + $0x70] sm:$0xff] }
 0x3b4   :  { %v7729_v37 = vpack.c.bf16 %v3497_v31, %v3465_v30  ;;  %v7871_v25 = vpack.c.bf16 %v1644_v12, %v1612_v11  ;;  %v1679_v26 = vld [vmem:[%s17146_s5 + $0x278] sm:$0xff]  ;;  %v1676_v29 = vld [vmem:[%s17146_s5 + $0x260] sm:$0xff]  ;;  %v1678_v31 = vld [vmem:[%s17146_s5 + $0x270] sm:$0xff] }
 0x3b5   :  { %7712 = vmatpush1.bf16.msra.mxu1 %v7711_v44  ;;  %v3498_v44 = vld [vmem:[%s17146_s5 + $0x3b50] sm:$0xff]  ;;  %v1711_v27 = vld [vmem:[%s17146_s5 + $0x378] sm:$0xff]  ;;  %v1708_v30 = vld [vmem:[%s17146_s5 + $0x360] sm:$0xff] }
 0x3b6   :  { %7840 = vmatpush1.bf16.msra.mxu0 %v7839_v45  ;;  %7714 = vmatprep.subr.bf16.mxu1 %v7713_v46  ;;  %v3529_v45 = vld [vmem:[%s17146_s5 + $0x3c48] sm:$0xff]  ;;  %v1710_v34 = vld [vmem:[%s17146_s5 + $0x370] sm:$0xff]  ;;  %v1743_v39 = vld [vmem:[%s17146_s5 + $0x478] sm:$0xff] }
 0x3b7   :  { %7842 = vmatprep.subr.bf16.mxu0 %v7841_v50  ;;  %v3561_v46 = vld [vmem:[%s17146_s5 + $0x3d48] sm:$0xff]  ;;  %v7859_v50 = vpack.c.bf16 %v3498_v44, %v3466_v41  ;;  %v1775_v40 = vld [vmem:[%s17146_s5 + $0x578] sm:$0xff]  ;;  %v7875_v41 = vpack.c.bf16 %v1708_v30, %v1676_v29  ;;  %v1806_v58 = vld [vmem:[%s17146_s5 + $0x670] sm:$0xff] }
 0x3b8   :  { %v7733_v22 = vpack.c.bf16 %v3561_v46, %v3529_v45  ;;  %v1740_v45 = vld [vmem:[%s17146_s5 + $0x460] sm:$0xff]  ;;  %v8005_v48 = vpack.c.bf16 %v1775_v40, %v1743_v39  ;;  %v1807_v52 = vld [vmem:[%s17146_s5 + $0x678] sm:$0xff]  ;;  %v1870_v6 = vld [vmem:[%s17146_s5 + $0x870] sm:$0xff] }
 0x3b9   :  { %7716 = vmatpush1.bf16.msra.mxu1 %v7715_v55  ;;  %v3562_v55 = vld [vmem:[%s17146_s5 + $0x3d50] sm:$0xff]  ;;  %v1772_v46 = vld [vmem:[%s17146_s5 + $0x560] sm:$0xff]  ;;  %v1839_v53 = vld [vmem:[%s17146_s5 + $0x778] sm:$0xff] }
 0x3ba   :  { %7844 = vmatpush1.bf16.msra.mxu0 %v7843_v56  ;;  %7718 = vmatprep.subr.bf16.mxu1 %v7717_v57  ;;  %v3593_v56 = vld [vmem:[%s17146_s5 + $0x3e48] sm:$0xff]  ;;  %v8009_v59 = vpack.c.bf16 %v1839_v53, %v1807_v52  ;;  %v1871_v63 = vld [vmem:[%s17146_s5 + $0x878] sm:$0xff]  ;;  %v1998_v39 = vld [vmem:[%s17146_s5 + $0xc70] sm:$0xff] }
 0x3bb   :  { %7846 = vmatprep.subr.bf16.mxu0 %v7845_v61  ;;  %v3625_v57 = vld [vmem:[%s17146_s5 + $0x3f48] sm:$0xff]  ;;  %v7863_v61 = vpack.c.bf16 %v3562_v55, %v3530_v16  ;;  %v7879_v16 = vpack.c.bf16 %v1772_v46, %v1740_v45  ;;  %v1903_v24 = vld [vmem:[%s17146_s5 + $0x978] sm:$0xff]  ;;  %v2062_v52 = vld [vmem:[%s17146_s5 + $0xe70] sm:$0xff] }
 0x3bc   :  { %v7737_v62 = vpack.c.bf16 %v3625_v57, %v3593_v56  ;;  %v1804_v56 = vld [vmem:[%s17146_s5 + $0x660] sm:$0xff]  ;;  %v8013_v7 = vpack.c.bf16 %v1903_v24, %v1871_v63  ;;  %v1935_v11 = vld [vmem:[%s17146_s5 + $0xa78] sm:$0xff]  ;;  %v2029_v29 = vld [vmem:[%s17146_s5 + $0xd68] sm:$0xff] }
 0x3bd   :  { %7720 = vmatpush1.bf16.msra.mxu1 %v7719_v2  ;;  %v3626_v2 = vld [vmem:[%s17146_s5 + $0x3f50] sm:$0xff]  ;;  %v1836_v57 = vld [vmem:[%s17146_s5 + $0x760] sm:$0xff]  ;;  %v1967_v12 = vld [vmem:[%s17146_s5 + $0xb78] sm:$0xff] }
 0x3be   :  { %7848 = vmatpush1.bf16.msra.mxu0 %v7847_v3  ;;  %7722 = vmatprep.subr.bf16.mxu1 %v7721_v4  ;;  %v1613_v3 = vld [vmem:[%s17146_s5 + $0x68] sm:$0xff]  ;;  %v1999_v30 = vld [vmem:[%s17146_s5 + $0xc78] sm:$0xff]  ;;  %v2126_v63 = vld [vmem:[%s17146_s5 + $0x1070] sm:$0xff] }
 0x3bf   :  { %7850 = vmatprep.subr.bf16.mxu0 %v7849_v9  ;;  %v1645_v4 = vld [vmem:[%s17146_s5 + $0x168] sm:$0xff]  ;;  %v7867_v9 = vpack.c.bf16 %v3626_v2, %v3594_v0  ;;  %v7883_v0 = vpack.c.bf16 %v1836_v57, %v1804_v56  ;;  %v2063_v45 = vld [vmem:[%s17146_s5 + $0xe78] sm:$0xff] }
 0x3c0   :  { %v7869_v10 = vpack.c.bf16 %v1645_v4, %v1613_v3  ;;  %v1868_v3 = vld [vmem:[%s17146_s5 + $0x860] sm:$0xff]  ;;  %v2095_v46 = vld [vmem:[%s17146_s5 + $0xf78] sm:$0xff] }
 0x3c1   :  { %7724 = vmatpush1.bf16.msra.mxu1 %v7723_v20  ;;  %v1646_v20 = vld [vmem:[%s17146_s5 + $0x170] sm:$0xff]  ;;  %v1900_v4 = vld [vmem:[%s17146_s5 + $0x960] sm:$0xff]  ;;  %v8025_v53 = vpack.c.bf16 %v2095_v46, %v2063_v45  ;;  %v2127_v56 = vld [vmem:[%s17146_s5 + $0x1078] sm:$0xff] }
 0x3c2   :  { %7852 = vmatpush1.bf16.msra.mxu0 %v7851_v21  ;;  %7726 = vmatprep.subr.bf16.mxu1 %v7725_v23  ;;  %v1677_v21 = vld [vmem:[%s17146_s5 + $0x268] sm:$0xff]  ;;  %v2159_v57 = vld [vmem:[%s17146_s5 + $0x1178] sm:$0xff]  ;;  %v2318_v45 = vld [vmem:[%s17146_s5 + $0x1670] sm:$0xff] }
 0x3c3   :  { %7854 = vmatprep.subr.bf16.mxu0 %v7853_v28  ;;  %v1709_v23 = vld [vmem:[%s17146_s5 + $0x368] sm:$0xff]  ;;  %v7999_v28 = vpack.c.bf16 %v1646_v20, %v1614_v19  ;;  %v8029_v24 = vpack.c.bf16 %v2159_v57, %v2127_v56  ;;  %v2382_v56 = vld [vmem:[%s17146_s5 + $0x1870] sm:$0xff] }
 0x3c4   :  { %v7873_v32 = vpack.c.bf16 %v1709_v23, %v1677_v21  ;;  %v1932_v21 = vld [vmem:[%s17146_s5 + $0xa60] sm:$0xff] }
 0x3c5   :  { %7728 = vmatpush1.bf16.msra.mxu1 %v7727_v35  ;;  %v1741_v35 = vld [vmem:[%s17146_s5 + $0x468] sm:$0xff]  ;;  %v1964_v23 = vld [vmem:[%s17146_s5 + $0xb60] sm:$0xff] }
 0x3c6   :  { %7856 = vmatpush1.bf16.msra.mxu0 %v7855_v36  ;;  %7730 = vmatprep.subr.bf16.mxu1 %v7729_v37  ;;  %v1773_v36 = vld [vmem:[%s17146_s5 + $0x568] sm:$0xff]  ;;  %v8001_v37 = vpack.c.bf16 %v1711_v27, %v1679_v26  ;;  %v8017_v26 = vpack.c.bf16 %v1967_v12, %v1935_v11  ;;  %v1966_v27 = vld [vmem:[%s17146_s5 + $0xb70] sm:$0xff] }
 0x3c7   :  { %7858 = vmatprep.subr.bf16.mxu0 %v7857_v42  ;;  %v8003_v42 = vpack.c.bf16 %v1710_v34, %v1678_v31  ;;  %v7877_v44 = vpack.c.bf16 %v1773_v36, %v1741_v35  ;;  %v2031_v31 = vld [vmem:[%s17146_s5 + $0xd78] sm:$0xff]  ;;  %v1996_v36 = vld [vmem:[%s17146_s5 + $0xc60] sm:$0xff]  ;;  %v2190_v11 = vld [vmem:[%s17146_s5 + $0x1270] sm:$0xff] }
 0x3c8   :  { %v8021_v40 = vpack.c.bf16 %v2031_v31, %v1999_v30  ;;  %v2254_v30 = vld [vmem:[%s17146_s5 + $0x1470] sm:$0xff] }
 0x3c9   :  { %7732 = vmatpush1.bf16.msra.mxu1 %v7731_v49  ;;  %v1774_v49 = vld [vmem:[%s17146_s5 + $0x570] sm:$0xff] }
 0x3ca   :  { %7860 = vmatpush1.bf16.msra.mxu0 %v7859_v50  ;;  %7734 = vmatprep.subr.bf16.mxu1 %v7733_v22  ;;  %v1805_v50 = vld [vmem:[%s17146_s5 + $0x668] sm:$0xff] }
 0x3cb   :  { %7862 = vmatprep.subr.bf16.mxu0 %v7861_v54  ;;  %v1837_v22 = vld [vmem:[%s17146_s5 + $0x768] sm:$0xff]  ;;  %v8007_v54 = vpack.c.bf16 %v1774_v49, %v1742_v47 }
 0x3cc   :  { %v7881_v55 = vpack.c.bf16 %v1837_v22, %v1805_v50  ;;  %v2060_v50 = vld [vmem:[%s17146_s5 + $0xe60] sm:$0xff] }
 0x3cd   :  { %7736 = vmatpush1.bf16.msra.mxu1 %v7735_v60  ;;  %v1838_v60 = vld [vmem:[%s17146_s5 + $0x770] sm:$0xff]  ;;  %v2092_v22 = vld [vmem:[%s17146_s5 + $0xf60] sm:$0xff] }
 0x3ce   :  { %7864 = vmatpush1.bf16.msra.mxu0 %v7863_v61  ;;  %7738 = vmatprep.subr.bf16.mxu1 %v7737_v62  ;;  %v1869_v61 = vld [vmem:[%s17146_s5 + $0x868] sm:$0xff] }
 0x3cf   :  { %7866 = vmatprep.subr.bf16.mxu0 %v7865_v1  ;;  %v1901_v62 = vld [vmem:[%s17146_s5 + $0x968] sm:$0xff]  ;;  %v8011_v1 = vpack.c.bf16 %v1838_v60, %v1806_v58  ;;  %v7899_v58 = vpack.c.bf16 %v2092_v22, %v2060_v50  ;;  %v2383_v50 = vld [vmem:[%s17146_s5 + $0x1878] sm:$0xff] }
 0x3d0   :  { %v7885_v2 = vpack.c.bf16 %v1901_v62, %v1869_v61  ;;  %v2124_v61 = vld [vmem:[%s17146_s5 + $0x1060] sm:$0xff]  ;;  %v2415_v22 = vld [vmem:[%s17146_s5 + $0x1978] sm:$0xff] }
 0x3d1   :  { %7740 = vmatpush1.bf16.msra.mxu1 %v7739_v8  ;;  %v1902_v8 = vld [vmem:[%s17146_s5 + $0x970] sm:$0xff]  ;;  %v2156_v62 = vld [vmem:[%s17146_s5 + $0x1160] sm:$0xff]  ;;  %v8045_v57 = vpack.c.bf16 %v2415_v22, %v2383_v50 }
 0x3d2   :  { %7868 = vmatpush1.bf16.msra.mxu0 %v7867_v9  ;;  %7870 = vmatprep.subr.bf16.mxu1 %v7869_v10  ;;  %v1933_v9 = vld [vmem:[%s17146_s5 + $0xa68] sm:$0xff]  ;;  %v8015_v19 = vpack.c.bf16 %v1902_v8, %v1870_v6  ;;  %v7903_v6 = vpack.c.bf16 %v2156_v62, %v2124_v61  ;;  %v2447_v61 = vld [vmem:[%s17146_s5 + $0x1a78] sm:$0xff]  ;;  %v2638_v22 = vld [vmem:[%s17146_s5 + $0x2070] sm:$0xff] }
 0x3d3   :  { %7998 = vmatprep.subr.bf16.mxu0 %v7997_v13  ;;  %v1965_v10 = vld [vmem:[%s17146_s5 + $0xb68] sm:$0xff]  ;;  %v7887_v13 = vpack.c.bf16 %v1900_v4, %v1868_v3  ;;  %v2191_v3 = vld [vmem:[%s17146_s5 + $0x1278] sm:$0xff] }
 0x3d4   :  { %4520 = vmatmul.mubr.f32.vlgmr.msra.gmra.mrb[18].mxu1 %v11581_v5  ;;  %v7889_v20 = vpack.c.bf16 %v1965_v10, %v1933_v9  ;;  %v2223_v4 = vld [vmem:[%s17146_s5 + $0x1378] sm:$0xff]  ;;  %v2188_v9 = vld [vmem:[%s17146_s5 + $0x1260] sm:$0xff] }
 0x3d5   :  { %4662 = vmatmul.mubr.f32.vlgmr.msra.gmra.mrb[20].mxu0 %v11581_v5  ;;  %7872 = vmatpush1.bf16.msra.mxu1 %v7871_v25  ;;  %v1934_v25 = vld [vmem:[%s17146_s5 + $0xa70] sm:$0xff]  ;;  %v2220_v10 = vld [vmem:[%s17146_s5 + $0x1360] sm:$0xff]  ;;  %v8033_v12 = vpack.c.bf16 %v2223_v4, %v2191_v3  ;;  %v2479_v62 = vld [vmem:[%s17146_s5 + $0x1b78] sm:$0xff] }
 0x3d6   :  { %4732 = vmatprep.mubr.f32.mxu1 %v11179_v38  ;;  %8000 = vmatpush1.bf16.msra.mxu0 %v7999_v28  ;;  %v1997_v28 = vld [vmem:[%s17146_s5 + $0xc68] sm:$0xff]  ;;  %v8019_v34 = vpack.c.bf16 %v1966_v27, %v1934_v25  ;;  %v7907_v25 = vpack.c.bf16 %v2220_v10, %v2188_v9  ;;  %v2446_v3 = vld [vmem:[%s17146_s5 + $0x1a70] sm:$0xff]  ;;  %v8049_v4 = vpack.c.bf16 %v2479_v62, %v2447_v61  ;;  %v2511_v9 = vld [vmem:[%s17146_s5 + $0x1c78] sm:$0xff] }
 0x3d7   :  { %4874 = vmatprep.mubr.f32.mxu0 %v11179_v38  ;;  %7874 = vmatprep.subr.bf16.mxu1 %v7873_v32  ;;  %v7891_v32 = vpack.c.bf16 %v1964_v23, %v1932_v21  ;;  %v7893_v35 = vpack.c.bf16 %v2029_v29, %v1997_v28  ;;  %v2255_v21 = vld [vmem:[%s17146_s5 + $0x1478] sm:$0xff]  ;;  %v2252_v28 = vld [vmem:[%s17146_s5 + $0x1460] sm:$0xff]  ;;  %v2734_v62 = vld [vmem:[%s17146_s5 + $0x2370] sm:$0xff] }
 0x3d8   :  { %8002 = vmatprep.subr.bf16.mxu0 %v8001_v37  ;;  %v2028_v37 = vld [vmem:[%s17146_s5 + $0xd60] sm:$0xff]  ;;  %v2287_v23 = vld [vmem:[%s17146_s5 + $0x1578] sm:$0xff] }
 0x3d9   :  { %7876 = vmatpush1.bf16.msra.mxu1 %v7875_v41  ;;  %v2030_v41 = vld [vmem:[%s17146_s5 + $0xd70] sm:$0xff]  ;;  %v7895_v47 = vpack.c.bf16 %v2028_v37, %v1996_v36  ;;  %v2284_v29 = vld [vmem:[%s17146_s5 + $0x1560] sm:$0xff]  ;;  %v8037_v31 = vpack.c.bf16 %v2287_v23, %v2255_v21  ;;  %v2319_v36 = vld [vmem:[%s17146_s5 + $0x1678] sm:$0xff] }
 0x3da   :  { %8004 = vmatpush1.bf16.msra.mxu0 %v8003_v42  ;;  %7878 = vmatprep.subr.bf16.mxu1 %v7877_v44  ;;  %v2061_v42 = vld [vmem:[%s17146_s5 + $0xe68] sm:$0xff]  ;;  %v2351_v37 = vld [vmem:[%s17146_s5 + $0x1778] sm:$0xff]  ;;  %v2510_v21 = vld [vmem:[%s17146_s5 + $0x1c70] sm:$0xff] }
 0x3db   :  { %8006 = vmatprep.subr.bf16.mxu0 %v8005_v48  ;;  %v2093_v44 = vld [vmem:[%s17146_s5 + $0xf68] sm:$0xff]  ;;  %v8023_v48 = vpack.c.bf16 %v2030_v41, %v1998_v39  ;;  %v7911_v39 = vpack.c.bf16 %v2284_v29, %v2252_v28  ;;  %v8041_v46 = vpack.c.bf16 %v2351_v37, %v2319_v36  ;;  %v2543_v10 = vld [vmem:[%s17146_s5 + $0x1d78] sm:$0xff]  ;;  %v2574_v36 = vld [vmem:[%s17146_s5 + $0x1e70] sm:$0xff] }
 0x3dc   :  { %v7897_v49 = vpack.c.bf16 %v2093_v44, %v2061_v42  ;;  %v2316_v42 = vld [vmem:[%s17146_s5 + $0x1660] sm:$0xff]  ;;  %v8053_v23 = vpack.c.bf16 %v2543_v10, %v2511_v9  ;;  %v2575_v28 = vld [vmem:[%s17146_s5 + $0x1e78] sm:$0xff]  ;;  %v2766_v9 = vld [vmem:[%s17146_s5 + $0x2470] sm:$0xff] }
 0x3dd   :  { %7880 = vmatpush1.bf16.msra.mxu1 %v7879_v16  ;;  %v2094_v16 = vld [vmem:[%s17146_s5 + $0xf70] sm:$0xff]  ;;  %v2348_v44 = vld [vmem:[%s17146_s5 + $0x1760] sm:$0xff]  ;;  %v2607_v29 = vld [vmem:[%s17146_s5 + $0x1f78] sm:$0xff] }
 0x3de   :  { %8008 = vmatpush1.bf16.msra.mxu0 %v8007_v54  ;;  %7882 = vmatprep.subr.bf16.mxu1 %v7881_v55  ;;  %v2125_v54 = vld [vmem:[%s17146_s5 + $0x1068] sm:$0xff]  ;;  %v8057_v37 = vpack.c.bf16 %v2607_v29, %v2575_v28  ;;  %v2830_v28 = vld [vmem:[%s17146_s5 + $0x2670] sm:$0xff] }
 0x3df   :  { %8010 = vmatprep.subr.bf16.mxu0 %v8009_v59  ;;  %v2157_v55 = vld [vmem:[%s17146_s5 + $0x1168] sm:$0xff]  ;;  %v8027_v59 = vpack.c.bf16 %v2094_v16, %v2062_v52  ;;  %v7915_v52 = vpack.c.bf16 %v2348_v44, %v2316_v42  ;;  %v2639_v42 = vld [vmem:[%s17146_s5 + $0x2078] sm:$0xff] }
 0x3e0   :  { %v7901_v60 = vpack.c.bf16 %v2157_v55, %v2125_v54  ;;  %v2380_v54 = vld [vmem:[%s17146_s5 + $0x1860] sm:$0xff]  ;;  %v2671_v44 = vld [vmem:[%s17146_s5 + $0x2178] sm:$0xff] }
 0x3e1   :  { %7884 = vmatpush1.bf16.msra.mxu1 %v7883_v0  ;;  %v2158_v0 = vld [vmem:[%s17146_s5 + $0x1170] sm:$0xff]  ;;  %v2412_v55 = vld [vmem:[%s17146_s5 + $0x1960] sm:$0xff]  ;;  %v8061_v50 = vpack.c.bf16 %v2671_v44, %v2639_v42 }
 0x3e2   :  { %8012 = vmatpush1.bf16.msra.mxu0 %v8011_v1  ;;  %7886 = vmatprep.subr.bf16.mxu1 %v7885_v2  ;;  %v2189_v1 = vld [vmem:[%s17146_s5 + $0x1268] sm:$0xff]  ;;  %v2894_v42 = vld [vmem:[%s17146_s5 + $0x2870] sm:$0xff] }
 0x3e3   :  { %8014 = vmatprep.subr.bf16.mxu0 %v8013_v7  ;;  %v2221_v2 = vld [vmem:[%s17146_s5 + $0x1368] sm:$0xff]  ;;  %v8031_v7 = vpack.c.bf16 %v2158_v0, %v2126_v63  ;;  %v7919_v63 = vpack.c.bf16 %v2412_v55, %v2380_v54  ;;  %v2703_v55 = vld [vmem:[%s17146_s5 + $0x2278] sm:$0xff] }
 0x3e4   :  { %v7905_v8 = vpack.c.bf16 %v2221_v2, %v2189_v1  ;;  %v2444_v1 = vld [vmem:[%s17146_s5 + $0x1a60] sm:$0xff] }
 0x3e5   :  { %7888 = vmatpush1.bf16.msra.mxu1 %v7887_v13  ;;  %v2222_v13 = vld [vmem:[%s17146_s5 + $0x1370] sm:$0xff]  ;;  %v2476_v2 = vld [vmem:[%s17146_s5 + $0x1b60] sm:$0xff] }
 0x3e6   :  { %8016 = vmatpush1.bf16.msra.mxu0 %v8015_v19  ;;  %7890 = vmatprep.subr.bf16.mxu1 %v7889_v20  ;;  %v2253_v19 = vld [vmem:[%s17146_s5 + $0x1468] sm:$0xff] }
 0x3e7   :  { %8018 = vmatprep.subr.bf16.mxu0 %v8017_v26  ;;  %v2285_v20 = vld [vmem:[%s17146_s5 + $0x1568] sm:$0xff]  ;;  %v8035_v26 = vpack.c.bf16 %v2222_v13, %v2190_v11  ;;  %v7923_v11 = vpack.c.bf16 %v2476_v2, %v2444_v1  ;;  %v2767_v1 = vld [vmem:[%s17146_s5 + $0x2478] sm:$0xff] }
 0x3e8   :  { %v7909_v27 = vpack.c.bf16 %v2285_v20, %v2253_v19  ;;  %v2508_v19 = vld [vmem:[%s17146_s5 + $0x1c60] sm:$0xff]  ;;  %v2799_v2 = vld [vmem:[%s17146_s5 + $0x2578] sm:$0xff] }
 0x3e9   :  { %7892 = vmatpush1.bf16.msra.mxu1 %v7891_v32  ;;  %v2286_v32 = vld [vmem:[%s17146_s5 + $0x1570] sm:$0xff]  ;;  %v2540_v20 = vld [vmem:[%s17146_s5 + $0x1d60] sm:$0xff]  ;;  %v8069_v10 = vpack.c.bf16 %v2799_v2, %v2767_v1 }
 0x3ea   :  { %8020 = vmatpush1.bf16.msra.mxu0 %v8019_v34  ;;  %7894 = vmatprep.subr.bf16.mxu1 %v7893_v35  ;;  %v2317_v34 = vld [vmem:[%s17146_s5 + $0x1668] sm:$0xff] }
 0x3eb   :  { %8022 = vmatprep.subr.bf16.mxu0 %v8021_v40  ;;  %v2349_v35 = vld [vmem:[%s17146_s5 + $0x1768] sm:$0xff]  ;;  %v8039_v40 = vpack.c.bf16 %v2286_v32, %v2254_v30  ;;  %v7927_v30 = vpack.c.bf16 %v2540_v20, %v2508_v19  ;;  %v2831_v19 = vld [vmem:[%s17146_s5 + $0x2678] sm:$0xff] }
 0x3ec   :  { %v7913_v41 = vpack.c.bf16 %v2349_v35, %v2317_v34  ;;  %v2572_v34 = vld [vmem:[%s17146_s5 + $0x1e60] sm:$0xff]  ;;  %v2863_v20 = vld [vmem:[%s17146_s5 + $0x2778] sm:$0xff] }
 0x3ed   :  { %7896 = vmatpush1.bf16.msra.mxu1 %v7895_v47  ;;  %v2350_v47 = vld [vmem:[%s17146_s5 + $0x1770] sm:$0xff]  ;;  %v2604_v35 = vld [vmem:[%s17146_s5 + $0x1f60] sm:$0xff]  ;;  %v8073_v29 = vpack.c.bf16 %v2863_v20, %v2831_v19  ;;  %v3085_v19 = vld [vmem:[%s17146_s5 + $0x2e68] sm:$0xff] }
 0x3ee   :  { %8024 = vmatpush1.bf16.msra.mxu0 %v8023_v48  ;;  %7898 = vmatprep.subr.bf16.mxu1 %v7897_v49  ;;  %v2381_v48 = vld [vmem:[%s17146_s5 + $0x1868] sm:$0xff] }
 0x3ef   :  { %8026 = vmatprep.subr.bf16.mxu0 %v8025_v53  ;;  %v2413_v49 = vld [vmem:[%s17146_s5 + $0x1968] sm:$0xff]  ;;  %v8043_v53 = vpack.c.bf16 %v2350_v47, %v2318_v45  ;;  %v7931_v45 = vpack.c.bf16 %v2604_v35, %v2572_v34  ;;  %v2895_v34 = vld [vmem:[%s17146_s5 + $0x2878] sm:$0xff] }
 0x3f0   :  { %v7917_v16 = vpack.c.bf16 %v2413_v49, %v2381_v48  ;;  %v2636_v48 = vld [vmem:[%s17146_s5 + $0x2060] sm:$0xff]  ;;  %v2927_v35 = vld [vmem:[%s17146_s5 + $0x2978] sm:$0xff]  ;;  %v3117_v20 = vld [vmem:[%s17146_s5 + $0x2f68] sm:$0xff] }
 0x3f1   :  { %7900 = vmatpush1.bf16.msra.mxu1 %v7899_v58  ;;  %v2414_v58 = vld [vmem:[%s17146_s5 + $0x1970] sm:$0xff]  ;;  %v2668_v49 = vld [vmem:[%s17146_s5 + $0x2160] sm:$0xff]  ;;  %v8077_v44 = vpack.c.bf16 %v2927_v35, %v2895_v34 }
 0x3f2   :  { %8028 = vmatpush1.bf16.msra.mxu0 %v8027_v59  ;;  %7902 = vmatprep.subr.bf16.mxu1 %v7901_v60  ;;  %v2445_v59 = vld [vmem:[%s17146_s5 + $0x1a68] sm:$0xff]  ;;  %v7935_v54 = vpack.c.bf16 %v2668_v49, %v2636_v48  ;;  %v13637_v48 = vsub.s32 4, %v11131_v14  ;;  %v2959_v49 = vld [vmem:[%s17146_s5 + $0x2a78] sm:$0xff] }
 0x3f3   :  { %8030 = vmatprep.subr.bf16.mxu0 %v8029_v24  ;;  %v2477_v60 = vld [vmem:[%s17146_s5 + $0x1b68] sm:$0xff]  ;;  %v8047_v24 = vpack.c.bf16 %v2414_v58, %v2382_v56  ;;  %v2735_v56 = vld [vmem:[%s17146_s5 + $0x2378] sm:$0xff]  ;;  %v2700_v58 = vld [vmem:[%s17146_s5 + $0x2260] sm:$0xff] }
 0x3f4   :  { %v7921_v0 = vpack.c.bf16 %v2477_v60, %v2445_v59  ;;  %v2732_v59 = vld [vmem:[%s17146_s5 + $0x2360] sm:$0xff]  ;;  %v2702_v60 = vld [vmem:[%s17146_s5 + $0x2270] sm:$0xff] }
 0x3f5   :  { %7904 = vmatpush1.bf16.msra.mxu1 %v7903_v6  ;;  %v2478_v6 = vld [vmem:[%s17146_s5 + $0x1b70] sm:$0xff] }
 0x3f6   :  { %8032 = vmatpush1.bf16.msra.mxu0 %v8031_v7  ;;  %7906 = vmatprep.subr.bf16.mxu1 %v7905_v8  ;;  %v2509_v7 = vld [vmem:[%s17146_s5 + $0x1c68] sm:$0xff] }
 0x3f7   :  { %8034 = vmatprep.subr.bf16.mxu0 %v8033_v12  ;;  %v2541_v8 = vld [vmem:[%s17146_s5 + $0x1d68] sm:$0xff]  ;;  %v8051_v12 = vpack.c.bf16 %v2478_v6, %v2446_v3  ;;  %v7939_v3 = vpack.c.bf16 %v2732_v59, %v2700_v58  ;;  %v2958_v58 = vld [vmem:[%s17146_s5 + $0x2a70] sm:$0xff] }
 0x3f8   :  { %v7925_v13 = vpack.c.bf16 %v2541_v8, %v2509_v7  ;;  %v2764_v7 = vld [vmem:[%s17146_s5 + $0x2460] sm:$0xff] }
 0x3f9   :  { %7908 = vmatpush1.bf16.msra.mxu1 %v7907_v25  ;;  %v2542_v25 = vld [vmem:[%s17146_s5 + $0x1d70] sm:$0xff]  ;;  %v2796_v8 = vld [vmem:[%s17146_s5 + $0x2560] sm:$0xff] }
 0x3fa   :  { %8036 = vmatpush1.bf16.msra.mxu0 %v8035_v26  ;;  %7910 = vmatprep.subr.bf16.mxu1 %v7909_v27  ;;  %v2573_v26 = vld [vmem:[%s17146_s5 + $0x1e68] sm:$0xff] }
 0x3fb   :  { %8038 = vmatprep.subr.bf16.mxu0 %v8037_v31  ;;  %v2605_v27 = vld [vmem:[%s17146_s5 + $0x1f68] sm:$0xff]  ;;  %v8055_v31 = vpack.c.bf16 %v2542_v25, %v2510_v21  ;;  %v7943_v21 = vpack.c.bf16 %v2796_v8, %v2764_v7  ;;  %v3020_v8 = vld [vmem:[%s17146_s5 + $0x2c60] sm:$0xff] }
 0x3fc   :  { %v7929_v32 = vpack.c.bf16 %v2605_v27, %v2573_v26  ;;  %v2828_v26 = vld [vmem:[%s17146_s5 + $0x2660] sm:$0xff] }
 0x3fd   :  { %7912 = vmatpush1.bf16.msra.mxu1 %v7911_v39  ;;  %v2606_v39 = vld [vmem:[%s17146_s5 + $0x1f70] sm:$0xff]  ;;  %v2860_v27 = vld [vmem:[%s17146_s5 + $0x2760] sm:$0xff] }
 0x3fe   :  { %8040 = vmatpush1.bf16.msra.mxu0 %v8039_v40  ;;  %7914 = vmatprep.subr.bf16.mxu1 %v7913_v41  ;;  %v2637_v40 = vld [vmem:[%s17146_s5 + $0x2068] sm:$0xff] }
 0x3ff   :  { %8042 = vmatprep.subr.bf16.mxu0 %v8041_v46  ;;  %v2669_v41 = vld [vmem:[%s17146_s5 + $0x2168] sm:$0xff]  ;;  %v8059_v46 = vpack.c.bf16 %v2606_v39, %v2574_v36  ;;  %v7947_v36 = vpack.c.bf16 %v2860_v27, %v2828_v26  ;;  %v3087_v26 = vld [vmem:[%s17146_s5 + $0x2e78] sm:$0xff] }
 0x400   :  { %v7933_v47 = vpack.c.bf16 %v2669_v41, %v2637_v40  ;;  %v2892_v40 = vld [vmem:[%s17146_s5 + $0x2860] sm:$0xff]  ;;  %v3119_v27 = vld [vmem:[%s17146_s5 + $0x2f78] sm:$0xff] }
 0x401   :  { %7916 = vmatpush1.bf16.msra.mxu1 %v7915_v52  ;;  %v2670_v52 = vld [vmem:[%s17146_s5 + $0x2170] sm:$0xff]  ;;  %v2924_v41 = vld [vmem:[%s17146_s5 + $0x2960] sm:$0xff] }
 0x402   :  { %8044 = vmatpush1.bf16.msra.mxu0 %v8043_v53  ;;  %7918 = vmatprep.subr.bf16.mxu1 %v7917_v16  ;;  %v2701_v53 = vld [vmem:[%s17146_s5 + $0x2268] sm:$0xff] }
 0x403   :  { %8046 = vmatprep.subr.bf16.mxu0 %v8045_v57  ;;  %v2733_v16 = vld [vmem:[%s17146_s5 + $0x2368] sm:$0xff]  ;;  %v8063_v57 = vpack.c.bf16 %v2670_v52, %v2638_v22  ;;  %v7951_v22 = vpack.c.bf16 %v2924_v41, %v2892_v40  ;;  %v13646_v52 = vsub.s32 6, %v11131_v14  ;;  %v3086_v40 = vld [vmem:[%s17146_s5 + $0x2e70] sm:$0xff] }
 0x404   :  { %v7937_v61 = vpack.c.bf16 %v2733_v16, %v2701_v53  ;;  %v13649_v53 = vsub.s32 5, %v11131_v14 }
 0x405   :  { %7920 = vmatpush1.bf16.msra.mxu1 %v7919_v63  ;;  %v2765_v63 = vld [vmem:[%s17146_s5 + $0x2468] sm:$0xff] }
 0x406   :  { %8048 = vmatpush1.bf16.msra.mxu0 %v8047_v24  ;;  %7922 = vmatprep.subr.bf16.mxu1 %v7921_v0  ;;  %v2797_v24 = vld [vmem:[%s17146_s5 + $0x2568] sm:$0xff]  ;;  %v8065_v0 = vpack.c.bf16 %v2735_v56, %v2703_v55  ;;  %v2956_v56 = vld [vmem:[%s17146_s5 + $0x2a60] sm:$0xff] }
 0x407   :  { %8050 = vmatprep.subr.bf16.mxu0 %v8049_v4  ;;  %v8067_v4 = vpack.c.bf16 %v2734_v62, %v2702_v60  ;;  %v7941_v6 = vpack.c.bf16 %v2797_v24, %v2765_v63  ;;  %v3021_v60 = vld [vmem:[%s17146_s5 + $0x2c68] sm:$0xff]  ;;  %v9216_v62 = vld [vmem:[%s17148_s6] sm:$0xff]  ;;  %v3023_v24 = vld [vmem:[%s17146_s5 + $0x2c78] sm:$0xff] }
 0x408   :  { %v3675_v63 = vrot.slane %v9216_v62, %v13637_v48  ;;  %v3683_v1 = vrot.slane %v9216_v62, %v13646_v52  ;;  %v3679_v2 = vrot.slane %v9216_v62, %v13649_v53 }
 0x409   :  { %7924 = vmatpush1.bf16.msra.mxu1 %v7923_v11  ;;  %v2798_v11 = vld [vmem:[%s17146_s5 + $0x2570] sm:$0xff] }
 0x40a   :  { %8052 = vmatpush1.bf16.msra.mxu0 %v8051_v12  ;;  %7926 = vmatprep.subr.bf16.mxu1 %v7925_v13  ;;  %v2829_v12 = vld [vmem:[%s17146_s5 + $0x2668] sm:$0xff] }
 0x40b   :  { %8054 = vmatprep.subr.bf16.mxu0 %v8053_v23  ;;  %v2861_v13 = vld [vmem:[%s17146_s5 + $0x2768] sm:$0xff]  ;;  %v8071_v23 = vpack.c.bf16 %v2798_v11, %v2766_v9  ;;  %v3052_v9 = vld [vmem:[%s17146_s5 + $0x2d60] sm:$0xff] }
 0x40c   :  { %v7945_v25 = vpack.c.bf16 %v2861_v13, %v2829_v12  ;;  %v3054_v13 = vld [vmem:[%s17146_s5 + $0x2d70] sm:$0xff] }
 0x40d   :  { %7928 = vmatpush1.bf16.msra.mxu1 %v7927_v30  ;;  %v2862_v30 = vld [vmem:[%s17146_s5 + $0x2770] sm:$0xff] }
 0x40e   :  { %8056 = vmatpush1.bf16.msra.mxu0 %v8055_v31  ;;  %7930 = vmatprep.subr.bf16.mxu1 %v7929_v32  ;;  %v2893_v31 = vld [vmem:[%s17146_s5 + $0x2868] sm:$0xff] }
 0x40f   :  { %8058 = vmatprep.subr.bf16.mxu0 %v8057_v37  ;;  %v2925_v32 = vld [vmem:[%s17146_s5 + $0x2968] sm:$0xff]  ;;  %v8075_v37 = vpack.c.bf16 %v2862_v30, %v2830_v28 }
 0x410   :  { %v7949_v39 = vpack.c.bf16 %v2925_v32, %v2893_v31  ;;  %v7959_v31 = vpack.c.bf16 %v3052_v9, %v3020_v8  ;;  %v3246_v8 = vld [vmem:[%s17146_s5 + $0x3370] sm:$0xff]  ;;  %v3277_v9 = vld [vmem:[%s17146_s5 + $0x3468] sm:$0xff] }
 0x411   :  { %7932 = vmatpush1.bf16.msra.mxu1 %v7931_v45  ;;  %v2926_v45 = vld [vmem:[%s17146_s5 + $0x2970] sm:$0xff] }
 0x412   :  { %8060 = vmatpush1.bf16.msra.mxu0 %v8059_v46  ;;  %7934 = vmatprep.subr.bf16.mxu1 %v7933_v47  ;;  %v2957_v46 = vld [vmem:[%s17146_s5 + $0x2a68] sm:$0xff]  ;;  %v8079_v16 = vpack.c.bf16 %v2926_v45, %v2894_v42  ;;  %v3118_v45 = vld [vmem:[%s17146_s5 + $0x2f70] sm:$0xff] }
 0x413   :  { %8062 = vmatprep.subr.bf16.mxu0 %v8061_v50  ;;  %v2989_v47 = vld [vmem:[%s17146_s5 + $0x2b68] sm:$0xff]  ;;  %v2991_v50 = vld [vmem:[%s17146_s5 + $0x2b78] sm:$0xff] }
 0x414   :  { %4733 = vmatmul.mubr.f32.vlgmr.msra.gmra.mrb[20].mxu1 %v11187_v43  ;;  %v7953_v55 = vpack.c.bf16 %v2989_v47, %v2957_v46  ;;  %v8081_v59 = vpack.c.bf16 %v2991_v50, %v2959_v49  ;;  %v3149_v46 = vld [vmem:[%s17146_s5 + $0x3068] sm:$0xff]  ;;  %v3151_v50 = vld [vmem:[%s17146_s5 + $0x3078] sm:$0xff] }
 0x415   :  { %4875 = vmatmul.mubr.f32.vlgmr.msra.gmra.mrb[22].mxu0 %v11187_v43  ;;  %7936 = vmatpush1.bf16.msra.mxu1 %v7935_v54  ;;  %v13652_v54 = vsub.s32 7, %v11131_v14  ;;  %v2990_v14 = vld [vmem:[%s17146_s5 + $0x2b70] sm:$0xff]  ;;  %v3181_v47 = vld [vmem:[%s17146_s5 + $0x3168] sm:$0xff] }
 0x416   :  { %4803 = vmatprep.mubr.f32.mxu1 %v11209_v51  ;;  %8064 = vmatpush1.bf16.msra.mxu0 %v8063_v57  ;;  %v2988_v57 = vld [vmem:[%s17146_s5 + $0x2b60] sm:$0xff] }
 0x417   :  { %4945 = vmatprep.mubr.f32.mxu0 %v11209_v51  ;;  %7938 = vmatprep.subr.bf16.mxu1 %v7937_v61  ;;  %v3053_v61 = vld [vmem:[%s17146_s5 + $0x2d68] sm:$0xff] }
 0x418   :  { %8066 = vmatprep.subr.bf16.mxu0 %v8065_v0  ;;  %v3055_v0 = vld [vmem:[%s17146_s5 + $0x2d78] sm:$0xff]  ;;  %v7957_v7 = vpack.c.bf16 %v3053_v61, %v3021_v60  ;;  %v3182_v60 = vld [vmem:[%s17146_s5 + $0x3170] sm:$0xff]  ;;  %v3213_v61 = vld [vmem:[%s17146_s5 + $0x3268] sm:$0xff] }
 0x419   :  { %7940 = vmatpush1.bf16.msra.mxu1 %v7939_v3  ;;  %v7955_v3 = vpack.c.bf16 %v2988_v57, %v2956_v56  ;;  %v8085_v12 = vpack.c.bf16 %v3055_v0, %v3023_v24  ;;  %v7965_v56 = vpack.c.bf16 %v3181_v47, %v3149_v46  ;;  %v3148_v57 = vld [vmem:[%s17146_s5 + $0x3060] sm:$0xff]  ;;  %v3247_v24 = vld [vmem:[%s17146_s5 + $0x3378] sm:$0xff] }
 0x41a   :  { %8068 = vmatpush1.bf16.msra.mxu0 %v8067_v4  ;;  %7942 = vmatprep.subr.bf16.mxu1 %v7941_v6  ;;  %v3687_v4 = vrot.slane %v9216_v62, %v13652_v54  ;;  %v8083_v6 = vpack.c.bf16 %v2990_v14, %v2958_v58  ;;  %v3180_v58 = vld [vmem:[%s17146_s5 + $0x3160] sm:$0xff]  ;;  %v3245_v62 = vld [vmem:[%s17146_s5 + $0x3368] sm:$0xff]  ;;  %v3439_v46 = vld [vmem:[%s17146_s5 + $0x3978] sm:$0xff] }
 0x41b   :  { %8070 = vmatprep.subr.bf16.mxu0 %v8069_v10  ;;  %v3022_v10 = vld [vmem:[%s17146_s5 + $0x2c70] sm:$0xff]  ;;  %v7967_v0 = vpack.c.bf16 %v3180_v58, %v3148_v57  ;;  %v3469_v58 = vld [vmem:[%s17146_s5 + $0x3a68] sm:$0xff] }
 0x41c   :  { %v8087_v35 = vpack.c.bf16 %v3054_v13, %v3022_v10  ;;  %v3309_v10 = vld [vmem:[%s17146_s5 + $0x3568] sm:$0xff]  ;;  %v3438_v57 = vld [vmem:[%s17146_s5 + $0x3970] sm:$0xff] }
 0x41d   :  { %7944 = vmatpush1.bf16.msra.mxu1 %v7943_v21 }
 0x41e   :  { %8072 = vmatpush1.bf16.msra.mxu0 %v8071_v23  ;;  %7946 = vmatprep.subr.bf16.mxu1 %v7945_v25 }
 0x41f   :  { %8074 = vmatprep.subr.bf16.mxu0 %v8073_v29 }
 0x421   :  { %7948 = vmatpush1.bf16.msra.mxu1 %v7947_v36  ;;  %v7961_v36 = vpack.c.bf16 %v3117_v20, %v3085_v19  ;;  %v7973_v20 = vpack.c.bf16 %v3309_v10, %v3277_v9 }
 0x422   :  { %8076 = vmatpush1.bf16.msra.mxu0 %v8075_v37  ;;  %7950 = vmatprep.subr.bf16.mxu1 %v7949_v39  ;;  %v3084_v37 = vld [vmem:[%s17146_s5 + $0x2e60] sm:$0xff] }
 0x423   :  { %8078 = vmatprep.subr.bf16.mxu0 %v8077_v44  ;;  %v3116_v39 = vld [vmem:[%s17146_s5 + $0x2f60] sm:$0xff]  ;;  %v8089_v44 = vpack.c.bf16 %v3119_v27, %v3087_v26  ;;  %v3310_v27 = vld [vmem:[%s17146_s5 + $0x3570] sm:$0xff] }
 0x425   :  { %7952 = vmatpush1.bf16.msra.mxu1 %v7951_v22  ;;  %v3183_v22 = vld [vmem:[%s17146_s5 + $0x3178] sm:$0xff] }
 0x426   :  { %8080 = vmatpush1.bf16.msra.mxu0 %v8079_v16  ;;  %7954 = vmatprep.subr.bf16.mxu1 %v7953_v55  ;;  %v7963_v16 = vpack.c.bf16 %v3116_v39, %v3084_v37  ;;  %v8091_v55 = vpack.c.bf16 %v3118_v45, %v3086_v40  ;;  %v8093_v14 = vpack.c.bf16 %v3183_v22, %v3151_v50  ;;  %v3372_v37 = vld [vmem:[%s17146_s5 + $0x3760] sm:$0xff]  ;;  %v3342_v39 = vld [vmem:[%s17146_s5 + $0x3670] sm:$0xff]  ;;  %v3407_v45 = vld [vmem:[%s17146_s5 + $0x3878] sm:$0xff] }
 0x427   :  { %v4237_v11 = vpop.f32.mrb[16].mxu1  ;;  %8082 = vmatprep.subr.bf16.mxu0 %v8081_v59  ;;  %v3150_v59 = vld [vmem:[%s17146_s5 + $0x3070] sm:$0xff]  ;;  %v3404_v22 = vld [vmem:[%s17146_s5 + $0x3860] sm:$0xff] }
 0x428   :  { %v9153_v21 = vadd.f32 %v4237_v11, %v3675_v63  ;;  %v4379_v23 = vpop.f32.mrb[18].mxu0  ;;  %v4239_v25 = vpop.f32.mrb[17].mxu1  ;;  %v3215_v63 = vld [vmem:[%s17146_s5 + $0x3278] sm:$0xff] }
 0x429   :  { %v9155_v28 = vadd.f32 %v4379_v23, %v3683_v1  ;;  %v9154_v29 = vadd.f32 %v4239_v25, %v3679_v2  ;;  %v4381_v30 = vpop.f32.mrb[19].mxu0  ;;  %7956 = vmatpush1.bf16.msra.mxu1 %v7955_v3  ;;  %v8095_v1 = vpack.c.bf16 %v3182_v60, %v3150_v59  ;;  %v7969_v2 = vpack.c.bf16 %v3245_v62, %v3213_v61  ;;  %v3212_v3 = vld [vmem:[%s17146_s5 + $0x3260] sm:$0xff]  ;;  %v3279_v11 = vld [vmem:[%s17146_s5 + $0x3478] sm:$0xff]  ;;  %v3278_v25 = vld [vmem:[%s17146_s5 + $0x3470] sm:$0xff] }
 0x42a   :  { %v6092_v32 = vmax.f32 %v9153_v21, 0.0  ;;  %v9156_v34 = vadd.f32 %v4381_v30, %v3687_v4  ;;  %8084 = vmatpush1.bf16.msra.mxu0 %v8083_v6  ;;  %7958 = vmatprep.subr.bf16.mxu1 %v7957_v7  ;;  %v3244_v4 = vld [vmem:[%s17146_s5 + $0x3360] sm:$0xff]  ;;  %v3214_v6 = vld [vmem:[%s17146_s5 + $0x3270] sm:$0xff]  ;;  %v8097_v7 = vpack.c.bf16 %v3247_v24, %v3215_v63  ;;  %v3343_v30 = vld [vmem:[%s17146_s5 + $0x3678] sm:$0xff] }
 0x42b   :  { %v6094_v41 = vmax.f32 %v9155_v28, 0.0  ;;  %v6093_v42 = vmax.f32 %v9154_v29, 0.0  ;;  %8086 = vmatprep.subr.bf16.mxu0 %v8085_v12  ;;  %v3311_v12 = vld [vmem:[%s17146_s5 + $0x3578] sm:$0xff]  ;;  %v7971_v13 = vpack.c.bf16 %v3244_v4, %v3212_v3  ;;  %v8099_v19 = vpack.c.bf16 %v3246_v8, %v3214_v6  ;;  %v3276_v21 = vld [vmem:[%s17146_s5 + $0x3460] sm:$0xff]  ;;  %v3341_v28 = vld [vmem:[%s17146_s5 + $0x3668] sm:$0xff] }
 0x42c   :  { %6124 = vst [vmem:[%s17149_s7 + $0x20] sm:$0xff] %v6092_v32  ;;  %v6095_v49 = vmax.f32 %v9156_v34, 0.0  ;;  %v3308_v23 = vld [vmem:[%s17146_s5 + $0x3560] sm:$0xff]  ;;  %v8101_v26 = vpack.c.bf16 %v3311_v12, %v3279_v11  ;;  %v3373_v29 = vld [vmem:[%s17146_s5 + $0x3768] sm:$0xff]  ;;  %v8103_v34 = vpack.c.bf16 %v3310_v27, %v3278_v25  ;;  %v3503_v60 = vld [vmem:[%s17146_s5 + $0x3b78] sm:$0xff] }
 0x42d   :  { %6126 = vst [vmem:[%s17149_s7 + $0x30] sm:$0xff] %v6094_v41  ;;  %6125 = vst [vmem:[%s17149_s7 + $0x28] sm:$0xff] %v6093_v42  ;;  %7960 = vmatpush1.bf16.msra.mxu1 %v7959_v31  ;;  %v3375_v31 = vld [vmem:[%s17146_s5 + $0x3778] sm:$0xff]  ;;  %v7975_v32 = vpack.c.bf16 %v3308_v23, %v3276_v21  ;;  %v3374_v41 = vld [vmem:[%s17146_s5 + $0x3770] sm:$0xff] }
 0x42e   :  { %6127 = vst [vmem:[%s17149_s7 + $0x38] sm:$0xff] %v6095_v49  ;;  %8088 = vmatpush1.bf16.msra.mxu0 %v8087_v35  ;;  %7962 = vmatprep.subr.bf16.mxu1 %v7961_v36  ;;  %v7977_v35 = vpack.c.bf16 %v3373_v29, %v3341_v28  ;;  %v3340_v36 = vld [vmem:[%s17146_s5 + $0x3660] sm:$0xff]  ;;  %v8105_v40 = vpack.c.bf16 %v3375_v31, %v3343_v30  ;;  %v3405_v42 = vld [vmem:[%s17146_s5 + $0x3868] sm:$0xff]  ;;  %v3502_v3 = vld [vmem:[%s17146_s5 + $0x3b70] sm:$0xff] }
 0x42f   :  { %8090 = vmatprep.subr.bf16.mxu0 %v8089_v44  ;;  %v3437_v44 = vld [vmem:[%s17146_s5 + $0x3968] sm:$0xff]  ;;  %v7979_v47 = vpack.c.bf16 %v3372_v37, %v3340_v36  ;;  %v8107_v49 = vpack.c.bf16 %v3374_v41, %v3342_v39  ;;  %v3468_v24 = vld [vmem:[%s17146_s5 + $0x3a60] sm:$0xff]  ;;  %v3567_v8 = vld [vmem:[%s17146_s5 + $0x3d78] sm:$0xff] }
 0x430   :  { %v7981_v50 = vpack.c.bf16 %v3437_v44, %v3405_v42  ;;  %v3501_v59 = vld [vmem:[%s17146_s5 + $0x3b68] sm:$0xff]  ;;  %v3532_v12 = vld [vmem:[%s17146_s5 + $0x3c60] sm:$0xff]  ;;  %v3566_v21 = vld [vmem:[%s17146_s5 + $0x3d70] sm:$0xff] }
 0x431   :  { %7964 = vmatpush1.bf16.msra.mxu1 %v7963_v16  ;;  %v3436_v16 = vld [vmem:[%s17146_s5 + $0x3960] sm:$0xff]  ;;  %v7985_v63 = vpack.c.bf16 %v3501_v59, %v3469_v58  ;;  %v3533_v4 = vld [vmem:[%s17146_s5 + $0x3c68] sm:$0xff]  ;;  %v3631_v27 = vld [vmem:[%s17146_s5 + $0x3f78] sm:$0xff] }
 0x432   :  { %8092 = vmatpush1.bf16.msra.mxu0 %v8091_v55  ;;  %7966 = vmatprep.subr.bf16.mxu1 %v7965_v56  ;;  %v3406_v55 = vld [vmem:[%s17146_s5 + $0x3870] sm:$0xff]  ;;  %v8109_v56 = vpack.c.bf16 %v3439_v46, %v3407_v45  ;;  %v7983_v61 = vpack.c.bf16 %v3436_v16, %v3404_v22  ;;  %v3565_v6 = vld [vmem:[%s17146_s5 + $0x3d68] sm:$0xff]  ;;  %v3596_v31 = vld [vmem:[%s17146_s5 + $0x3e60] sm:$0xff] }
 0x433   :  { %8094 = vmatprep.subr.bf16.mxu0 %v8093_v14  ;;  %v3471_v14 = vld [vmem:[%s17146_s5 + $0x3a78] sm:$0xff]  ;;  %v8111_v62 = vpack.c.bf16 %v3438_v57, %v3406_v55  ;;  %v7989_v11 = vpack.c.bf16 %v3565_v6, %v3533_v4  ;;  %v3597_v23 = vld [vmem:[%s17146_s5 + $0x3e68] sm:$0xff]  ;;  %v3630_v36 = vld [vmem:[%s17146_s5 + $0x3f70] sm:$0xff] }
 0x434   :  { %v3629_v25 = vld [vmem:[%s17146_s5 + $0x3f68] sm:$0xff]  ;;  %v1651_v41 = vld [vmem:[%s17146_s5 + $0x198] sm:$0xff]  ;;  %v1616_v46 = vld [vmem:[%s17146_s5 + $0x80] sm:$0xff] }
 0x435   :  { %7968 = vmatpush1.bf16.msra.mxu1 %v7967_v0  ;;  %v3500_v0 = vld [vmem:[%s17146_s5 + $0x3b60] sm:$0xff]  ;;  %v7993_v30 = vpack.c.bf16 %v3629_v25, %v3597_v23  ;;  %v1617_v37 = vld [vmem:[%s17146_s5 + $0x88] sm:$0xff]  ;;  %v1650_v22 = vld [vmem:[%s17146_s5 + $0x190] sm:$0xff] }
 0x436   :  { %8096 = vmatpush1.bf16.msra.mxu0 %v8095_v1  ;;  %7970 = vmatprep.subr.bf16.mxu1 %v7969_v2  ;;  %v3470_v1 = vld [vmem:[%s17146_s5 + $0x3a70] sm:$0xff]  ;;  %v8113_v2 = vpack.c.bf16 %v3503_v60, %v3471_v14  ;;  %v7987_v9 = vpack.c.bf16 %v3500_v0, %v3468_v24  ;;  %v1649_v39 = vld [vmem:[%s17146_s5 + $0x188] sm:$0xff]  ;;  %v1683_v57 = vld [vmem:[%s17146_s5 + $0x298] sm:$0xff] }
 0x437   :  { %8098 = vmatprep.subr.bf16.mxu0 %v8097_v7  ;;  %v3535_v7 = vld [vmem:[%s17146_s5 + $0x3c78] sm:$0xff]  ;;  %v8115_v10 = vpack.c.bf16 %v3502_v3, %v3470_v1  ;;  %v8125_v45 = vpack.c.bf16 %v1649_v39, %v1617_v37  ;;  %v1681_v16 = vld [vmem:[%s17146_s5 + $0x288] sm:$0xff]  ;;  %v1680_v14 = vld [vmem:[%s17146_s5 + $0x280] sm:$0xff] }
 0x438   :  { %v1713_v55 = vld [vmem:[%s17146_s5 + $0x388] sm:$0xff]  ;;  %v1715_v58 = vld [vmem:[%s17146_s5 + $0x398] sm:$0xff]  ;;  %v1712_v60 = vld [vmem:[%s17146_s5 + $0x380] sm:$0xff] }
 0x439   :  { %7972 = vmatpush1.bf16.msra.mxu1 %v7971_v13  ;;  %v3564_v13 = vld [vmem:[%s17146_s5 + $0x3d60] sm:$0xff]  ;;  %v1745_v24 = vld [vmem:[%s17146_s5 + $0x488] sm:$0xff]  ;;  %v8257_v1 = vpack.c.bf16 %v1715_v58, %v1683_v57  ;;  %v1779_v3 = vld [vmem:[%s17146_s5 + $0x598] sm:$0xff]  ;;  %v8131_v4 = vpack.c.bf16 %v1712_v60, %v1680_v14 }
 0x43a   :  { %8100 = vmatpush1.bf16.msra.mxu0 %v8099_v19  ;;  %7974 = vmatprep.subr.bf16.mxu1 %v7973_v20  ;;  %v3534_v19 = vld [vmem:[%s17146_s5 + $0x3c70] sm:$0xff]  ;;  %v8117_v20 = vpack.c.bf16 %v3567_v8, %v3535_v7  ;;  %v7991_v28 = vpack.c.bf16 %v3564_v13, %v3532_v12  ;;  %v1777_v0 = vld [vmem:[%s17146_s5 + $0x588] sm:$0xff]  ;;  %v1744_v8 = vld [vmem:[%s17146_s5 + $0x480] sm:$0xff] }
 0x43b   :  { %8102 = vmatprep.subr.bf16.mxu0 %v8101_v26  ;;  %v3599_v26 = vld [vmem:[%s17146_s5 + $0x3e78] sm:$0xff]  ;;  %v8119_v29 = vpack.c.bf16 %v3566_v21, %v3534_v19  ;;  %v8133_v7 = vpack.c.bf16 %v1777_v0, %v1745_v24  ;;  %v1778_v12 = vld [vmem:[%s17146_s5 + $0x590] sm:$0xff]  ;;  %v1809_v13 = vld [vmem:[%s17146_s5 + $0x688] sm:$0xff] }
 0x43c   :  { %v1841_v19 = vld [vmem:[%s17146_s5 + $0x788] sm:$0xff]  ;;  %v1843_v21 = vld [vmem:[%s17146_s5 + $0x798] sm:$0xff]  ;;  %v1936_v57 = vld [vmem:[%s17146_s5 + $0xa80] sm:$0xff] }
 0x43d   :  { %7976 = vmatpush1.bf16.msra.mxu1 %v7975_v32  ;;  %v3628_v32 = vld [vmem:[%s17146_s5 + $0x3f60] sm:$0xff]  ;;  %v1970_v60 = vld [vmem:[%s17146_s5 + $0xb90] sm:$0xff]  ;;  %v2035_v24 = vld [vmem:[%s17146_s5 + $0xd98] sm:$0xff] }
 0x43e   :  { %8104 = vmatpush1.bf16.msra.mxu0 %v8103_v34  ;;  %7978 = vmatprep.subr.bf16.mxu1 %v7977_v35  ;;  %v3598_v34 = vld [vmem:[%s17146_s5 + $0x3e70] sm:$0xff]  ;;  %v8121_v35 = vpack.c.bf16 %v3631_v27, %v3599_v26  ;;  %v7995_v42 = vpack.c.bf16 %v3628_v32, %v3596_v31  ;;  %v8137_v26 = vpack.c.bf16 %v1841_v19, %v1809_v13  ;;  %v1808_v27 = vld [vmem:[%s17146_s5 + $0x680] sm:$0xff]  ;;  %v1873_v32 = vld [vmem:[%s17146_s5 + $0x888] sm:$0xff] }
 0x43f   :  { %8106 = vmatprep.subr.bf16.mxu0 %v8105_v40  ;;  %v1619_v40 = vld [vmem:[%s17146_s5 + $0x98] sm:$0xff]  ;;  %v8123_v44 = vpack.c.bf16 %v3630_v36, %v3598_v34  ;;  %v1842_v31 = vld [vmem:[%s17146_s5 + $0x790] sm:$0xff]  ;;  %v1905_v34 = vld [vmem:[%s17146_s5 + $0x988] sm:$0xff] }
 0x440   :  { %v1907_v36 = vld [vmem:[%s17146_s5 + $0x998] sm:$0xff]  ;;  %v1968_v58 = vld [vmem:[%s17146_s5 + $0xb80] sm:$0xff] }
 0x441   :  { %7980 = vmatpush1.bf16.msra.mxu1 %v7979_v47  ;;  %v1648_v47 = vld [vmem:[%s17146_s5 + $0x180] sm:$0xff]  ;;  %v8147_v0 = vpack.c.bf16 %v1968_v58, %v1936_v57  ;;  %v2226_v57 = vld [vmem:[%s17146_s5 + $0x1390] sm:$0xff]  ;;  %v2257_v58 = vld [vmem:[%s17146_s5 + $0x1488] sm:$0xff] }
 0x442   :  { %8108 = vmatpush1.bf16.msra.mxu0 %v8107_v49  ;;  %7982 = vmatprep.subr.bf16.mxu1 %v7981_v50  ;;  %v8253_v49 = vpack.c.bf16 %v1651_v41, %v1619_v40  ;;  %v1618_v50 = vld [vmem:[%s17146_s5 + $0x90] sm:$0xff]  ;;  %v8141_v40 = vpack.c.bf16 %v1905_v34, %v1873_v32  ;;  %v1872_v41 = vld [vmem:[%s17146_s5 + $0x880] sm:$0xff] }
 0x443   :  { %8110 = vmatprep.subr.bf16.mxu0 %v8109_v56  ;;  %v8127_v56 = vpack.c.bf16 %v1648_v47, %v1616_v46  ;;  %v8255_v59 = vpack.c.bf16 %v1650_v22, %v1618_v50  ;;  %v1906_v46 = vld [vmem:[%s17146_s5 + $0x990] sm:$0xff]  ;;  %v1937_v47 = vld [vmem:[%s17146_s5 + $0xa88] sm:$0xff]  ;;  %v1939_v50 = vld [vmem:[%s17146_s5 + $0xa98] sm:$0xff] }
 0x444   :  { %v1971_v22 = vld [vmem:[%s17146_s5 + $0xb98] sm:$0xff] }
 0x445   :  { %7984 = vmatpush1.bf16.msra.mxu1 %v7983_v61  ;;  %v1682_v61 = vld [vmem:[%s17146_s5 + $0x290] sm:$0xff]  ;;  %v8273_v14 = vpack.c.bf16 %v1971_v22, %v1939_v50  ;;  %v2192_v22 = vld [vmem:[%s17146_s5 + $0x1280] sm:$0xff] }
 0x446   :  { %8112 = vmatpush1.bf16.msra.mxu0 %v8111_v62  ;;  %7986 = vmatprep.subr.bf16.mxu1 %v7985_v63  ;;  %v8129_v62 = vpack.c.bf16 %v1713_v55, %v1681_v16  ;;  %v1714_v63 = vld [vmem:[%s17146_s5 + $0x390] sm:$0xff] }
 0x447   :  { %8114 = vmatprep.subr.bf16.mxu0 %v8113_v2  ;;  %v1747_v2 = vld [vmem:[%s17146_s5 + $0x498] sm:$0xff]  ;;  %v8259_v6 = vpack.c.bf16 %v1714_v63, %v1682_v61  ;;  %v2001_v61 = vld [vmem:[%s17146_s5 + $0xc88] sm:$0xff] }
 0x448   :  { %v2003_v63 = vld [vmem:[%s17146_s5 + $0xc98] sm:$0xff] }
 0x449   :  { %7988 = vmatpush1.bf16.msra.mxu1 %v7987_v9  ;;  %v1776_v9 = vld [vmem:[%s17146_s5 + $0x580] sm:$0xff] }
 0x44a   :  { %8116 = vmatpush1.bf16.msra.mxu0 %v8115_v10  ;;  %7990 = vmatprep.subr.bf16.mxu1 %v7989_v11  ;;  %v1746_v10 = vld [vmem:[%s17146_s5 + $0x490] sm:$0xff]  ;;  %v8261_v11 = vpack.c.bf16 %v1779_v3, %v1747_v2  ;;  %v8135_v23 = vpack.c.bf16 %v1776_v9, %v1744_v8  ;;  %v2000_v3 = vld [vmem:[%s17146_s5 + $0xc80] sm:$0xff]  ;;  %v2065_v9 = vld [vmem:[%s17146_s5 + $0xe88] sm:$0xff] }
 0x44b   :  { %8118 = vmatprep.subr.bf16.mxu0 %v8117_v20  ;;  %v1811_v20 = vld [vmem:[%s17146_s5 + $0x698] sm:$0xff]  ;;  %v8263_v25 = vpack.c.bf16 %v1778_v12, %v1746_v10  ;;  %v2034_v8 = vld [vmem:[%s17146_s5 + $0xd90] sm:$0xff]  ;;  %v2097_v10 = vld [vmem:[%s17146_s5 + $0xf88] sm:$0xff] }
 0x44c   :  { %v2099_v12 = vld [vmem:[%s17146_s5 + $0xf98] sm:$0xff] }
 0x44d   :  { %7992 = vmatpush1.bf16.msra.mxu1 %v7991_v28  ;;  %v1840_v28 = vld [vmem:[%s17146_s5 + $0x780] sm:$0xff] }
 0x44e   :  { %8120 = vmatpush1.bf16.msra.mxu0 %v8119_v29  ;;  %7994 = vmatprep.subr.bf16.mxu1 %v7993_v30  ;;  %v1810_v29 = vld [vmem:[%s17146_s5 + $0x690] sm:$0xff]  ;;  %v8265_v30 = vpack.c.bf16 %v1843_v21, %v1811_v20  ;;  %v8139_v37 = vpack.c.bf16 %v1840_v28, %v1808_v27  ;;  %v8153_v20 = vpack.c.bf16 %v2097_v10, %v2065_v9  ;;  %v2064_v21 = vld [vmem:[%s17146_s5 + $0xe80] sm:$0xff]  ;;  %v2129_v28 = vld [vmem:[%s17146_s5 + $0x1088] sm:$0xff] }
 0x44f   :  { %8122 = vmatprep.subr.bf16.mxu0 %v8121_v35  ;;  %v1875_v35 = vld [vmem:[%s17146_s5 + $0x898] sm:$0xff]  ;;  %v8267_v39 = vpack.c.bf16 %v1842_v31, %v1810_v29  ;;  %v2098_v27 = vld [vmem:[%s17146_s5 + $0xf90] sm:$0xff]  ;;  %v2161_v29 = vld [vmem:[%s17146_s5 + $0x1188] sm:$0xff] }
 0x450   :  { %v2163_v31 = vld [vmem:[%s17146_s5 + $0x1198] sm:$0xff] }
 0x451   :  { %7996 = vmatpush1.bf16.msra.mxu1 %v7995_v42  ;;  %v1904_v42 = vld [vmem:[%s17146_s5 + $0x980] sm:$0xff] }
 0x452   :  { %8124 = vmatpush1.bf16.msra.mxu0 %v8123_v44  ;;  %8126 = vmatprep.subr.bf16.mxu1 %v8125_v45  ;;  %v1874_v44 = vld [vmem:[%s17146_s5 + $0x890] sm:$0xff]  ;;  %v8269_v45 = vpack.c.bf16 %v1907_v36, %v1875_v35  ;;  %v8143_v16 = vpack.c.bf16 %v1904_v42, %v1872_v41  ;;  %v8157_v35 = vpack.c.bf16 %v2161_v29, %v2129_v28  ;;  %v2128_v36 = vld [vmem:[%s17146_s5 + $0x1080] sm:$0xff]  ;;  %v2193_v42 = vld [vmem:[%s17146_s5 + $0x1288] sm:$0xff] }
 0x453   :  { %8254 = vmatprep.subr.bf16.mxu0 %v8253_v49  ;;  %v1969_v49 = vld [vmem:[%s17146_s5 + $0xb88] sm:$0xff]  ;;  %v8271_v55 = vpack.c.bf16 %v1906_v46, %v1874_v44  ;;  %v2162_v41 = vld [vmem:[%s17146_s5 + $0x1190] sm:$0xff]  ;;  %v2227_v46 = vld [vmem:[%s17146_s5 + $0x1398] sm:$0xff] }
 0x454   :  { %4804 = vmatmul.mubr.f32.vlgmr.msra.gmra.mrb[20].mxu1 %v11581_v5  ;;  %v2225_v44 = vld [vmem:[%s17146_s5 + $0x1388] sm:$0xff] }
 0x455   :  { %4946 = vmatmul.mubr.f32.vlgmr.msra.gmra.mrb[22].mxu0 %v11581_v5  ;;  %8128 = vmatpush1.bf16.msra.mxu1 %v8127_v56  ;;  %v8145_v56 = vpack.c.bf16 %v1969_v49, %v1937_v47  ;;  %v8161_v50 = vpack.c.bf16 %v2225_v44, %v2193_v42 }
 0x456   :  { %5016 = vmatprep.mubr.f32.mxu1 %v11179_v38  ;;  %8256 = vmatpush1.bf16.msra.mxu0 %v8255_v59  ;;  %v1938_v59 = vld [vmem:[%s17146_s5 + $0xa90] sm:$0xff] }
 0x457   :  { %5158 = vmatprep.mubr.f32.mxu0 %v11179_v38  ;;  %8130 = vmatprep.subr.bf16.mxu1 %v8129_v62  ;;  %v2033_v62 = vld [vmem:[%s17146_s5 + $0xd88] sm:$0xff] }
 0x458   :  { %8258 = vmatprep.subr.bf16.mxu0 %v8257_v1  ;;  %v8275_v1 = vpack.c.bf16 %v1970_v60, %v1938_v59  ;;  %v8149_v2 = vpack.c.bf16 %v2033_v62, %v2001_v61  ;;  %v2289_v59 = vld [vmem:[%s17146_s5 + $0x1588] sm:$0xff]  ;;  %v2291_v60 = vld [vmem:[%s17146_s5 + $0x1598] sm:$0xff] }
 0x459   :  { %8132 = vmatpush1.bf16.msra.mxu1 %v8131_v4  ;;  %v2032_v4 = vld [vmem:[%s17146_s5 + $0xd80] sm:$0xff] }
 0x45a   :  { %8260 = vmatpush1.bf16.msra.mxu0 %v8259_v6  ;;  %8134 = vmatprep.subr.bf16.mxu1 %v8133_v7  ;;  %v2002_v6 = vld [vmem:[%s17146_s5 + $0xc90] sm:$0xff]  ;;  %v8277_v7 = vpack.c.bf16 %v2035_v24, %v2003_v63  ;;  %v8151_v13 = vpack.c.bf16 %v2032_v4, %v2000_v3  ;;  %v8165_v63 = vpack.c.bf16 %v2289_v59, %v2257_v58  ;;  %v2256_v24 = vld [vmem:[%s17146_s5 + $0x1480] sm:$0xff]  ;;  %v2321_v4 = vld [vmem:[%s17146_s5 + $0x1688] sm:$0xff] }
 0x45b   :  { %8262 = vmatprep.subr.bf16.mxu0 %v8261_v11  ;;  %v2067_v11 = vld [vmem:[%s17146_s5 + $0xe98] sm:$0xff]  ;;  %v8279_v19 = vpack.c.bf16 %v2034_v8, %v2002_v6  ;;  %v2290_v3 = vld [vmem:[%s17146_s5 + $0x1590] sm:$0xff]  ;;  %v2353_v6 = vld [vmem:[%s17146_s5 + $0x1788] sm:$0xff] }
 0x45c   :  { %v2355_v8 = vld [vmem:[%s17146_s5 + $0x1798] sm:$0xff] }
 0x45d   :  { %8136 = vmatpush1.bf16.msra.mxu1 %v8135_v23  ;;  %v2096_v23 = vld [vmem:[%s17146_s5 + $0xf80] sm:$0xff] }
 0x45e   :  { %8264 = vmatpush1.bf16.msra.mxu0 %v8263_v25  ;;  %8138 = vmatprep.subr.bf16.mxu1 %v8137_v26  ;;  %v2066_v25 = vld [vmem:[%s17146_s5 + $0xe90] sm:$0xff]  ;;  %v8281_v26 = vpack.c.bf16 %v2099_v12, %v2067_v11  ;;  %v8155_v32 = vpack.c.bf16 %v2096_v23, %v2064_v21  ;;  %v8169_v11 = vpack.c.bf16 %v2353_v6, %v2321_v4  ;;  %v2320_v12 = vld [vmem:[%s17146_s5 + $0x1680] sm:$0xff]  ;;  %v2385_v23 = vld [vmem:[%s17146_s5 + $0x1888] sm:$0xff] }
 0x45f   :  { %8266 = vmatprep.subr.bf16.mxu0 %v8265_v30  ;;  %v2131_v30 = vld [vmem:[%s17146_s5 + $0x1098] sm:$0xff]  ;;  %v8283_v34 = vpack.c.bf16 %v2098_v27, %v2066_v25  ;;  %v2354_v21 = vld [vmem:[%s17146_s5 + $0x1790] sm:$0xff]  ;;  %v2417_v25 = vld [vmem:[%s17146_s5 + $0x1988] sm:$0xff] }
 0x460   :  { %v2419_v27 = vld [vmem:[%s17146_s5 + $0x1998] sm:$0xff] }
 0x461   :  { %8140 = vmatpush1.bf16.msra.mxu1 %v8139_v37  ;;  %v2160_v37 = vld [vmem:[%s17146_s5 + $0x1180] sm:$0xff] }
 0x462   :  { %8268 = vmatpush1.bf16.msra.mxu0 %v8267_v39  ;;  %8142 = vmatprep.subr.bf16.mxu1 %v8141_v40  ;;  %v2130_v39 = vld [vmem:[%s17146_s5 + $0x1090] sm:$0xff]  ;;  %v8285_v40 = vpack.c.bf16 %v2163_v31, %v2131_v30  ;;  %v8159_v47 = vpack.c.bf16 %v2160_v37, %v2128_v36  ;;  %v8173_v30 = vpack.c.bf16 %v2417_v25, %v2385_v23  ;;  %v2384_v31 = vld [vmem:[%s17146_s5 + $0x1880] sm:$0xff]  ;;  %v2449_v37 = vld [vmem:[%s17146_s5 + $0x1a88] sm:$0xff] }
 0x463   :  { %8270 = vmatprep.subr.bf16.mxu0 %v8269_v45  ;;  %v2195_v45 = vld [vmem:[%s17146_s5 + $0x1298] sm:$0xff]  ;;  %v8287_v49 = vpack.c.bf16 %v2162_v41, %v2130_v39  ;;  %v2418_v36 = vld [vmem:[%s17146_s5 + $0x1990] sm:$0xff]  ;;  %v2481_v39 = vld [vmem:[%s17146_s5 + $0x1b88] sm:$0xff] }
 0x464   :  { %v2483_v41 = vld [vmem:[%s17146_s5 + $0x1b98] sm:$0xff] }
 0x465   :  { %8144 = vmatpush1.bf16.msra.mxu1 %v8143_v16  ;;  %v2224_v16 = vld [vmem:[%s17146_s5 + $0x1380] sm:$0xff] }
 0x466   :  { %8272 = vmatpush1.bf16.msra.mxu0 %v8271_v55  ;;  %8146 = vmatprep.subr.bf16.mxu1 %v8145_v56  ;;  %v2194_v55 = vld [vmem:[%s17146_s5 + $0x1290] sm:$0xff]  ;;  %v8289_v56 = vpack.c.bf16 %v2227_v46, %v2195_v45  ;;  %v8163_v61 = vpack.c.bf16 %v2224_v16, %v2192_v22  ;;  %v8177_v45 = vpack.c.bf16 %v2481_v39, %v2449_v37  ;;  %v2448_v46 = vld [vmem:[%s17146_s5 + $0x1a80] sm:$0xff]  ;;  %v2513_v16 = vld [vmem:[%s17146_s5 + $0x1c88] sm:$0xff] }
 0x467   :  { %8274 = vmatprep.subr.bf16.mxu0 %v8273_v14  ;;  %v2259_v14 = vld [vmem:[%s17146_s5 + $0x1498] sm:$0xff]  ;;  %v8291_v62 = vpack.c.bf16 %v2226_v57, %v2194_v55  ;;  %v2482_v22 = vld [vmem:[%s17146_s5 + $0x1b90] sm:$0xff]  ;;  %v2545_v55 = vld [vmem:[%s17146_s5 + $0x1d88] sm:$0xff] }
 0x468   :  { %v2547_v57 = vld [vmem:[%s17146_s5 + $0x1d98] sm:$0xff] }
 0x469   :  { %8148 = vmatpush1.bf16.msra.mxu1 %v8147_v0  ;;  %v2288_v0 = vld [vmem:[%s17146_s5 + $0x1580] sm:$0xff]  ;;  %v2739_v37 = vld [vmem:[%s17146_s5 + $0x2398] sm:$0xff] }
 0x46a   :  { %8276 = vmatpush1.bf16.msra.mxu0 %v8275_v1  ;;  %8150 = vmatprep.subr.bf16.mxu1 %v8149_v2  ;;  %v2258_v1 = vld [vmem:[%s17146_s5 + $0x1490] sm:$0xff]  ;;  %v8293_v2 = vpack.c.bf16 %v2291_v60, %v2259_v14  ;;  %v8167_v9 = vpack.c.bf16 %v2288_v0, %v2256_v24  ;;  %v8181_v14 = vpack.c.bf16 %v2545_v55, %v2513_v16  ;;  %v2512_v60 = vld [vmem:[%s17146_s5 + $0x1c80] sm:$0xff]  ;;  %v2577_v0 = vld [vmem:[%s17146_s5 + $0x1e88] sm:$0xff] }
 0x46b   :  { %8278 = vmatprep.subr.bf16.mxu0 %v8277_v7  ;;  %v2323_v7 = vld [vmem:[%s17146_s5 + $0x1698] sm:$0xff]  ;;  %v8295_v10 = vpack.c.bf16 %v2290_v3, %v2258_v1  ;;  %v2546_v24 = vld [vmem:[%s17146_s5 + $0x1d90] sm:$0xff]  ;;  %v2609_v1 = vld [vmem:[%s17146_s5 + $0x1f88] sm:$0xff] }
 0x46c   :  { %v2611_v3 = vld [vmem:[%s17146_s5 + $0x1f98] sm:$0xff] }
 0x46d   :  { %8152 = vmatpush1.bf16.msra.mxu1 %v8151_v13  ;;  %v2352_v13 = vld [vmem:[%s17146_s5 + $0x1780] sm:$0xff] }
 0x46e   :  { %8280 = vmatpush1.bf16.msra.mxu0 %v8279_v19  ;;  %8154 = vmatprep.subr.bf16.mxu1 %v8153_v20  ;;  %v2322_v19 = vld [vmem:[%s17146_s5 + $0x1690] sm:$0xff]  ;;  %v8297_v20 = vpack.c.bf16 %v2355_v8, %v2323_v7  ;;  %v8171_v28 = vpack.c.bf16 %v2352_v13, %v2320_v12  ;;  %v8185_v7 = vpack.c.bf16 %v2609_v1, %v2577_v0  ;;  %v2576_v8 = vld [vmem:[%s17146_s5 + $0x1e80] sm:$0xff]  ;;  %v2641_v13 = vld [vmem:[%s17146_s5 + $0x2088] sm:$0xff] }
 0x46f   :  { %8282 = vmatprep.subr.bf16.mxu0 %v8281_v26  ;;  %v2387_v26 = vld [vmem:[%s17146_s5 + $0x1898] sm:$0xff]  ;;  %v8299_v29 = vpack.c.bf16 %v2354_v21, %v2322_v19  ;;  %v2610_v12 = vld [vmem:[%s17146_s5 + $0x1f90] sm:$0xff]  ;;  %v2673_v19 = vld [vmem:[%s17146_s5 + $0x2188] sm:$0xff] }
 0x470   :  { %v2675_v21 = vld [vmem:[%s17146_s5 + $0x2198] sm:$0xff] }
 0x471   :  { %8156 = vmatpush1.bf16.msra.mxu1 %v8155_v32  ;;  %v2416_v32 = vld [vmem:[%s17146_s5 + $0x1980] sm:$0xff] }
 0x472   :  { %8284 = vmatpush1.bf16.msra.mxu0 %v8283_v34  ;;  %8158 = vmatprep.subr.bf16.mxu1 %v8157_v35  ;;  %v2386_v34 = vld [vmem:[%s17146_s5 + $0x1890] sm:$0xff]  ;;  %v8301_v35 = vpack.c.bf16 %v2419_v27, %v2387_v26  ;;  %v8175_v42 = vpack.c.bf16 %v2416_v32, %v2384_v31  ;;  %v8189_v26 = vpack.c.bf16 %v2673_v19, %v2641_v13  ;;  %v2640_v27 = vld [vmem:[%s17146_s5 + $0x2080] sm:$0xff]  ;;  %v2705_v32 = vld [vmem:[%s17146_s5 + $0x2288] sm:$0xff] }
 0x473   :  { %8286 = vmatprep.subr.bf16.mxu0 %v8285_v40  ;;  %v2451_v40 = vld [vmem:[%s17146_s5 + $0x1a98] sm:$0xff]  ;;  %v8303_v44 = vpack.c.bf16 %v2418_v36, %v2386_v34  ;;  %v2674_v31 = vld [vmem:[%s17146_s5 + $0x2190] sm:$0xff]  ;;  %v2737_v34 = vld [vmem:[%s17146_s5 + $0x2388] sm:$0xff] }
 0x474   :  { %v2707_v36 = vld [vmem:[%s17146_s5 + $0x2298] sm:$0xff] }
 0x475   :  { %8160 = vmatpush1.bf16.msra.mxu1 %v8159_v47  ;;  %v2480_v47 = vld [vmem:[%s17146_s5 + $0x1b80] sm:$0xff] }
 0x476   :  { %8288 = vmatpush1.bf16.msra.mxu0 %v8287_v49  ;;  %8162 = vmatprep.subr.bf16.mxu1 %v8161_v50  ;;  %v2450_v49 = vld [vmem:[%s17146_s5 + $0x1a90] sm:$0xff]  ;;  %v8305_v50 = vpack.c.bf16 %v2483_v41, %v2451_v40  ;;  %v8179_v58 = vpack.c.bf16 %v2480_v47, %v2448_v46  ;;  %v2704_v40 = vld [vmem:[%s17146_s5 + $0x2280] sm:$0xff]  ;;  %v2769_v46 = vld [vmem:[%s17146_s5 + $0x2488] sm:$0xff] }
 0x477   :  { %8290 = vmatprep.subr.bf16.mxu0 %v8289_v56  ;;  %v2515_v56 = vld [vmem:[%s17146_s5 + $0x1c98] sm:$0xff]  ;;  %v8307_v59 = vpack.c.bf16 %v2482_v22, %v2450_v49  ;;  %v2736_v41 = vld [vmem:[%s17146_s5 + $0x2380] sm:$0xff]  ;;  %v2801_v47 = vld [vmem:[%s17146_s5 + $0x2588] sm:$0xff]  ;;  %v8321_v49 = vpack.c.bf16 %v2739_v37, %v2707_v36 }
 0x478   :  { %v2803_v22 = vld [vmem:[%s17146_s5 + $0x2598] sm:$0xff]  ;;  %v8195_v16 = vpack.c.bf16 %v2736_v41, %v2704_v40  ;;  %v2960_v37 = vld [vmem:[%s17146_s5 + $0x2a80] sm:$0xff]  ;;  %v2962_v40 = vld [vmem:[%s17146_s5 + $0x2a90] sm:$0xff] }
 0x479   :  { %8164 = vmatpush1.bf16.msra.mxu1 %v8163_v61  ;;  %v2544_v61 = vld [vmem:[%s17146_s5 + $0x1d80] sm:$0xff] }
 0x47a   :  { %8292 = vmatpush1.bf16.msra.mxu0 %v8291_v62  ;;  %8166 = vmatprep.subr.bf16.mxu1 %v8165_v63  ;;  %v2514_v62 = vld [vmem:[%s17146_s5 + $0x1c90] sm:$0xff]  ;;  %v8309_v63 = vpack.c.bf16 %v2547_v57, %v2515_v56  ;;  %v8183_v4 = vpack.c.bf16 %v2544_v61, %v2512_v60  ;;  %v8197_v56 = vpack.c.bf16 %v2801_v47, %v2769_v46  ;;  %v2768_v57 = vld [vmem:[%s17146_s5 + $0x2480] sm:$0xff]  ;;  %v2833_v61 = vld [vmem:[%s17146_s5 + $0x2688] sm:$0xff] }
 0x47b   :  { %8294 = vmatprep.subr.bf16.mxu0 %v8293_v2  ;;  %v2579_v2 = vld [vmem:[%s17146_s5 + $0x1e98] sm:$0xff]  ;;  %v8311_v6 = vpack.c.bf16 %v2546_v24, %v2514_v62  ;;  %v2802_v60 = vld [vmem:[%s17146_s5 + $0x2590] sm:$0xff]  ;;  %v2865_v62 = vld [vmem:[%s17146_s5 + $0x2788] sm:$0xff] }
 0x47c   :  { %v2867_v24 = vld [vmem:[%s17146_s5 + $0x2798] sm:$0xff] }
 0x47d   :  { %8168 = vmatpush1.bf16.msra.mxu1 %v8167_v9  ;;  %v2608_v9 = vld [vmem:[%s17146_s5 + $0x1f80] sm:$0xff]  ;;  %v3027_v47 = vld [vmem:[%s17146_s5 + $0x2c98] sm:$0xff] }
 0x47e   :  { %8296 = vmatpush1.bf16.msra.mxu0 %v8295_v10  ;;  %8170 = vmatprep.subr.bf16.mxu1 %v8169_v11  ;;  %v2578_v10 = vld [vmem:[%s17146_s5 + $0x1e90] sm:$0xff]  ;;  %v8313_v11 = vpack.c.bf16 %v2611_v3, %v2579_v2  ;;  %v8187_v23 = vpack.c.bf16 %v2608_v9, %v2576_v8  ;;  %v8201_v2 = vpack.c.bf16 %v2865_v62, %v2833_v61  ;;  %v2832_v3 = vld [vmem:[%s17146_s5 + $0x2680] sm:$0xff]  ;;  %v2897_v9 = vld [vmem:[%s17146_s5 + $0x2888] sm:$0xff] }
 0x47f   :  { %8298 = vmatprep.subr.bf16.mxu0 %v8297_v20  ;;  %v2643_v20 = vld [vmem:[%s17146_s5 + $0x2098] sm:$0xff]  ;;  %v8315_v25 = vpack.c.bf16 %v2610_v12, %v2578_v10  ;;  %v2866_v8 = vld [vmem:[%s17146_s5 + $0x2790] sm:$0xff]  ;;  %v2929_v10 = vld [vmem:[%s17146_s5 + $0x2988] sm:$0xff] }
 0x480   :  { %v2931_v12 = vld [vmem:[%s17146_s5 + $0x2998] sm:$0xff]  ;;  %v3058_v62 = vld [vmem:[%s17146_s5 + $0x2d90] sm:$0xff] }
 0x481   :  { %8172 = vmatpush1.bf16.msra.mxu1 %v8171_v28  ;;  %v2672_v28 = vld [vmem:[%s17146_s5 + $0x2180] sm:$0xff] }
 0x482   :  { %8300 = vmatpush1.bf16.msra.mxu0 %v8299_v29  ;;  %8174 = vmatprep.subr.bf16.mxu1 %v8173_v30  ;;  %v8317_v29 = vpack.c.bf16 %v2675_v21, %v2643_v20  ;;  %v2642_v30 = vld [vmem:[%s17146_s5 + $0x2090] sm:$0xff]  ;;  %v8205_v20 = vpack.c.bf16 %v2929_v10, %v2897_v9  ;;  %v2896_v21 = vld [vmem:[%s17146_s5 + $0x2880] sm:$0xff] }
 0x483   :  { %8302 = vmatprep.subr.bf16.mxu0 %v8301_v35  ;;  %v8191_v35 = vpack.c.bf16 %v2672_v28, %v2640_v27  ;;  %v8319_v39 = vpack.c.bf16 %v2674_v31, %v2642_v30  ;;  %v2930_v27 = vld [vmem:[%s17146_s5 + $0x2990] sm:$0xff]  ;;  %v2961_v28 = vld [vmem:[%s17146_s5 + $0x2a88] sm:$0xff]  ;;  %v2963_v30 = vld [vmem:[%s17146_s5 + $0x2a98] sm:$0xff] }
 0x484   :  { %v2995_v31 = vld [vmem:[%s17146_s5 + $0x2b98] sm:$0xff] }
 0x485   :  { %8176 = vmatpush1.bf16.msra.mxu1 %v8175_v42  ;;  %v2706_v42 = vld [vmem:[%s17146_s5 + $0x2290] sm:$0xff]  ;;  %v8337_v41 = vpack.c.bf16 %v2995_v31, %v2963_v30  ;;  %v3155_v31 = vld [vmem:[%s17146_s5 + $0x3098] sm:$0xff] }
 0x486   :  { %8304 = vmatpush1.bf16.msra.mxu0 %v8303_v44  ;;  %8178 = vmatprep.subr.bf16.mxu1 %v8177_v45  ;;  %v8193_v44 = vpack.c.bf16 %v2737_v34, %v2705_v32  ;;  %v2738_v45 = vld [vmem:[%s17146_s5 + $0x2390] sm:$0xff]  ;;  %v3649_v34 = vld [vmem:[%s17148_s6 + $0x8] sm:$0xff] }
 0x487   :  { %8306 = vmatprep.subr.bf16.mxu0 %v8305_v50  ;;  %v2771_v50 = vld [vmem:[%s17146_s5 + $0x2498] sm:$0xff]  ;;  %v8323_v55 = vpack.c.bf16 %v2738_v45, %v2706_v42  ;;  %v2994_v42 = vld [vmem:[%s17146_s5 + $0x2b90] sm:$0xff]  ;;  %v3057_v45 = vld [vmem:[%s17146_s5 + $0x2d88] sm:$0xff]  ;;  %v3691_v46 = vrot.slane %v3649_v34, %v11134_v15 }
 0x489   :  { %8180 = vmatpush1.bf16.msra.mxu1 %v8179_v58  ;;  %v2800_v58 = vld [vmem:[%s17146_s5 + $0x2580] sm:$0xff] }
 0x48a   :  { %8308 = vmatpush1.bf16.msra.mxu0 %v8307_v59  ;;  %8182 = vmatprep.subr.bf16.mxu1 %v8181_v14  ;;  %v2770_v59 = vld [vmem:[%s17146_s5 + $0x2490] sm:$0xff]  ;;  %v8325_v14 = vpack.c.bf16 %v2803_v22, %v2771_v50  ;;  %v8199_v0 = vpack.c.bf16 %v2800_v58, %v2768_v57  ;;  %v3699_v50 = vrot.slane %v3649_v34, %v11510_v33  ;;  %v3024_v58 = vld [vmem:[%s17146_s5 + $0x2c80] sm:$0xff] }
 0x48b   :  { %8310 = vmatprep.subr.bf16.mxu0 %v8309_v63  ;;  %v2835_v63 = vld [vmem:[%s17146_s5 + $0x2698] sm:$0xff]  ;;  %v8327_v1 = vpack.c.bf16 %v2802_v60, %v2770_v59  ;;  %v3695_v22 = vrot.slane %v3649_v34, %v11142_v17  ;;  %v3056_v59 = vld [vmem:[%s17146_s5 + $0x2d80] sm:$0xff] }
 0x48c   :  { %v8215_v9 = vpack.c.bf16 %v3056_v59, %v3024_v58  ;;  %v3250_v58 = vld [vmem:[%s17146_s5 + $0x3390] sm:$0xff]  ;;  %v3281_v59 = vld [vmem:[%s17146_s5 + $0x3488] sm:$0xff] }
 0x48d   :  { %8184 = vmatpush1.bf16.msra.mxu1 %v8183_v4  ;;  %v2864_v4 = vld [vmem:[%s17146_s5 + $0x2780] sm:$0xff] }
 0x48e   :  { %8312 = vmatpush1.bf16.msra.mxu0 %v8311_v6  ;;  %8186 = vmatprep.subr.bf16.mxu1 %v8185_v7  ;;  %v2834_v6 = vld [vmem:[%s17146_s5 + $0x2690] sm:$0xff]  ;;  %v8329_v7 = vpack.c.bf16 %v2867_v24, %v2835_v63  ;;  %v8203_v13 = vpack.c.bf16 %v2864_v4, %v2832_v3  ;;  %v3089_v63 = vld [vmem:[%s17146_s5 + $0x2e88] sm:$0xff]  ;;  %v3091_v3 = vld [vmem:[%s17146_s5 + $0x2e98] sm:$0xff] }
 0x48f   :  { %8314 = vmatprep.subr.bf16.mxu0 %v8313_v11  ;;  %v2899_v11 = vld [vmem:[%s17146_s5 + $0x2898] sm:$0xff]  ;;  %v8331_v19 = vpack.c.bf16 %v2866_v8, %v2834_v6  ;;  %v3121_v24 = vld [vmem:[%s17146_s5 + $0x2f88] sm:$0xff] }
 0x490   :  { %v3123_v4 = vld [vmem:[%s17146_s5 + $0x2f98] sm:$0xff] }
 0x491   :  { %8188 = vmatpush1.bf16.msra.mxu1 %v8187_v23  ;;  %v2928_v23 = vld [vmem:[%s17146_s5 + $0x2980] sm:$0xff] }
 0x492   :  { %8316 = vmatpush1.bf16.msra.mxu0 %v8315_v25  ;;  %8190 = vmatprep.subr.bf16.mxu1 %v8189_v26  ;;  %v2898_v25 = vld [vmem:[%s17146_s5 + $0x2890] sm:$0xff]  ;;  %v8333_v26 = vpack.c.bf16 %v2931_v12, %v2899_v11  ;;  %v8207_v32 = vpack.c.bf16 %v2928_v23, %v2896_v21 }
 0x493   :  { %8318 = vmatprep.subr.bf16.mxu0 %v8317_v29  ;;  %v2993_v29 = vld [vmem:[%s17146_s5 + $0x2b88] sm:$0xff]  ;;  %v3090_v21 = vld [vmem:[%s17146_s5 + $0x2e90] sm:$0xff] }
 0x494   :  { %5017 = vmatmul.mubr.f32.vlgmr.msra.gmra.mrb[22].mxu1 %v11187_v43  ;;  %v8209_v36 = vpack.c.bf16 %v2993_v29, %v2961_v28  ;;  %v3153_v28 = vld [vmem:[%s17146_s5 + $0x3088] sm:$0xff] }
 0x495   :  { %5159 = vmatmul.mubr.f32.vlgmr.msra.gmra.mrb[24].mxu0 %v11187_v43  ;;  %8192 = vmatpush1.bf16.msra.mxu1 %v8191_v35  ;;  %v8335_v35 = vpack.c.bf16 %v2930_v27, %v2898_v25  ;;  %v3122_v27 = vld [vmem:[%s17146_s5 + $0x2f90] sm:$0xff]  ;;  %v3185_v29 = vld [vmem:[%s17146_s5 + $0x3188] sm:$0xff] }
 0x496   :  { %5087 = vmatprep.mubr.f32.mxu1 %v11209_v51  ;;  %8320 = vmatpush1.bf16.msra.mxu0 %v8319_v39  ;;  %v2992_v39 = vld [vmem:[%s17146_s5 + $0x2b80] sm:$0xff] }
 0x497   :  { %5229 = vmatprep.mubr.f32.mxu0 %v11209_v51  ;;  %8194 = vmatprep.subr.bf16.mxu1 %v8193_v44  ;;  %v3025_v44 = vld [vmem:[%s17146_s5 + $0x2c88] sm:$0xff] }
 0x498   :  { %8322 = vmatprep.subr.bf16.mxu0 %v8321_v49  ;;  %v3059_v49 = vld [vmem:[%s17146_s5 + $0x2d98] sm:$0xff]  ;;  %v8213_v57 = vpack.c.bf16 %v3057_v45, %v3025_v44  ;;  %v3217_v44 = vld [vmem:[%s17146_s5 + $0x3288] sm:$0xff] }
 0x499   :  { %8196 = vmatpush1.bf16.msra.mxu1 %v8195_v16  ;;  %v8211_v16 = vpack.c.bf16 %v2992_v39, %v2960_v37  ;;  %v8341_v61 = vpack.c.bf16 %v3059_v49, %v3027_v47  ;;  %v3152_v37 = vld [vmem:[%s17146_s5 + $0x3080] sm:$0xff]  ;;  %v3249_v45 = vld [vmem:[%s17146_s5 + $0x3388] sm:$0xff]  ;;  %v3251_v47 = vld [vmem:[%s17146_s5 + $0x3398] sm:$0xff] }
 0x49a   :  { %8324 = vmatpush1.bf16.msra.mxu0 %v8323_v55  ;;  %8198 = vmatprep.subr.bf16.mxu1 %v8197_v56  ;;  %v3703_v55 = vrot.slane %v3649_v34, %v11145_v18  ;;  %v8339_v56 = vpack.c.bf16 %v2994_v42, %v2962_v40  ;;  %v3184_v39 = vld [vmem:[%s17146_s5 + $0x3180] sm:$0xff]  ;;  %v3154_v40 = vld [vmem:[%s17146_s5 + $0x3090] sm:$0xff] }
 0x49b   :  { %8326 = vmatprep.subr.bf16.mxu0 %v8325_v14  ;;  %v3026_v14 = vld [vmem:[%s17146_s5 + $0x2c90] sm:$0xff]  ;;  %v8223_v49 = vpack.c.bf16 %v3184_v39, %v3152_v37  ;;  %v3473_v39 = vld [vmem:[%s17146_s5 + $0x3a88] sm:$0xff] }
 0x49c   :  { %v8343_v12 = vpack.c.bf16 %v3058_v62, %v3026_v14  ;;  %v3186_v42 = vld [vmem:[%s17146_s5 + $0x3190] sm:$0xff]  ;;  %v3313_v14 = vld [vmem:[%s17146_s5 + $0x3588] sm:$0xff] }
 0x49d   :  { %8200 = vmatpush1.bf16.msra.mxu1 %v8199_v0  ;;  %v3442_v37 = vld [vmem:[%s17146_s5 + $0x3990] sm:$0xff] }
 0x49e   :  { %8328 = vmatpush1.bf16.msra.mxu0 %v8327_v1  ;;  %8202 = vmatprep.subr.bf16.mxu1 %v8201_v2 }
 0x49f   :  { %8330 = vmatprep.subr.bf16.mxu0 %v8329_v7 }
 0x4a1   :  { %8204 = vmatpush1.bf16.msra.mxu1 %v8203_v13  ;;  %v8217_v13 = vpack.c.bf16 %v3121_v24, %v3089_v63  ;;  %v8229_v24 = vpack.c.bf16 %v3313_v14, %v3281_v59 }
 0x4a2   :  { %8332 = vmatpush1.bf16.msra.mxu0 %v8331_v19  ;;  %8206 = vmatprep.subr.bf16.mxu1 %v8205_v20  ;;  %v3088_v19 = vld [vmem:[%s17146_s5 + $0x2e80] sm:$0xff] }
 0x4a3   :  { %8334 = vmatprep.subr.bf16.mxu0 %v8333_v26  ;;  %v3120_v20 = vld [vmem:[%s17146_s5 + $0x2f80] sm:$0xff]  ;;  %v8345_v26 = vpack.c.bf16 %v3123_v4, %v3091_v3  ;;  %v3314_v4 = vld [vmem:[%s17146_s5 + $0x3590] sm:$0xff] }
 0x4a4   :  { %v8219_v34 = vpack.c.bf16 %v3120_v20, %v3088_v19  ;;  %v3376_v19 = vld [vmem:[%s17146_s5 + $0x3780] sm:$0xff]  ;;  %v3346_v20 = vld [vmem:[%s17146_s5 + $0x3690] sm:$0xff] }
 0x4a5   :  { %8208 = vmatpush1.bf16.msra.mxu1 %v8207_v32  ;;  %v3187_v32 = vld [vmem:[%s17146_s5 + $0x3198] sm:$0xff] }
 0x4a6   :  { %8336 = vmatpush1.bf16.msra.mxu0 %v8335_v35  ;;  %8210 = vmatprep.subr.bf16.mxu1 %v8209_v36  ;;  %v8347_v35 = vpack.c.bf16 %v3122_v27, %v3090_v21  ;;  %v8221_v36 = vpack.c.bf16 %v3185_v29, %v3153_v28  ;;  %v3411_v27 = vld [vmem:[%s17146_s5 + $0x3898] sm:$0xff] }
 0x4a7   :  { %v4521_v60 = vpop.f32.mrb[18].mxu1  ;;  %8338 = vmatprep.subr.bf16.mxu0 %v8337_v41  ;;  %v8349_v41 = vpack.c.bf16 %v3187_v32, %v3155_v31  ;;  %v3443_v28 = vld [vmem:[%s17146_s5 + $0x3998] sm:$0xff]  ;;  %v3408_v32 = vld [vmem:[%s17146_s5 + $0x3880] sm:$0xff] }
 0x4a8   :  { %v9157_v0 = vadd.f32 %v4521_v60, %v3691_v46  ;;  %v4663_v1 = vpop.f32.mrb[20].mxu0  ;;  %v4523_v2 = vpop.f32.mrb[19].mxu1  ;;  %v3219_v46 = vld [vmem:[%s17146_s5 + $0x3298] sm:$0xff] }
 0x4a9   :  { %v9159_v6 = vadd.f32 %v4663_v1, %v3699_v50  ;;  %v9158_v7 = vadd.f32 %v4523_v2, %v3695_v22  ;;  %v4665_v8 = vpop.f32.mrb[21].mxu0  ;;  %8212 = vmatpush1.bf16.msra.mxu1 %v8211_v16  ;;  %v8351_v50 = vpack.c.bf16 %v3186_v42, %v3154_v40  ;;  %v8225_v22 = vpack.c.bf16 %v3249_v45, %v3217_v44  ;;  %v3216_v16 = vld [vmem:[%s17146_s5 + $0x3280] sm:$0xff]  ;;  %v3283_v60 = vld [vmem:[%s17146_s5 + $0x3498] sm:$0xff]  ;;  %v3282_v2 = vld [vmem:[%s17146_s5 + $0x3490] sm:$0xff] }
 0x4aa   :  { %v6096_v10 = vmax.f32 %v9157_v0, 0.0  ;;  %v9160_v11 = vadd.f32 %v4665_v8, %v3703_v55  ;;  %8340 = vmatpush1.bf16.msra.mxu0 %v8339_v56  ;;  %8214 = vmatprep.subr.bf16.mxu1 %v8213_v57  ;;  %v3248_v55 = vld [vmem:[%s17146_s5 + $0x3380] sm:$0xff]  ;;  %v3218_v56 = vld [vmem:[%s17146_s5 + $0x3290] sm:$0xff]  ;;  %v8353_v57 = vpack.c.bf16 %v3251_v47, %v3219_v46  ;;  %v3347_v8 = vld [vmem:[%s17146_s5 + $0x3698] sm:$0xff] }
 0x4ab   :  { %v6098_v23 = vmax.f32 %v9159_v6, 0.0  ;;  %v6097_v25 = vmax.f32 %v9158_v7, 0.0  ;;  %8342 = vmatprep.subr.bf16.mxu0 %v8341_v61  ;;  %v3315_v61 = vld [vmem:[%s17146_s5 + $0x3598] sm:$0xff]  ;;  %v8227_v62 = vpack.c.bf16 %v3248_v55, %v3216_v16  ;;  %v8355_v63 = vpack.c.bf16 %v3250_v58, %v3218_v56  ;;  %v3280_v0 = vld [vmem:[%s17146_s5 + $0x3480] sm:$0xff]  ;;  %v3345_v6 = vld [vmem:[%s17146_s5 + $0x3688] sm:$0xff] }
 0x4ac   :  { %6128 = vst [vmem:[%s17149_s7 + $0x40] sm:$0xff] %v6096_v10  ;;  %v6099_v30 = vmax.f32 %v9160_v11, 0.0  ;;  %v3312_v1 = vld [vmem:[%s17146_s5 + $0x3580] sm:$0xff]  ;;  %v8357_v3 = vpack.c.bf16 %v3315_v61, %v3283_v60  ;;  %v3377_v7 = vld [vmem:[%s17146_s5 + $0x3788] sm:$0xff]  ;;  %v8359_v11 = vpack.c.bf16 %v3314_v4, %v3282_v2  ;;  %v3507_v42 = vld [vmem:[%s17146_s5 + $0x3b98] sm:$0xff] }
 0x4ad   :  { %6130 = vst [vmem:[%s17149_s7 + $0x50] sm:$0xff] %v6098_v23  ;;  %6129 = vst [vmem:[%s17149_s7 + $0x48] sm:$0xff] %v6097_v25  ;;  %8216 = vmatpush1.bf16.msra.mxu1 %v8215_v9  ;;  %v3379_v9 = vld [vmem:[%s17146_s5 + $0x3798] sm:$0xff]  ;;  %v8231_v10 = vpack.c.bf16 %v3312_v1, %v3280_v0  ;;  %v3378_v23 = vld [vmem:[%s17146_s5 + $0x3790] sm:$0xff] }
 0x4ae   :  { %6131 = vst [vmem:[%s17149_s7 + $0x58] sm:$0xff] %v6099_v30  ;;  %8344 = vmatpush1.bf16.msra.mxu0 %v8343_v12  ;;  %8218 = vmatprep.subr.bf16.mxu1 %v8217_v13  ;;  %v8233_v12 = vpack.c.bf16 %v3377_v7, %v3345_v6  ;;  %v3344_v13 = vld [vmem:[%s17146_s5 + $0x3680] sm:$0xff]  ;;  %v8361_v21 = vpack.c.bf16 %v3379_v9, %v3347_v8  ;;  %v3409_v25 = vld [vmem:[%s17146_s5 + $0x3888] sm:$0xff]  ;;  %v3506_v16 = vld [vmem:[%s17146_s5 + $0x3b90] sm:$0xff] }
 0x4af   :  { %8346 = vmatprep.subr.bf16.mxu0 %v8345_v26  ;;  %v3441_v26 = vld [vmem:[%s17146_s5 + $0x3988] sm:$0xff]  ;;  %v8235_v29 = vpack.c.bf16 %v3376_v19, %v3344_v13  ;;  %v8363_v30 = vpack.c.bf16 %v3378_v23, %v3346_v20  ;;  %v3472_v47 = vld [vmem:[%s17146_s5 + $0x3a80] sm:$0xff]  ;;  %v3571_v58 = vld [vmem:[%s17146_s5 + $0x3d98] sm:$0xff] }
 0x4b0   :  { %v8237_v31 = vpack.c.bf16 %v3441_v26, %v3409_v25  ;;  %v3505_v40 = vld [vmem:[%s17146_s5 + $0x3b88] sm:$0xff]  ;;  %v3536_v61 = vld [vmem:[%s17146_s5 + $0x3c80] sm:$0xff]  ;;  %v3570_v0 = vld [vmem:[%s17146_s5 + $0x3d90] sm:$0xff] }
 0x4b1   :  { %8220 = vmatpush1.bf16.msra.mxu1 %v8219_v34  ;;  %v3440_v34 = vld [vmem:[%s17146_s5 + $0x3980] sm:$0xff]  ;;  %v8241_v46 = vpack.c.bf16 %v3505_v40, %v3473_v39  ;;  %v3537_v55 = vld [vmem:[%s17146_s5 + $0x3c88] sm:$0xff]  ;;  %v3635_v4 = vld [vmem:[%s17146_s5 + $0x3f98] sm:$0xff] }
 0x4b2   :  { %8348 = vmatpush1.bf16.msra.mxu0 %v8347_v35  ;;  %8222 = vmatprep.subr.bf16.mxu1 %v8221_v36  ;;  %v3410_v35 = vld [vmem:[%s17146_s5 + $0x3890] sm:$0xff]  ;;  %v8365_v36 = vpack.c.bf16 %v3443_v28, %v3411_v27  ;;  %v8239_v44 = vpack.c.bf16 %v3440_v34, %v3408_v32  ;;  %v3569_v56 = vld [vmem:[%s17146_s5 + $0x3d88] sm:$0xff]  ;;  %v3600_v9 = vld [vmem:[%s17146_s5 + $0x3e80] sm:$0xff] }
 0x4b3   :  { %8350 = vmatprep.subr.bf16.mxu0 %v8349_v41  ;;  %v3475_v41 = vld [vmem:[%s17146_s5 + $0x3a98] sm:$0xff]  ;;  %v8367_v45 = vpack.c.bf16 %v3442_v37, %v3410_v35  ;;  %v8245_v60 = vpack.c.bf16 %v3569_v56, %v3537_v55  ;;  %v3601_v1 = vld [vmem:[%s17146_s5 + $0x3e88] sm:$0xff]  ;;  %v3634_v13 = vld [vmem:[%s17146_s5 + $0x3f90] sm:$0xff] }
 0x4b4   :  { %v3633_v2 = vld [vmem:[%s17146_s5 + $0x3f88] sm:$0xff]  ;;  %v1655_v23 = vld [vmem:[%s17146_s5 + $0x1b8] sm:$0xff]  ;;  %v1620_v28 = vld [vmem:[%s17146_s5 + $0xa0] sm:$0xff] }
 0x4b5   :  { %8224 = vmatpush1.bf16.msra.mxu1 %v8223_v49  ;;  %v3504_v49 = vld [vmem:[%s17146_s5 + $0x3b80] sm:$0xff]  ;;  %v8249_v8 = vpack.c.bf16 %v3633_v2, %v3601_v1  ;;  %v1621_v19 = vld [vmem:[%s17146_s5 + $0xa8] sm:$0xff]  ;;  %v1654_v32 = vld [vmem:[%s17146_s5 + $0x1b0] sm:$0xff] }
 0x4b6   :  { %8352 = vmatpush1.bf16.msra.mxu0 %v8351_v50  ;;  %8226 = vmatprep.subr.bf16.mxu1 %v8225_v22  ;;  %v3474_v50 = vld [vmem:[%s17146_s5 + $0x3a90] sm:$0xff]  ;;  %v8369_v22 = vpack.c.bf16 %v3507_v42, %v3475_v41  ;;  %v8243_v59 = vpack.c.bf16 %v3504_v49, %v3472_v47  ;;  %v1653_v20 = vld [vmem:[%s17146_s5 + $0x1a8] sm:$0xff]  ;;  %v1687_v37 = vld [vmem:[%s17146_s5 + $0x2b8] sm:$0xff] }
 0x4b7   :  { %8354 = vmatprep.subr.bf16.mxu0 %v8353_v57  ;;  %v3539_v57 = vld [vmem:[%s17146_s5 + $0x3c98] sm:$0xff]  ;;  %v8371_v14 = vpack.c.bf16 %v3506_v16, %v3474_v50  ;;  %v8381_v27 = vpack.c.bf16 %v1653_v20, %v1621_v19  ;;  %v1685_v34 = vld [vmem:[%s17146_s5 + $0x2a8] sm:$0xff]  ;;  %v1684_v41 = vld [vmem:[%s17146_s5 + $0x2a0] sm:$0xff] }
 0x4b8   :  { %v1717_v35 = vld [vmem:[%s17146_s5 + $0x3a8] sm:$0xff]  ;;  %v1719_v39 = vld [vmem:[%s17146_s5 + $0x3b8] sm:$0xff]  ;;  %v1716_v42 = vld [vmem:[%s17146_s5 + $0x3a0] sm:$0xff] }
 0x4b9   :  { %8228 = vmatpush1.bf16.msra.mxu1 %v8227_v62  ;;  %v3568_v62 = vld [vmem:[%s17146_s5 + $0x3d80] sm:$0xff]  ;;  %v1749_v47 = vld [vmem:[%s17146_s5 + $0x4a8] sm:$0xff]  ;;  %v8513_v50 = vpack.c.bf16 %v1719_v39, %v1687_v37  ;;  %v1783_v16 = vld [vmem:[%s17146_s5 + $0x5b8] sm:$0xff]  ;;  %v8387_v55 = vpack.c.bf16 %v1716_v42, %v1684_v41 }
 0x4ba   :  { %8356 = vmatpush1.bf16.msra.mxu0 %v8355_v63  ;;  %8230 = vmatprep.subr.bf16.mxu1 %v8229_v24  ;;  %v3538_v63 = vld [vmem:[%s17146_s5 + $0x3c90] sm:$0xff]  ;;  %v8373_v24 = vpack.c.bf16 %v3571_v58, %v3539_v57  ;;  %v8247_v6 = vpack.c.bf16 %v3568_v62, %v3536_v61  ;;  %v1781_v49 = vld [vmem:[%s17146_s5 + $0x5a8] sm:$0xff]  ;;  %v1748_v58 = vld [vmem:[%s17146_s5 + $0x4a0] sm:$0xff] }
 0x4bb   :  { %8358 = vmatprep.subr.bf16.mxu0 %v8357_v3  ;;  %v3603_v3 = vld [vmem:[%s17146_s5 + $0x3e98] sm:$0xff]  ;;  %v8375_v7 = vpack.c.bf16 %v3570_v0, %v3538_v63  ;;  %v8389_v57 = vpack.c.bf16 %v1781_v49, %v1749_v47  ;;  %v1782_v61 = vld [vmem:[%s17146_s5 + $0x5b0] sm:$0xff]  ;;  %v1813_v62 = vld [vmem:[%s17146_s5 + $0x6a8] sm:$0xff] }
 0x4bc   :  { %v1845_v63 = vld [vmem:[%s17146_s5 + $0x7a8] sm:$0xff]  ;;  %v1847_v0 = vld [vmem:[%s17146_s5 + $0x7b8] sm:$0xff]  ;;  %v1940_v37 = vld [vmem:[%s17146_s5 + $0xaa0] sm:$0xff] }
 0x4bd   :  { %8232 = vmatpush1.bf16.msra.mxu1 %v8231_v10  ;;  %v3632_v10 = vld [vmem:[%s17146_s5 + $0x3f80] sm:$0xff]  ;;  %v1974_v42 = vld [vmem:[%s17146_s5 + $0xbb0] sm:$0xff]  ;;  %v2039_v47 = vld [vmem:[%s17146_s5 + $0xdb8] sm:$0xff] }
 0x4be   :  { %8360 = vmatpush1.bf16.msra.mxu0 %v8359_v11  ;;  %8234 = vmatprep.subr.bf16.mxu1 %v8233_v12  ;;  %v3602_v11 = vld [vmem:[%s17146_s5 + $0x3e90] sm:$0xff]  ;;  %v8377_v12 = vpack.c.bf16 %v3635_v4, %v3603_v3  ;;  %v8251_v25 = vpack.c.bf16 %v3632_v10, %v3600_v9  ;;  %v8393_v3 = vpack.c.bf16 %v1845_v63, %v1813_v62  ;;  %v1812_v4 = vld [vmem:[%s17146_s5 + $0x6a0] sm:$0xff]  ;;  %v1877_v10 = vld [vmem:[%s17146_s5 + $0x8a8] sm:$0xff] }
 0x4bf   :  { %8362 = vmatprep.subr.bf16.mxu0 %v8361_v21  ;;  %v1623_v21 = vld [vmem:[%s17146_s5 + $0xb8] sm:$0xff]  ;;  %v8379_v26 = vpack.c.bf16 %v3634_v13, %v3602_v11  ;;  %v1846_v9 = vld [vmem:[%s17146_s5 + $0x7b0] sm:$0xff]  ;;  %v1909_v11 = vld [vmem:[%s17146_s5 + $0x9a8] sm:$0xff] }
 0x4c0   :  { %v1911_v13 = vld [vmem:[%s17146_s5 + $0x9b8] sm:$0xff]  ;;  %v1972_v39 = vld [vmem:[%s17146_s5 + $0xba0] sm:$0xff] }
 0x4c1   :  { %8236 = vmatpush1.bf16.msra.mxu1 %v8235_v29  ;;  %v1652_v29 = vld [vmem:[%s17146_s5 + $0x1a0] sm:$0xff]  ;;  %v8403_v49 = vpack.c.bf16 %v1972_v39, %v1940_v37  ;;  %v2230_v37 = vld [vmem:[%s17146_s5 + $0x13b0] sm:$0xff]  ;;  %v2261_v39 = vld [vmem:[%s17146_s5 + $0x14a8] sm:$0xff] }
 0x4c2   :  { %8364 = vmatpush1.bf16.msra.mxu0 %v8363_v30  ;;  %8238 = vmatprep.subr.bf16.mxu1 %v8237_v31  ;;  %v8509_v30 = vpack.c.bf16 %v1655_v23, %v1623_v21  ;;  %v1622_v31 = vld [vmem:[%s17146_s5 + $0xb0] sm:$0xff]  ;;  %v8397_v21 = vpack.c.bf16 %v1909_v11, %v1877_v10  ;;  %v1876_v23 = vld [vmem:[%s17146_s5 + $0x8a0] sm:$0xff] }
 0x4c3   :  { %8366 = vmatprep.subr.bf16.mxu0 %v8365_v36  ;;  %v8383_v36 = vpack.c.bf16 %v1652_v29, %v1620_v28  ;;  %v8511_v40 = vpack.c.bf16 %v1654_v32, %v1622_v31  ;;  %v1910_v28 = vld [vmem:[%s17146_s5 + $0x9b0] sm:$0xff]  ;;  %v1941_v29 = vld [vmem:[%s17146_s5 + $0xaa8] sm:$0xff]  ;;  %v1943_v31 = vld [vmem:[%s17146_s5 + $0xab8] sm:$0xff] }
 0x4c4   :  { %v1975_v32 = vld [vmem:[%s17146_s5 + $0xbb8] sm:$0xff] }
 0x4c5   :  { %8240 = vmatpush1.bf16.msra.mxu1 %v8239_v44  ;;  %v1686_v44 = vld [vmem:[%s17146_s5 + $0x2b0] sm:$0xff]  ;;  %v8529_v41 = vpack.c.bf16 %v1975_v32, %v1943_v31  ;;  %v2196_v32 = vld [vmem:[%s17146_s5 + $0x12a0] sm:$0xff] }
 0x4c6   :  { %8368 = vmatpush1.bf16.msra.mxu0 %v8367_v45  ;;  %8242 = vmatprep.subr.bf16.mxu1 %v8241_v46  ;;  %v8385_v45 = vpack.c.bf16 %v1717_v35, %v1685_v34  ;;  %v1718_v46 = vld [vmem:[%s17146_s5 + $0x3b0] sm:$0xff] }
 0x4c7   :  { %8370 = vmatprep.subr.bf16.mxu0 %v8369_v22  ;;  %v1751_v22 = vld [vmem:[%s17146_s5 + $0x4b8] sm:$0xff]  ;;  %v8515_v56 = vpack.c.bf16 %v1718_v46, %v1686_v44  ;;  %v2005_v44 = vld [vmem:[%s17146_s5 + $0xca8] sm:$0xff] }
 0x4c8   :  { %v2007_v46 = vld [vmem:[%s17146_s5 + $0xcb8] sm:$0xff] }
 0x4c9   :  { %8244 = vmatpush1.bf16.msra.mxu1 %v8243_v59  ;;  %v1780_v59 = vld [vmem:[%s17146_s5 + $0x5a0] sm:$0xff] }
 0x4ca   :  { %8372 = vmatpush1.bf16.msra.mxu0 %v8371_v14  ;;  %8246 = vmatprep.subr.bf16.mxu1 %v8245_v60  ;;  %v1750_v14 = vld [vmem:[%s17146_s5 + $0x4b0] sm:$0xff]  ;;  %v8517_v60 = vpack.c.bf16 %v1783_v16, %v1751_v22  ;;  %v8391_v1 = vpack.c.bf16 %v1780_v59, %v1748_v58  ;;  %v2004_v16 = vld [vmem:[%s17146_s5 + $0xca0] sm:$0xff]  ;;  %v2069_v59 = vld [vmem:[%s17146_s5 + $0xea8] sm:$0xff] }
 0x4cb   :  { %8374 = vmatprep.subr.bf16.mxu0 %v8373_v24  ;;  %v1815_v24 = vld [vmem:[%s17146_s5 + $0x6b8] sm:$0xff]  ;;  %v8519_v2 = vpack.c.bf16 %v1782_v61, %v1750_v14  ;;  %v2038_v58 = vld [vmem:[%s17146_s5 + $0xdb0] sm:$0xff]  ;;  %v2101_v14 = vld [vmem:[%s17146_s5 + $0xfa8] sm:$0xff] }
 0x4cc   :  { %v2103_v61 = vld [vmem:[%s17146_s5 + $0xfb8] sm:$0xff] }
 0x4cd   :  { %8248 = vmatpush1.bf16.msra.mxu1 %v8247_v6  ;;  %v1844_v6 = vld [vmem:[%s17146_s5 + $0x7a0] sm:$0xff] }
 0x4ce   :  { %8376 = vmatpush1.bf16.msra.mxu0 %v8375_v7  ;;  %8250 = vmatprep.subr.bf16.mxu1 %v8249_v8  ;;  %v1814_v7 = vld [vmem:[%s17146_s5 + $0x6b0] sm:$0xff]  ;;  %v8521_v8 = vpack.c.bf16 %v1847_v0, %v1815_v24  ;;  %v8395_v19 = vpack.c.bf16 %v1844_v6, %v1812_v4  ;;  %v8409_v24 = vpack.c.bf16 %v2101_v14, %v2069_v59  ;;  %v2068_v0 = vld [vmem:[%s17146_s5 + $0xea0] sm:$0xff]  ;;  %v2133_v6 = vld [vmem:[%s17146_s5 + $0x10a8] sm:$0xff] }
 0x4cf   :  { %8378 = vmatprep.subr.bf16.mxu0 %v8377_v12  ;;  %v1879_v12 = vld [vmem:[%s17146_s5 + $0x8b8] sm:$0xff]  ;;  %v8523_v20 = vpack.c.bf16 %v1846_v9, %v1814_v7  ;;  %v2102_v4 = vld [vmem:[%s17146_s5 + $0xfb0] sm:$0xff]  ;;  %v2165_v7 = vld [vmem:[%s17146_s5 + $0x11a8] sm:$0xff] }
 0x4d0   :  { %v2167_v9 = vld [vmem:[%s17146_s5 + $0x11b8] sm:$0xff] }
 0x4d1   :  { %8252 = vmatpush1.bf16.msra.mxu1 %v8251_v25  ;;  %v1908_v25 = vld [vmem:[%s17146_s5 + $0x9a0] sm:$0xff] }
 0x4d2   :  { %8380 = vmatpush1.bf16.msra.mxu0 %v8379_v26  ;;  %8382 = vmatprep.subr.bf16.mxu1 %v8381_v27  ;;  %v1878_v26 = vld [vmem:[%s17146_s5 + $0x8b0] sm:$0xff]  ;;  %v8525_v27 = vpack.c.bf16 %v1911_v13, %v1879_v12  ;;  %v8399_v34 = vpack.c.bf16 %v1908_v25, %v1876_v23  ;;  %v8413_v12 = vpack.c.bf16 %v2165_v7, %v2133_v6  ;;  %v2132_v13 = vld [vmem:[%s17146_s5 + $0x10a0] sm:$0xff]  ;;  %v2197_v25 = vld [vmem:[%s17146_s5 + $0x12a8] sm:$0xff] }
 0x4d3   :  { %8510 = vmatprep.subr.bf16.mxu0 %v8509_v30  ;;  %v1973_v30 = vld [vmem:[%s17146_s5 + $0xba8] sm:$0xff]  ;;  %v8527_v35 = vpack.c.bf16 %v1910_v28, %v1878_v26  ;;  %v2166_v23 = vld [vmem:[%s17146_s5 + $0x11b0] sm:$0xff]  ;;  %v2231_v28 = vld [vmem:[%s17146_s5 + $0x13b8] sm:$0xff] }
 0x4d4   :  { %5088 = vmatmul.mubr.f32.vlgmr.msra.gmra.mrb[22].mxu1 %v11581_v5  ;;  %v2229_v26 = vld [vmem:[%s17146_s5 + $0x13a8] sm:$0xff] }
 0x4d5   :  { %5230 = vmatmul.mubr.f32.vlgmr.msra.gmra.mrb[24].mxu0 %v11581_v5  ;;  %8384 = vmatpush1.bf16.msra.mxu1 %v8383_v36  ;;  %v8401_v36 = vpack.c.bf16 %v1973_v30, %v1941_v29  ;;  %v8417_v31 = vpack.c.bf16 %v2229_v26, %v2197_v25 }
 0x4d6   :  { %5300 = vmatprep.mubr.f32.mxu1 %v11179_v38  ;;  %8512 = vmatpush1.bf16.msra.mxu0 %v8511_v40  ;;  %v1942_v40 = vld [vmem:[%s17146_s5 + $0xab0] sm:$0xff] }
 0x4d7   :  { %5442 = vmatprep.mubr.f32.mxu0 %v11179_v38  ;;  %8386 = vmatprep.subr.bf16.mxu1 %v8385_v45  ;;  %v2037_v45 = vld [vmem:[%s17146_s5 + $0xda8] sm:$0xff] }
 0x4d8   :  { %8514 = vmatprep.subr.bf16.mxu0 %v8513_v50  ;;  %v8531_v50 = vpack.c.bf16 %v1974_v42, %v1942_v40  ;;  %v8405_v22 = vpack.c.bf16 %v2037_v45, %v2005_v44  ;;  %v2293_v40 = vld [vmem:[%s17146_s5 + $0x15a8] sm:$0xff]  ;;  %v2295_v42 = vld [vmem:[%s17146_s5 + $0x15b8] sm:$0xff] }
 0x4d9   :  { %8388 = vmatpush1.bf16.msra.mxu1 %v8387_v55  ;;  %v2036_v55 = vld [vmem:[%s17146_s5 + $0xda0] sm:$0xff] }
 0x4da   :  { %8516 = vmatpush1.bf16.msra.mxu0 %v8515_v56  ;;  %8390 = vmatprep.subr.bf16.mxu1 %v8389_v57  ;;  %v2006_v56 = vld [vmem:[%s17146_s5 + $0xcb0] sm:$0xff]  ;;  %v8533_v57 = vpack.c.bf16 %v2039_v47, %v2007_v46  ;;  %v8407_v62 = vpack.c.bf16 %v2036_v55, %v2004_v16  ;;  %v8421_v46 = vpack.c.bf16 %v2293_v40, %v2261_v39  ;;  %v2260_v47 = vld [vmem:[%s17146_s5 + $0x14a0] sm:$0xff]  ;;  %v2325_v55 = vld [vmem:[%s17146_s5 + $0x16a8] sm:$0xff] }
 0x4db   :  { %8518 = vmatprep.subr.bf16.mxu0 %v8517_v60  ;;  %v2071_v60 = vld [vmem:[%s17146_s5 + $0xeb8] sm:$0xff]  ;;  %v8535_v63 = vpack.c.bf16 %v2038_v58, %v2006_v56  ;;  %v2294_v16 = vld [vmem:[%s17146_s5 + $0x15b0] sm:$0xff]  ;;  %v2357_v56 = vld [vmem:[%s17146_s5 + $0x17a8] sm:$0xff] }
 0x4dc   :  { %v2359_v58 = vld [vmem:[%s17146_s5 + $0x17b8] sm:$0xff] }
 0x4dd   :  { %8392 = vmatpush1.bf16.msra.mxu1 %v8391_v1  ;;  %v2100_v1 = vld [vmem:[%s17146_s5 + $0xfa0] sm:$0xff] }
 0x4de   :  { %8520 = vmatpush1.bf16.msra.mxu0 %v8519_v2  ;;  %8394 = vmatprep.subr.bf16.mxu1 %v8393_v3  ;;  %v2070_v2 = vld [vmem:[%s17146_s5 + $0xeb0] sm:$0xff]  ;;  %v8537_v3 = vpack.c.bf16 %v2103_v61, %v2071_v60  ;;  %v8411_v10 = vpack.c.bf16 %v2100_v1, %v2068_v0  ;;  %v8425_v60 = vpack.c.bf16 %v2357_v56, %v2325_v55  ;;  %v2324_v61 = vld [vmem:[%s17146_s5 + $0x16a0] sm:$0xff]  ;;  %v2389_v1 = vld [vmem:[%s17146_s5 + $0x18a8] sm:$0xff] }
 0x4df   :  { %8522 = vmatprep.subr.bf16.mxu0 %v8521_v8  ;;  %v2135_v8 = vld [vmem:[%s17146_s5 + $0x10b8] sm:$0xff]  ;;  %v8539_v11 = vpack.c.bf16 %v2102_v4, %v2070_v2  ;;  %v2358_v0 = vld [vmem:[%s17146_s5 + $0x17b0] sm:$0xff]  ;;  %v2421_v2 = vld [vmem:[%s17146_s5 + $0x19a8] sm:$0xff] }
 0x4e0   :  { %v2423_v4 = vld [vmem:[%s17146_s5 + $0x19b8] sm:$0xff] }
 0x4e1   :  { %8396 = vmatpush1.bf16.msra.mxu1 %v8395_v19  ;;  %v2164_v19 = vld [vmem:[%s17146_s5 + $0x11a0] sm:$0xff] }
 0x4e2   :  { %8524 = vmatpush1.bf16.msra.mxu0 %v8523_v20  ;;  %8398 = vmatprep.subr.bf16.mxu1 %v8397_v21  ;;  %v2134_v20 = vld [vmem:[%s17146_s5 + $0x10b0] sm:$0xff]  ;;  %v8541_v21 = vpack.c.bf16 %v2167_v9, %v2135_v8  ;;  %v8415_v29 = vpack.c.bf16 %v2164_v19, %v2132_v13  ;;  %v8429_v8 = vpack.c.bf16 %v2421_v2, %v2389_v1  ;;  %v2388_v9 = vld [vmem:[%s17146_s5 + $0x18a0] sm:$0xff]  ;;  %v2453_v19 = vld [vmem:[%s17146_s5 + $0x1aa8] sm:$0xff] }
 0x4e3   :  { %8526 = vmatprep.subr.bf16.mxu0 %v8525_v27  ;;  %v2199_v27 = vld [vmem:[%s17146_s5 + $0x12b8] sm:$0xff]  ;;  %v8543_v30 = vpack.c.bf16 %v2166_v23, %v2134_v20  ;;  %v2422_v13 = vld [vmem:[%s17146_s5 + $0x19b0] sm:$0xff]  ;;  %v2485_v20 = vld [vmem:[%s17146_s5 + $0x1ba8] sm:$0xff] }
 0x4e4   :  { %v2487_v23 = vld [vmem:[%s17146_s5 + $0x1bb8] sm:$0xff] }
 0x4e5   :  { %8400 = vmatpush1.bf16.msra.mxu1 %v8399_v34  ;;  %v2228_v34 = vld [vmem:[%s17146_s5 + $0x13a0] sm:$0xff] }
 0x4e6   :  { %8528 = vmatpush1.bf16.msra.mxu0 %v8527_v35  ;;  %8402 = vmatprep.subr.bf16.mxu1 %v8401_v36  ;;  %v2198_v35 = vld [vmem:[%s17146_s5 + $0x12b0] sm:$0xff]  ;;  %v8545_v36 = vpack.c.bf16 %v2231_v28, %v2199_v27  ;;  %v8419_v44 = vpack.c.bf16 %v2228_v34, %v2196_v32  ;;  %v8433_v27 = vpack.c.bf16 %v2485_v20, %v2453_v19  ;;  %v2452_v28 = vld [vmem:[%s17146_s5 + $0x1aa0] sm:$0xff]  ;;  %v2517_v34 = vld [vmem:[%s17146_s5 + $0x1ca8] sm:$0xff] }
 0x4e7   :  { %8530 = vmatprep.subr.bf16.mxu0 %v8529_v41  ;;  %v2263_v41 = vld [vmem:[%s17146_s5 + $0x14b8] sm:$0xff]  ;;  %v8547_v45 = vpack.c.bf16 %v2230_v37, %v2198_v35  ;;  %v2486_v32 = vld [vmem:[%s17146_s5 + $0x1bb0] sm:$0xff]  ;;  %v2549_v35 = vld [vmem:[%s17146_s5 + $0x1da8] sm:$0xff] }
 0x4e8   :  { %v2551_v37 = vld [vmem:[%s17146_s5 + $0x1db8] sm:$0xff] }
 0x4e9   :  { %8404 = vmatpush1.bf16.msra.mxu1 %v8403_v49  ;;  %v2292_v49 = vld [vmem:[%s17146_s5 + $0x15a0] sm:$0xff]  ;;  %v2743_v19 = vld [vmem:[%s17146_s5 + $0x23b8] sm:$0xff] }
 0x4ea   :  { %8532 = vmatpush1.bf16.msra.mxu0 %v8531_v50  ;;  %8406 = vmatprep.subr.bf16.mxu1 %v8405_v22  ;;  %v2262_v50 = vld [vmem:[%s17146_s5 + $0x14b0] sm:$0xff]  ;;  %v8549_v22 = vpack.c.bf16 %v2295_v42, %v2263_v41  ;;  %v8423_v59 = vpack.c.bf16 %v2292_v49, %v2260_v47  ;;  %v8437_v41 = vpack.c.bf16 %v2549_v35, %v2517_v34  ;;  %v2516_v42 = vld [vmem:[%s17146_s5 + $0x1ca0] sm:$0xff]  ;;  %v2581_v49 = vld [vmem:[%s17146_s5 + $0x1ea8] sm:$0xff] }
 0x4eb   :  { %8534 = vmatprep.subr.bf16.mxu0 %v8533_v57  ;;  %v2327_v57 = vld [vmem:[%s17146_s5 + $0x16b8] sm:$0xff]  ;;  %v8551_v14 = vpack.c.bf16 %v2294_v16, %v2262_v50  ;;  %v2550_v47 = vld [vmem:[%s17146_s5 + $0x1db0] sm:$0xff]  ;;  %v2613_v50 = vld [vmem:[%s17146_s5 + $0x1fa8] sm:$0xff] }
 0x4ec   :  { %v2615_v16 = vld [vmem:[%s17146_s5 + $0x1fb8] sm:$0xff] }
 0x4ed   :  { %8408 = vmatpush1.bf16.msra.mxu1 %v8407_v62  ;;  %v2356_v62 = vld [vmem:[%s17146_s5 + $0x17a0] sm:$0xff] }
 0x4ee   :  { %8536 = vmatpush1.bf16.msra.mxu0 %v8535_v63  ;;  %8410 = vmatprep.subr.bf16.mxu1 %v8409_v24  ;;  %v2326_v63 = vld [vmem:[%s17146_s5 + $0x16b0] sm:$0xff]  ;;  %v8553_v24 = vpack.c.bf16 %v2359_v58, %v2327_v57  ;;  %v8427_v6 = vpack.c.bf16 %v2356_v62, %v2324_v61  ;;  %v8441_v57 = vpack.c.bf16 %v2613_v50, %v2581_v49  ;;  %v2580_v58 = vld [vmem:[%s17146_s5 + $0x1ea0] sm:$0xff]  ;;  %v2645_v62 = vld [vmem:[%s17146_s5 + $0x20a8] sm:$0xff] }
 0x4ef   :  { %8538 = vmatprep.subr.bf16.mxu0 %v8537_v3  ;;  %v2391_v3 = vld [vmem:[%s17146_s5 + $0x18b8] sm:$0xff]  ;;  %v8555_v7 = vpack.c.bf16 %v2358_v0, %v2326_v63  ;;  %v2614_v61 = vld [vmem:[%s17146_s5 + $0x1fb0] sm:$0xff]  ;;  %v2677_v63 = vld [vmem:[%s17146_s5 + $0x21a8] sm:$0xff] }
 0x4f0   :  { %v2679_v0 = vld [vmem:[%s17146_s5 + $0x21b8] sm:$0xff] }
 0x4f1   :  { %8412 = vmatpush1.bf16.msra.mxu1 %v8411_v10  ;;  %v2420_v10 = vld [vmem:[%s17146_s5 + $0x19a0] sm:$0xff] }
 0x4f2   :  { %8540 = vmatpush1.bf16.msra.mxu0 %v8539_v11  ;;  %8414 = vmatprep.subr.bf16.mxu1 %v8413_v12  ;;  %v2390_v11 = vld [vmem:[%s17146_s5 + $0x18b0] sm:$0xff]  ;;  %v8557_v12 = vpack.c.bf16 %v2423_v4, %v2391_v3  ;;  %v8431_v25 = vpack.c.bf16 %v2420_v10, %v2388_v9  ;;  %v8445_v3 = vpack.c.bf16 %v2677_v63, %v2645_v62  ;;  %v2644_v4 = vld [vmem:[%s17146_s5 + $0x20a0] sm:$0xff]  ;;  %v2709_v10 = vld [vmem:[%s17146_s5 + $0x22a8] sm:$0xff] }
 0x4f3   :  { %8542 = vmatprep.subr.bf16.mxu0 %v8541_v21  ;;  %v2455_v21 = vld [vmem:[%s17146_s5 + $0x1ab8] sm:$0xff]  ;;  %v8559_v26 = vpack.c.bf16 %v2422_v13, %v2390_v11  ;;  %v2678_v9 = vld [vmem:[%s17146_s5 + $0x21b0] sm:$0xff]  ;;  %v2741_v11 = vld [vmem:[%s17146_s5 + $0x23a8] sm:$0xff] }
 0x4f4   :  { %v2711_v13 = vld [vmem:[%s17146_s5 + $0x22b8] sm:$0xff] }
 0x4f5   :  { %8416 = vmatpush1.bf16.msra.mxu1 %v8415_v29  ;;  %v2484_v29 = vld [vmem:[%s17146_s5 + $0x1ba0] sm:$0xff] }
 0x4f6   :  { %8544 = vmatpush1.bf16.msra.mxu0 %v8543_v30  ;;  %8418 = vmatprep.subr.bf16.mxu1 %v8417_v31  ;;  %v2454_v30 = vld [vmem:[%s17146_s5 + $0x1ab0] sm:$0xff]  ;;  %v8561_v31 = vpack.c.bf16 %v2487_v23, %v2455_v21  ;;  %v8435_v39 = vpack.c.bf16 %v2484_v29, %v2452_v28  ;;  %v2708_v21 = vld [vmem:[%s17146_s5 + $0x22a0] sm:$0xff]  ;;  %v2773_v28 = vld [vmem:[%s17146_s5 + $0x24a8] sm:$0xff] }
 0x4f7   :  { %8546 = vmatprep.subr.bf16.mxu0 %v8545_v36  ;;  %v2519_v36 = vld [vmem:[%s17146_s5 + $0x1cb8] sm:$0xff]  ;;  %v8563_v40 = vpack.c.bf16 %v2486_v32, %v2454_v30  ;;  %v2740_v23 = vld [vmem:[%s17146_s5 + $0x23a0] sm:$0xff]  ;;  %v2805_v29 = vld [vmem:[%s17146_s5 + $0x25a8] sm:$0xff]  ;;  %v8577_v30 = vpack.c.bf16 %v2743_v19, %v2711_v13 }
 0x4f8   :  { %v2807_v32 = vld [vmem:[%s17146_s5 + $0x25b8] sm:$0xff]  ;;  %v8451_v34 = vpack.c.bf16 %v2740_v23, %v2708_v21  ;;  %v2964_v13 = vld [vmem:[%s17146_s5 + $0x2aa0] sm:$0xff]  ;;  %v2998_v23 = vld [vmem:[%s17146_s5 + $0x2bb0] sm:$0xff] }
 0x4f9   :  { %8420 = vmatpush1.bf16.msra.mxu1 %v8419_v44  ;;  %v2548_v44 = vld [vmem:[%s17146_s5 + $0x1da0] sm:$0xff] }
 0x4fa   :  { %8548 = vmatpush1.bf16.msra.mxu0 %v8547_v45  ;;  %8422 = vmatprep.subr.bf16.mxu1 %v8421_v46  ;;  %v2518_v45 = vld [vmem:[%s17146_s5 + $0x1cb0] sm:$0xff]  ;;  %v8565_v46 = vpack.c.bf16 %v2551_v37, %v2519_v36  ;;  %v8439_v55 = vpack.c.bf16 %v2548_v44, %v2516_v42  ;;  %v8453_v36 = vpack.c.bf16 %v2805_v29, %v2773_v28  ;;  %v2772_v37 = vld [vmem:[%s17146_s5 + $0x24a0] sm:$0xff]  ;;  %v2837_v44 = vld [vmem:[%s17146_s5 + $0x26a8] sm:$0xff] }
 0x4fb   :  { %8550 = vmatprep.subr.bf16.mxu0 %v8549_v22  ;;  %v2583_v22 = vld [vmem:[%s17146_s5 + $0x1eb8] sm:$0xff]  ;;  %v8567_v56 = vpack.c.bf16 %v2550_v47, %v2518_v45  ;;  %v2806_v42 = vld [vmem:[%s17146_s5 + $0x25b0] sm:$0xff]  ;;  %v2869_v45 = vld [vmem:[%s17146_s5 + $0x27a8] sm:$0xff] }
 0x4fc   :  { %v2871_v47 = vld [vmem:[%s17146_s5 + $0x27b8] sm:$0xff]  ;;  %v2996_v19 = vld [vmem:[%s17146_s5 + $0x2ba0] sm:$0xff] }
 0x4fd   :  { %8424 = vmatpush1.bf16.msra.mxu1 %v8423_v59  ;;  %v2612_v59 = vld [vmem:[%s17146_s5 + $0x1fa0] sm:$0xff]  ;;  %v3031_v29 = vld [vmem:[%s17146_s5 + $0x2cb8] sm:$0xff] }
 0x4fe   :  { %8552 = vmatpush1.bf16.msra.mxu0 %v8551_v14  ;;  %8426 = vmatprep.subr.bf16.mxu1 %v8425_v60  ;;  %v2582_v14 = vld [vmem:[%s17146_s5 + $0x1eb0] sm:$0xff]  ;;  %v8569_v60 = vpack.c.bf16 %v2615_v16, %v2583_v22  ;;  %v8443_v1 = vpack.c.bf16 %v2612_v59, %v2580_v58  ;;  %v8457_v22 = vpack.c.bf16 %v2869_v45, %v2837_v44  ;;  %v2836_v16 = vld [vmem:[%s17146_s5 + $0x26a0] sm:$0xff]  ;;  %v2901_v59 = vld [vmem:[%s17146_s5 + $0x28a8] sm:$0xff] }
 0x4ff   :  { %8554 = vmatprep.subr.bf16.mxu0 %v8553_v24  ;;  %v2647_v24 = vld [vmem:[%s17146_s5 + $0x20b8] sm:$0xff]  ;;  %v8571_v2 = vpack.c.bf16 %v2614_v61, %v2582_v14  ;;  %v2870_v58 = vld [vmem:[%s17146_s5 + $0x27b0] sm:$0xff]  ;;  %v2933_v14 = vld [vmem:[%s17146_s5 + $0x29a8] sm:$0xff] }
 0x500   :  { %v2935_v61 = vld [vmem:[%s17146_s5 + $0x29b8] sm:$0xff]  ;;  %v3062_v45 = vld [vmem:[%s17146_s5 + $0x2db0] sm:$0xff] }
 0x501   :  { %8428 = vmatpush1.bf16.msra.mxu1 %v8427_v6  ;;  %v2676_v6 = vld [vmem:[%s17146_s5 + $0x21a0] sm:$0xff] }
 0x502   :  { %8556 = vmatpush1.bf16.msra.mxu0 %v8555_v7  ;;  %8430 = vmatprep.subr.bf16.mxu1 %v8429_v8  ;;  %v8573_v7 = vpack.c.bf16 %v2679_v0, %v2647_v24  ;;  %v2646_v8 = vld [vmem:[%s17146_s5 + $0x20b0] sm:$0xff]  ;;  %v8461_v24 = vpack.c.bf16 %v2933_v14, %v2901_v59  ;;  %v2900_v0 = vld [vmem:[%s17146_s5 + $0x28a0] sm:$0xff] }
 0x503   :  { %8558 = vmatprep.subr.bf16.mxu0 %v8557_v12  ;;  %v8447_v12 = vpack.c.bf16 %v2676_v6, %v2644_v4  ;;  %v8575_v20 = vpack.c.bf16 %v2678_v9, %v2646_v8  ;;  %v2934_v4 = vld [vmem:[%s17146_s5 + $0x29b0] sm:$0xff]  ;;  %v2965_v6 = vld [vmem:[%s17146_s5 + $0x2aa8] sm:$0xff]  ;;  %v2967_v8 = vld [vmem:[%s17146_s5 + $0x2ab8] sm:$0xff] }
 0x504   :  { %v2999_v9 = vld [vmem:[%s17146_s5 + $0x2bb8] sm:$0xff] }
 0x505   :  { %8432 = vmatpush1.bf16.msra.mxu1 %v8431_v25  ;;  %v2710_v25 = vld [vmem:[%s17146_s5 + $0x22b0] sm:$0xff]  ;;  %v8593_v21 = vpack.c.bf16 %v2999_v9, %v2967_v8  ;;  %v3159_v9 = vld [vmem:[%s17146_s5 + $0x30b8] sm:$0xff] }
 0x506   :  { %8560 = vmatpush1.bf16.msra.mxu0 %v8559_v26  ;;  %8434 = vmatprep.subr.bf16.mxu1 %v8433_v27  ;;  %v8449_v26 = vpack.c.bf16 %v2741_v11, %v2709_v10  ;;  %v2742_v27 = vld [vmem:[%s17146_s5 + $0x23b0] sm:$0xff] }
 0x507   :  { %8562 = vmatprep.subr.bf16.mxu0 %v8561_v31  ;;  %v2775_v31 = vld [vmem:[%s17146_s5 + $0x24b8] sm:$0xff]  ;;  %v8579_v35 = vpack.c.bf16 %v2742_v27, %v2710_v25  ;;  %v3029_v25 = vld [vmem:[%s17146_s5 + $0x2ca8] sm:$0xff] }
 0x508   :  { %v9217_v27 = vld [vmem:[%s17148_s6 + $0x8] sm:$0xff] }
 0x509   :  { %8436 = vmatpush1.bf16.msra.mxu1 %v8435_v39  ;;  %v2804_v39 = vld [vmem:[%s17146_s5 + $0x25a0] sm:$0xff]  ;;  %v3707_v28 = vrot.slane %v9217_v27, %v13637_v48 }
 0x50a   :  { %8564 = vmatpush1.bf16.msra.mxu0 %v8563_v40  ;;  %8438 = vmatprep.subr.bf16.mxu1 %v8437_v41  ;;  %v2774_v40 = vld [vmem:[%s17146_s5 + $0x24b0] sm:$0xff]  ;;  %v8581_v41 = vpack.c.bf16 %v2807_v32, %v2775_v31  ;;  %v8455_v49 = vpack.c.bf16 %v2804_v39, %v2772_v37  ;;  %v3715_v31 = vrot.slane %v9217_v27, %v13646_v52  ;;  %v3028_v39 = vld [vmem:[%s17146_s5 + $0x2ca0] sm:$0xff] }
 0x50b   :  { %8566 = vmatprep.subr.bf16.mxu0 %v8565_v46  ;;  %v2839_v46 = vld [vmem:[%s17146_s5 + $0x26b8] sm:$0xff]  ;;  %v8583_v50 = vpack.c.bf16 %v2806_v42, %v2774_v40  ;;  %v3711_v32 = vrot.slane %v9217_v27, %v13649_v53  ;;  %v3060_v40 = vld [vmem:[%s17146_s5 + $0x2da0] sm:$0xff] }
 0x50c   :  { %v8471_v59 = vpack.c.bf16 %v3060_v40, %v3028_v39  ;;  %v3254_v39 = vld [vmem:[%s17146_s5 + $0x33b0] sm:$0xff]  ;;  %v3285_v40 = vld [vmem:[%s17146_s5 + $0x34a8] sm:$0xff] }
 0x50d   :  { %8440 = vmatpush1.bf16.msra.mxu1 %v8439_v55  ;;  %v2868_v55 = vld [vmem:[%s17146_s5 + $0x27a0] sm:$0xff] }
 0x50e   :  { %8568 = vmatpush1.bf16.msra.mxu0 %v8567_v56  ;;  %8442 = vmatprep.subr.bf16.mxu1 %v8441_v57  ;;  %v2838_v56 = vld [vmem:[%s17146_s5 + $0x26b0] sm:$0xff]  ;;  %v8585_v57 = vpack.c.bf16 %v2871_v47, %v2839_v46  ;;  %v8459_v62 = vpack.c.bf16 %v2868_v55, %v2836_v16  ;;  %v3093_v46 = vld [vmem:[%s17146_s5 + $0x2ea8] sm:$0xff]  ;;  %v3095_v16 = vld [vmem:[%s17146_s5 + $0x2eb8] sm:$0xff] }
 0x50f   :  { %8570 = vmatprep.subr.bf16.mxu0 %v8569_v60  ;;  %v2903_v60 = vld [vmem:[%s17146_s5 + $0x28b8] sm:$0xff]  ;;  %v8587_v63 = vpack.c.bf16 %v2870_v58, %v2838_v56  ;;  %v3125_v47 = vld [vmem:[%s17146_s5 + $0x2fa8] sm:$0xff] }
 0x510   :  { %v3127_v55 = vld [vmem:[%s17146_s5 + $0x2fb8] sm:$0xff] }
 0x511   :  { %8444 = vmatpush1.bf16.msra.mxu1 %v8443_v1  ;;  %v2932_v1 = vld [vmem:[%s17146_s5 + $0x29a0] sm:$0xff] }
 0x512   :  { %8572 = vmatpush1.bf16.msra.mxu0 %v8571_v2  ;;  %8446 = vmatprep.subr.bf16.mxu1 %v8445_v3  ;;  %v2902_v2 = vld [vmem:[%s17146_s5 + $0x28b0] sm:$0xff]  ;;  %v8589_v3 = vpack.c.bf16 %v2935_v61, %v2903_v60  ;;  %v8463_v10 = vpack.c.bf16 %v2932_v1, %v2900_v0 }
 0x513   :  { %8574 = vmatprep.subr.bf16.mxu0 %v8573_v7  ;;  %v2997_v7 = vld [vmem:[%s17146_s5 + $0x2ba8] sm:$0xff]  ;;  %v8591_v11 = vpack.c.bf16 %v2934_v4, %v2902_v2  ;;  %v3094_v0 = vld [vmem:[%s17146_s5 + $0x2eb0] sm:$0xff] }
 0x514   :  { %5301 = vmatmul.mubr.f32.vlgmr.msra.gmra.mrb[24].mxu1 %v11187_v43  ;;  %v3126_v4 = vld [vmem:[%s17146_s5 + $0x2fb0] sm:$0xff] }
 0x515   :  { %5443 = vmatmul.mubr.f32.vlgmr.msra.gmra.mrb[26].mxu0 %v11187_v43  ;;  %8448 = vmatpush1.bf16.msra.mxu1 %v8447_v12  ;;  %v8465_v12 = vpack.c.bf16 %v2997_v7, %v2965_v6  ;;  %v3157_v6 = vld [vmem:[%s17146_s5 + $0x30a8] sm:$0xff] }
 0x516   :  { %5371 = vmatprep.mubr.f32.mxu1 %v11209_v51  ;;  %8576 = vmatpush1.bf16.msra.mxu0 %v8575_v20  ;;  %v2966_v20 = vld [vmem:[%s17146_s5 + $0x2ab0] sm:$0xff]  ;;  %v3189_v7 = vld [vmem:[%s17146_s5 + $0x31a8] sm:$0xff] }
 0x517   :  { %5513 = vmatprep.mubr.f32.mxu0 %v11209_v51  ;;  %8450 = vmatprep.subr.bf16.mxu1 %v8449_v26  ;;  %v3061_v26 = vld [vmem:[%s17146_s5 + $0x2da8] sm:$0xff] }
 0x518   :  { %8578 = vmatprep.subr.bf16.mxu0 %v8577_v30  ;;  %v3063_v30 = vld [vmem:[%s17146_s5 + $0x2db8] sm:$0xff]  ;;  %v8469_v37 = vpack.c.bf16 %v3061_v26, %v3029_v25  ;;  %v3190_v25 = vld [vmem:[%s17146_s5 + $0x31b0] sm:$0xff]  ;;  %v3221_v26 = vld [vmem:[%s17146_s5 + $0x32a8] sm:$0xff] }
 0x519   :  { %8452 = vmatpush1.bf16.msra.mxu1 %v8451_v34  ;;  %v8467_v34 = vpack.c.bf16 %v2996_v19, %v2964_v13  ;;  %v8597_v44 = vpack.c.bf16 %v3063_v30, %v3031_v29  ;;  %v8477_v13 = vpack.c.bf16 %v3189_v7, %v3157_v6  ;;  %v3156_v19 = vld [vmem:[%s17146_s5 + $0x30a0] sm:$0xff]  ;;  %v3255_v29 = vld [vmem:[%s17146_s5 + $0x33b8] sm:$0xff] }
 0x51a   :  { %8580 = vmatpush1.bf16.msra.mxu0 %v8579_v35  ;;  %8454 = vmatprep.subr.bf16.mxu1 %v8453_v36  ;;  %v3719_v35 = vrot.slane %v9217_v27, %v13652_v54  ;;  %v8595_v36 = vpack.c.bf16 %v2998_v23, %v2966_v20  ;;  %v3188_v20 = vld [vmem:[%s17146_s5 + $0x31a0] sm:$0xff]  ;;  %v3253_v27 = vld [vmem:[%s17146_s5 + $0x33a8] sm:$0xff]  ;;  %v3447_v6 = vld [vmem:[%s17146_s5 + $0x39b8] sm:$0xff] }
 0x51b   :  { %8582 = vmatprep.subr.bf16.mxu0 %v8581_v41  ;;  %v3030_v41 = vld [vmem:[%s17146_s5 + $0x2cb0] sm:$0xff]  ;;  %v8479_v30 = vpack.c.bf16 %v3188_v20, %v3156_v19  ;;  %v3477_v20 = vld [vmem:[%s17146_s5 + $0x3aa8] sm:$0xff] }
 0x51c   :  { %v8599_v61 = vpack.c.bf16 %v3062_v45, %v3030_v41  ;;  %v3317_v41 = vld [vmem:[%s17146_s5 + $0x35a8] sm:$0xff]  ;;  %v3446_v19 = vld [vmem:[%s17146_s5 + $0x39b0] sm:$0xff] }
 0x51d   :  { %8456 = vmatpush1.bf16.msra.mxu1 %v8455_v49 }
 0x51e   :  { %8584 = vmatpush1.bf16.msra.mxu0 %v8583_v50  ;;  %8458 = vmatprep.subr.bf16.mxu1 %v8457_v22 }
 0x51f   :  { %8586 = vmatprep.subr.bf16.mxu0 %v8585_v57 }
 0x521   :  { %8460 = vmatpush1.bf16.msra.mxu1 %v8459_v62  ;;  %v8473_v62 = vpack.c.bf16 %v3125_v47, %v3093_v46  ;;  %v8485_v47 = vpack.c.bf16 %v3317_v41, %v3285_v40 }
 0x522   :  { %8588 = vmatpush1.bf16.msra.mxu0 %v8587_v63  ;;  %8462 = vmatprep.subr.bf16.mxu1 %v8461_v24  ;;  %v3092_v63 = vld [vmem:[%s17146_s5 + $0x2ea0] sm:$0xff] }
 0x523   :  { %8590 = vmatprep.subr.bf16.mxu0 %v8589_v3  ;;  %v3124_v24 = vld [vmem:[%s17146_s5 + $0x2fa0] sm:$0xff]  ;;  %v8601_v3 = vpack.c.bf16 %v3127_v55, %v3095_v16  ;;  %v3318_v55 = vld [vmem:[%s17146_s5 + $0x35b0] sm:$0xff] }
 0x525   :  { %8464 = vmatpush1.bf16.msra.mxu1 %v8463_v10  ;;  %v3191_v10 = vld [vmem:[%s17146_s5 + $0x31b8] sm:$0xff] }
 0x526   :  { %8592 = vmatpush1.bf16.msra.mxu0 %v8591_v11  ;;  %8466 = vmatprep.subr.bf16.mxu1 %v8465_v12  ;;  %v8475_v11 = vpack.c.bf16 %v3124_v24, %v3092_v63  ;;  %v8603_v12 = vpack.c.bf16 %v3126_v4, %v3094_v0  ;;  %v8605_v23 = vpack.c.bf16 %v3191_v10, %v3159_v9  ;;  %v3380_v63 = vld [vmem:[%s17146_s5 + $0x37a0] sm:$0xff]  ;;  %v3350_v24 = vld [vmem:[%s17146_s5 + $0x36b0] sm:$0xff]  ;;  %v3415_v4 = vld [vmem:[%s17146_s5 + $0x38b8] sm:$0xff] }
 0x527   :  { %v4805_v42 = vpop.f32.mrb[20].mxu1  ;;  %8594 = vmatprep.subr.bf16.mxu0 %v8593_v21  ;;  %v3158_v21 = vld [vmem:[%s17146_s5 + $0x30b0] sm:$0xff]  ;;  %v3412_v10 = vld [vmem:[%s17146_s5 + $0x38a0] sm:$0xff] }
 0x528   :  { %v9161_v49 = vadd.f32 %v4805_v42, %v3707_v28  ;;  %v4947_v50 = vpop.f32.mrb[22].mxu0  ;;  %v4807_v22 = vpop.f32.mrb[21].mxu1  ;;  %v3223_v28 = vld [vmem:[%s17146_s5 + $0x32b8] sm:$0xff] }
 0x529   :  { %v9163_v56 = vadd.f32 %v4947_v50, %v3715_v31  ;;  %v9162_v57 = vadd.f32 %v4807_v22, %v3711_v32  ;;  %v4949_v58 = vpop.f32.mrb[23].mxu0  ;;  %8468 = vmatpush1.bf16.msra.mxu1 %v8467_v34  ;;  %v8607_v31 = vpack.c.bf16 %v3190_v25, %v3158_v21  ;;  %v8481_v32 = vpack.c.bf16 %v3253_v27, %v3221_v26  ;;  %v3220_v34 = vld [vmem:[%s17146_s5 + $0x32a0] sm:$0xff]  ;;  %v3287_v42 = vld [vmem:[%s17146_s5 + $0x34b8] sm:$0xff]  ;;  %v3286_v22 = vld [vmem:[%s17146_s5 + $0x34b0] sm:$0xff] }
 0x52a   :  { %v6100_v14 = vmax.f32 %v9161_v49, 0.0  ;;  %v9164_v60 = vadd.f32 %v4949_v58, %v3719_v35  ;;  %8596 = vmatpush1.bf16.msra.mxu0 %v8595_v36  ;;  %8470 = vmatprep.subr.bf16.mxu1 %v8469_v37  ;;  %v3252_v35 = vld [vmem:[%s17146_s5 + $0x33a0] sm:$0xff]  ;;  %v3222_v36 = vld [vmem:[%s17146_s5 + $0x32b0] sm:$0xff]  ;;  %v8609_v37 = vpack.c.bf16 %v3255_v29, %v3223_v28  ;;  %v3351_v58 = vld [vmem:[%s17146_s5 + $0x36b8] sm:$0xff] }
 0x52b   :  { %v6102_v1 = vmax.f32 %v9163_v56, 0.0  ;;  %v6101_v2 = vmax.f32 %v9162_v57, 0.0  ;;  %8598 = vmatprep.subr.bf16.mxu0 %v8597_v44  ;;  %v3319_v44 = vld [vmem:[%s17146_s5 + $0x35b8] sm:$0xff]  ;;  %v8483_v45 = vpack.c.bf16 %v3252_v35, %v3220_v34  ;;  %v8611_v46 = vpack.c.bf16 %v3254_v39, %v3222_v36  ;;  %v3284_v49 = vld [vmem:[%s17146_s5 + $0x34a0] sm:$0xff]  ;;  %v3349_v56 = vld [vmem:[%s17146_s5 + $0x36a8] sm:$0xff] }
 0x52c   :  { %6132 = vst [vmem:[%s17149_s7 + $0x60] sm:$0xff] %v6100_v14  ;;  %v6103_v8 = vmax.f32 %v9164_v60, 0.0  ;;  %v3316_v50 = vld [vmem:[%s17146_s5 + $0x35a0] sm:$0xff]  ;;  %v8613_v16 = vpack.c.bf16 %v3319_v44, %v3287_v42  ;;  %v3381_v57 = vld [vmem:[%s17146_s5 + $0x37a8] sm:$0xff]  ;;  %v8615_v60 = vpack.c.bf16 %v3318_v55, %v3286_v22  ;;  %v3511_v25 = vld [vmem:[%s17146_s5 + $0x3bb8] sm:$0xff] }
 0x52d   :  { %6134 = vst [vmem:[%s17149_s7 + $0x70] sm:$0xff] %v6102_v1  ;;  %6133 = vst [vmem:[%s17149_s7 + $0x68] sm:$0xff] %v6101_v2  ;;  %8472 = vmatpush1.bf16.msra.mxu1 %v8471_v59  ;;  %v3383_v59 = vld [vmem:[%s17146_s5 + $0x37b8] sm:$0xff]  ;;  %v8487_v14 = vpack.c.bf16 %v3316_v50, %v3284_v49  ;;  %v3382_v1 = vld [vmem:[%s17146_s5 + $0x37b0] sm:$0xff] }
 0x52e   :  { %6135 = vst [vmem:[%s17149_s7 + $0x78] sm:$0xff] %v6103_v8  ;;  %8600 = vmatpush1.bf16.msra.mxu0 %v8599_v61  ;;  %8474 = vmatprep.subr.bf16.mxu1 %v8473_v62  ;;  %v8489_v61 = vpack.c.bf16 %v3381_v57, %v3349_v56  ;;  %v3348_v62 = vld [vmem:[%s17146_s5 + $0x36a0] sm:$0xff]  ;;  %v8617_v0 = vpack.c.bf16 %v3383_v59, %v3351_v58  ;;  %v3413_v2 = vld [vmem:[%s17146_s5 + $0x38a8] sm:$0xff]  ;;  %v3510_v34 = vld [vmem:[%s17146_s5 + $0x3bb0] sm:$0xff] }
 0x52f   :  { %8602 = vmatprep.subr.bf16.mxu0 %v8601_v3  ;;  %v3445_v3 = vld [vmem:[%s17146_s5 + $0x39a8] sm:$0xff]  ;;  %v8491_v7 = vpack.c.bf16 %v3380_v63, %v3348_v62  ;;  %v8619_v8 = vpack.c.bf16 %v3382_v1, %v3350_v24  ;;  %v3476_v29 = vld [vmem:[%s17146_s5 + $0x3aa0] sm:$0xff]  ;;  %v3575_v39 = vld [vmem:[%s17146_s5 + $0x3db8] sm:$0xff] }
 0x530   :  { %v8493_v9 = vpack.c.bf16 %v3445_v3, %v3413_v2  ;;  %v3509_v21 = vld [vmem:[%s17146_s5 + $0x3ba8] sm:$0xff]  ;;  %v3540_v44 = vld [vmem:[%s17146_s5 + $0x3ca0] sm:$0xff]  ;;  %v3574_v49 = vld [vmem:[%s17146_s5 + $0x3db0] sm:$0xff] }
 0x531   :  { %8476 = vmatpush1.bf16.msra.mxu1 %v8475_v11  ;;  %v3444_v11 = vld [vmem:[%s17146_s5 + $0x39a0] sm:$0xff]  ;;  %v8497_v28 = vpack.c.bf16 %v3509_v21, %v3477_v20  ;;  %v3541_v35 = vld [vmem:[%s17146_s5 + $0x3ca8] sm:$0xff]  ;;  %v3639_v55 = vld [vmem:[%s17146_s5 + $0x3fb8] sm:$0xff] }
 0x532   :  { %8604 = vmatpush1.bf16.msra.mxu0 %v8603_v12  ;;  %8478 = vmatprep.subr.bf16.mxu1 %v8477_v13  ;;  %v3414_v12 = vld [vmem:[%s17146_s5 + $0x38b0] sm:$0xff]  ;;  %v8621_v13 = vpack.c.bf16 %v3447_v6, %v3415_v4  ;;  %v8495_v26 = vpack.c.bf16 %v3444_v11, %v3412_v10  ;;  %v3573_v36 = vld [vmem:[%s17146_s5 + $0x3da8] sm:$0xff]  ;;  %v3604_v59 = vld [vmem:[%s17146_s5 + $0x3ea0] sm:$0xff] }
 0x533   :  { %8606 = vmatprep.subr.bf16.mxu0 %v8605_v23  ;;  %v3479_v23 = vld [vmem:[%s17146_s5 + $0x3ab8] sm:$0xff]  ;;  %v8623_v27 = vpack.c.bf16 %v3446_v19, %v3414_v12  ;;  %v8501_v42 = vpack.c.bf16 %v3573_v36, %v3541_v35  ;;  %v3605_v50 = vld [vmem:[%s17146_s5 + $0x3ea8] sm:$0xff]  ;;  %v3638_v62 = vld [vmem:[%s17146_s5 + $0x3fb0] sm:$0xff] }
 0x534   :  { %v3637_v22 = vld [vmem:[%s17146_s5 + $0x3fa8] sm:$0xff]  ;;  %v1659_v1 = vld [vmem:[%s17146_s5 + $0x1d8] sm:$0xff]  ;;  %v1624_v6 = vld [vmem:[%s17146_s5 + $0xc0] sm:$0xff] }
 0x535   :  { %8480 = vmatpush1.bf16.msra.mxu1 %v8479_v30  ;;  %v3508_v30 = vld [vmem:[%s17146_s5 + $0x3ba0] sm:$0xff]  ;;  %v8505_v58 = vpack.c.bf16 %v3637_v22, %v3605_v50  ;;  %v1625_v63 = vld [vmem:[%s17146_s5 + $0xc8] sm:$0xff]  ;;  %v1658_v10 = vld [vmem:[%s17146_s5 + $0x1d0] sm:$0xff] }
 0x536   :  { %8608 = vmatpush1.bf16.msra.mxu0 %v8607_v31  ;;  %8482 = vmatprep.subr.bf16.mxu1 %v8481_v32  ;;  %v3478_v31 = vld [vmem:[%s17146_s5 + $0x3ab0] sm:$0xff]  ;;  %v8625_v32 = vpack.c.bf16 %v3511_v25, %v3479_v23  ;;  %v8499_v40 = vpack.c.bf16 %v3508_v30, %v3476_v29  ;;  %v1657_v24 = vld [vmem:[%s17146_s5 + $0x1c8] sm:$0xff]  ;;  %v1691_v19 = vld [vmem:[%s17146_s5 + $0x2d8] sm:$0xff] }
 0x537   :  { %8610 = vmatprep.subr.bf16.mxu0 %v8609_v37  ;;  %v3543_v37 = vld [vmem:[%s17146_s5 + $0x3cb8] sm:$0xff]  ;;  %v8627_v41 = vpack.c.bf16 %v3510_v34, %v3478_v31  ;;  %v8637_v4 = vpack.c.bf16 %v1657_v24, %v1625_v63  ;;  %v1689_v11 = vld [vmem:[%s17146_s5 + $0x2c8] sm:$0xff]  ;;  %v1688_v23 = vld [vmem:[%s17146_s5 + $0x2c0] sm:$0xff] }
 0x538   :  { %v1721_v12 = vld [vmem:[%s17146_s5 + $0x3c8] sm:$0xff]  ;;  %v1723_v20 = vld [vmem:[%s17146_s5 + $0x3d8] sm:$0xff]  ;;  %v1720_v25 = vld [vmem:[%s17146_s5 + $0x3c0] sm:$0xff] }
 0x539   :  { %8484 = vmatpush1.bf16.msra.mxu1 %v8483_v45  ;;  %v3572_v45 = vld [vmem:[%s17146_s5 + $0x3da0] sm:$0xff]  ;;  %v1753_v29 = vld [vmem:[%s17146_s5 + $0x4c8] sm:$0xff]  ;;  %v8769_v31 = vpack.c.bf16 %v1723_v20, %v1691_v19  ;;  %v1787_v34 = vld [vmem:[%s17146_s5 + $0x5d8] sm:$0xff]  ;;  %v8643_v35 = vpack.c.bf16 %v1720_v25, %v1688_v23 }
 0x53a   :  { %8612 = vmatpush1.bf16.msra.mxu0 %v8611_v46  ;;  %8486 = vmatprep.subr.bf16.mxu1 %v8485_v47  ;;  %v3542_v46 = vld [vmem:[%s17146_s5 + $0x3cb0] sm:$0xff]  ;;  %v8629_v47 = vpack.c.bf16 %v3575_v39, %v3543_v37  ;;  %v8503_v56 = vpack.c.bf16 %v3572_v45, %v3540_v44  ;;  %v1785_v30 = vld [vmem:[%s17146_s5 + $0x5c8] sm:$0xff]  ;;  %v1752_v39 = vld [vmem:[%s17146_s5 + $0x4c0] sm:$0xff] }
 0x53b   :  { %8614 = vmatprep.subr.bf16.mxu0 %v8613_v16  ;;  %v3607_v16 = vld [vmem:[%s17146_s5 + $0x3eb8] sm:$0xff]  ;;  %v8631_v57 = vpack.c.bf16 %v3574_v49, %v3542_v46  ;;  %v8645_v37 = vpack.c.bf16 %v1785_v30, %v1753_v29  ;;  %v1786_v44 = vld [vmem:[%s17146_s5 + $0x5d0] sm:$0xff]  ;;  %v1817_v45 = vld [vmem:[%s17146_s5 + $0x6c8] sm:$0xff] }
 0x53c   :  { %v1849_v46 = vld [vmem:[%s17146_s5 + $0x7c8] sm:$0xff]  ;;  %v1851_v49 = vld [vmem:[%s17146_s5 + $0x7d8] sm:$0xff]  ;;  %v1944_v19 = vld [vmem:[%s17146_s5 + $0xac0] sm:$0xff] }
 0x53d   :  { %8488 = vmatpush1.bf16.msra.mxu1 %v8487_v14  ;;  %v3636_v14 = vld [vmem:[%s17146_s5 + $0x3fa0] sm:$0xff]  ;;  %v1978_v25 = vld [vmem:[%s17146_s5 + $0xbd0] sm:$0xff]  ;;  %v2043_v29 = vld [vmem:[%s17146_s5 + $0xdd8] sm:$0xff] }
 0x53e   :  { %8616 = vmatpush1.bf16.msra.mxu0 %v8615_v60  ;;  %8490 = vmatprep.subr.bf16.mxu1 %v8489_v61  ;;  %v3606_v60 = vld [vmem:[%s17146_s5 + $0x3eb0] sm:$0xff]  ;;  %v8633_v61 = vpack.c.bf16 %v3639_v55, %v3607_v16  ;;  %v8507_v2 = vpack.c.bf16 %v3636_v14, %v3604_v59  ;;  %v8649_v16 = vpack.c.bf16 %v1849_v46, %v1817_v45  ;;  %v1816_v55 = vld [vmem:[%s17146_s5 + $0x6c0] sm:$0xff]  ;;  %v1881_v14 = vld [vmem:[%s17146_s5 + $0x8c8] sm:$0xff] }
 0x53f   :  { %8618 = vmatprep.subr.bf16.mxu0 %v8617_v0  ;;  %v1627_v0 = vld [vmem:[%s17146_s5 + $0xd8] sm:$0xff]  ;;  %v8635_v3 = vpack.c.bf16 %v3638_v62, %v3606_v60  ;;  %v1850_v59 = vld [vmem:[%s17146_s5 + $0x7d0] sm:$0xff]  ;;  %v1913_v60 = vld [vmem:[%s17146_s5 + $0x9c8] sm:$0xff] }
 0x540   :  { %v1915_v62 = vld [vmem:[%s17146_s5 + $0x9d8] sm:$0xff]  ;;  %v1976_v20 = vld [vmem:[%s17146_s5 + $0xbc0] sm:$0xff] }
 0x541   :  { %8492 = vmatpush1.bf16.msra.mxu1 %v8491_v7  ;;  %v1656_v7 = vld [vmem:[%s17146_s5 + $0x1c0] sm:$0xff]  ;;  %v8659_v30 = vpack.c.bf16 %v1976_v20, %v1944_v19  ;;  %v2234_v19 = vld [vmem:[%s17146_s5 + $0x13d0] sm:$0xff]  ;;  %v2265_v20 = vld [vmem:[%s17146_s5 + $0x14c8] sm:$0xff] }
 0x542   :  { %8620 = vmatpush1.bf16.msra.mxu0 %v8619_v8  ;;  %8494 = vmatprep.subr.bf16.mxu1 %v8493_v9  ;;  %v8765_v8 = vpack.c.bf16 %v1659_v1, %v1627_v0  ;;  %v1626_v9 = vld [vmem:[%s17146_s5 + $0xd0] sm:$0xff]  ;;  %v8653_v0 = vpack.c.bf16 %v1913_v60, %v1881_v14  ;;  %v1880_v1 = vld [vmem:[%s17146_s5 + $0x8c0] sm:$0xff] }
 0x543   :  { %8622 = vmatprep.subr.bf16.mxu0 %v8621_v13  ;;  %v8639_v13 = vpack.c.bf16 %v1656_v7, %v1624_v6  ;;  %v8767_v21 = vpack.c.bf16 %v1658_v10, %v1626_v9  ;;  %v1914_v6 = vld [vmem:[%s17146_s5 + $0x9d0] sm:$0xff]  ;;  %v1945_v7 = vld [vmem:[%s17146_s5 + $0xac8] sm:$0xff]  ;;  %v1947_v9 = vld [vmem:[%s17146_s5 + $0xad8] sm:$0xff] }
 0x544   :  { %v1979_v10 = vld [vmem:[%s17146_s5 + $0xbd8] sm:$0xff] }
 0x545   :  { %8496 = vmatpush1.bf16.msra.mxu1 %v8495_v26  ;;  %v1690_v26 = vld [vmem:[%s17146_s5 + $0x2d0] sm:$0xff]  ;;  %v8785_v23 = vpack.c.bf16 %v1979_v10, %v1947_v9  ;;  %v2200_v10 = vld [vmem:[%s17146_s5 + $0x12c0] sm:$0xff] }
 0x546   :  { %8624 = vmatpush1.bf16.msra.mxu0 %v8623_v27  ;;  %8498 = vmatprep.subr.bf16.mxu1 %v8497_v28  ;;  %v8641_v27 = vpack.c.bf16 %v1721_v12, %v1689_v11  ;;  %v1722_v28 = vld [vmem:[%s17146_s5 + $0x3d0] sm:$0xff] }
 0x547   :  { %8626 = vmatprep.subr.bf16.mxu0 %v8625_v32  ;;  %v1755_v32 = vld [vmem:[%s17146_s5 + $0x4d8] sm:$0xff]  ;;  %v8771_v36 = vpack.c.bf16 %v1722_v28, %v1690_v26  ;;  %v2009_v26 = vld [vmem:[%s17146_s5 + $0xcc8] sm:$0xff] }
 0x548   :  { %v2011_v28 = vld [vmem:[%s17146_s5 + $0xcd8] sm:$0xff] }
 0x549   :  { %8500 = vmatpush1.bf16.msra.mxu1 %v8499_v40  ;;  %v1784_v40 = vld [vmem:[%s17146_s5 + $0x5c0] sm:$0xff] }
 0x54a   :  { %8628 = vmatpush1.bf16.msra.mxu0 %v8627_v41  ;;  %8502 = vmatprep.subr.bf16.mxu1 %v8501_v42  ;;  %v1754_v41 = vld [vmem:[%s17146_s5 + $0x4d0] sm:$0xff]  ;;  %v8773_v42 = vpack.c.bf16 %v1787_v34, %v1755_v32  ;;  %v8647_v50 = vpack.c.bf16 %v1784_v40, %v1752_v39  ;;  %v2008_v34 = vld [vmem:[%s17146_s5 + $0xcc0] sm:$0xff]  ;;  %v2073_v40 = vld [vmem:[%s17146_s5 + $0xec8] sm:$0xff] }
 0x54b   :  { %8630 = vmatprep.subr.bf16.mxu0 %v8629_v47  ;;  %v1819_v47 = vld [vmem:[%s17146_s5 + $0x6d8] sm:$0xff]  ;;  %v8775_v22 = vpack.c.bf16 %v1786_v44, %v1754_v41  ;;  %v2042_v39 = vld [vmem:[%s17146_s5 + $0xdd0] sm:$0xff]  ;;  %v2105_v41 = vld [vmem:[%s17146_s5 + $0xfc8] sm:$0xff] }
 0x54c   :  { %v2107_v44 = vld [vmem:[%s17146_s5 + $0xfd8] sm:$0xff] }
 0x54d   :  { %8504 = vmatpush1.bf16.msra.mxu1 %v8503_v56  ;;  %v1848_v56 = vld [vmem:[%s17146_s5 + $0x7c0] sm:$0xff] }
 0x54e   :  { %8632 = vmatpush1.bf16.msra.mxu0 %v8631_v57  ;;  %8506 = vmatprep.subr.bf16.mxu1 %v8505_v58  ;;  %v1818_v57 = vld [vmem:[%s17146_s5 + $0x6d0] sm:$0xff]  ;;  %v8777_v58 = vpack.c.bf16 %v1851_v49, %v1819_v47  ;;  %v8651_v63 = vpack.c.bf16 %v1848_v56, %v1816_v55  ;;  %v8665_v47 = vpack.c.bf16 %v2105_v41, %v2073_v40  ;;  %v2072_v49 = vld [vmem:[%s17146_s5 + $0xec0] sm:$0xff]  ;;  %v2137_v56 = vld [vmem:[%s17146_s5 + $0x10c8] sm:$0xff] }
 0x54f   :  { %8634 = vmatprep.subr.bf16.mxu0 %v8633_v61  ;;  %v1883_v61 = vld [vmem:[%s17146_s5 + $0x8d8] sm:$0xff]  ;;  %v8779_v24 = vpack.c.bf16 %v1850_v59, %v1818_v57  ;;  %v2106_v55 = vld [vmem:[%s17146_s5 + $0xfd0] sm:$0xff]  ;;  %v2169_v57 = vld [vmem:[%s17146_s5 + $0x11c8] sm:$0xff] }
 0x550   :  { %v2171_v59 = vld [vmem:[%s17146_s5 + $0x11d8] sm:$0xff] }
 0x551   :  { %8508 = vmatpush1.bf16.msra.mxu1 %v8507_v2  ;;  %v1912_v2 = vld [vmem:[%s17146_s5 + $0x9c0] sm:$0xff] }
 0x552   :  { %8636 = vmatpush1.bf16.msra.mxu0 %v8635_v3  ;;  %8638 = vmatprep.subr.bf16.mxu1 %v8637_v4  ;;  %v1882_v3 = vld [vmem:[%s17146_s5 + $0x8d0] sm:$0xff]  ;;  %v8781_v4 = vpack.c.bf16 %v1915_v62, %v1883_v61  ;;  %v8655_v11 = vpack.c.bf16 %v1912_v2, %v1880_v1  ;;  %v8669_v61 = vpack.c.bf16 %v2169_v57, %v2137_v56  ;;  %v2136_v62 = vld [vmem:[%s17146_s5 + $0x10c0] sm:$0xff]  ;;  %v2201_v2 = vld [vmem:[%s17146_s5 + $0x12c8] sm:$0xff] }
 0x553   :  { %8766 = vmatprep.subr.bf16.mxu0 %v8765_v8  ;;  %v1977_v8 = vld [vmem:[%s17146_s5 + $0xbc8] sm:$0xff]  ;;  %v8783_v12 = vpack.c.bf16 %v1914_v6, %v1882_v3  ;;  %v2170_v1 = vld [vmem:[%s17146_s5 + $0x11d0] sm:$0xff]  ;;  %v2235_v6 = vld [vmem:[%s17146_s5 + $0x13d8] sm:$0xff] }
 0x554   :  { %5372 = vmatmul.mubr.f32.vlgmr.msra.gmra.mrb[24].mxu1 %v11581_v5  ;;  %v2233_v3 = vld [vmem:[%s17146_s5 + $0x13c8] sm:$0xff] }
 0x555   :  { %5514 = vmatmul.mubr.f32.vlgmr.msra.gmra.mrb[26].mxu0 %v11581_v5  ;;  %8640 = vmatpush1.bf16.msra.mxu1 %v8639_v13  ;;  %v8657_v13 = vpack.c.bf16 %v1977_v8, %v1945_v7  ;;  %v8673_v9 = vpack.c.bf16 %v2233_v3, %v2201_v2 }
 0x556   :  { %5584 = vmatprep.mubr.f32.mxu1 %v11179_v38  ;;  %8768 = vmatpush1.bf16.msra.mxu0 %v8767_v21  ;;  %v1946_v21 = vld [vmem:[%s17146_s5 + $0xad0] sm:$0xff] }
 0x557   :  { %5726 = vmatprep.mubr.f32.mxu0 %v11179_v38  ;;  %8642 = vmatprep.subr.bf16.mxu1 %v8641_v27  ;;  %v2041_v27 = vld [vmem:[%s17146_s5 + $0xdc8] sm:$0xff] }
 0x558   :  { %8770 = vmatprep.subr.bf16.mxu0 %v8769_v31  ;;  %v8787_v31 = vpack.c.bf16 %v1978_v25, %v1946_v21  ;;  %v8661_v32 = vpack.c.bf16 %v2041_v27, %v2009_v26  ;;  %v2297_v21 = vld [vmem:[%s17146_s5 + $0x15c8] sm:$0xff]  ;;  %v2299_v25 = vld [vmem:[%s17146_s5 + $0x15d8] sm:$0xff] }
 0x559   :  { %8644 = vmatpush1.bf16.msra.mxu1 %v8643_v35  ;;  %v2040_v35 = vld [vmem:[%s17146_s5 + $0xdc0] sm:$0xff] }
 0x55a   :  { %8772 = vmatpush1.bf16.msra.mxu0 %v8771_v36  ;;  %8646 = vmatprep.subr.bf16.mxu1 %v8645_v37  ;;  %v2010_v36 = vld [vmem:[%s17146_s5 + $0xcd0] sm:$0xff]  ;;  %v8789_v37 = vpack.c.bf16 %v2043_v29, %v2011_v28  ;;  %v8663_v45 = vpack.c.bf16 %v2040_v35, %v2008_v34  ;;  %v8677_v28 = vpack.c.bf16 %v2297_v21, %v2265_v20  ;;  %v2264_v29 = vld [vmem:[%s17146_s5 + $0x14c0] sm:$0xff]  ;;  %v2329_v35 = vld [vmem:[%s17146_s5 + $0x16c8] sm:$0xff] }
 0x55b   :  { %8774 = vmatprep.subr.bf16.mxu0 %v8773_v42  ;;  %v2075_v42 = vld [vmem:[%s17146_s5 + $0xed8] sm:$0xff]  ;;  %v8791_v46 = vpack.c.bf16 %v2042_v39, %v2010_v36  ;;  %v2298_v34 = vld [vmem:[%s17146_s5 + $0x15d0] sm:$0xff]  ;;  %v2361_v36 = vld [vmem:[%s17146_s5 + $0x17c8] sm:$0xff] }
 0x55c   :  { %v2363_v39 = vld [vmem:[%s17146_s5 + $0x17d8] sm:$0xff] }
 0x55d   :  { %8648 = vmatpush1.bf16.msra.mxu1 %v8647_v50  ;;  %v2104_v50 = vld [vmem:[%s17146_s5 + $0xfc0] sm:$0xff] }
 0x55e   :  { %8776 = vmatpush1.bf16.msra.mxu0 %v8775_v22  ;;  %8650 = vmatprep.subr.bf16.mxu1 %v8649_v16  ;;  %v2074_v22 = vld [vmem:[%s17146_s5 + $0xed0] sm:$0xff]  ;;  %v8793_v16 = vpack.c.bf16 %v2107_v44, %v2075_v42  ;;  %v8667_v14 = vpack.c.bf16 %v2104_v50, %v2072_v49  ;;  %v8681_v42 = vpack.c.bf16 %v2361_v36, %v2329_v35  ;;  %v2328_v44 = vld [vmem:[%s17146_s5 + $0x16c0] sm:$0xff]  ;;  %v2393_v50 = vld [vmem:[%s17146_s5 + $0x18c8] sm:$0xff] }
 0x55f   :  { %8778 = vmatprep.subr.bf16.mxu0 %v8777_v58  ;;  %v2139_v58 = vld [vmem:[%s17146_s5 + $0x10d8] sm:$0xff]  ;;  %v8795_v60 = vpack.c.bf16 %v2106_v55, %v2074_v22  ;;  %v2362_v49 = vld [vmem:[%s17146_s5 + $0x17d0] sm:$0xff]  ;;  %v2425_v22 = vld [vmem:[%s17146_s5 + $0x19c8] sm:$0xff] }
 0x560   :  { %v2427_v55 = vld [vmem:[%s17146_s5 + $0x19d8] sm:$0xff] }
 0x561   :  { %8652 = vmatpush1.bf16.msra.mxu1 %v8651_v63  ;;  %v2168_v63 = vld [vmem:[%s17146_s5 + $0x11c0] sm:$0xff] }
 0x562   :  { %8780 = vmatpush1.bf16.msra.mxu0 %v8779_v24  ;;  %8654 = vmatprep.subr.bf16.mxu1 %v8653_v0  ;;  %v2138_v24 = vld [vmem:[%s17146_s5 + $0x10d0] sm:$0xff]  ;;  %v8797_v0 = vpack.c.bf16 %v2171_v59, %v2139_v58  ;;  %v8671_v7 = vpack.c.bf16 %v2168_v63, %v2136_v62  ;;  %v8685_v58 = vpack.c.bf16 %v2425_v22, %v2393_v50  ;;  %v2392_v59 = vld [vmem:[%s17146_s5 + $0x18c0] sm:$0xff]  ;;  %v2457_v63 = vld [vmem:[%s17146_s5 + $0x1ac8] sm:$0xff] }
 0x563   :  { %8782 = vmatprep.subr.bf16.mxu0 %v8781_v4  ;;  %v2203_v4 = vld [vmem:[%s17146_s5 + $0x12d8] sm:$0xff]  ;;  %v8799_v8 = vpack.c.bf16 %v2170_v1, %v2138_v24  ;;  %v2426_v62 = vld [vmem:[%s17146_s5 + $0x19d0] sm:$0xff]  ;;  %v2489_v24 = vld [vmem:[%s17146_s5 + $0x1bc8] sm:$0xff] }
 0x564   :  { %v2491_v1 = vld [vmem:[%s17146_s5 + $0x1bd8] sm:$0xff] }
 0x565   :  { %8656 = vmatpush1.bf16.msra.mxu1 %v8655_v11  ;;  %v2232_v11 = vld [vmem:[%s17146_s5 + $0x13c0] sm:$0xff] }
 0x566   :  { %8784 = vmatpush1.bf16.msra.mxu0 %v8783_v12  ;;  %8658 = vmatprep.subr.bf16.mxu1 %v8657_v13  ;;  %v2202_v12 = vld [vmem:[%s17146_s5 + $0x12d0] sm:$0xff]  ;;  %v8801_v13 = vpack.c.bf16 %v2235_v6, %v2203_v4  ;;  %v8675_v26 = vpack.c.bf16 %v2232_v11, %v2200_v10  ;;  %v8689_v4 = vpack.c.bf16 %v2489_v24, %v2457_v63  ;;  %v2456_v6 = vld [vmem:[%s17146_s5 + $0x1ac0] sm:$0xff]  ;;  %v2521_v11 = vld [vmem:[%s17146_s5 + $0x1cc8] sm:$0xff] }
 0x567   :  { %8786 = vmatprep.subr.bf16.mxu0 %v8785_v23  ;;  %v2267_v23 = vld [vmem:[%s17146_s5 + $0x14d8] sm:$0xff]  ;;  %v8803_v27 = vpack.c.bf16 %v2234_v19, %v2202_v12  ;;  %v2490_v10 = vld [vmem:[%s17146_s5 + $0x1bd0] sm:$0xff]  ;;  %v2553_v12 = vld [vmem:[%s17146_s5 + $0x1dc8] sm:$0xff] }
 0x568   :  { %v2555_v19 = vld [vmem:[%s17146_s5 + $0x1dd8] sm:$0xff] }
 0x569   :  { %8660 = vmatpush1.bf16.msra.mxu1 %v8659_v30  ;;  %v2296_v30 = vld [vmem:[%s17146_s5 + $0x15c0] sm:$0xff]  ;;  %v2747_v63 = vld [vmem:[%s17146_s5 + $0x23d8] sm:$0xff] }
 0x56a   :  { %8788 = vmatpush1.bf16.msra.mxu0 %v8787_v31  ;;  %8662 = vmatprep.subr.bf16.mxu1 %v8661_v32  ;;  %v2266_v31 = vld [vmem:[%s17146_s5 + $0x14d0] sm:$0xff]  ;;  %v8805_v32 = vpack.c.bf16 %v2299_v25, %v2267_v23  ;;  %v8679_v40 = vpack.c.bf16 %v2296_v30, %v2264_v29  ;;  %v8693_v23 = vpack.c.bf16 %v2553_v12, %v2521_v11  ;;  %v2520_v25 = vld [vmem:[%s17146_s5 + $0x1cc0] sm:$0xff]  ;;  %v2585_v30 = vld [vmem:[%s17146_s5 + $0x1ec8] sm:$0xff] }
 0x56b   :  { %8790 = vmatprep.subr.bf16.mxu0 %v8789_v37  ;;  %v2331_v37 = vld [vmem:[%s17146_s5 + $0x16d8] sm:$0xff]  ;;  %v8807_v41 = vpack.c.bf16 %v2298_v34, %v2266_v31  ;;  %v2554_v29 = vld [vmem:[%s17146_s5 + $0x1dd0] sm:$0xff]  ;;  %v2617_v31 = vld [vmem:[%s17146_s5 + $0x1fc8] sm:$0xff] }
 0x56c   :  { %v2619_v34 = vld [vmem:[%s17146_s5 + $0x1fd8] sm:$0xff] }
 0x56d   :  { %8664 = vmatpush1.bf16.msra.mxu1 %v8663_v45  ;;  %v2360_v45 = vld [vmem:[%s17146_s5 + $0x17c0] sm:$0xff] }
 0x56e   :  { %8792 = vmatpush1.bf16.msra.mxu0 %v8791_v46  ;;  %8666 = vmatprep.subr.bf16.mxu1 %v8665_v47  ;;  %v2330_v46 = vld [vmem:[%s17146_s5 + $0x16d0] sm:$0xff]  ;;  %v8809_v47 = vpack.c.bf16 %v2363_v39, %v2331_v37  ;;  %v8683_v56 = vpack.c.bf16 %v2360_v45, %v2328_v44  ;;  %v8697_v37 = vpack.c.bf16 %v2617_v31, %v2585_v30  ;;  %v2584_v39 = vld [vmem:[%s17146_s5 + $0x1ec0] sm:$0xff]  ;;  %v2649_v45 = vld [vmem:[%s17146_s5 + $0x20c8] sm:$0xff] }
 0x56f   :  { %8794 = vmatprep.subr.bf16.mxu0 %v8793_v16  ;;  %v2395_v16 = vld [vmem:[%s17146_s5 + $0x18d8] sm:$0xff]  ;;  %v8811_v57 = vpack.c.bf16 %v2362_v49, %v2330_v46  ;;  %v2618_v44 = vld [vmem:[%s17146_s5 + $0x1fd0] sm:$0xff]  ;;  %v2681_v46 = vld [vmem:[%s17146_s5 + $0x21c8] sm:$0xff] }
 0x570   :  { %v2683_v49 = vld [vmem:[%s17146_s5 + $0x21d8] sm:$0xff] }
 0x571   :  { %8668 = vmatpush1.bf16.msra.mxu1 %v8667_v14  ;;  %v2424_v14 = vld [vmem:[%s17146_s5 + $0x19c0] sm:$0xff] }
 0x572   :  { %8796 = vmatpush1.bf16.msra.mxu0 %v8795_v60  ;;  %8670 = vmatprep.subr.bf16.mxu1 %v8669_v61  ;;  %v2394_v60 = vld [vmem:[%s17146_s5 + $0x18d0] sm:$0xff]  ;;  %v8813_v61 = vpack.c.bf16 %v2427_v55, %v2395_v16  ;;  %v8687_v2 = vpack.c.bf16 %v2424_v14, %v2392_v59  ;;  %v8701_v16 = vpack.c.bf16 %v2681_v46, %v2649_v45  ;;  %v2648_v55 = vld [vmem:[%s17146_s5 + $0x20c0] sm:$0xff]  ;;  %v2713_v14 = vld [vmem:[%s17146_s5 + $0x22c8] sm:$0xff] }
 0x573   :  { %8798 = vmatprep.subr.bf16.mxu0 %v8797_v0  ;;  %v2459_v0 = vld [vmem:[%s17146_s5 + $0x1ad8] sm:$0xff]  ;;  %v8815_v3 = vpack.c.bf16 %v2426_v62, %v2394_v60  ;;  %v2682_v59 = vld [vmem:[%s17146_s5 + $0x21d0] sm:$0xff]  ;;  %v2745_v60 = vld [vmem:[%s17146_s5 + $0x23c8] sm:$0xff] }
 0x574   :  { %v2715_v62 = vld [vmem:[%s17146_s5 + $0x22d8] sm:$0xff] }
 0x575   :  { %8672 = vmatpush1.bf16.msra.mxu1 %v8671_v7  ;;  %v2488_v7 = vld [vmem:[%s17146_s5 + $0x1bc0] sm:$0xff] }
 0x576   :  { %8800 = vmatpush1.bf16.msra.mxu0 %v8799_v8  ;;  %8674 = vmatprep.subr.bf16.mxu1 %v8673_v9  ;;  %v2458_v8 = vld [vmem:[%s17146_s5 + $0x1ad0] sm:$0xff]  ;;  %v8817_v9 = vpack.c.bf16 %v2491_v1, %v2459_v0  ;;  %v8691_v20 = vpack.c.bf16 %v2488_v7, %v2456_v6  ;;  %v2712_v0 = vld [vmem:[%s17146_s5 + $0x22c0] sm:$0xff]  ;;  %v2777_v6 = vld [vmem:[%s17146_s5 + $0x24c8] sm:$0xff] }
 0x577   :  { %8802 = vmatprep.subr.bf16.mxu0 %v8801_v13  ;;  %v2523_v13 = vld [vmem:[%s17146_s5 + $0x1cd8] sm:$0xff]  ;;  %v8819_v21 = vpack.c.bf16 %v2490_v10, %v2458_v8  ;;  %v2744_v1 = vld [vmem:[%s17146_s5 + $0x23c0] sm:$0xff]  ;;  %v2809_v7 = vld [vmem:[%s17146_s5 + $0x25c8] sm:$0xff]  ;;  %v8833_v8 = vpack.c.bf16 %v2747_v63, %v2715_v62 }
 0x578   :  { %v2811_v10 = vld [vmem:[%s17146_s5 + $0x25d8] sm:$0xff]  ;;  %v8707_v11 = vpack.c.bf16 %v2744_v1, %v2712_v0  ;;  %v2968_v63 = vld [vmem:[%s17146_s5 + $0x2ac0] sm:$0xff]  ;;  %v2970_v0 = vld [vmem:[%s17146_s5 + $0x2ad0] sm:$0xff] }
 0x579   :  { %8676 = vmatpush1.bf16.msra.mxu1 %v8675_v26  ;;  %v2552_v26 = vld [vmem:[%s17146_s5 + $0x1dc0] sm:$0xff] }
 0x57a   :  { %8804 = vmatpush1.bf16.msra.mxu0 %v8803_v27  ;;  %8678 = vmatprep.subr.bf16.mxu1 %v8677_v28  ;;  %v2522_v27 = vld [vmem:[%s17146_s5 + $0x1cd0] sm:$0xff]  ;;  %v8821_v28 = vpack.c.bf16 %v2555_v19, %v2523_v13  ;;  %v8695_v35 = vpack.c.bf16 %v2552_v26, %v2520_v25  ;;  %v8709_v13 = vpack.c.bf16 %v2809_v7, %v2777_v6  ;;  %v2776_v19 = vld [vmem:[%s17146_s5 + $0x24c0] sm:$0xff]  ;;  %v2841_v26 = vld [vmem:[%s17146_s5 + $0x26c8] sm:$0xff] }
 0x57b   :  { %8806 = vmatprep.subr.bf16.mxu0 %v8805_v32  ;;  %v2587_v32 = vld [vmem:[%s17146_s5 + $0x1ed8] sm:$0xff]  ;;  %v8823_v36 = vpack.c.bf16 %v2554_v29, %v2522_v27  ;;  %v2810_v25 = vld [vmem:[%s17146_s5 + $0x25d0] sm:$0xff]  ;;  %v2873_v27 = vld [vmem:[%s17146_s5 + $0x27c8] sm:$0xff] }
 0x57c   :  { %v2875_v29 = vld [vmem:[%s17146_s5 + $0x27d8] sm:$0xff] }
 0x57d   :  { %8680 = vmatpush1.bf16.msra.mxu1 %v8679_v40  ;;  %v2616_v40 = vld [vmem:[%s17146_s5 + $0x1fc0] sm:$0xff]  ;;  %v3035_v7 = vld [vmem:[%s17146_s5 + $0x2cd8] sm:$0xff] }
 0x57e   :  { %8808 = vmatpush1.bf16.msra.mxu0 %v8807_v41  ;;  %8682 = vmatprep.subr.bf16.mxu1 %v8681_v42  ;;  %v2586_v41 = vld [vmem:[%s17146_s5 + $0x1ed0] sm:$0xff]  ;;  %v8825_v42 = vpack.c.bf16 %v2619_v34, %v2587_v32  ;;  %v8699_v50 = vpack.c.bf16 %v2616_v40, %v2584_v39  ;;  %v8713_v32 = vpack.c.bf16 %v2873_v27, %v2841_v26  ;;  %v2840_v34 = vld [vmem:[%s17146_s5 + $0x26c0] sm:$0xff]  ;;  %v2905_v40 = vld [vmem:[%s17146_s5 + $0x28c8] sm:$0xff] }
 0x57f   :  { %8810 = vmatprep.subr.bf16.mxu0 %v8809_v47  ;;  %v2651_v47 = vld [vmem:[%s17146_s5 + $0x20d8] sm:$0xff]  ;;  %v8827_v22 = vpack.c.bf16 %v2618_v44, %v2586_v41  ;;  %v2874_v39 = vld [vmem:[%s17146_s5 + $0x27d0] sm:$0xff]  ;;  %v2937_v41 = vld [vmem:[%s17146_s5 + $0x29c8] sm:$0xff] }
 0x580   :  { %v2939_v44 = vld [vmem:[%s17146_s5 + $0x29d8] sm:$0xff]  ;;  %v3066_v27 = vld [vmem:[%s17146_s5 + $0x2dd0] sm:$0xff] }
 0x581   :  { %8684 = vmatpush1.bf16.msra.mxu1 %v8683_v56  ;;  %v2680_v56 = vld [vmem:[%s17146_s5 + $0x21c0] sm:$0xff] }
 0x582   :  { %8812 = vmatpush1.bf16.msra.mxu0 %v8811_v57  ;;  %8686 = vmatprep.subr.bf16.mxu1 %v8685_v58  ;;  %v8829_v57 = vpack.c.bf16 %v2683_v49, %v2651_v47  ;;  %v2650_v58 = vld [vmem:[%s17146_s5 + $0x20d0] sm:$0xff]  ;;  %v8717_v47 = vpack.c.bf16 %v2937_v41, %v2905_v40  ;;  %v2904_v49 = vld [vmem:[%s17146_s5 + $0x28c0] sm:$0xff] }
 0x583   :  { %8814 = vmatprep.subr.bf16.mxu0 %v8813_v61  ;;  %v8703_v61 = vpack.c.bf16 %v2680_v56, %v2648_v55  ;;  %v8831_v24 = vpack.c.bf16 %v2682_v59, %v2650_v58  ;;  %v2938_v55 = vld [vmem:[%s17146_s5 + $0x29d0] sm:$0xff]  ;;  %v2969_v56 = vld [vmem:[%s17146_s5 + $0x2ac8] sm:$0xff]  ;;  %v2971_v58 = vld [vmem:[%s17146_s5 + $0x2ad8] sm:$0xff] }
 0x584   :  { %v3003_v59 = vld [vmem:[%s17146_s5 + $0x2bd8] sm:$0xff] }
 0x585   :  { %8688 = vmatpush1.bf16.msra.mxu1 %v8687_v2  ;;  %v2714_v2 = vld [vmem:[%s17146_s5 + $0x22d0] sm:$0xff]  ;;  %v8849_v1 = vpack.c.bf16 %v3003_v59, %v2971_v58  ;;  %v3163_v59 = vld [vmem:[%s17146_s5 + $0x30d8] sm:$0xff] }
 0x586   :  { %8816 = vmatpush1.bf16.msra.mxu0 %v8815_v3  ;;  %8690 = vmatprep.subr.bf16.mxu1 %v8689_v4  ;;  %v8705_v3 = vpack.c.bf16 %v2745_v60, %v2713_v14  ;;  %v2746_v4 = vld [vmem:[%s17146_s5 + $0x23d0] sm:$0xff] }
 0x587   :  { %8818 = vmatprep.subr.bf16.mxu0 %v8817_v9  ;;  %v2779_v9 = vld [vmem:[%s17146_s5 + $0x24d8] sm:$0xff]  ;;  %v8835_v12 = vpack.c.bf16 %v2746_v4, %v2714_v2  ;;  %v3650_v60 = vld [vmem:[%s17148_s6 + $0x10] sm:$0xff]  ;;  %v3065_v4 = vld [vmem:[%s17146_s5 + $0x2dc8] sm:$0xff] }
 0x588   :  { %v3002_v2 = vld [vmem:[%s17146_s5 + $0x2bd0] sm:$0xff]  ;;  %v3723_v6 = vrot.slane %v3650_v60, %v11134_v15 }
 0x589   :  { %8692 = vmatpush1.bf16.msra.mxu1 %v8691_v20  ;;  %v2808_v20 = vld [vmem:[%s17146_s5 + $0x25c0] sm:$0xff] }
 0x58a   :  { %8820 = vmatpush1.bf16.msra.mxu0 %v8819_v21  ;;  %8694 = vmatprep.subr.bf16.mxu1 %v8693_v23  ;;  %v2778_v21 = vld [vmem:[%s17146_s5 + $0x24d0] sm:$0xff]  ;;  %v8837_v23 = vpack.c.bf16 %v2811_v10, %v2779_v9  ;;  %v8711_v30 = vpack.c.bf16 %v2808_v20, %v2776_v19  ;;  %v3731_v9 = vrot.slane %v3650_v60, %v11510_v33  ;;  %v3032_v20 = vld [vmem:[%s17146_s5 + $0x2cc0] sm:$0xff] }
 0x58b   :  { %8822 = vmatprep.subr.bf16.mxu0 %v8821_v28  ;;  %v2843_v28 = vld [vmem:[%s17146_s5 + $0x26d8] sm:$0xff]  ;;  %v8839_v31 = vpack.c.bf16 %v2810_v25, %v2778_v21  ;;  %v3727_v10 = vrot.slane %v3650_v60, %v11142_v17  ;;  %v3064_v21 = vld [vmem:[%s17146_s5 + $0x2dc0] sm:$0xff] }
 0x58c   :  { %v8727_v40 = vpack.c.bf16 %v3064_v21, %v3032_v20  ;;  %v3258_v20 = vld [vmem:[%s17146_s5 + $0x33d0] sm:$0xff]  ;;  %v3289_v21 = vld [vmem:[%s17146_s5 + $0x34c8] sm:$0xff] }
 0x58d   :  { %8696 = vmatpush1.bf16.msra.mxu1 %v8695_v35  ;;  %v2872_v35 = vld [vmem:[%s17146_s5 + $0x27c0] sm:$0xff] }
 0x58e   :  { %8824 = vmatpush1.bf16.msra.mxu0 %v8823_v36  ;;  %8698 = vmatprep.subr.bf16.mxu1 %v8697_v37  ;;  %v2842_v36 = vld [vmem:[%s17146_s5 + $0x26d0] sm:$0xff]  ;;  %v8841_v37 = vpack.c.bf16 %v2875_v29, %v2843_v28  ;;  %v8715_v45 = vpack.c.bf16 %v2872_v35, %v2840_v34  ;;  %v3097_v28 = vld [vmem:[%s17146_s5 + $0x2ec8] sm:$0xff]  ;;  %v3099_v34 = vld [vmem:[%s17146_s5 + $0x2ed8] sm:$0xff] }
 0x58f   :  { %8826 = vmatprep.subr.bf16.mxu0 %v8825_v42  ;;  %v2907_v42 = vld [vmem:[%s17146_s5 + $0x28d8] sm:$0xff]  ;;  %v8843_v46 = vpack.c.bf16 %v2874_v39, %v2842_v36  ;;  %v3129_v29 = vld [vmem:[%s17146_s5 + $0x2fc8] sm:$0xff] }
 0x590   :  { %v3131_v35 = vld [vmem:[%s17146_s5 + $0x2fd8] sm:$0xff] }
 0x591   :  { %8700 = vmatpush1.bf16.msra.mxu1 %v8699_v50  ;;  %v2936_v50 = vld [vmem:[%s17146_s5 + $0x29c0] sm:$0xff] }
 0x592   :  { %8828 = vmatpush1.bf16.msra.mxu0 %v8827_v22  ;;  %8702 = vmatprep.subr.bf16.mxu1 %v8701_v16  ;;  %v2906_v22 = vld [vmem:[%s17146_s5 + $0x28d0] sm:$0xff]  ;;  %v8845_v16 = vpack.c.bf16 %v2939_v44, %v2907_v42  ;;  %v8719_v14 = vpack.c.bf16 %v2936_v50, %v2904_v49 }
 0x593   :  { %8830 = vmatprep.subr.bf16.mxu0 %v8829_v57  ;;  %v3001_v57 = vld [vmem:[%s17146_s5 + $0x2bc8] sm:$0xff]  ;;  %v3098_v49 = vld [vmem:[%s17146_s5 + $0x2ed0] sm:$0xff] }
 0x594   :  { %5585 = vmatmul.mubr.f32.vlgmr.msra.gmra.mrb[26].mxu1 %v11187_v43  ;;  %v8721_v62 = vpack.c.bf16 %v3001_v57, %v2969_v56  ;;  %v3161_v56 = vld [vmem:[%s17146_s5 + $0x30c8] sm:$0xff] }
 0x595   :  { %5727 = vmatmul.mubr.f32.vlgmr.msra.gmra.mrb[28].mxu0 %v11187_v43  ;;  %8704 = vmatpush1.bf16.msra.mxu1 %v8703_v61  ;;  %v8847_v61 = vpack.c.bf16 %v2938_v55, %v2906_v22  ;;  %v3130_v55 = vld [vmem:[%s17146_s5 + $0x2fd0] sm:$0xff]  ;;  %v3193_v57 = vld [vmem:[%s17146_s5 + $0x31c8] sm:$0xff] }
 0x596   :  { %5655 = vmatprep.mubr.f32.mxu1 %v11209_v51  ;;  %8832 = vmatpush1.bf16.msra.mxu0 %v8831_v24  ;;  %v3000_v24 = vld [vmem:[%s17146_s5 + $0x2bc0] sm:$0xff] }
 0x597   :  { %5797 = vmatprep.mubr.f32.mxu0 %v11209_v51  ;;  %8706 = vmatprep.subr.bf16.mxu1 %v8705_v3  ;;  %v3033_v3 = vld [vmem:[%s17146_s5 + $0x2cc8] sm:$0xff] }
 0x598   :  { %8834 = vmatprep.subr.bf16.mxu0 %v8833_v8  ;;  %v3067_v8 = vld [vmem:[%s17146_s5 + $0x2dd8] sm:$0xff]  ;;  %v8725_v19 = vpack.c.bf16 %v3065_v4, %v3033_v3  ;;  %v3225_v3 = vld [vmem:[%s17146_s5 + $0x32c8] sm:$0xff] }
 0x599   :  { %8708 = vmatpush1.bf16.msra.mxu1 %v8707_v11  ;;  %v8723_v11 = vpack.c.bf16 %v3000_v24, %v2968_v63  ;;  %v8853_v26 = vpack.c.bf16 %v3067_v8, %v3035_v7  ;;  %v3160_v63 = vld [vmem:[%s17146_s5 + $0x30c0] sm:$0xff]  ;;  %v3257_v4 = vld [vmem:[%s17146_s5 + $0x33c8] sm:$0xff]  ;;  %v3259_v7 = vld [vmem:[%s17146_s5 + $0x33d8] sm:$0xff] }
 0x59a   :  { %8836 = vmatpush1.bf16.msra.mxu0 %v8835_v12  ;;  %8710 = vmatprep.subr.bf16.mxu1 %v8709_v13  ;;  %v3735_v12 = vrot.slane %v3650_v60, %v11145_v18  ;;  %v8851_v13 = vpack.c.bf16 %v3002_v2, %v2970_v0  ;;  %v3192_v24 = vld [vmem:[%s17146_s5 + $0x31c0] sm:$0xff]  ;;  %v3162_v0 = vld [vmem:[%s17146_s5 + $0x30d0] sm:$0xff] }
 0x59b   :  { %8838 = vmatprep.subr.bf16.mxu0 %v8837_v23  ;;  %v3034_v23 = vld [vmem:[%s17146_s5 + $0x2cd0] sm:$0xff]  ;;  %v8735_v8 = vpack.c.bf16 %v3192_v24, %v3160_v63  ;;  %v3481_v24 = vld [vmem:[%s17146_s5 + $0x3ac8] sm:$0xff] }
 0x59c   :  { %v8855_v44 = vpack.c.bf16 %v3066_v27, %v3034_v23  ;;  %v3194_v2 = vld [vmem:[%s17146_s5 + $0x31d0] sm:$0xff]  ;;  %v3321_v23 = vld [vmem:[%s17146_s5 + $0x35c8] sm:$0xff] }
 0x59d   :  { %8712 = vmatpush1.bf16.msra.mxu1 %v8711_v30  ;;  %v3450_v63 = vld [vmem:[%s17146_s5 + $0x39d0] sm:$0xff] }
 0x59e   :  { %8840 = vmatpush1.bf16.msra.mxu0 %v8839_v31  ;;  %8714 = vmatprep.subr.bf16.mxu1 %v8713_v32 }
 0x59f   :  { %8842 = vmatprep.subr.bf16.mxu0 %v8841_v37 }
 0x5a1   :  { %8716 = vmatpush1.bf16.msra.mxu1 %v8715_v45  ;;  %v8729_v45 = vpack.c.bf16 %v3129_v29, %v3097_v28  ;;  %v8741_v29 = vpack.c.bf16 %v3321_v23, %v3289_v21 }
 0x5a2   :  { %8844 = vmatpush1.bf16.msra.mxu0 %v8843_v46  ;;  %8718 = vmatprep.subr.bf16.mxu1 %v8717_v47  ;;  %v3096_v46 = vld [vmem:[%s17146_s5 + $0x2ec0] sm:$0xff] }
 0x5a3   :  { %8846 = vmatprep.subr.bf16.mxu0 %v8845_v16  ;;  %v3128_v47 = vld [vmem:[%s17146_s5 + $0x2fc0] sm:$0xff]  ;;  %v8857_v16 = vpack.c.bf16 %v3131_v35, %v3099_v34  ;;  %v3322_v35 = vld [vmem:[%s17146_s5 + $0x35d0] sm:$0xff] }
 0x5a4   :  { %v8731_v60 = vpack.c.bf16 %v3128_v47, %v3096_v46  ;;  %v3384_v46 = vld [vmem:[%s17146_s5 + $0x37c0] sm:$0xff]  ;;  %v3354_v47 = vld [vmem:[%s17146_s5 + $0x36d0] sm:$0xff] }
 0x5a5   :  { %8720 = vmatpush1.bf16.msra.mxu1 %v8719_v14  ;;  %v3195_v14 = vld [vmem:[%s17146_s5 + $0x31d8] sm:$0xff] }
 0x5a6   :  { %8848 = vmatpush1.bf16.msra.mxu0 %v8847_v61  ;;  %8722 = vmatprep.subr.bf16.mxu1 %v8721_v62  ;;  %v8859_v61 = vpack.c.bf16 %v3130_v55, %v3098_v49  ;;  %v8733_v62 = vpack.c.bf16 %v3193_v57, %v3161_v56  ;;  %v3419_v55 = vld [vmem:[%s17146_s5 + $0x38d8] sm:$0xff] }
 0x5a7   :  { %v5089_v25 = vpop.f32.mrb[22].mxu1  ;;  %8850 = vmatprep.subr.bf16.mxu0 %v8849_v1  ;;  %v8861_v1 = vpack.c.bf16 %v3195_v14, %v3163_v59  ;;  %v3451_v56 = vld [vmem:[%s17146_s5 + $0x39d8] sm:$0xff]  ;;  %v3416_v14 = vld [vmem:[%s17146_s5 + $0x38c0] sm:$0xff] }
 0x5a8   :  { %v9165_v30 = vadd.f32 %v5089_v25, %v3723_v6  ;;  %v5231_v31 = vpop.f32.mrb[24].mxu0  ;;  %v5091_v32 = vpop.f32.mrb[23].mxu1  ;;  %v3227_v6 = vld [vmem:[%s17146_s5 + $0x32d8] sm:$0xff] }
 0x5a9   :  { %v9167_v36 = vadd.f32 %v5231_v31, %v3731_v9  ;;  %v9166_v37 = vadd.f32 %v5091_v32, %v3727_v10  ;;  %v5233_v39 = vpop.f32.mrb[25].mxu0  ;;  %8724 = vmatpush1.bf16.msra.mxu1 %v8723_v11  ;;  %v8863_v9 = vpack.c.bf16 %v3194_v2, %v3162_v0  ;;  %v8737_v10 = vpack.c.bf16 %v3257_v4, %v3225_v3  ;;  %v3224_v11 = vld [vmem:[%s17146_s5 + $0x32c0] sm:$0xff]  ;;  %v3291_v25 = vld [vmem:[%s17146_s5 + $0x34d8] sm:$0xff]  ;;  %v3290_v32 = vld [vmem:[%s17146_s5 + $0x34d0] sm:$0xff] }
 0x5aa   :  { %v6104_v41 = vmax.f32 %v9165_v30, 0.0  ;;  %v9168_v42 = vadd.f32 %v5233_v39, %v3735_v12  ;;  %8852 = vmatpush1.bf16.msra.mxu0 %v8851_v13  ;;  %8726 = vmatprep.subr.bf16.mxu1 %v8725_v19  ;;  %v3256_v12 = vld [vmem:[%s17146_s5 + $0x33c0] sm:$0xff]  ;;  %v3226_v13 = vld [vmem:[%s17146_s5 + $0x32d0] sm:$0xff]  ;;  %v8865_v19 = vpack.c.bf16 %v3259_v7, %v3227_v6  ;;  %v3355_v39 = vld [vmem:[%s17146_s5 + $0x36d8] sm:$0xff] }
 0x5ab   :  { %v6106_v50 = vmax.f32 %v9167_v36, 0.0  ;;  %v6105_v22 = vmax.f32 %v9166_v37, 0.0  ;;  %8854 = vmatprep.subr.bf16.mxu0 %v8853_v26  ;;  %v3323_v26 = vld [vmem:[%s17146_s5 + $0x35d8] sm:$0xff]  ;;  %v8739_v27 = vpack.c.bf16 %v3256_v12, %v3224_v11  ;;  %v8867_v28 = vpack.c.bf16 %v3258_v20, %v3226_v13  ;;  %v3288_v30 = vld [vmem:[%s17146_s5 + $0x34c0] sm:$0xff]  ;;  %v3353_v36 = vld [vmem:[%s17146_s5 + $0x36c8] sm:$0xff] }
 0x5ac   :  { %6136 = vst [vmem:[%s17149_s7 + $0x80] sm:$0xff] %v6104_v41  ;;  %v6107_v58 = vmax.f32 %v9168_v42, 0.0  ;;  %v3320_v31 = vld [vmem:[%s17146_s5 + $0x35c0] sm:$0xff]  ;;  %v8869_v34 = vpack.c.bf16 %v3323_v26, %v3291_v25  ;;  %v3385_v37 = vld [vmem:[%s17146_s5 + $0x37c8] sm:$0xff]  ;;  %v8871_v42 = vpack.c.bf16 %v3322_v35, %v3290_v32  ;;  %v3515_v2 = vld [vmem:[%s17146_s5 + $0x3bd8] sm:$0xff] }
 0x5ad   :  { %6138 = vst [vmem:[%s17149_s7 + $0x90] sm:$0xff] %v6106_v50  ;;  %6137 = vst [vmem:[%s17149_s7 + $0x88] sm:$0xff] %v6105_v22  ;;  %8728 = vmatpush1.bf16.msra.mxu1 %v8727_v40  ;;  %v3387_v40 = vld [vmem:[%s17146_s5 + $0x37d8] sm:$0xff]  ;;  %v8743_v41 = vpack.c.bf16 %v3320_v31, %v3288_v30  ;;  %v3386_v50 = vld [vmem:[%s17146_s5 + $0x37d0] sm:$0xff] }
 0x5ae   :  { %6139 = vst [vmem:[%s17149_s7 + $0x98] sm:$0xff] %v6107_v58  ;;  %8856 = vmatpush1.bf16.msra.mxu0 %v8855_v44  ;;  %8730 = vmatprep.subr.bf16.mxu1 %v8729_v45  ;;  %v8745_v44 = vpack.c.bf16 %v3385_v37, %v3353_v36  ;;  %v3352_v45 = vld [vmem:[%s17146_s5 + $0x36c0] sm:$0xff]  ;;  %v8873_v49 = vpack.c.bf16 %v3387_v40, %v3355_v39  ;;  %v3417_v22 = vld [vmem:[%s17146_s5 + $0x38c8] sm:$0xff]  ;;  %v3514_v11 = vld [vmem:[%s17146_s5 + $0x3bd0] sm:$0xff] }
 0x5af   :  { %8858 = vmatprep.subr.bf16.mxu0 %v8857_v16  ;;  %v3449_v16 = vld [vmem:[%s17146_s5 + $0x39c8] sm:$0xff]  ;;  %v8747_v57 = vpack.c.bf16 %v3384_v46, %v3352_v45  ;;  %v8875_v58 = vpack.c.bf16 %v3386_v50, %v3354_v47  ;;  %v3480_v7 = vld [vmem:[%s17146_s5 + $0x3ac0] sm:$0xff]  ;;  %v3579_v20 = vld [vmem:[%s17146_s5 + $0x3dd8] sm:$0xff] }
 0x5b0   :  { %v8749_v59 = vpack.c.bf16 %v3449_v16, %v3417_v22  ;;  %v3513_v0 = vld [vmem:[%s17146_s5 + $0x3bc8] sm:$0xff]  ;;  %v3544_v26 = vld [vmem:[%s17146_s5 + $0x3cc0] sm:$0xff]  ;;  %v3578_v30 = vld [vmem:[%s17146_s5 + $0x3dd0] sm:$0xff] }
 0x5b1   :  { %8732 = vmatpush1.bf16.msra.mxu1 %v8731_v60  ;;  %v3448_v60 = vld [vmem:[%s17146_s5 + $0x39c0] sm:$0xff]  ;;  %v8753_v6 = vpack.c.bf16 %v3513_v0, %v3481_v24  ;;  %v3545_v12 = vld [vmem:[%s17146_s5 + $0x3cc8] sm:$0xff]  ;;  %v3643_v35 = vld [vmem:[%s17146_s5 + $0x3fd8] sm:$0xff] }
 0x5b2   :  { %8860 = vmatpush1.bf16.msra.mxu0 %v8859_v61  ;;  %8734 = vmatprep.subr.bf16.mxu1 %v8733_v62  ;;  %v3418_v61 = vld [vmem:[%s17146_s5 + $0x38d0] sm:$0xff]  ;;  %v8877_v62 = vpack.c.bf16 %v3451_v56, %v3419_v55  ;;  %v8751_v3 = vpack.c.bf16 %v3448_v60, %v3416_v14  ;;  %v3577_v13 = vld [vmem:[%s17146_s5 + $0x3dc8] sm:$0xff]  ;;  %v3608_v40 = vld [vmem:[%s17146_s5 + $0x3ec0] sm:$0xff] }
 0x5b3   :  { %8862 = vmatprep.subr.bf16.mxu0 %v8861_v1  ;;  %v3483_v1 = vld [vmem:[%s17146_s5 + $0x3ad8] sm:$0xff]  ;;  %v8879_v4 = vpack.c.bf16 %v3450_v63, %v3418_v61  ;;  %v8757_v25 = vpack.c.bf16 %v3577_v13, %v3545_v12  ;;  %v3609_v31 = vld [vmem:[%s17146_s5 + $0x3ec8] sm:$0xff]  ;;  %v3642_v45 = vld [vmem:[%s17146_s5 + $0x3fd0] sm:$0xff] }
 0x5b4   :  { %v3641_v32 = vld [vmem:[%s17146_s5 + $0x3fc8] sm:$0xff]  ;;  %v1663_v50 = vld [vmem:[%s17146_s5 + $0x1f8] sm:$0xff]  ;;  %v1628_v56 = vld [vmem:[%s17146_s5 + $0xe0] sm:$0xff] }
 0x5b5   :  { %8736 = vmatpush1.bf16.msra.mxu1 %v8735_v8  ;;  %v3512_v8 = vld [vmem:[%s17146_s5 + $0x3bc0] sm:$0xff]  ;;  %v8761_v39 = vpack.c.bf16 %v3641_v32, %v3609_v31  ;;  %v1629_v46 = vld [vmem:[%s17146_s5 + $0xe8] sm:$0xff]  ;;  %v1662_v14 = vld [vmem:[%s17146_s5 + $0x1f0] sm:$0xff] }
 0x5b6   :  { %8864 = vmatpush1.bf16.msra.mxu0 %v8863_v9  ;;  %8738 = vmatprep.subr.bf16.mxu1 %v8737_v10  ;;  %v3482_v9 = vld [vmem:[%s17146_s5 + $0x3ad0] sm:$0xff]  ;;  %v8881_v10 = vpack.c.bf16 %v3515_v2, %v3483_v1  ;;  %v8755_v21 = vpack.c.bf16 %v3512_v8, %v3480_v7  ;;  %v1661_v47 = vld [vmem:[%s17146_s5 + $0x1e8] sm:$0xff]  ;;  %v1695_v63 = vld [vmem:[%s17146_s5 + $0x2f8] sm:$0xff] }
 0x5b7   :  { %8866 = vmatprep.subr.bf16.mxu0 %v8865_v19  ;;  %v3547_v19 = vld [vmem:[%s17146_s5 + $0x3cd8] sm:$0xff]  ;;  %v8883_v23 = vpack.c.bf16 %v3514_v11, %v3482_v9  ;;  %v8893_v55 = vpack.c.bf16 %v1661_v47, %v1629_v46  ;;  %v1693_v60 = vld [vmem:[%s17146_s5 + $0x2e8] sm:$0xff]  ;;  %v1692_v1 = vld [vmem:[%s17146_s5 + $0x2e0] sm:$0xff] }
 0x5b8   :  { %v1725_v61 = vld [vmem:[%s17146_s5 + $0x3e8] sm:$0xff]  ;;  %v1727_v24 = vld [vmem:[%s17146_s5 + $0x3f8] sm:$0xff]  ;;  %v1724_v2 = vld [vmem:[%s17146_s5 + $0x3e0] sm:$0xff] }
 0x5b9   :  { %8740 = vmatpush1.bf16.msra.mxu1 %v8739_v27  ;;  %v3576_v27 = vld [vmem:[%s17146_s5 + $0x3dc0] sm:$0xff]  ;;  %v1757_v7 = vld [vmem:[%s17146_s5 + $0x4e8] sm:$0xff]  ;;  %v9025_v9 = vpack.c.bf16 %v1727_v24, %v1695_v63  ;;  %v1791_v11 = vld [vmem:[%s17146_s5 + $0x5f8] sm:$0xff]  ;;  %v8899_v12 = vpack.c.bf16 %v1724_v2, %v1692_v1 }
 0x5ba   :  { %8868 = vmatpush1.bf16.msra.mxu0 %v8867_v28  ;;  %8742 = vmatprep.subr.bf16.mxu1 %v8741_v29  ;;  %v3546_v28 = vld [vmem:[%s17146_s5 + $0x3cd0] sm:$0xff]  ;;  %v8885_v29 = vpack.c.bf16 %v3579_v20, %v3547_v19  ;;  %v8759_v36 = vpack.c.bf16 %v3576_v27, %v3544_v26  ;;  %v1789_v8 = vld [vmem:[%s17146_s5 + $0x5e8] sm:$0xff]  ;;  %v1756_v20 = vld [vmem:[%s17146_s5 + $0x4e0] sm:$0xff] }
 0x5bb   :  { %8870 = vmatprep.subr.bf16.mxu0 %v8869_v34  ;;  %v3611_v34 = vld [vmem:[%s17146_s5 + $0x3ed8] sm:$0xff]  ;;  %v8887_v37 = vpack.c.bf16 %v3578_v30, %v3546_v28  ;;  %v8901_v19 = vpack.c.bf16 %v1789_v8, %v1757_v7  ;;  %v1790_v26 = vld [vmem:[%s17146_s5 + $0x5f0] sm:$0xff]  ;;  %v1821_v27 = vld [vmem:[%s17146_s5 + $0x6e8] sm:$0xff] }
 0x5bc   :  { %v1853_v28 = vld [vmem:[%s17146_s5 + $0x7e8] sm:$0xff]  ;;  %v1980_v63 = vld [vmem:[%s17146_s5 + $0xbe0] sm:$0xff]  ;;  %v1950_v24 = vld [vmem:[%s17146_s5 + $0xaf0] sm:$0xff] }
 0x5bd   :  { %8744 = vmatpush1.bf16.msra.mxu1 %v8743_v41  ;;  %v3640_v41 = vld [vmem:[%s17146_s5 + $0x3fc0] sm:$0xff]  ;;  %v8905_v32 = vpack.c.bf16 %v1853_v28, %v1821_v27  ;;  %v1982_v1 = vld [vmem:[%s17146_s5 + $0xbf0] sm:$0xff]  ;;  %v2013_v2 = vld [vmem:[%s17146_s5 + $0xce8] sm:$0xff] }
 0x5be   :  { %8872 = vmatpush1.bf16.msra.mxu0 %v8871_v42  ;;  %8746 = vmatprep.subr.bf16.mxu1 %v8745_v44  ;;  %v3610_v42 = vld [vmem:[%s17146_s5 + $0x3ed0] sm:$0xff]  ;;  %v8889_v44 = vpack.c.bf16 %v3643_v35, %v3611_v34  ;;  %v8763_v22 = vpack.c.bf16 %v3640_v41, %v3608_v40  ;;  %v1820_v34 = vld [vmem:[%s17146_s5 + $0x6e0] sm:$0xff]  ;;  %v1885_v40 = vld [vmem:[%s17146_s5 + $0x8e8] sm:$0xff]  ;;  %v9043_v8 = vpack.c.bf16 %v1982_v1, %v1950_v24 }
 0x5bf   :  { %8874 = vmatprep.subr.bf16.mxu0 %v8873_v49  ;;  %v1631_v49 = vld [vmem:[%s17146_s5 + $0xf8] sm:$0xff]  ;;  %v8891_v16 = vpack.c.bf16 %v3642_v45, %v3610_v42  ;;  %v1852_v35 = vld [vmem:[%s17146_s5 + $0x7e0] sm:$0xff]  ;;  %v1917_v41 = vld [vmem:[%s17146_s5 + $0x9e8] sm:$0xff] }
 0x5c0   :  { %v1887_v42 = vld [vmem:[%s17146_s5 + $0x8f8] sm:$0xff]  ;;  %v8907_v45 = vpack.c.bf16 %v1852_v35, %v1820_v34  ;;  %v8909_v47 = vpack.c.bf16 %v1917_v41, %v1885_v40  ;;  %v2141_v34 = vld [vmem:[%s17146_s5 + $0x10e8] sm:$0xff] }
 0x5c1   :  { %8748 = vmatpush1.bf16.msra.mxu1 %v8747_v57  ;;  %v1660_v57 = vld [vmem:[%s17146_s5 + $0x1e0] sm:$0xff]  ;;  %v2173_v35 = vld [vmem:[%s17146_s5 + $0x11e8] sm:$0xff]  ;;  %v2271_v24 = vld [vmem:[%s17146_s5 + $0x14f8] sm:$0xff] }
 0x5c2   :  { %8876 = vmatpush1.bf16.msra.mxu0 %v8875_v58  ;;  %8750 = vmatprep.subr.bf16.mxu1 %v8749_v59  ;;  %v9021_v58 = vpack.c.bf16 %v1663_v50, %v1631_v49  ;;  %v1630_v59 = vld [vmem:[%s17146_s5 + $0xf0] sm:$0xff]  ;;  %v1884_v49 = vld [vmem:[%s17146_s5 + $0x8e0] sm:$0xff]  ;;  %v8925_v41 = vpack.c.bf16 %v2173_v35, %v2141_v34 }
 0x5c3   :  { %8878 = vmatprep.subr.bf16.mxu0 %v8877_v62  ;;  %v8895_v62 = vpack.c.bf16 %v1660_v57, %v1628_v56  ;;  %v9023_v0 = vpack.c.bf16 %v1662_v14, %v1630_v59  ;;  %v1916_v50 = vld [vmem:[%s17146_s5 + $0x9e0] sm:$0xff]  ;;  %v1949_v56 = vld [vmem:[%s17146_s5 + $0xae8] sm:$0xff]  ;;  %v1983_v59 = vld [vmem:[%s17146_s5 + $0xbf8] sm:$0xff] }
 0x5c4   :  { %v1981_v57 = vld [vmem:[%s17146_s5 + $0xbe8] sm:$0xff]  ;;  %v8911_v14 = vpack.c.bf16 %v1916_v50, %v1884_v49 }
 0x5c5   :  { %8752 = vmatpush1.bf16.msra.mxu1 %v8751_v3  ;;  %v1694_v3 = vld [vmem:[%s17146_s5 + $0x2f0] sm:$0xff]  ;;  %v2205_v49 = vld [vmem:[%s17146_s5 + $0x12e8] sm:$0xff] }
 0x5c6   :  { %8880 = vmatpush1.bf16.msra.mxu0 %v8879_v4  ;;  %8754 = vmatprep.subr.bf16.mxu1 %v8753_v6  ;;  %v8897_v4 = vpack.c.bf16 %v1725_v61, %v1693_v60  ;;  %v1726_v6 = vld [vmem:[%s17146_s5 + $0x3f0] sm:$0xff]  ;;  %v8913_v61 = vpack.c.bf16 %v1981_v57, %v1949_v56  ;;  %v2237_v50 = vld [vmem:[%s17146_s5 + $0x13e8] sm:$0xff] }
 0x5c7   :  { %8882 = vmatprep.subr.bf16.mxu0 %v8881_v10  ;;  %v1759_v10 = vld [vmem:[%s17146_s5 + $0x4f8] sm:$0xff]  ;;  %v9027_v13 = vpack.c.bf16 %v1726_v6, %v1694_v3  ;;  %v2045_v3 = vld [vmem:[%s17146_s5 + $0xde8] sm:$0xff]  ;;  %v8929_v57 = vpack.c.bf16 %v2237_v50, %v2205_v49 }
 0x5c8   :  { %v2047_v6 = vld [vmem:[%s17146_s5 + $0xdf8] sm:$0xff] }
 0x5c9   :  { %8756 = vmatpush1.bf16.msra.mxu1 %v8755_v21  ;;  %v1788_v21 = vld [vmem:[%s17146_s5 + $0x5e0] sm:$0xff] }
 0x5ca   :  { %8884 = vmatpush1.bf16.msra.mxu0 %v8883_v23  ;;  %8758 = vmatprep.subr.bf16.mxu1 %v8757_v25  ;;  %v1758_v23 = vld [vmem:[%s17146_s5 + $0x4f0] sm:$0xff]  ;;  %v9029_v25 = vpack.c.bf16 %v1791_v11, %v1759_v10  ;;  %v8903_v30 = vpack.c.bf16 %v1788_v21, %v1756_v20  ;;  %v2012_v10 = vld [vmem:[%s17146_s5 + $0xce0] sm:$0xff]  ;;  %v2077_v20 = vld [vmem:[%s17146_s5 + $0xee8] sm:$0xff] }
 0x5cb   :  { %8886 = vmatprep.subr.bf16.mxu0 %v8885_v29  ;;  %v1823_v29 = vld [vmem:[%s17146_s5 + $0x6f8] sm:$0xff]  ;;  %v9031_v31 = vpack.c.bf16 %v1790_v26, %v1758_v23  ;;  %v2044_v11 = vld [vmem:[%s17146_s5 + $0xde0] sm:$0xff]  ;;  %v2109_v21 = vld [vmem:[%s17146_s5 + $0xfe8] sm:$0xff] }
 0x5cc   :  { %v2079_v23 = vld [vmem:[%s17146_s5 + $0xef8] sm:$0xff]  ;;  %v8919_v26 = vpack.c.bf16 %v2044_v11, %v2012_v10  ;;  %v8921_v28 = vpack.c.bf16 %v2109_v21, %v2077_v20  ;;  %v2333_v10 = vld [vmem:[%s17146_s5 + $0x16e8] sm:$0xff] }
 0x5cd   :  { %8760 = vmatpush1.bf16.msra.mxu1 %v8759_v36  ;;  %v1822_v36 = vld [vmem:[%s17146_s5 + $0x6f0] sm:$0xff]  ;;  %v2365_v11 = vld [vmem:[%s17146_s5 + $0x17e8] sm:$0xff] }
 0x5ce   :  { %8888 = vmatpush1.bf16.msra.mxu0 %v8887_v37  ;;  %8762 = vmatprep.subr.bf16.mxu1 %v8761_v39  ;;  %v1854_v39 = vld [vmem:[%s17146_s5 + $0x7f0] sm:$0xff]  ;;  %v8937_v21 = vpack.c.bf16 %v2365_v11, %v2333_v10 }
 0x5cf   :  { %8890 = vmatprep.subr.bf16.mxu0 %v8889_v44  ;;  %v1919_v44 = vld [vmem:[%s17146_s5 + $0x9f8] sm:$0xff]  ;;  %v9035_v46 = vpack.c.bf16 %v1854_v39, %v1822_v36 }
 0x5d0   :  { %v2143_v36 = vld [vmem:[%s17146_s5 + $0x10f8] sm:$0xff] }
 0x5d1   :  { %8764 = vmatpush1.bf16.msra.mxu1 %v8763_v22  ;;  %v1886_v22 = vld [vmem:[%s17146_s5 + $0x8f0] sm:$0xff] }
 0x5d2   :  { %8892 = vmatpush1.bf16.msra.mxu0 %v8891_v16  ;;  %8894 = vmatprep.subr.bf16.mxu1 %v8893_v55  ;;  %v9037_v16 = vpack.c.bf16 %v1919_v44, %v1887_v42  ;;  %v1918_v55 = vld [vmem:[%s17146_s5 + $0x9f0] sm:$0xff]  ;;  %v2140_v42 = vld [vmem:[%s17146_s5 + $0x10e0] sm:$0xff] }
 0x5d3   :  { %9022 = vmatprep.subr.bf16.mxu0 %v9021_v58  ;;  %v1951_v58 = vld [vmem:[%s17146_s5 + $0xaf8] sm:$0xff]  ;;  %v9039_v60 = vpack.c.bf16 %v1918_v55, %v1886_v22  ;;  %v2172_v44 = vld [vmem:[%s17146_s5 + $0x11e0] sm:$0xff] }
 0x5d4   :  { %5656 = vmatmul.mubr.f32.vlgmr.msra.gmra.mrb[26].mxu1 %v11581_v5  ;;  %v2207_v22 = vld [vmem:[%s17146_s5 + $0x12f8] sm:$0xff]  ;;  %v8927_v55 = vpack.c.bf16 %v2172_v44, %v2140_v42  ;;  %v2461_v42 = vld [vmem:[%s17146_s5 + $0x1ae8] sm:$0xff] }
 0x5d5   :  { %5798 = vmatmul.mubr.f32.vlgmr.msra.gmra.mrb[28].mxu0 %v11581_v5  ;;  %8896 = vmatpush1.bf16.msra.mxu1 %v8895_v62  ;;  %v1948_v62 = vld [vmem:[%s17146_s5 + $0xae0] sm:$0xff]  ;;  %v2493_v44 = vld [vmem:[%s17146_s5 + $0x1be8] sm:$0xff] }
 0x5d6   :  { %5868 = vmatprep.mubr.f32.mxu1 %v11179_v38  ;;  %9024 = vmatpush1.bf16.msra.mxu0 %v9023_v0  ;;  %v9041_v0 = vpack.c.bf16 %v1983_v59, %v1951_v58  ;;  %v8915_v7 = vpack.c.bf16 %v1980_v63, %v1948_v62  ;;  %v2204_v58 = vld [vmem:[%s17146_s5 + $0x12e0] sm:$0xff]  ;;  %v2269_v62 = vld [vmem:[%s17146_s5 + $0x14e8] sm:$0xff]  ;;  %v8945_v50 = vpack.c.bf16 %v2493_v44, %v2461_v42 }
 0x5d7   :  { %6010 = vmatprep.mubr.f32.mxu0 %v11179_v38  ;;  %8898 = vmatprep.subr.bf16.mxu1 %v8897_v4  ;;  %v1855_v38 = vld [vmem:[%s17146_s5 + $0x7f8] sm:$0xff]  ;;  %v2236_v59 = vld [vmem:[%s17146_s5 + $0x13e0] sm:$0xff]  ;;  %v2301_v63 = vld [vmem:[%s17146_s5 + $0x15e8] sm:$0xff] }
 0x5d8   :  { %9026 = vmatprep.subr.bf16.mxu0 %v9025_v9  ;;  %v9033_v37 = vpack.c.bf16 %v1855_v38, %v1823_v29  ;;  %v2015_v4 = vld [vmem:[%s17146_s5 + $0xcf8] sm:$0xff]  ;;  %v8917_v9 = vpack.c.bf16 %v2045_v3, %v2013_v2  ;;  %v2076_v29 = vld [vmem:[%s17146_s5 + $0xee0] sm:$0xff]  ;;  %v8931_v1 = vpack.c.bf16 %v2236_v59, %v2204_v58  ;;  %v8933_v3 = vpack.c.bf16 %v2301_v63, %v2269_v62  ;;  %v2525_v58 = vld [vmem:[%s17146_s5 + $0x1ce8] sm:$0xff] }
 0x5d9   :  { %8900 = vmatpush1.bf16.msra.mxu1 %v8899_v12  ;;  %v2014_v12 = vld [vmem:[%s17146_s5 + $0xcf0] sm:$0xff]  ;;  %v2108_v38 = vld [vmem:[%s17146_s5 + $0xfe0] sm:$0xff]  ;;  %v2557_v59 = vld [vmem:[%s17146_s5 + $0x1de8] sm:$0xff] }
 0x5da   :  { %9028 = vmatpush1.bf16.msra.mxu0 %v9027_v13  ;;  %8902 = vmatprep.subr.bf16.mxu1 %v8901_v19  ;;  %v9045_v13 = vpack.c.bf16 %v2047_v6, %v2015_v4  ;;  %v2046_v19 = vld [vmem:[%s17146_s5 + $0xdf0] sm:$0xff]  ;;  %v8923_v39 = vpack.c.bf16 %v2108_v38, %v2076_v29  ;;  %v2268_v4 = vld [vmem:[%s17146_s5 + $0x14e0] sm:$0xff]  ;;  %v2397_v29 = vld [vmem:[%s17146_s5 + $0x18e8] sm:$0xff]  ;;  %v8949_v63 = vpack.c.bf16 %v2557_v59, %v2525_v58 }
 0x5db   :  { %9030 = vmatprep.subr.bf16.mxu0 %v9029_v25  ;;  %v2111_v25 = vld [vmem:[%s17146_s5 + $0xff8] sm:$0xff]  ;;  %v9047_v27 = vpack.c.bf16 %v2046_v19, %v2014_v12  ;;  %v2300_v6 = vld [vmem:[%s17146_s5 + $0x15e0] sm:$0xff]  ;;  %v2429_v38 = vld [vmem:[%s17146_s5 + $0x19e8] sm:$0xff] }
 0x5dc   :  { %v2335_v12 = vld [vmem:[%s17146_s5 + $0x16f8] sm:$0xff]  ;;  %v8935_v19 = vpack.c.bf16 %v2300_v6, %v2268_v4  ;;  %v8941_v35 = vpack.c.bf16 %v2429_v38, %v2397_v29  ;;  %v2589_v4 = vld [vmem:[%s17146_s5 + $0x1ee8] sm:$0xff]  ;;  %v2716_v44 = vld [vmem:[%s17146_s5 + $0x22e0] sm:$0xff] }
 0x5dd   :  { %8904 = vmatpush1.bf16.msra.mxu1 %v8903_v30  ;;  %v2078_v30 = vld [vmem:[%s17146_s5 + $0xef0] sm:$0xff]  ;;  %v2621_v6 = vld [vmem:[%s17146_s5 + $0x1fe8] sm:$0xff] }
 0x5de   :  { %9032 = vmatpush1.bf16.msra.mxu0 %v9031_v31  ;;  %8906 = vmatprep.subr.bf16.mxu1 %v8905_v32  ;;  %v9049_v31 = vpack.c.bf16 %v2111_v25, %v2079_v23  ;;  %v2110_v32 = vld [vmem:[%s17146_s5 + $0xff0] sm:$0xff]  ;;  %v2332_v23 = vld [vmem:[%s17146_s5 + $0x16e0] sm:$0xff]  ;;  %v8953_v11 = vpack.c.bf16 %v2621_v6, %v2589_v4 }
 0x5df   :  { %9034 = vmatprep.subr.bf16.mxu0 %v9033_v37  ;;  %v2175_v37 = vld [vmem:[%s17146_s5 + $0x11f8] sm:$0xff]  ;;  %v9051_v40 = vpack.c.bf16 %v2110_v32, %v2078_v30  ;;  %v2364_v25 = vld [vmem:[%s17146_s5 + $0x17e0] sm:$0xff] }
 0x5e0   :  { %v2399_v30 = vld [vmem:[%s17146_s5 + $0x18f8] sm:$0xff]  ;;  %v8939_v32 = vpack.c.bf16 %v2364_v25, %v2332_v23  ;;  %v2653_v23 = vld [vmem:[%s17146_s5 + $0x20e8] sm:$0xff]  ;;  %v2844_v4 = vld [vmem:[%s17146_s5 + $0x26e0] sm:$0xff] }
 0x5e1   :  { %8908 = vmatpush1.bf16.msra.mxu1 %v8907_v45  ;;  %v2142_v45 = vld [vmem:[%s17146_s5 + $0x10f0] sm:$0xff]  ;;  %v2685_v25 = vld [vmem:[%s17146_s5 + $0x21e8] sm:$0xff]  ;;  %v2876_v6 = vld [vmem:[%s17146_s5 + $0x27e0] sm:$0xff] }
 0x5e2   :  { %9036 = vmatpush1.bf16.msra.mxu0 %v9035_v46  ;;  %8910 = vmatprep.subr.bf16.mxu1 %v8909_v47  ;;  %v9053_v46 = vpack.c.bf16 %v2175_v37, %v2143_v36  ;;  %v2174_v47 = vld [vmem:[%s17146_s5 + $0x11f0] sm:$0xff]  ;;  %v2396_v36 = vld [vmem:[%s17146_s5 + $0x18e0] sm:$0xff]  ;;  %v8957_v38 = vpack.c.bf16 %v2685_v25, %v2653_v23 }
 0x5e3   :  { %9038 = vmatprep.subr.bf16.mxu0 %v9037_v16  ;;  %v2239_v16 = vld [vmem:[%s17146_s5 + $0x13f8] sm:$0xff]  ;;  %v9055_v56 = vpack.c.bf16 %v2174_v47, %v2142_v45  ;;  %v2428_v37 = vld [vmem:[%s17146_s5 + $0x19e0] sm:$0xff] }
 0x5e4   :  { %v2463_v45 = vld [vmem:[%s17146_s5 + $0x1af8] sm:$0xff]  ;;  %v8943_v47 = vpack.c.bf16 %v2428_v37, %v2396_v36  ;;  %v2717_v36 = vld [vmem:[%s17146_s5 + $0x22e8] sm:$0xff]  ;;  %v2908_v23 = vld [vmem:[%s17146_s5 + $0x28e0] sm:$0xff] }
 0x5e5   :  { %8912 = vmatpush1.bf16.msra.mxu1 %v8911_v14  ;;  %v2206_v14 = vld [vmem:[%s17146_s5 + $0x12f0] sm:$0xff]  ;;  %v2749_v37 = vld [vmem:[%s17146_s5 + $0x23e8] sm:$0xff]  ;;  %v2940_v25 = vld [vmem:[%s17146_s5 + $0x29e0] sm:$0xff] }
 0x5e6   :  { %9040 = vmatpush1.bf16.msra.mxu0 %v9039_v60  ;;  %8914 = vmatprep.subr.bf16.mxu1 %v8913_v61  ;;  %v9057_v60 = vpack.c.bf16 %v2239_v16, %v2207_v22  ;;  %v2238_v61 = vld [vmem:[%s17146_s5 + $0x13f0] sm:$0xff]  ;;  %v2460_v22 = vld [vmem:[%s17146_s5 + $0x1ae0] sm:$0xff] }
 0x5e7   :  { %9042 = vmatprep.subr.bf16.mxu0 %v9041_v0  ;;  %v2303_v0 = vld [vmem:[%s17146_s5 + $0x15f8] sm:$0xff]  ;;  %v9059_v2 = vpack.c.bf16 %v2238_v61, %v2206_v14  ;;  %v2492_v16 = vld [vmem:[%s17146_s5 + $0x1be0] sm:$0xff] }
 0x5e8   :  { %v2527_v14 = vld [vmem:[%s17146_s5 + $0x1cf8] sm:$0xff]  ;;  %v8947_v61 = vpack.c.bf16 %v2492_v16, %v2460_v22  ;;  %v2813_v22 = vld [vmem:[%s17146_s5 + $0x25e8] sm:$0xff] }
 0x5e9   :  { %8916 = vmatpush1.bf16.msra.mxu1 %v8915_v7  ;;  %v2270_v7 = vld [vmem:[%s17146_s5 + $0x14f0] sm:$0xff] }
 0x5ea   :  { %9044 = vmatpush1.bf16.msra.mxu0 %v9043_v8  ;;  %8918 = vmatprep.subr.bf16.mxu1 %v8917_v9  ;;  %v9061_v8 = vpack.c.bf16 %v2303_v0, %v2271_v24  ;;  %v2302_v9 = vld [vmem:[%s17146_s5 + $0x15f0] sm:$0xff]  ;;  %v2524_v24 = vld [vmem:[%s17146_s5 + $0x1ce0] sm:$0xff] }
 0x5eb   :  { %9046 = vmatprep.subr.bf16.mxu0 %v9045_v13  ;;  %v2367_v13 = vld [vmem:[%s17146_s5 + $0x17f8] sm:$0xff]  ;;  %v9063_v20 = vpack.c.bf16 %v2302_v9, %v2270_v7  ;;  %v2556_v0 = vld [vmem:[%s17146_s5 + $0x1de0] sm:$0xff] }
 0x5ec   :  { %v2591_v7 = vld [vmem:[%s17146_s5 + $0x1ef8] sm:$0xff]  ;;  %v8951_v9 = vpack.c.bf16 %v2556_v0, %v2524_v24  ;;  %v2877_v24 = vld [vmem:[%s17146_s5 + $0x27e8] sm:$0xff] }
 0x5ed   :  { %8920 = vmatpush1.bf16.msra.mxu1 %v8919_v26  ;;  %v2334_v26 = vld [vmem:[%s17146_s5 + $0x16f0] sm:$0xff]  ;;  %v2847_v0 = vld [vmem:[%s17146_s5 + $0x26f8] sm:$0xff] }
 0x5ee   :  { %9048 = vmatpush1.bf16.msra.mxu0 %v9047_v27  ;;  %8922 = vmatprep.subr.bf16.mxu1 %v8921_v28  ;;  %v9065_v27 = vpack.c.bf16 %v2367_v13, %v2335_v12  ;;  %v2366_v28 = vld [vmem:[%s17146_s5 + $0x17f0] sm:$0xff]  ;;  %v2588_v12 = vld [vmem:[%s17146_s5 + $0x1ee0] sm:$0xff] }
 0x5ef   :  { %9050 = vmatprep.subr.bf16.mxu0 %v9049_v31  ;;  %v2431_v31 = vld [vmem:[%s17146_s5 + $0x19f8] sm:$0xff]  ;;  %v9067_v34 = vpack.c.bf16 %v2366_v28, %v2334_v26  ;;  %v2620_v13 = vld [vmem:[%s17146_s5 + $0x1fe0] sm:$0xff] }
 0x5f0   :  { %v2655_v26 = vld [vmem:[%s17146_s5 + $0x20f8] sm:$0xff]  ;;  %v8955_v28 = vpack.c.bf16 %v2620_v13, %v2588_v12 }
 0x5f1   :  { %8924 = vmatpush1.bf16.msra.mxu1 %v8923_v39  ;;  %v2398_v39 = vld [vmem:[%s17146_s5 + $0x18f0] sm:$0xff]  ;;  %v2911_v12 = vld [vmem:[%s17146_s5 + $0x28f8] sm:$0xff] }
 0x5f2   :  { %9052 = vmatpush1.bf16.msra.mxu0 %v9051_v40  ;;  %8926 = vmatprep.subr.bf16.mxu1 %v8925_v41  ;;  %v9069_v40 = vpack.c.bf16 %v2431_v31, %v2399_v30  ;;  %v2430_v41 = vld [vmem:[%s17146_s5 + $0x19f0] sm:$0xff]  ;;  %v2652_v30 = vld [vmem:[%s17146_s5 + $0x20e0] sm:$0xff]  ;;  %v2943_v13 = vld [vmem:[%s17146_s5 + $0x29f8] sm:$0xff] }
 0x5f3   :  { %9054 = vmatprep.subr.bf16.mxu0 %v9053_v46  ;;  %v2495_v46 = vld [vmem:[%s17146_s5 + $0x1bf8] sm:$0xff]  ;;  %v9071_v49 = vpack.c.bf16 %v2430_v41, %v2398_v39  ;;  %v2684_v31 = vld [vmem:[%s17146_s5 + $0x21e0] sm:$0xff] }
 0x5f4   :  { %v8959_v39 = vpack.c.bf16 %v2684_v31, %v2652_v30  ;;  %v2751_v41 = vld [vmem:[%s17146_s5 + $0x23f8] sm:$0xff] }
 0x5f5   :  { %8928 = vmatpush1.bf16.msra.mxu1 %v8927_v55  ;;  %v2462_v55 = vld [vmem:[%s17146_s5 + $0x1af0] sm:$0xff]  ;;  %v2975_v30 = vld [vmem:[%s17146_s5 + $0x2af8] sm:$0xff] }
 0x5f6   :  { %9056 = vmatpush1.bf16.msra.mxu0 %v9055_v56  ;;  %8930 = vmatprep.subr.bf16.mxu1 %v8929_v57  ;;  %v9073_v56 = vpack.c.bf16 %v2495_v46, %v2463_v45  ;;  %v2494_v57 = vld [vmem:[%s17146_s5 + $0x1bf0] sm:$0xff]  ;;  %v2748_v45 = vld [vmem:[%s17146_s5 + $0x23e0] sm:$0xff]  ;;  %v3007_v31 = vld [vmem:[%s17146_s5 + $0x2bf8] sm:$0xff] }
 0x5f7   :  { %9058 = vmatprep.subr.bf16.mxu0 %v9057_v60  ;;  %v2559_v60 = vld [vmem:[%s17146_s5 + $0x1df8] sm:$0xff]  ;;  %v9075_v62 = vpack.c.bf16 %v2494_v57, %v2462_v55  ;;  %v2718_v46 = vld [vmem:[%s17146_s5 + $0x22f0] sm:$0xff]  ;;  %v8963_v57 = vpack.c.bf16 %v2748_v45, %v2716_v44  ;;  %v3069_v44 = vld [vmem:[%s17146_s5 + $0x2de8] sm:$0xff] }
 0x5f8   :  { %v2783_v55 = vld [vmem:[%s17146_s5 + $0x24f8] sm:$0xff]  ;;  %v9218_v45 = vld [vmem:[%s17148_s6 + $0x10] sm:$0xff] }
 0x5f9   :  { %8932 = vmatpush1.bf16.msra.mxu1 %v8931_v1  ;;  %v2526_v1 = vld [vmem:[%s17146_s5 + $0x1cf0] sm:$0xff] }
 0x5fa   :  { %9060 = vmatpush1.bf16.msra.mxu0 %v9059_v2  ;;  %8934 = vmatprep.subr.bf16.mxu1 %v8933_v3  ;;  %v9077_v2 = vpack.c.bf16 %v2559_v60, %v2527_v14  ;;  %v2558_v3 = vld [vmem:[%s17146_s5 + $0x1df0] sm:$0xff]  ;;  %v2780_v14 = vld [vmem:[%s17146_s5 + $0x24e0] sm:$0xff] }
 0x5fb   :  { %9062 = vmatprep.subr.bf16.mxu0 %v9061_v8  ;;  %v2623_v8 = vld [vmem:[%s17146_s5 + $0x1ff8] sm:$0xff]  ;;  %v9079_v10 = vpack.c.bf16 %v2558_v3, %v2526_v1  ;;  %v2812_v60 = vld [vmem:[%s17146_s5 + $0x25e0] sm:$0xff] }
 0x5fc   :  { %v8967_v1 = vpack.c.bf16 %v2812_v60, %v2780_v14  ;;  %v3038_v14 = vld [vmem:[%s17146_s5 + $0x2cf0] sm:$0xff] }
 0x5fd   :  { %8936 = vmatpush1.bf16.msra.mxu1 %v8935_v19  ;;  %v2590_v19 = vld [vmem:[%s17146_s5 + $0x1ef0] sm:$0xff] }
 0x5fe   :  { %9064 = vmatpush1.bf16.msra.mxu0 %v9063_v20  ;;  %8938 = vmatprep.subr.bf16.mxu1 %v8937_v21  ;;  %v9081_v20 = vpack.c.bf16 %v2623_v8, %v2591_v7  ;;  %v2622_v21 = vld [vmem:[%s17146_s5 + $0x1ff0] sm:$0xff] }
 0x5ff   :  { %9066 = vmatprep.subr.bf16.mxu0 %v9065_v27  ;;  %v2687_v27 = vld [vmem:[%s17146_s5 + $0x21f8] sm:$0xff]  ;;  %v9083_v29 = vpack.c.bf16 %v2622_v21, %v2590_v19  ;;  %v2846_v7 = vld [vmem:[%s17146_s5 + $0x26f0] sm:$0xff]  ;;  %v8971_v19 = vpack.c.bf16 %v2876_v6, %v2844_v4 }
 0x601   :  { %8940 = vmatpush1.bf16.msra.mxu1 %v8939_v32  ;;  %v9085_v32 = vpack.c.bf16 %v2687_v27, %v2655_v26  ;;  %v2910_v26 = vld [vmem:[%s17146_s5 + $0x28f0] sm:$0xff]  ;;  %v9101_v27 = vpack.c.bf16 %v2943_v13, %v2911_v12  ;;  %v3100_v12 = vld [vmem:[%s17146_s5 + $0x2ee0] sm:$0xff] }
 0x602   :  { %9068 = vmatpush1.bf16.msra.mxu0 %v9067_v34  ;;  %8942 = vmatprep.subr.bf16.mxu1 %v8941_v35  ;;  %v2654_v34 = vld [vmem:[%s17146_s5 + $0x20f0] sm:$0xff]  ;;  %v3132_v13 = vld [vmem:[%s17146_s5 + $0x2fe0] sm:$0xff] }
 0x603   :  { %9070 = vmatprep.subr.bf16.mxu0 %v9069_v40  ;;  %v2686_v35 = vld [vmem:[%s17146_s5 + $0x21f0] sm:$0xff]  ;;  %v2719_v40 = vld [vmem:[%s17146_s5 + $0x22f8] sm:$0xff] }
 0x604   :  { %v9087_v42 = vpack.c.bf16 %v2686_v35, %v2654_v34  ;;  %v9089_v16 = vpack.c.bf16 %v2751_v41, %v2719_v40  ;;  %v9105_v40 = vpack.c.bf16 %v3007_v31, %v2975_v30  ;;  %v3006_v41 = vld [vmem:[%s17146_s5 + $0x2bf0] sm:$0xff]  ;;  %v8987_v30 = vpack.c.bf16 %v3132_v13, %v3100_v12  ;;  %v3421_v13 = vld [vmem:[%s17146_s5 + $0x38e8] sm:$0xff] }
 0x605   :  { %8944 = vmatpush1.bf16.msra.mxu1 %v8943_v47  ;;  %v8961_v47 = vpack.c.bf16 %v2749_v37, %v2717_v36  ;;  %v2972_v36 = vld [vmem:[%s17146_s5 + $0x2ae0] sm:$0xff]  ;;  %v3390_v12 = vld [vmem:[%s17146_s5 + $0x37f0] sm:$0xff] }
 0x606   :  { %9072 = vmatpush1.bf16.msra.mxu0 %v9071_v49  ;;  %8946 = vmatprep.subr.bf16.mxu1 %v8945_v50  ;;  %v2750_v49 = vld [vmem:[%s17146_s5 + $0x23f0] sm:$0xff]  ;;  %v2781_v50 = vld [vmem:[%s17146_s5 + $0x24e8] sm:$0xff]  ;;  %v3004_v37 = vld [vmem:[%s17146_s5 + $0x2be0] sm:$0xff] }
 0x607   :  { %9074 = vmatprep.subr.bf16.mxu0 %v9073_v56  ;;  %v2815_v56 = vld [vmem:[%s17146_s5 + $0x25f8] sm:$0xff]  ;;  %v9091_v58 = vpack.c.bf16 %v2750_v49, %v2718_v46  ;;  %v8965_v59 = vpack.c.bf16 %v2813_v22, %v2781_v50  ;;  %v3739_v46 = vrot.slane %v9218_v45, %v13637_v48  ;;  %v3747_v50 = vrot.slane %v9218_v45, %v13646_v52 }
 0x608   :  { %v3071_v49 = vld [vmem:[%s17146_s5 + $0x2df8] sm:$0xff]  ;;  %v3743_v22 = vrot.slane %v9218_v45, %v13649_v53 }
 0x609   :  { %8948 = vmatpush1.bf16.msra.mxu1 %v8947_v61  ;;  %v2782_v61 = vld [vmem:[%s17146_s5 + $0x24f0] sm:$0xff] }
 0x60a   :  { %9076 = vmatpush1.bf16.msra.mxu0 %v9075_v62  ;;  %8950 = vmatprep.subr.bf16.mxu1 %v8949_v63  ;;  %v2814_v62 = vld [vmem:[%s17146_s5 + $0x25f0] sm:$0xff]  ;;  %v2845_v63 = vld [vmem:[%s17146_s5 + $0x26e8] sm:$0xff] }
 0x60b   :  { %9078 = vmatprep.subr.bf16.mxu0 %v9077_v2  ;;  %v9095_v2 = vpack.c.bf16 %v2814_v62, %v2782_v61  ;;  %v8969_v3 = vpack.c.bf16 %v2877_v24, %v2845_v63  ;;  %v3101_v62 = vld [vmem:[%s17146_s5 + $0x2ee8] sm:$0xff] }
 0x60c   :  { %v3133_v63 = vld [vmem:[%s17146_s5 + $0x2fe8] sm:$0xff] }
 0x60d   :  { %8952 = vmatpush1.bf16.msra.mxu1 %v8951_v9  ;;  %v2878_v9 = vld [vmem:[%s17146_s5 + $0x27f0] sm:$0xff] }
 0x60e   :  { %9080 = vmatpush1.bf16.msra.mxu0 %v9079_v10  ;;  %8954 = vmatprep.subr.bf16.mxu1 %v8953_v11  ;;  %v2909_v10 = vld [vmem:[%s17146_s5 + $0x28e8] sm:$0xff] }
 0x60f   :  { %9082 = vmatprep.subr.bf16.mxu0 %v9081_v20  ;;  %v2941_v11 = vld [vmem:[%s17146_s5 + $0x29e8] sm:$0xff]  ;;  %v9099_v20 = vpack.c.bf16 %v2878_v9, %v2846_v7 }
 0x610   :  { %v8973_v21 = vpack.c.bf16 %v2941_v11, %v2909_v10  ;;  %v8985_v11 = vpack.c.bf16 %v3133_v63, %v3101_v62  ;;  %v3324_v62 = vld [vmem:[%s17146_s5 + $0x35e0] sm:$0xff]  ;;  %v3294_v63 = vld [vmem:[%s17146_s5 + $0x34f0] sm:$0xff] }
 0x611   :  { %8956 = vmatpush1.bf16.msra.mxu1 %v8955_v28  ;;  %v2942_v28 = vld [vmem:[%s17146_s5 + $0x29f0] sm:$0xff] }
 0x612   :  { %9084 = vmatpush1.bf16.msra.mxu0 %v9083_v29  ;;  %8958 = vmatprep.subr.bf16.mxu1 %v8957_v38  ;;  %v2973_v29 = vld [vmem:[%s17146_s5 + $0x2ae8] sm:$0xff]  ;;  %v9103_v34 = vpack.c.bf16 %v2942_v28, %v2910_v26 }
 0x613   :  { %9086 = vmatprep.subr.bf16.mxu0 %v9085_v32  ;;  %v3005_v38 = vld [vmem:[%s17146_s5 + $0x2be8] sm:$0xff]  ;;  %v8975_v32 = vpack.c.bf16 %v2940_v25, %v2908_v23  ;;  %v3134_v25 = vld [vmem:[%s17146_s5 + $0x2ff0] sm:$0xff] }
 0x614   :  { %5869 = vmatmul.mubr.f32.vlgmr.msra.gmra.mrb[28].mxu1 %v11187_v43  ;;  %v8977_v35 = vpack.c.bf16 %v3005_v38, %v2973_v29  ;;  %v3165_v26 = vld [vmem:[%s17146_s5 + $0x30e8] sm:$0xff]  ;;  %v3167_v29 = vld [vmem:[%s17146_s5 + $0x30f8] sm:$0xff] }
 0x615   :  { %6011 = vmatmul.mubr.f32.vlgmr.msra.gmra.mrb[30].mxu0 %v11187_v43  ;;  %8960 = vmatpush1.bf16.msra.mxu1 %v8959_v39  ;;  %v9093_v43 = vpack.c.bf16 %v2815_v56, %v2783_v55  ;;  %v2974_v39 = vld [vmem:[%s17146_s5 + $0x2af0] sm:$0xff]  ;;  %v3751_v55 = vrot.slane %v9218_v45, %v13652_v54  ;;  %v3199_v38 = vld [vmem:[%s17146_s5 + $0x31f8] sm:$0xff] }
 0x616   :  { %5939 = vmatprep.mubr.f32.mxu1 %v11209_v51  ;;  %9088 = vmatpush1.bf16.msra.mxu0 %v9087_v42  ;;  %v3037_v42 = vld [vmem:[%s17146_s5 + $0x2ce8] sm:$0xff]  ;;  %v9107_v56 = vpack.c.bf16 %v3006_v41, %v2974_v39  ;;  %v3198_v39 = vld [vmem:[%s17146_s5 + $0x31f0] sm:$0xff] }
 0x617   :  { %6081 = vmatprep.mubr.f32.mxu0 %v11209_v51  ;;  %8962 = vmatprep.subr.bf16.mxu1 %v8961_v47  ;;  %v2879_v51 = vld [vmem:[%s17146_s5 + $0x27f8] sm:$0xff]  ;;  %v3261_v41 = vld [vmem:[%s17146_s5 + $0x33e8] sm:$0xff] }
 0x618   :  { %9090 = vmatprep.subr.bf16.mxu0 %v9089_v16  ;;  %v9097_v8 = vpack.c.bf16 %v2879_v51, %v2847_v0  ;;  %v3039_v47 = vld [vmem:[%s17146_s5 + $0x2cf8] sm:$0xff]  ;;  %v8979_v16 = vpack.c.bf16 %v3004_v37, %v2972_v36  ;;  %v3166_v36 = vld [vmem:[%s17146_s5 + $0x30f0] sm:$0xff]  ;;  %v9117_v37 = vpack.c.bf16 %v3199_v38, %v3167_v29 }
 0x619   :  { %8964 = vmatpush1.bf16.msra.mxu1 %v8963_v57  ;;  %v8981_v57 = vpack.c.bf16 %v3069_v44, %v3037_v42  ;;  %v9109_v61 = vpack.c.bf16 %v3071_v49, %v3039_v47  ;;  %v3231_v42 = vld [vmem:[%s17146_s5 + $0x32f8] sm:$0xff]  ;;  %v3228_v49 = vld [vmem:[%s17146_s5 + $0x32e0] sm:$0xff]  ;;  %v3422_v29 = vld [vmem:[%s17146_s5 + $0x38f0] sm:$0xff] }
 0x61a   :  { %9092 = vmatpush1.bf16.msra.mxu0 %v9091_v58  ;;  %8966 = vmatprep.subr.bf16.mxu1 %v8965_v59  ;;  %v3036_v58 = vld [vmem:[%s17146_s5 + $0x2ce0] sm:$0xff]  ;;  %v3263_v44 = vld [vmem:[%s17146_s5 + $0x33f8] sm:$0xff] }
 0x61b   :  { %9094 = vmatprep.subr.bf16.mxu0 %v9093_v43  ;;  %v3068_v59 = vld [vmem:[%s17146_s5 + $0x2de0] sm:$0xff]  ;;  %v3070_v43 = vld [vmem:[%s17146_s5 + $0x2df0] sm:$0xff] }
 0x61c   :  { %v8983_v7 = vpack.c.bf16 %v3068_v59, %v3036_v58  ;;  %v9111_v10 = vpack.c.bf16 %v3070_v43, %v3038_v14  ;;  %v3295_v58 = vld [vmem:[%s17146_s5 + $0x34f8] sm:$0xff]  ;;  %v3292_v43 = vld [vmem:[%s17146_s5 + $0x34e0] sm:$0xff] }
 0x61d   :  { %8968 = vmatpush1.bf16.msra.mxu1 %v8967_v1  ;;  %v3103_v1 = vld [vmem:[%s17146_s5 + $0x2ef8] sm:$0xff] }
 0x61e   :  { %9096 = vmatpush1.bf16.msra.mxu0 %v9095_v2  ;;  %8970 = vmatprep.subr.bf16.mxu1 %v8969_v3  ;;  %v3135_v2 = vld [vmem:[%s17146_s5 + $0x2ff8] sm:$0xff] }
 0x61f   :  { %9098 = vmatprep.subr.bf16.mxu0 %v9097_v8  ;;  %v9113_v23 = vpack.c.bf16 %v3135_v2, %v3103_v1  ;;  %v3327_v59 = vld [vmem:[%s17146_s5 + $0x35f8] sm:$0xff]  ;;  %v3389_v1 = vld [vmem:[%s17146_s5 + $0x37e8] sm:$0xff] }
 0x620   :  { %v3359_v2 = vld [vmem:[%s17146_s5 + $0x36f8] sm:$0xff] }
 0x621   :  { %8972 = vmatpush1.bf16.msra.mxu1 %v8971_v19  ;;  %v3102_v19 = vld [vmem:[%s17146_s5 + $0x2ef0] sm:$0xff] }
 0x622   :  { %9100 = vmatpush1.bf16.msra.mxu0 %v9099_v20  ;;  %8974 = vmatprep.subr.bf16.mxu1 %v8973_v21  ;;  %v9115_v31 = vpack.c.bf16 %v3134_v25, %v3102_v19  ;;  %v3453_v19 = vld [vmem:[%s17146_s5 + $0x39e8] sm:$0xff] }
 0x623   :  { %9102 = vmatprep.subr.bf16.mxu0 %v9101_v27  ;;  %v3197_v27 = vld [vmem:[%s17146_s5 + $0x31e8] sm:$0xff] }
 0x625   :  { %8976 = vmatpush1.bf16.msra.mxu1 %v8975_v32  ;;  %v8989_v32 = vpack.c.bf16 %v3197_v27, %v3165_v26  ;;  %v9005_v26 = vpack.c.bf16 %v3453_v19, %v3421_v13  ;;  %v3420_v27 = vld [vmem:[%s17146_s5 + $0x38e0] sm:$0xff] }
 0x626   :  { %9104 = vmatpush1.bf16.msra.mxu0 %v9103_v34  ;;  %8978 = vmatprep.subr.bf16.mxu1 %v8977_v35  ;;  %v3164_v34 = vld [vmem:[%s17146_s5 + $0x30e0] sm:$0xff] }
 0x627   :  { %v5373_v60 = vpop.f32.mrb[24].mxu1  ;;  %9106 = vmatprep.subr.bf16.mxu0 %v9105_v40  ;;  %v3196_v35 = vld [vmem:[%s17146_s5 + $0x31e0] sm:$0xff]  ;;  %v3229_v40 = vld [vmem:[%s17146_s5 + $0x32e8] sm:$0xff] }
 0x628   :  { %v9169_v24 = vadd.f32 %v5373_v60, %v3739_v46  ;;  %v5515_v0 = vpop.f32.mrb[26].mxu0  ;;  %v5375_v51 = vpop.f32.mrb[25].mxu1  ;;  %v8991_v45 = vpack.c.bf16 %v3196_v35, %v3164_v34  ;;  %v9119_v46 = vpack.c.bf16 %v3198_v39, %v3166_v36  ;;  %v8993_v47 = vpack.c.bf16 %v3261_v41, %v3229_v40  ;;  %v3487_v34 = vld [vmem:[%s17146_s5 + $0x3af8] sm:$0xff]  ;;  %v3484_v40 = vld [vmem:[%s17146_s5 + $0x3ae0] sm:$0xff] }
 0x629   :  { %v9171_v3 = vadd.f32 %v5515_v0, %v3747_v50  ;;  %v9170_v4 = vadd.f32 %v5375_v51, %v3743_v22  ;;  %v5517_v6 = vpop.f32.mrb[27].mxu0  ;;  %8980 = vmatpush1.bf16.msra.mxu1 %v8979_v16  ;;  %v3260_v50 = vld [vmem:[%s17146_s5 + $0x33e0] sm:$0xff]  ;;  %v3230_v22 = vld [vmem:[%s17146_s5 + $0x32f0] sm:$0xff]  ;;  %v9121_v16 = vpack.c.bf16 %v3263_v44, %v3231_v42  ;;  %v3357_v51 = vld [vmem:[%s17146_s5 + $0x36e8] sm:$0xff] }
 0x62a   :  { %v6108_v8 = vmax.f32 %v9169_v24, 0.0  ;;  %v9172_v9 = vadd.f32 %v5517_v6, %v3751_v55  ;;  %9108 = vmatpush1.bf16.msra.mxu0 %v9107_v56  ;;  %8982 = vmatprep.subr.bf16.mxu1 %v8981_v57  ;;  %v3262_v55 = vld [vmem:[%s17146_s5 + $0x33f0] sm:$0xff]  ;;  %v3293_v56 = vld [vmem:[%s17146_s5 + $0x34e8] sm:$0xff]  ;;  %v8995_v14 = vpack.c.bf16 %v3260_v50, %v3228_v49  ;;  %v9125_v24 = vpack.c.bf16 %v3327_v59, %v3295_v58  ;;  %v3519_v35 = vld [vmem:[%s17146_s5 + $0x3bf8] sm:$0xff] }
 0x62b   :  { %v6110_v20 = vmax.f32 %v9171_v3, 0.0  ;;  %v6109_v21 = vmax.f32 %v9170_v4, 0.0  ;;  %9110 = vmatprep.subr.bf16.mxu0 %v9109_v61  ;;  %v3325_v57 = vld [vmem:[%s17146_s5 + $0x35e8] sm:$0xff]  ;;  %v9123_v60 = vpack.c.bf16 %v3262_v55, %v3230_v22  ;;  %v3326_v0 = vld [vmem:[%s17146_s5 + $0x35f0] sm:$0xff]  ;;  %v3391_v3 = vld [vmem:[%s17146_s5 + $0x37f8] sm:$0xff]  ;;  %v8999_v4 = vpack.c.bf16 %v3324_v62, %v3292_v43 }
 0x62c   :  { %6140 = vst [vmem:[%s17149_s7 + $0xa0] sm:$0xff] %v6108_v8  ;;  %v6111_v28 = vmax.f32 %v9172_v9, 0.0  ;;  %v8997_v61 = vpack.c.bf16 %v3325_v57, %v3293_v56  ;;  %v9127_v6 = vpack.c.bf16 %v3326_v0, %v3294_v63  ;;  %v3356_v8 = vld [vmem:[%s17146_s5 + $0x36e0] sm:$0xff]  ;;  %v3486_v42 = vld [vmem:[%s17146_s5 + $0x3af0] sm:$0xff]  ;;  %v9137_v44 = vpack.c.bf16 %v3519_v35, %v3487_v34  ;;  %v3551_v49 = vld [vmem:[%s17146_s5 + $0x3cf8] sm:$0xff] }
 0x62d   :  { %6142 = vst [vmem:[%s17149_s7 + $0xb0] sm:$0xff] %v6110_v20  ;;  %6141 = vst [vmem:[%s17149_s7 + $0xa8] sm:$0xff] %v6109_v21  ;;  %8984 = vmatpush1.bf16.msra.mxu1 %v8983_v7  ;;  %v9001_v7 = vpack.c.bf16 %v3389_v1, %v3357_v51  ;;  %v3388_v9 = vld [vmem:[%s17146_s5 + $0x37e0] sm:$0xff]  ;;  %v3423_v20 = vld [vmem:[%s17146_s5 + $0x38f8] sm:$0xff] }
 0x62e   :  { %6143 = vst [vmem:[%s17149_s7 + $0xb8] sm:$0xff] %v6111_v28  ;;  %9112 = vmatpush1.bf16.msra.mxu0 %v9111_v10  ;;  %8986 = vmatprep.subr.bf16.mxu1 %v8985_v11  ;;  %v3358_v10 = vld [vmem:[%s17146_s5 + $0x36f0] sm:$0xff]  ;;  %v9129_v11 = vpack.c.bf16 %v3391_v3, %v3359_v2  ;;  %v3455_v21 = vld [vmem:[%s17146_s5 + $0x39f8] sm:$0xff]  ;;  %v3452_v28 = vld [vmem:[%s17146_s5 + $0x39e0] sm:$0xff] }
 0x62f   :  { %9114 = vmatprep.subr.bf16.mxu0 %v9113_v23  ;;  %v9003_v23 = vpack.c.bf16 %v3388_v9, %v3356_v8  ;;  %v9131_v25 = vpack.c.bf16 %v3390_v12, %v3358_v10  ;;  %v9133_v38 = vpack.c.bf16 %v3455_v21, %v3423_v20  ;;  %v9007_v36 = vpack.c.bf16 %v3452_v28, %v3420_v27  ;;  %v3516_v41 = vld [vmem:[%s17146_s5 + $0x3be0] sm:$0xff]  ;;  %v3583_v50 = vld [vmem:[%s17146_s5 + $0x3df8] sm:$0xff]  ;;  %v3550_v58 = vld [vmem:[%s17146_s5 + $0x3cf0] sm:$0xff] }
 0x630   :  { %v9011_v22 = vpack.c.bf16 %v3516_v41, %v3484_v40  ;;  %v3548_v56 = vld [vmem:[%s17146_s5 + $0x3ce0] sm:$0xff]  ;;  %v9141_v59 = vpack.c.bf16 %v3583_v50, %v3551_v49  ;;  %v3615_v43 = vld [vmem:[%s17146_s5 + $0x3ef8] sm:$0xff]  ;;  %v3614_v3 = vld [vmem:[%s17146_s5 + $0x3ef0] sm:$0xff] }
 0x631   :  { %8988 = vmatpush1.bf16.msra.mxu1 %v8987_v30  ;;  %v3454_v30 = vld [vmem:[%s17146_s5 + $0x39f0] sm:$0xff]  ;;  %v3580_v57 = vld [vmem:[%s17146_s5 + $0x3de0] sm:$0xff]  ;;  %v3647_v62 = vld [vmem:[%s17146_s5 + $0x3ff8] sm:$0xff] }
 0x632   :  { %9116 = vmatpush1.bf16.msra.mxu0 %v9115_v31  ;;  %8990 = vmatprep.subr.bf16.mxu1 %v8989_v32  ;;  %v3485_v31 = vld [vmem:[%s17146_s5 + $0x3ae8] sm:$0xff]  ;;  %v9015_v63 = vpack.c.bf16 %v3580_v57, %v3548_v56  ;;  %v3612_v51 = vld [vmem:[%s17146_s5 + $0x3ee0] sm:$0xff]  ;;  %v9145_v2 = vpack.c.bf16 %v3647_v62, %v3615_v43  ;;  %v3651_v8 = vld [vmem:[%s17148_s6 + $0x18] sm:$0xff] }
 0x633   :  { %9118 = vmatprep.subr.bf16.mxu0 %v9117_v37  ;;  %v3517_v32 = vld [vmem:[%s17146_s5 + $0x3be8] sm:$0xff]  ;;  %v9135_v37 = vpack.c.bf16 %v3454_v30, %v3422_v29  ;;  %v3644_v1 = vld [vmem:[%s17146_s5 + $0x3fe0] sm:$0xff]  ;;  %v3755_v9 = vrot.slane %v3651_v8, %v11134_v15  ;;  %v3763_v10 = vrot.slane %v3651_v8, %v11510_v33  ;;  %v3767_v12 = vrot.slane %v3651_v8, %v11145_v18 }
 0x634   :  { %v9009_v39 = vpack.c.bf16 %v3517_v32, %v3485_v31  ;;  %v3779_v18 = vrot.slane %v3651_v8, %v13646_v52  ;;  %v3775_v33 = vrot.slane %v3651_v8, %v13649_v53 }
 0x635   :  { %8992 = vmatpush1.bf16.msra.mxu1 %v8991_v45  ;;  %v3518_v45 = vld [vmem:[%s17146_s5 + $0x3bf0] sm:$0xff] }
 0x636   :  { %9120 = vmatpush1.bf16.msra.mxu0 %v9119_v46  ;;  %8994 = vmatprep.subr.bf16.mxu1 %v8993_v47  ;;  %v3549_v46 = vld [vmem:[%s17146_s5 + $0x3ce8] sm:$0xff] }
 0x637   :  { %9122 = vmatprep.subr.bf16.mxu0 %v9121_v16  ;;  %v3581_v47 = vld [vmem:[%s17146_s5 + $0x3de8] sm:$0xff]  ;;  %v9139_v16 = vpack.c.bf16 %v3518_v45, %v3486_v42 }
 0x638   :  { %v9013_v55 = vpack.c.bf16 %v3581_v47, %v3549_v46 }
 0x639   :  { %8996 = vmatpush1.bf16.msra.mxu1 %v8995_v14  ;;  %v3582_v14 = vld [vmem:[%s17146_s5 + $0x3df0] sm:$0xff] }
 0x63a   :  { %9124 = vmatpush1.bf16.msra.mxu0 %v9123_v60  ;;  %8998 = vmatprep.subr.bf16.mxu1 %v8997_v61  ;;  %v3613_v60 = vld [vmem:[%s17146_s5 + $0x3ee8] sm:$0xff] }
 0x63b   :  { %9126 = vmatprep.subr.bf16.mxu0 %v9125_v24  ;;  %v3645_v61 = vld [vmem:[%s17146_s5 + $0x3fe8] sm:$0xff]  ;;  %v9143_v24 = vpack.c.bf16 %v3582_v14, %v3550_v58 }
 0x63c   :  { %v9017_v0 = vpack.c.bf16 %v3645_v61, %v3613_v60 }
 0x63d   :  { %9000 = vmatpush1.bf16.msra.mxu1 %v8999_v4  ;;  %v3646_v4 = vld [vmem:[%s17146_s5 + $0x3ff0] sm:$0xff] }
 0x63e   :  { %9128 = vmatpush1.bf16.msra.mxu0 %v9127_v6  ;;  %9002 = vmatprep.subr.bf16.mxu1 %v9001_v7  ;;  %v9019_v6 = vpack.c.bf16 %v3644_v1, %v3612_v51  ;;  %v9147_v7 = vpack.c.bf16 %v3646_v4, %v3614_v3 }
 0x63f   :  { %9130 = vmatprep.subr.bf16.mxu0 %v9129_v11  ;;  %v3759_v11 = vrot.slane %v3651_v8, %v11142_v17  ;;  %v3771_v17 = vrot.slane %v3651_v8, %v13637_v48 }
 0x641   :  { %9004 = vmatpush1.bf16.msra.mxu1 %v9003_v23 }
 0x642   :  { %9132 = vmatpush1.bf16.msra.mxu0 %v9131_v25  ;;  %9006 = vmatprep.subr.bf16.mxu1 %v9005_v26 }
 0x643   :  { %9134 = vmatprep.subr.bf16.mxu0 %v9133_v38  ;;  %v3783_v38 = vrot.slane %v3651_v8, %v13652_v54 }
 0x645   :  { %9008 = vmatpush1.bf16.msra.mxu1 %v9007_v36 }
 0x646   :  { %9136 = vmatpush1.bf16.msra.mxu0 %v9135_v37  ;;  %9010 = vmatprep.subr.bf16.mxu1 %v9009_v39 }
 0x647   :  { %9138 = vmatprep.subr.bf16.mxu0 %v9137_v44 }
 0x649   :  { %9012 = vmatpush1.bf16.msra.mxu1 %v9011_v22 }
 0x64a   :  { %9140 = vmatpush1.bf16.msra.mxu0 %v9139_v16  ;;  %9014 = vmatprep.subr.bf16.mxu1 %v9013_v55 }
 0x64b   :  { %9142 = vmatprep.subr.bf16.mxu0 %v9141_v59 }
 0x64d   :  { %9016 = vmatpush1.bf16.msra.mxu1 %v9015_v63 }
 0x64e   :  { %9144 = vmatpush1.bf16.msra.mxu0 %v9143_v24  ;;  %9018 = vmatprep.subr.bf16.mxu1 %v9017_v0 }
 0x64f   :  { %9146 = vmatprep.subr.bf16.mxu0 %v9145_v2 }
 0x651   :  { %9020 = vmatpush1.bf16.msra.mxu1 %v9019_v6 }
 0x652   :  { %9148 = vmatpush1.bf16.msra.mxu0 %v9147_v7 }
 0x654   :  { %5940 = vmatmul.mubr.f32.vlgmr.msra.gmra.mrb[28].mxu1 %v11581_v5 }
 0x655   :  { %6082 = vmatmul.mubr.f32.vlgmr.msra.gmra.mrb[30].mxu0 %v11581_v5 }
 0x6a7   :  { %v5657_v13 = vpop.f32.mrb[26].mxu1 }
 0x6a8   :  { %v9173_v19 = vadd.f32 %v5657_v13, %v3755_v9  ;;  %v5799_v20 = vpop.f32.mrb[28].mxu0  ;;  %v5659_v21 = vpop.f32.mrb[27].mxu1 }
 0x6a9   :  { %v9175_v23 = vadd.f32 %v5799_v20, %v3763_v10  ;;  %v9174_v25 = vadd.f32 %v5659_v21, %v3759_v11  ;;  %v5801_v26 = vpop.f32.mrb[29].mxu0 }
 0x6aa   :  { %v6112_v5 = vmax.f32 %v9173_v19, 0.0  ;;  %v9176_v27 = vadd.f32 %v5801_v26, %v3767_v12 }
 0x6ab   :  { %v6114_v28 = vmax.f32 %v9175_v23, 0.0  ;;  %v6113_v29 = vmax.f32 %v9174_v25, 0.0 }
 0x6ac   :  { %6144 = vst [vmem:[%s17149_s7 + $0xc0] sm:$0xff] %v6112_v5  ;;  %v6115_v15 = vmax.f32 %v9176_v27, 0.0 }
 0x6ad   :  { %6146 = vst [vmem:[%s17149_s7 + $0xd0] sm:$0xff] %v6114_v28  ;;  %6145 = vst [vmem:[%s17149_s7 + $0xc8] sm:$0xff] %v6113_v29 }
 0x6ae   :  { %6147 = vst [vmem:[%s17149_s7 + $0xd8] sm:$0xff] %v6115_v15 }
 0x727   :  { %v5941_v30 = vpop.f32.mrb[28].mxu1 }
 0x728   :  { %v9177_v31 = vadd.f32 %v5941_v30, %v3771_v17  ;;  %v6083_v32 = vpop.f32.mrb[30].mxu0  ;;  %v5943_v34 = vpop.f32.mrb[29].mxu1 }
 0x729   :  { %v9179_v35 = vadd.f32 %v6083_v32, %v3779_v18  ;;  %v9178_v36 = vadd.f32 %v5943_v34, %v3775_v33  ;;  %v6085_v37 = vpop.f32.mrb[31].mxu0 }
 0x72a   :  { %v6116_v39 = vmax.f32 %v9177_v31, 0.0  ;;  %v9180_v40 = vadd.f32 %v6085_v37, %v3783_v38 }
 0x72b   :  { %v6118_v41 = vmax.f32 %v9179_v35, 0.0  ;;  %v6117_v42 = vmax.f32 %v9178_v36, 0.0 }
 0x72c   :  { %6148 = vst [vmem:[%s17149_s7 + $0xe0] sm:$0xff] %v6116_v39  ;;  %v6119_v48 = vmax.f32 %v9180_v40, 0.0 }
 0x72d   :  { %6150 = vst [vmem:[%s17149_s7 + $0xf0] sm:$0xff] %v6118_v41  ;;  %6149 = vst [vmem:[%s17149_s7 + $0xe8] sm:$0xff] %v6117_v42 }
 0x72e   :  { %6151 = vst [vmem:[%s17149_s7 + $0xf8] sm:$0xff] %v6119_v48 }

// kernel: cnn_autoencoder_forward.8
= control target key start
LH: loop header
LB: loop body
LE: loop exit
PB: predicated region body
PF: predicated region fallthrough
CT: control target
= control target key end

     0   :  { %s856_s12 = smov 0   ;;  %s858_s13 = smov 0   ;;  %s1158_s0 = inlined_call_operand.vmem [shape: f32[1280,256], index: 0, kind: input, shape index: {}]   ;;  %s1159_s1 = inlined_call_operand.vmem [shape: f32[256,128], index: 1, kind: input, shape index: {}]   ;;  %s1160_s2 = inlined_call_operand.vmem [shape: f32[1,128], index: 2, kind: input, shape index: {}]   ;;  %s1161_s3 = inlined_call_operand.vmem [shape: f32[1280,128], index: 3, kind: output, shape index: {}]  }
   0x1   :  { %s860_s14 = smov 0  }
   0x2 LB: > { %s25_s15 = sadd.s32 1, %s829_s13  ;;  %p696_p0 = scmp.ge.s32.totalorder %s833_s14, 1  ;;  %s833_s14 = sphi %s860_s14, %s13_s14   ;;  %s829_s13 = sphi %s858_s13, %s1163_s13   ;;  %s825_s12 = sphi %s856_s12, %s1162_s12  }
   0x3   : > { %p27_p1 = scmp.ge.s32.totalorder %s25_s15, 5  ;;  %p170_p2 = scmp.lt.s32.totalorder %s833_s14, 6 }
   0x5   : > { %s1165_s15 = smov (%p27_p1, %s25_s15), 0  ;;  %p171_p3 = pnand %p696_p0, %p170_p2 }
   0x6   : > { %v292_v0 = vld [vmem:[%s1159_s1] sm:$0xff] (!%p171_p3)  ;;  %v293_v1 = vld [vmem:[%s1159_s1 + $0x8] sm:$0xff] (!%p171_p3)  ;;  %v294_v2 = vld [vmem:[%s1159_s1 + $0x10] sm:$0xff] (!%p171_p3)  ;;  %s697_s22 = sshll.u32 (!%p171_p3), %s825_s12, 5  ;;  %v835_v3 = vmov (!%p171_p3), 0.0|0.0  }
   0x7   : > { %174 = sbr.rel (%p171_p3) target bundleno = 347 (0x15b), region = 32  ;;  %706 = vmatprep.subr.bf16.mxu0 (!%p171_p3), %v835_v3  ;;  %754 = vmatprep.subr.bf16.mxu1 (!%p171_p3), %v835_v3  ;;  %v707_v4 = vpack.c.bf16 (!%p171_p3), %v293_v1, %v292_v0  ;;  %v295_v5 = vld [vmem:[%s1159_s1 + $0x18] sm:$0xff] (!%p171_p3)  ;;  %p206_p4 = scmp.lt.s32.totalorder (!%p171_p3), %s697_s22, 159  ;;  %v296_v7 = vld [vmem:[%s1159_s1 + $0x20] sm:$0xff] (!%p171_p3)  ;;  %v297_v8 = vld [vmem:[%s1159_s1 + $0x28] sm:$0xff] (!%p171_p3) }
   0x8   : > { %v710_v6 = vpack.c.bf16 (!%p171_p3), %v295_v5, %v294_v2  ;;  %v713_v9 = vpack.c.bf16 (!%p171_p3), %v297_v8, %v296_v7  ;;  %v298_v10 = vld [vmem:[%s1159_s1 + $0x30] sm:$0xff] (!%p171_p3)  ;;  %v299_v11 = vld [vmem:[%s1159_s1 + $0x38] sm:$0xff] (!%p171_p3)  ;;  %v300_v15 = vld [vmem:[%s1159_s1 + $0x40] sm:$0xff] (!%p171_p3) }
   0x9   : > { %708 = vmatpush1.bf16.msra.mxu0 (!%p171_p3), %v707_v4  ;;  %770 = vmatpush1.bf16.msra.mxu1 (!%p171_p3), %v707_v4  ;;  %v716_v13 = vpack.c.bf16 (!%p171_p3), %v299_v11, %v298_v10  ;;  %v301_v16 = vld [vmem:[%s1159_s1 + $0x48] sm:$0xff] (!%p171_p3)  ;;  %v302_v18 = vld [vmem:[%s1159_s1 + $0x50] sm:$0xff] (!%p171_p3)  ;;  %v303_v19 = vld [vmem:[%s1159_s1 + $0x58] sm:$0xff] (!%p171_p3) }
   0xa   : > { %709 = vmatprep.subr.bf16.mxu0 (!%p171_p3), %v835_v3  ;;  %755 = vmatprep.subr.bf16.mxu1 (!%p171_p3), %v835_v3  ;;  %v719_v17 = vpack.c.bf16 (!%p171_p3), %v301_v16, %v300_v15  ;;  %v722_v20 = vpack.c.bf16 (!%p171_p3), %v303_v19, %v302_v18  ;;  %v304_v21 = vld [vmem:[%s1159_s1 + $0x60] sm:$0xff] (!%p171_p3)  ;;  %v305_v22 = vld [vmem:[%s1159_s1 + $0x68] sm:$0xff] (!%p171_p3)  ;;  %v306_v24 = vld [vmem:[%s1159_s1 + $0x70] sm:$0xff] (!%p171_p3) }
   0xb   : > { %v725_v23 = vpack.c.bf16 (!%p171_p3), %v305_v22, %v304_v21  ;;  %v307_v25 = vld [vmem:[%s1159_s1 + $0x78] sm:$0xff] (!%p171_p3)  ;;  %v308_v27 = vld [vmem:[%s1159_s1 + $0x80] sm:$0xff] (!%p171_p3)  ;;  %v309_v28 = vld [vmem:[%s1159_s1 + $0x88] sm:$0xff] (!%p171_p3) }
   0xc   : > { %v728_v26 = vpack.c.bf16 (!%p171_p3), %v307_v25, %v306_v24  ;;  %v731_v29 = vpack.c.bf16 (!%p171_p3), %v309_v28, %v308_v27  ;;  %v310_v30 = vld [vmem:[%s1159_s1 + $0x90] sm:$0xff] (!%p171_p3)  ;;  %v311_v31 = vld [vmem:[%s1159_s1 + $0x98] sm:$0xff] (!%p171_p3)  ;;  %v312_v33 = vld [vmem:[%s1159_s1 + $0xa0] sm:$0xff] (!%p171_p3) }
   0xd   : > { %711 = vmatpush1.bf16.msra.mxu0 (!%p171_p3), %v710_v6  ;;  %771 = vmatpush1.bf16.msra.mxu1 (!%p171_p3), %v710_v6  ;;  %v734_v32 = vpack.c.bf16 (!%p171_p3), %v311_v31, %v310_v30  ;;  %v313_v34 = vld [vmem:[%s1159_s1 + $0xa8] sm:$0xff] (!%p171_p3)  ;;  %v314_v36 = vld [vmem:[%s1159_s1 + $0xb0] sm:$0xff] (!%p171_p3)  ;;  %v315_v37 = vld [vmem:[%s1159_s1 + $0xb8] sm:$0xff] (!%p171_p3) }
   0xe   : > { %s1167_s22 = smov (!%p206_p4, %s697_s22), 159  ;;  %712 = vmatprep.subr.bf16.mxu0 %v835_v3  ;;  %756 = vmatprep.subr.bf16.mxu1 %v835_v3  ;;  %v737_v35 = vpack.c.bf16 %v313_v34, %v312_v33  ;;  %v740_v38 = vpack.c.bf16 %v315_v37, %v314_v36  ;;  %v316_v39 = vld [vmem:[%s1159_s1 + $0xc0] sm:$0xff]  ;;  %v317_v40 = vld [vmem:[%s1159_s1 + $0xc8] sm:$0xff]  ;;  %v318_v42 = vld [vmem:[%s1159_s1 + $0xd0] sm:$0xff] }
   0xf   : > { %s705_s29 = sshll.u32 %s1167_s22, 4  ;;  %v743_v41 = vpack.c.bf16 %v317_v40, %v316_v39  ;;  %v319_v43 = vld [vmem:[%s1159_s1 + $0xd8] sm:$0xff]  ;;  %v320_v45 = vld [vmem:[%s1159_s1 + $0xe0] sm:$0xff]  ;;  %v321_v46 = vld [vmem:[%s1159_s1 + $0xe8] sm:$0xff]  ;;  %s701_s17 = sshll.u32 %s1167_s22, 3 }
  0x10   : > { %s902_s5 = scalar_lea.vmem %s1158_s0, %s705_s29  ;;  %v746_v44 = vpack.c.bf16 %v319_v43, %v318_v42  ;;  %v749_v47 = vpack.c.bf16 %v321_v46, %v320_v45  ;;  %v322_v48 = vld [vmem:[%s1159_s1 + $0xf0] sm:$0xff]  ;;  %v323_v49 = vld [vmem:[%s1159_s1 + $0xf8] sm:$0xff]  ;;  %s1083_s23 = scalar_lea.vmem %s1161_s3, %s701_s17 }
  0x11   : > { %v229_v12 = vld [vmem:[%s902_s5 + $0x8] sm:$0xff]  ;;  %714 = vmatpush1.bf16.msra.mxu0 %v713_v9  ;;  %772 = vmatpush1.bf16.msra.mxu1 %v713_v9  ;;  %v752_v50 = vpack.c.bf16 %v323_v49, %v322_v48  ;;  %v228_v51 = vld [vmem:[%s902_s5] sm:$0xff]  ;;  %v231_v53 = vld [vmem:[%s902_s5 + $0x18] sm:$0xff] }
  0x12   : > { %v261_v14 = vld [vmem:[%s902_s5 + $0x108] sm:$0xff]  ;;  %715 = vmatprep.subr.bf16.mxu0 %v835_v3  ;;  %757 = vmatprep.subr.bf16.mxu1 %v835_v3  ;;  %v260_v52 = vld [vmem:[%s902_s5 + $0x100] sm:$0xff]  ;;  %v263_v54 = vld [vmem:[%s902_s5 + $0x118] sm:$0xff] }
  0x13   : > { %395 = vmatprep.mubr.f32.mxu0 %v229_v12  ;;  %475 = vmatprep.mubr.f32.mxu1 %v261_v14  ;;  %v230_v55 = vld [vmem:[%s902_s5 + $0x10] sm:$0xff]  ;;  %v233_v57 = vld [vmem:[%s902_s5 + $0x28] sm:$0xff]  ;;  %v232_v59 = vld [vmem:[%s902_s5 + $0x20] sm:$0xff] }
  0x14   : > { %v262_v56 = vld [vmem:[%s902_s5 + $0x110] sm:$0xff]  ;;  %v265_v58 = vld [vmem:[%s902_s5 + $0x128] sm:$0xff]  ;;  %v264_v60 = vld [vmem:[%s902_s5 + $0x120] sm:$0xff] }
  0x15   : > { %717 = vmatpush1.bf16.msra.mxu0 %v716_v13  ;;  %773 = vmatpush1.bf16.msra.mxu1 %v716_v13  ;;  %v235_v61 = vld [vmem:[%s902_s5 + $0x38] sm:$0xff]  ;;  %v234_v63 = vld [vmem:[%s902_s5 + $0x30] sm:$0xff]  ;;  %v237_v1 = vld [vmem:[%s902_s5 + $0x48] sm:$0xff] }
  0x16   : > { %718 = vmatprep.subr.bf16.mxu0 %v835_v3  ;;  %758 = vmatprep.subr.bf16.mxu1 %v835_v3  ;;  %v267_v62 = vld [vmem:[%s902_s5 + $0x138] sm:$0xff]  ;;  %v266_v0 = vld [vmem:[%s902_s5 + $0x130] sm:$0xff]  ;;  %v269_v2 = vld [vmem:[%s902_s5 + $0x148] sm:$0xff] }
  0x17   : > { %v268_v4 = vld [vmem:[%s902_s5 + $0x140] sm:$0xff]  ;;  %v239_v5 = vld [vmem:[%s902_s5 + $0x58] sm:$0xff]  ;;  %v238_v7 = vld [vmem:[%s902_s5 + $0x50] sm:$0xff] }
  0x18   : > { %v271_v6 = vld [vmem:[%s902_s5 + $0x158] sm:$0xff]  ;;  %v270_v8 = vld [vmem:[%s902_s5 + $0x150] sm:$0xff]  ;;  %v241_v9 = vld [vmem:[%s902_s5 + $0x68] sm:$0xff] }
  0x19   : > { %720 = vmatpush1.bf16.msra.mxu0 %v719_v17  ;;  %774 = vmatpush1.bf16.msra.mxu1 %v719_v17  ;;  %v273_v10 = vld [vmem:[%s902_s5 + $0x168] sm:$0xff]  ;;  %v240_v11 = vld [vmem:[%s902_s5 + $0x60] sm:$0xff]  ;;  %v243_v13 = vld [vmem:[%s902_s5 + $0x78] sm:$0xff] }
  0x1a   : > { %721 = vmatprep.subr.bf16.mxu0 %v835_v3  ;;  %759 = vmatprep.subr.bf16.mxu1 %v835_v3  ;;  %v272_v12 = vld [vmem:[%s902_s5 + $0x160] sm:$0xff]  ;;  %v275_v14 = vld [vmem:[%s902_s5 + $0x178] sm:$0xff]  ;;  %v242_v15 = vld [vmem:[%s902_s5 + $0x70] sm:$0xff] }
  0x1b   : > { %v274_v16 = vld [vmem:[%s902_s5 + $0x170] sm:$0xff]  ;;  %v245_v17 = vld [vmem:[%s902_s5 + $0x88] sm:$0xff]  ;;  %v244_v19 = vld [vmem:[%s902_s5 + $0x80] sm:$0xff] }
  0x1c   : > { %v277_v18 = vld [vmem:[%s902_s5 + $0x188] sm:$0xff]  ;;  %v247_v21 = vld [vmem:[%s902_s5 + $0x98] sm:$0xff]  ;;  %v278_v24 = vld [vmem:[%s902_s5 + $0x190] sm:$0xff] }
  0x1d   : > { %723 = vmatpush1.bf16.msra.mxu0 %v722_v20  ;;  %775 = vmatpush1.bf16.msra.mxu1 %v722_v20  ;;  %v276_v20 = vld [vmem:[%s902_s5 + $0x180] sm:$0xff]  ;;  %v279_v22 = vld [vmem:[%s902_s5 + $0x198] sm:$0xff]  ;;  %v249_v25 = vld [vmem:[%s902_s5 + $0xa8] sm:$0xff] }
  0x1e   : > { %724 = vmatprep.subr.bf16.mxu0 %v835_v3  ;;  %760 = vmatprep.subr.bf16.mxu1 %v835_v3  ;;  %v248_v27 = vld [vmem:[%s902_s5 + $0xa0] sm:$0xff]  ;;  %v283_v30 = vld [vmem:[%s902_s5 + $0x1b8] sm:$0xff]  ;;  %v250_v31 = vld [vmem:[%s902_s5 + $0xb0] sm:$0xff] }
  0x1f   : > { %v280_v28 = vld [vmem:[%s902_s5 + $0x1a0] sm:$0xff]  ;;  %v253_v33 = vld [vmem:[%s902_s5 + $0xc8] sm:$0xff]  ;;  %v255_v37 = vld [vmem:[%s902_s5 + $0xd8] sm:$0xff] }
  0x20   : > { %v285_v34 = vld [vmem:[%s902_s5 + $0x1c8] sm:$0xff]  ;;  %v284_v36 = vld [vmem:[%s902_s5 + $0x1c0] sm:$0xff]  ;;  %v254_v39 = vld [vmem:[%s902_s5 + $0xd0] sm:$0xff] }
  0x21   : > { %726 = vmatpush1.bf16.msra.mxu0 %v725_v23  ;;  %776 = vmatpush1.bf16.msra.mxu1 %v725_v23  ;;  %v246_v23 = vld [vmem:[%s902_s5 + $0x90] sm:$0xff]  ;;  %v289_v42 = vld [vmem:[%s902_s5 + $0x1e8] sm:$0xff]  ;;  %v256_v43 = vld [vmem:[%s902_s5 + $0xe0] sm:$0xff] }
  0x22   : > { %727 = vmatprep.subr.bf16.mxu0 %v835_v3  ;;  %761 = vmatprep.subr.bf16.mxu1 %v835_v3  ;;  %v286_v40 = vld [vmem:[%s902_s5 + $0x1d0] sm:$0xff]  ;;  %v259_v45 = vld [vmem:[%s902_s5 + $0xf8] sm:$0xff]  ;;  %v1078_v49 = vld [vmem:[%s1160_s2] ss:$0 sm:$0xff] }
  0x23   : > { %v291_v46 = vld [vmem:[%s902_s5 + $0x1f8] sm:$0xff]  ;;  %v290_v48 = vld [vmem:[%s902_s5 + $0x1f0] sm:$0xff] }
  0x25   : > { %729 = vmatpush1.bf16.msra.mxu0 %v728_v26  ;;  %777 = vmatpush1.bf16.msra.mxu1 %v728_v26  ;;  %v281_v26 = vld [vmem:[%s902_s5 + $0x1a8] sm:$0xff] }
  0x26   : > { %730 = vmatprep.subr.bf16.mxu0 %v835_v3  ;;  %762 = vmatprep.subr.bf16.mxu1 %v835_v3 }
  0x29   : > { %732 = vmatpush1.bf16.msra.mxu0 %v731_v29  ;;  %778 = vmatpush1.bf16.msra.mxu1 %v731_v29  ;;  %v251_v29 = vld [vmem:[%s902_s5 + $0xb8] sm:$0xff] }
  0x2a   : > { %733 = vmatprep.subr.bf16.mxu0 %v835_v3  ;;  %763 = vmatprep.subr.bf16.mxu1 %v835_v3 }
  0x2d   : > { %735 = vmatpush1.bf16.msra.mxu0 %v734_v32  ;;  %779 = vmatpush1.bf16.msra.mxu1 %v734_v32  ;;  %v282_v32 = vld [vmem:[%s902_s5 + $0x1b0] sm:$0xff] }
  0x2e   : > { %736 = vmatprep.subr.bf16.mxu0 %v835_v3  ;;  %764 = vmatprep.subr.bf16.mxu1 %v835_v3 }
  0x31   : > { %738 = vmatpush1.bf16.msra.mxu0 %v737_v35  ;;  %780 = vmatpush1.bf16.msra.mxu1 %v737_v35  ;;  %v252_v35 = vld [vmem:[%s902_s5 + $0xc0] sm:$0xff] }
  0x32   : > { %739 = vmatprep.subr.bf16.mxu0 %v835_v3  ;;  %765 = vmatprep.subr.bf16.mxu1 %v835_v3 }
  0x35   : > { %741 = vmatpush1.bf16.msra.mxu0 %v740_v38  ;;  %781 = vmatpush1.bf16.msra.mxu1 %v740_v38  ;;  %v287_v38 = vld [vmem:[%s902_s5 + $0x1d8] sm:$0xff] }
  0x36   : > { %742 = vmatprep.subr.bf16.mxu0 %v835_v3  ;;  %766 = vmatprep.subr.bf16.mxu1 %v835_v3 }
  0x39   : > { %744 = vmatpush1.bf16.msra.mxu0 %v743_v41  ;;  %782 = vmatpush1.bf16.msra.mxu1 %v743_v41  ;;  %v257_v41 = vld [vmem:[%s902_s5 + $0xe8] sm:$0xff] }
  0x3a   : > { %745 = vmatprep.subr.bf16.mxu0 %v835_v3  ;;  %767 = vmatprep.subr.bf16.mxu1 %v835_v3 }
  0x3d   : > { %747 = vmatpush1.bf16.msra.mxu0 %v746_v44  ;;  %783 = vmatpush1.bf16.msra.mxu1 %v746_v44  ;;  %v288_v44 = vld [vmem:[%s902_s5 + $0x1e0] sm:$0xff] }
  0x3e   : > { %748 = vmatprep.subr.bf16.mxu0 %v835_v3  ;;  %768 = vmatprep.subr.bf16.mxu1 %v835_v3 }
  0x41   : > { %750 = vmatpush1.bf16.msra.mxu0 %v749_v47  ;;  %784 = vmatpush1.bf16.msra.mxu1 %v749_v47  ;;  %v258_v47 = vld [vmem:[%s902_s5 + $0xf0] sm:$0xff] }
  0x42   : > { %751 = vmatprep.subr.bf16.mxu0 %v835_v3  ;;  %769 = vmatprep.subr.bf16.mxu1 %v835_v3  ;;  %v236_v3 = vld [vmem:[%s902_s5 + $0x40] sm:$0xff] }
  0x45   : > { %753 = vmatpush1.bf16.msra.mxu0 %v752_v50  ;;  %785 = vmatpush1.bf16.msra.mxu1 %v752_v50 }
  0x48   : > { %396 = vmatmul.mubr.f32.vlgmr.msra.gmra.mrb[0].mxu0 %v228_v51  ;;  %476 = vmatmul.mubr.f32.vlgmr.msra.gmra.mrb[0].mxu1 %v260_v52 }
  0x49   : > { %400 = vmatprep.mubr.f32.mxu0 %v231_v53  ;;  %480 = vmatprep.mubr.f32.mxu1 %v263_v54 }
  0x4c   : > { %401 = vmatmul.mubr.f32.gmra.mrb[2].mxu0 %v230_v55  ;;  %481 = vmatmul.mubr.f32.gmra.mrb[2].mxu1 %v262_v56 }
  0x4d   : > { %405 = vmatprep.mubr.f32.mxu0 %v233_v57  ;;  %485 = vmatprep.mubr.f32.mxu1 %v265_v58 }
  0x50   : > { %406 = vmatmul.mubr.f32.gmra.mrb[4].mxu0 %v232_v59  ;;  %486 = vmatmul.mubr.f32.gmra.mrb[4].mxu1 %v264_v60 }
  0x51   : > { %410 = vmatprep.mubr.f32.mxu0 %v235_v61  ;;  %490 = vmatprep.mubr.f32.mxu1 %v267_v62 }
  0x54   : > { %411 = vmatmul.mubr.f32.gmra.mrb[6].mxu0 %v234_v63  ;;  %491 = vmatmul.mubr.f32.gmra.mrb[6].mxu1 %v266_v0 }
  0x55   : > { %415 = vmatprep.mubr.f32.mxu0 %v237_v1  ;;  %495 = vmatprep.mubr.f32.mxu1 %v269_v2 }
  0x58   : > { %416 = vmatmul.mubr.f32.gmra.mrb[8].mxu0 %v236_v3  ;;  %496 = vmatmul.mubr.f32.gmra.mrb[8].mxu1 %v268_v4 }
  0x59   : > { %420 = vmatprep.mubr.f32.mxu0 %v239_v5  ;;  %500 = vmatprep.mubr.f32.mxu1 %v271_v6 }
  0x5c   : > { %421 = vmatmul.mubr.f32.gmra.mrb[10].mxu0 %v238_v7  ;;  %501 = vmatmul.mubr.f32.gmra.mrb[10].mxu1 %v270_v8 }
  0x5d   : > { %425 = vmatprep.mubr.f32.mxu0 %v241_v9  ;;  %505 = vmatprep.mubr.f32.mxu1 %v273_v10 }
  0x60   : > { %426 = vmatmul.mubr.f32.gmra.mrb[12].mxu0 %v240_v11  ;;  %506 = vmatmul.mubr.f32.gmra.mrb[12].mxu1 %v272_v12 }
  0x61   : > { %430 = vmatprep.mubr.f32.mxu0 %v243_v13  ;;  %510 = vmatprep.mubr.f32.mxu1 %v275_v14 }
  0x64   : > { %431 = vmatmul.mubr.f32.gmra.mrb[14].mxu0 %v242_v15  ;;  %511 = vmatmul.mubr.f32.gmra.mrb[14].mxu1 %v274_v16 }
  0x65   : > { %435 = vmatprep.mubr.f32.mxu0 %v245_v17  ;;  %515 = vmatprep.mubr.f32.mxu1 %v277_v18 }
  0x68   : > { %436 = vmatmul.mubr.f32.gmra.mrb[16].mxu0 %v244_v19  ;;  %516 = vmatmul.mubr.f32.gmra.mrb[16].mxu1 %v276_v20 }
  0x69   : > { %440 = vmatprep.mubr.f32.mxu0 %v247_v21  ;;  %520 = vmatprep.mubr.f32.mxu1 %v279_v22 }
  0x6c   : > { %441 = vmatmul.mubr.f32.gmra.mrb[18].mxu0 %v246_v23  ;;  %521 = vmatmul.mubr.f32.gmra.mrb[18].mxu1 %v278_v24 }
  0x6d   : > { %445 = vmatprep.mubr.f32.mxu0 %v249_v25  ;;  %525 = vmatprep.mubr.f32.mxu1 %v281_v26 }
  0x70   : > { %446 = vmatmul.mubr.f32.gmra.mrb[20].mxu0 %v248_v27  ;;  %526 = vmatmul.mubr.f32.gmra.mrb[20].mxu1 %v280_v28 }
  0x71   : > { %450 = vmatprep.mubr.f32.mxu0 %v251_v29  ;;  %530 = vmatprep.mubr.f32.mxu1 %v283_v30 }
  0x74   : > { %451 = vmatmul.mubr.f32.gmra.mrb[22].mxu0 %v250_v31  ;;  %531 = vmatmul.mubr.f32.gmra.mrb[22].mxu1 %v282_v32 }
  0x75   : > { %455 = vmatprep.mubr.f32.mxu0 %v253_v33  ;;  %535 = vmatprep.mubr.f32.mxu1 %v285_v34 }
  0x78   : > { %456 = vmatmul.mubr.f32.gmra.mrb[24].mxu0 %v252_v35  ;;  %536 = vmatmul.mubr.f32.gmra.mrb[24].mxu1 %v284_v36 }
  0x79   : > { %460 = vmatprep.mubr.f32.mxu0 %v255_v37  ;;  %540 = vmatprep.mubr.f32.mxu1 %v287_v38 }
  0x7c   : > { %461 = vmatmul.mubr.f32.gmra.mrb[26].mxu0 %v254_v39  ;;  %541 = vmatmul.mubr.f32.gmra.mrb[26].mxu1 %v286_v40 }
  0x7d   : > { %465 = vmatprep.mubr.f32.mxu0 %v257_v41  ;;  %545 = vmatprep.mubr.f32.mxu1 %v289_v42 }
  0x80   : > { %466 = vmatmul.mubr.f32.gmra.mrb[28].mxu0 %v256_v43  ;;  %546 = vmatmul.mubr.f32.gmra.mrb[28].mxu1 %v288_v44 }
  0x81   : > { %470 = vmatprep.mubr.f32.mxu0 %v259_v45  ;;  %550 = vmatprep.mubr.f32.mxu1 %v291_v46 }
  0x84   : > { %471 = vmatmul.mubr.f32.gmra.mrb[30].mxu0 %v258_v47  ;;  %551 = vmatmul.mubr.f32.gmra.mrb[30].mxu1 %v290_v48 }
 0x11b   : > { %v397_v50 = vpop.f32.mrb[0].mxu0  ;;  %v477_v51 = vpop.f32.mrb[0].mxu1 }
 0x11c   : > { %v398_v52 = vadd.f32 %v1078_v49, %v397_v50  ;;  %v478_v53 = vadd.f32 %v1078_v49, %v477_v51  ;;  %v399_v54 = vpop.f32.mrb[1].mxu0  ;;  %v479_v55 = vpop.f32.mrb[1].mxu1 }
 0x11e   : > { %556 = vst [vmem:[%s1083_s23] sm:$0xff] %v398_v52  ;;  %572 = vst [vmem:[%s1083_s23 + $0x80] sm:$0xff] %v478_v53 }
 0x11f   : > { %v402_v56 = vpop.f32.mrb[2].mxu0  ;;  %v482_v57 = vpop.f32.mrb[2].mxu1 }
 0x120   : > { %v403_v58 = vadd.f32 %v1078_v49, %v402_v56  ;;  %v483_v59 = vadd.f32 %v1078_v49, %v482_v57  ;;  %v404_v60 = vpop.f32.mrb[3].mxu0  ;;  %v484_v61 = vpop.f32.mrb[3].mxu1 }
 0x122   : > { %557 = vst [vmem:[%s1083_s23 + $0x8] sm:$0xff] %v403_v58  ;;  %573 = vst [vmem:[%s1083_s23 + $0x88] sm:$0xff] %v483_v59 }
 0x123   : > { %v407_v62 = vpop.f32.mrb[4].mxu0  ;;  %v487_v63 = vpop.f32.mrb[4].mxu1 }
 0x124   : > { %v408_v0 = vadd.f32 %v1078_v49, %v407_v62  ;;  %v488_v1 = vadd.f32 %v1078_v49, %v487_v63  ;;  %v409_v2 = vpop.f32.mrb[5].mxu0  ;;  %v489_v3 = vpop.f32.mrb[5].mxu1 }
 0x126   : > { %558 = vst [vmem:[%s1083_s23 + $0x10] sm:$0xff] %v408_v0  ;;  %574 = vst [vmem:[%s1083_s23 + $0x90] sm:$0xff] %v488_v1 }
 0x127   : > { %v412_v4 = vpop.f32.mrb[6].mxu0  ;;  %v492_v5 = vpop.f32.mrb[6].mxu1 }
 0x128   : > { %v413_v6 = vadd.f32 %v1078_v49, %v412_v4  ;;  %v493_v7 = vadd.f32 %v1078_v49, %v492_v5  ;;  %v414_v8 = vpop.f32.mrb[7].mxu0  ;;  %v494_v9 = vpop.f32.mrb[7].mxu1 }
 0x12a   : > { %559 = vst [vmem:[%s1083_s23 + $0x18] sm:$0xff] %v413_v6  ;;  %575 = vst [vmem:[%s1083_s23 + $0x98] sm:$0xff] %v493_v7 }
 0x12b   : > { %v417_v10 = vpop.f32.mrb[8].mxu0  ;;  %v497_v11 = vpop.f32.mrb[8].mxu1 }
 0x12c   : > { %v418_v12 = vadd.f32 %v1078_v49, %v417_v10  ;;  %v498_v13 = vadd.f32 %v1078_v49, %v497_v11  ;;  %v419_v14 = vpop.f32.mrb[9].mxu0  ;;  %v499_v15 = vpop.f32.mrb[9].mxu1 }
 0x12e   : > { %560 = vst [vmem:[%s1083_s23 + $0x20] sm:$0xff] %v418_v12  ;;  %576 = vst [vmem:[%s1083_s23 + $0xa0] sm:$0xff] %v498_v13 }
 0x12f   : > { %v422_v16 = vpop.f32.mrb[10].mxu0  ;;  %v502_v17 = vpop.f32.mrb[10].mxu1 }
 0x130   : > { %v423_v18 = vadd.f32 %v1078_v49, %v422_v16  ;;  %v503_v19 = vadd.f32 %v1078_v49, %v502_v17  ;;  %v424_v20 = vpop.f32.mrb[11].mxu0  ;;  %v504_v21 = vpop.f32.mrb[11].mxu1 }
 0x132   : > { %561 = vst [vmem:[%s1083_s23 + $0x28] sm:$0xff] %v423_v18  ;;  %577 = vst [vmem:[%s1083_s23 + $0xa8] sm:$0xff] %v503_v19 }
 0x133   : > { %v427_v22 = vpop.f32.mrb[12].mxu0  ;;  %v507_v23 = vpop.f32.mrb[12].mxu1 }
 0x134   : > { %v428_v24 = vadd.f32 %v1078_v49, %v427_v22  ;;  %v508_v25 = vadd.f32 %v1078_v49, %v507_v23  ;;  %v429_v26 = vpop.f32.mrb[13].mxu0  ;;  %v509_v27 = vpop.f32.mrb[13].mxu1 }
 0x136   : > { %562 = vst [vmem:[%s1083_s23 + $0x30] sm:$0xff] %v428_v24  ;;  %578 = vst [vmem:[%s1083_s23 + $0xb0] sm:$0xff] %v508_v25 }
 0x137   : > { %v432_v28 = vpop.f32.mrb[14].mxu0  ;;  %v512_v29 = vpop.f32.mrb[14].mxu1 }
 0x138   : > { %v433_v30 = vadd.f32 %v1078_v49, %v432_v28  ;;  %v513_v31 = vadd.f32 %v1078_v49, %v512_v29  ;;  %v434_v32 = vpop.f32.mrb[15].mxu0  ;;  %v514_v33 = vpop.f32.mrb[15].mxu1 }
 0x13a   : > { %563 = vst [vmem:[%s1083_s23 + $0x38] sm:$0xff] %v433_v30  ;;  %579 = vst [vmem:[%s1083_s23 + $0xb8] sm:$0xff] %v513_v31 }
 0x13b   : > { %v437_v34 = vpop.f32.mrb[16].mxu0  ;;  %v517_v35 = vpop.f32.mrb[16].mxu1 }
 0x13c   : > { %v438_v36 = vadd.f32 %v1078_v49, %v437_v34  ;;  %v518_v37 = vadd.f32 %v1078_v49, %v517_v35  ;;  %v439_v38 = vpop.f32.mrb[17].mxu0  ;;  %v519_v39 = vpop.f32.mrb[17].mxu1 }
 0x13e   : > { %564 = vst [vmem:[%s1083_s23 + $0x40] sm:$0xff] %v438_v36  ;;  %580 = vst [vmem:[%s1083_s23 + $0xc0] sm:$0xff] %v518_v37 }
 0x13f   : > { %v442_v40 = vpop.f32.mrb[18].mxu0  ;;  %v522_v41 = vpop.f32.mrb[18].mxu1 }
 0x140   : > { %v443_v42 = vadd.f32 %v1078_v49, %v442_v40  ;;  %v523_v43 = vadd.f32 %v1078_v49, %v522_v41  ;;  %v444_v44 = vpop.f32.mrb[19].mxu0  ;;  %v524_v45 = vpop.f32.mrb[19].mxu1 }
 0x142   : > { %565 = vst [vmem:[%s1083_s23 + $0x48] sm:$0xff] %v443_v42  ;;  %581 = vst [vmem:[%s1083_s23 + $0xc8] sm:$0xff] %v523_v43 }
 0x143   : > { %v447_v46 = vpop.f32.mrb[20].mxu0  ;;  %v527_v47 = vpop.f32.mrb[20].mxu1 }
 0x144   : > { %v448_v48 = vadd.f32 %v1078_v49, %v447_v46  ;;  %v528_v50 = vadd.f32 %v1078_v49, %v527_v47  ;;  %v449_v51 = vpop.f32.mrb[21].mxu0  ;;  %v529_v52 = vpop.f32.mrb[21].mxu1 }
 0x146   : > { %566 = vst [vmem:[%s1083_s23 + $0x50] sm:$0xff] %v448_v48  ;;  %582 = vst [vmem:[%s1083_s23 + $0xd0] sm:$0xff] %v528_v50 }
 0x147   : > { %v452_v53 = vpop.f32.mrb[22].mxu0  ;;  %v532_v54 = vpop.f32.mrb[22].mxu1 }
 0x148   : > { %v453_v55 = vadd.f32 %v1078_v49, %v452_v53  ;;  %v533_v56 = vadd.f32 %v1078_v49, %v532_v54  ;;  %v454_v57 = vpop.f32.mrb[23].mxu0  ;;  %v534_v58 = vpop.f32.mrb[23].mxu1 }
 0x14a   : > { %567 = vst [vmem:[%s1083_s23 + $0x58] sm:$0xff] %v453_v55  ;;  %583 = vst [vmem:[%s1083_s23 + $0xd8] sm:$0xff] %v533_v56 }
 0x14b   : > { %v457_v59 = vpop.f32.mrb[24].mxu0  ;;  %v537_v60 = vpop.f32.mrb[24].mxu1 }
 0x14c   : > { %v458_v61 = vadd.f32 %v1078_v49, %v457_v59  ;;  %v538_v62 = vadd.f32 %v1078_v49, %v537_v60  ;;  %v459_v63 = vpop.f32.mrb[25].mxu0  ;;  %v539_v0 = vpop.f32.mrb[25].mxu1 }
 0x14e   : > { %568 = vst [vmem:[%s1083_s23 + $0x60] sm:$0xff] %v458_v61  ;;  %584 = vst [vmem:[%s1083_s23 + $0xe0] sm:$0xff] %v538_v62 }
 0x14f   : > { %v462_v1 = vpop.f32.mrb[26].mxu0  ;;  %v542_v2 = vpop.f32.mrb[26].mxu1 }
 0x150   : > { %v463_v3 = vadd.f32 %v1078_v49, %v462_v1  ;;  %v543_v4 = vadd.f32 %v1078_v49, %v542_v2  ;;  %v464_v5 = vpop.f32.mrb[27].mxu0  ;;  %v544_v6 = vpop.f32.mrb[27].mxu1 }
 0x152   : > { %569 = vst [vmem:[%s1083_s23 + $0x68] sm:$0xff] %v463_v3  ;;  %585 = vst [vmem:[%s1083_s23 + $0xe8] sm:$0xff] %v543_v4 }
 0x153   : > { %v467_v7 = vpop.f32.mrb[28].mxu0  ;;  %v547_v8 = vpop.f32.mrb[28].mxu1 }
 0x154   : > { %v468_v9 = vadd.f32 %v1078_v49, %v467_v7  ;;  %v548_v10 = vadd.f32 %v1078_v49, %v547_v8  ;;  %v469_v11 = vpop.f32.mrb[29].mxu0  ;;  %v549_v12 = vpop.f32.mrb[29].mxu1 }
 0x156   : > { %570 = vst [vmem:[%s1083_s23 + $0x70] sm:$0xff] %v468_v9  ;;  %586 = vst [vmem:[%s1083_s23 + $0xf0] sm:$0xff] %v548_v10 }
 0x157   : > { %v472_v13 = vpop.f32.mrb[30].mxu0  ;;  %v552_v14 = vpop.f32.mrb[30].mxu1 }
 0x158   : > { %v473_v15 = vadd.f32 %v1078_v49, %v472_v13  ;;  %v553_v16 = vadd.f32 %v1078_v49, %v552_v14  ;;  %v474_v17 = vpop.f32.mrb[31].mxu0  ;;  %v554_v18 = vpop.f32.mrb[31].mxu1 }
 0x15a   : > { %571 = vst [vmem:[%s1083_s23 + $0x78] sm:$0xff] %v473_v15  ;;  %587 = vst [vmem:[%s1083_s23 + $0xf8] sm:$0xff] %v553_v16 }
 0x15b PF: > { %s13_s14 = sadd.s32 1, %s833_s14   ;;  %s1162_s12 = smov %s829_s13 }
 0x15c   : > { %p10_p5 = scmp.ge.s32.totalorder %s13_s14, 7   ;;  %s1163_s13 = smov %s1165_s15 }
 0x15e   :  { %12 = sbr.rel (!%p10_p5) target bundleno = 2 (0x2), region = 68 }

// kernel: cnn_autoencoder_forward.9
= control target key start
LH: loop header
LB: loop body
LE: loop exit
PB: predicated region body
PF: predicated region fallthrough
CT: control target
= control target key end

     0   :  { %s1176_s12 = smov 0   ;;  %s1178_s13 = smov 0   ;;  %s1478_s0 = inlined_call_operand.vmem [shape: f32[1792,256], index: 0, kind: input, shape index: {}]   ;;  %s1479_s1 = inlined_call_operand.vmem [shape: f32[256,128], index: 1, kind: input, shape index: {}]   ;;  %s1480_s2 = inlined_call_operand.vmem [shape: f32[1,128], index: 2, kind: input, shape index: {}]   ;;  %s1481_s3 = inlined_call_operand.vmem [shape: f32[1792,128], index: 3, kind: output, shape index: {}]  }
   0x1   :  { %s1180_s14 = smov 0  }
   0x2 LB: > { %s25_s15 = sadd.s32 1, %s1149_s13  ;;  %p888_p0 = scmp.ge.s32.totalorder %s1153_s14, 1  ;;  %s1153_s14 = sphi %s1180_s14, %s13_s14   ;;  %s1149_s13 = sphi %s1178_s13, %s1483_s13   ;;  %s1145_s12 = sphi %s1176_s12, %s1482_s12  }
   0x3   : > { %p27_p1 = scmp.ge.s32.totalorder %s25_s15, 7  ;;  %p170_p2 = scmp.lt.s32.totalorder %s1153_s14, 8 }
   0x5   : > { %s1485_s15 = smov (%p27_p1, %s25_s15), 0  ;;  %p171_p3 = pnand %p888_p0, %p170_p2 }
   0x6   : > { %v292_v0 = vld [vmem:[%s1479_s1] sm:$0xff] (!%p171_p3)  ;;  %v293_v1 = vld [vmem:[%s1479_s1 + $0x8] sm:$0xff] (!%p171_p3)  ;;  %v294_v2 = vld [vmem:[%s1479_s1 + $0x10] sm:$0xff] (!%p171_p3)  ;;  %s889_s22 = sshll.u32 (!%p171_p3), %s1145_s12, 5  ;;  %v1155_v3 = vmov (!%p171_p3), 0.0|0.0  }
   0x7   : > { %174 = sbr.rel (%p171_p3) target bundleno = 380 (0x17c), region = 32  ;;  %898 = vmatprep.subr.bf16.mxu0 (!%p171_p3), %v1155_v3  ;;  %946 = vmatprep.subr.bf16.mxu1 (!%p171_p3), %v1155_v3  ;;  %v899_v4 = vpack.c.bf16 (!%p171_p3), %v293_v1, %v292_v0  ;;  %v295_v5 = vld [vmem:[%s1479_s1 + $0x18] sm:$0xff] (!%p171_p3)  ;;  %p206_p4 = scmp.lt.s32.totalorder (!%p171_p3), %s889_s22, 223  ;;  %v296_v7 = vld [vmem:[%s1479_s1 + $0x20] sm:$0xff] (!%p171_p3)  ;;  %v297_v8 = vld [vmem:[%s1479_s1 + $0x28] sm:$0xff] (!%p171_p3) }
   0x8   : > { %v902_v6 = vpack.c.bf16 (!%p171_p3), %v295_v5, %v294_v2  ;;  %v905_v9 = vpack.c.bf16 (!%p171_p3), %v297_v8, %v296_v7  ;;  %v298_v10 = vld [vmem:[%s1479_s1 + $0x30] sm:$0xff] (!%p171_p3)  ;;  %v299_v11 = vld [vmem:[%s1479_s1 + $0x38] sm:$0xff] (!%p171_p3)  ;;  %v300_v15 = vld [vmem:[%s1479_s1 + $0x40] sm:$0xff] (!%p171_p3) }
   0x9   : > { %900 = vmatpush1.bf16.msra.mxu0 (!%p171_p3), %v899_v4  ;;  %962 = vmatpush1.bf16.msra.mxu1 (!%p171_p3), %v899_v4  ;;  %v908_v13 = vpack.c.bf16 (!%p171_p3), %v299_v11, %v298_v10  ;;  %v301_v16 = vld [vmem:[%s1479_s1 + $0x48] sm:$0xff] (!%p171_p3)  ;;  %v302_v18 = vld [vmem:[%s1479_s1 + $0x50] sm:$0xff] (!%p171_p3)  ;;  %v303_v19 = vld [vmem:[%s1479_s1 + $0x58] sm:$0xff] (!%p171_p3) }
   0xa   : > { %901 = vmatprep.subr.bf16.mxu0 (!%p171_p3), %v1155_v3  ;;  %947 = vmatprep.subr.bf16.mxu1 (!%p171_p3), %v1155_v3  ;;  %v911_v17 = vpack.c.bf16 (!%p171_p3), %v301_v16, %v300_v15  ;;  %v914_v20 = vpack.c.bf16 (!%p171_p3), %v303_v19, %v302_v18  ;;  %v304_v21 = vld [vmem:[%s1479_s1 + $0x60] sm:$0xff] (!%p171_p3)  ;;  %v305_v22 = vld [vmem:[%s1479_s1 + $0x68] sm:$0xff] (!%p171_p3)  ;;  %v306_v24 = vld [vmem:[%s1479_s1 + $0x70] sm:$0xff] (!%p171_p3) }
   0xb   : > { %v917_v23 = vpack.c.bf16 (!%p171_p3), %v305_v22, %v304_v21  ;;  %v307_v25 = vld [vmem:[%s1479_s1 + $0x78] sm:$0xff] (!%p171_p3)  ;;  %v308_v27 = vld [vmem:[%s1479_s1 + $0x80] sm:$0xff] (!%p171_p3)  ;;  %v309_v28 = vld [vmem:[%s1479_s1 + $0x88] sm:$0xff] (!%p171_p3) }
   0xc   : > { %v920_v26 = vpack.c.bf16 (!%p171_p3), %v307_v25, %v306_v24  ;;  %v923_v29 = vpack.c.bf16 (!%p171_p3), %v309_v28, %v308_v27  ;;  %v310_v30 = vld [vmem:[%s1479_s1 + $0x90] sm:$0xff] (!%p171_p3)  ;;  %v311_v31 = vld [vmem:[%s1479_s1 + $0x98] sm:$0xff] (!%p171_p3)  ;;  %v312_v33 = vld [vmem:[%s1479_s1 + $0xa0] sm:$0xff] (!%p171_p3) }
   0xd   : > { %903 = vmatpush1.bf16.msra.mxu0 (!%p171_p3), %v902_v6  ;;  %963 = vmatpush1.bf16.msra.mxu1 (!%p171_p3), %v902_v6  ;;  %v926_v32 = vpack.c.bf16 (!%p171_p3), %v311_v31, %v310_v30  ;;  %v313_v34 = vld [vmem:[%s1479_s1 + $0xa8] sm:$0xff] (!%p171_p3)  ;;  %v314_v36 = vld [vmem:[%s1479_s1 + $0xb0] sm:$0xff] (!%p171_p3)  ;;  %v315_v37 = vld [vmem:[%s1479_s1 + $0xb8] sm:$0xff] (!%p171_p3) }
   0xe   : > { %s1487_s22 = smov (!%p206_p4, %s889_s22), 223  ;;  %904 = vmatprep.subr.bf16.mxu0 %v1155_v3  ;;  %948 = vmatprep.subr.bf16.mxu1 %v1155_v3  ;;  %v929_v35 = vpack.c.bf16 %v313_v34, %v312_v33  ;;  %v932_v38 = vpack.c.bf16 %v315_v37, %v314_v36  ;;  %v316_v39 = vld [vmem:[%s1479_s1 + $0xc0] sm:$0xff]  ;;  %v317_v40 = vld [vmem:[%s1479_s1 + $0xc8] sm:$0xff]  ;;  %v318_v42 = vld [vmem:[%s1479_s1 + $0xd0] sm:$0xff] }
   0xf   : > { %s897_s29 = sshll.u32 %s1487_s22, 4  ;;  %v935_v41 = vpack.c.bf16 %v317_v40, %v316_v39  ;;  %v319_v43 = vld [vmem:[%s1479_s1 + $0xd8] sm:$0xff]  ;;  %v320_v45 = vld [vmem:[%s1479_s1 + $0xe0] sm:$0xff]  ;;  %v321_v46 = vld [vmem:[%s1479_s1 + $0xe8] sm:$0xff] }
  0x10   : > { %s1222_s5 = scalar_lea.vmem %s1478_s0, %s897_s29  ;;  %v938_v44 = vpack.c.bf16 %v319_v43, %v318_v42  ;;  %v941_v47 = vpack.c.bf16 %v321_v46, %v320_v45  ;;  %v322_v48 = vld [vmem:[%s1479_s1 + $0xf0] sm:$0xff]  ;;  %v323_v49 = vld [vmem:[%s1479_s1 + $0xf8] sm:$0xff] }
  0x11   : > { %v229_v12 = vld [vmem:[%s1222_s5 + $0x8] sm:$0xff]  ;;  %906 = vmatpush1.bf16.msra.mxu0 %v905_v9  ;;  %964 = vmatpush1.bf16.msra.mxu1 %v905_v9  ;;  %v944_v50 = vpack.c.bf16 %v323_v49, %v322_v48  ;;  %v228_v51 = vld [vmem:[%s1222_s5] sm:$0xff]  ;;  %v231_v53 = vld [vmem:[%s1222_s5 + $0x18] sm:$0xff] }
  0x12   : > { %v261_v14 = vld [vmem:[%s1222_s5 + $0x108] sm:$0xff]  ;;  %907 = vmatprep.subr.bf16.mxu0 %v1155_v3  ;;  %949 = vmatprep.subr.bf16.mxu1 %v1155_v3  ;;  %v260_v52 = vld [vmem:[%s1222_s5 + $0x100] sm:$0xff]  ;;  %v263_v54 = vld [vmem:[%s1222_s5 + $0x118] sm:$0xff] }
  0x13   : > { %395 = vmatprep.mubr.f32.mxu0 %v229_v12  ;;  %475 = vmatprep.mubr.f32.mxu1 %v261_v14  ;;  %v230_v55 = vld [vmem:[%s1222_s5 + $0x10] sm:$0xff]  ;;  %v233_v57 = vld [vmem:[%s1222_s5 + $0x28] sm:$0xff]  ;;  %v232_v59 = vld [vmem:[%s1222_s5 + $0x20] sm:$0xff] }
  0x14   : > { %v262_v56 = vld [vmem:[%s1222_s5 + $0x110] sm:$0xff]  ;;  %v265_v58 = vld [vmem:[%s1222_s5 + $0x128] sm:$0xff]  ;;  %v264_v60 = vld [vmem:[%s1222_s5 + $0x120] sm:$0xff] }
  0x15   : > { %909 = vmatpush1.bf16.msra.mxu0 %v908_v13  ;;  %965 = vmatpush1.bf16.msra.mxu1 %v908_v13  ;;  %v235_v61 = vld [vmem:[%s1222_s5 + $0x38] sm:$0xff]  ;;  %v234_v63 = vld [vmem:[%s1222_s5 + $0x30] sm:$0xff]  ;;  %v237_v1 = vld [vmem:[%s1222_s5 + $0x48] sm:$0xff] }
  0x16   : > { %910 = vmatprep.subr.bf16.mxu0 %v1155_v3  ;;  %950 = vmatprep.subr.bf16.mxu1 %v1155_v3  ;;  %v267_v62 = vld [vmem:[%s1222_s5 + $0x138] sm:$0xff]  ;;  %v266_v0 = vld [vmem:[%s1222_s5 + $0x130] sm:$0xff]  ;;  %v269_v2 = vld [vmem:[%s1222_s5 + $0x148] sm:$0xff] }
  0x17   : > { %v268_v4 = vld [vmem:[%s1222_s5 + $0x140] sm:$0xff]  ;;  %v239_v5 = vld [vmem:[%s1222_s5 + $0x58] sm:$0xff]  ;;  %v238_v7 = vld [vmem:[%s1222_s5 + $0x50] sm:$0xff] }
  0x18   : > { %v271_v6 = vld [vmem:[%s1222_s5 + $0x158] sm:$0xff]  ;;  %v270_v8 = vld [vmem:[%s1222_s5 + $0x150] sm:$0xff]  ;;  %v241_v9 = vld [vmem:[%s1222_s5 + $0x68] sm:$0xff] }
  0x19   : > { %912 = vmatpush1.bf16.msra.mxu0 %v911_v17  ;;  %966 = vmatpush1.bf16.msra.mxu1 %v911_v17  ;;  %v273_v10 = vld [vmem:[%s1222_s5 + $0x168] sm:$0xff]  ;;  %v240_v11 = vld [vmem:[%s1222_s5 + $0x60] sm:$0xff]  ;;  %v243_v13 = vld [vmem:[%s1222_s5 + $0x78] sm:$0xff] }
  0x1a   : > { %913 = vmatprep.subr.bf16.mxu0 %v1155_v3  ;;  %951 = vmatprep.subr.bf16.mxu1 %v1155_v3  ;;  %v272_v12 = vld [vmem:[%s1222_s5 + $0x160] sm:$0xff]  ;;  %v275_v14 = vld [vmem:[%s1222_s5 + $0x178] sm:$0xff]  ;;  %v242_v15 = vld [vmem:[%s1222_s5 + $0x70] sm:$0xff] }
  0x1b   : > { %v274_v16 = vld [vmem:[%s1222_s5 + $0x170] sm:$0xff]  ;;  %v245_v17 = vld [vmem:[%s1222_s5 + $0x88] sm:$0xff]  ;;  %v244_v19 = vld [vmem:[%s1222_s5 + $0x80] sm:$0xff] }
  0x1c   : > { %v277_v18 = vld [vmem:[%s1222_s5 + $0x188] sm:$0xff]  ;;  %v247_v21 = vld [vmem:[%s1222_s5 + $0x98] sm:$0xff]  ;;  %v278_v24 = vld [vmem:[%s1222_s5 + $0x190] sm:$0xff] }
  0x1d   : > { %915 = vmatpush1.bf16.msra.mxu0 %v914_v20  ;;  %967 = vmatpush1.bf16.msra.mxu1 %v914_v20  ;;  %v276_v20 = vld [vmem:[%s1222_s5 + $0x180] sm:$0xff]  ;;  %v279_v22 = vld [vmem:[%s1222_s5 + $0x198] sm:$0xff]  ;;  %v249_v25 = vld [vmem:[%s1222_s5 + $0xa8] sm:$0xff] }
  0x1e   : > { %916 = vmatprep.subr.bf16.mxu0 %v1155_v3  ;;  %952 = vmatprep.subr.bf16.mxu1 %v1155_v3  ;;  %v248_v27 = vld [vmem:[%s1222_s5 + $0xa0] sm:$0xff]  ;;  %v283_v30 = vld [vmem:[%s1222_s5 + $0x1b8] sm:$0xff]  ;;  %v250_v31 = vld [vmem:[%s1222_s5 + $0xb0] sm:$0xff] }
  0x1f   : > { %v280_v28 = vld [vmem:[%s1222_s5 + $0x1a0] sm:$0xff]  ;;  %v253_v33 = vld [vmem:[%s1222_s5 + $0xc8] sm:$0xff]  ;;  %v255_v37 = vld [vmem:[%s1222_s5 + $0xd8] sm:$0xff] }
  0x20   : > { %v285_v34 = vld [vmem:[%s1222_s5 + $0x1c8] sm:$0xff]  ;;  %v284_v36 = vld [vmem:[%s1222_s5 + $0x1c0] sm:$0xff]  ;;  %v254_v39 = vld [vmem:[%s1222_s5 + $0xd0] sm:$0xff] }
  0x21   : > { %918 = vmatpush1.bf16.msra.mxu0 %v917_v23  ;;  %968 = vmatpush1.bf16.msra.mxu1 %v917_v23  ;;  %v246_v23 = vld [vmem:[%s1222_s5 + $0x90] sm:$0xff]  ;;  %v289_v42 = vld [vmem:[%s1222_s5 + $0x1e8] sm:$0xff]  ;;  %v256_v43 = vld [vmem:[%s1222_s5 + $0xe0] sm:$0xff] }
  0x22   : > { %919 = vmatprep.subr.bf16.mxu0 %v1155_v3  ;;  %953 = vmatprep.subr.bf16.mxu1 %v1155_v3  ;;  %v286_v40 = vld [vmem:[%s1222_s5 + $0x1d0] sm:$0xff]  ;;  %v259_v45 = vld [vmem:[%s1222_s5 + $0xf8] sm:$0xff]  ;;  %v1397_v49 = vld [vmem:[%s1480_s2] ss:$0 sm:$0xff] }
  0x23   : > { %v291_v46 = vld [vmem:[%s1222_s5 + $0x1f8] sm:$0xff]  ;;  %v290_v48 = vld [vmem:[%s1222_s5 + $0x1f0] sm:$0xff] }
  0x25   : > { %921 = vmatpush1.bf16.msra.mxu0 %v920_v26  ;;  %969 = vmatpush1.bf16.msra.mxu1 %v920_v26  ;;  %v281_v26 = vld [vmem:[%s1222_s5 + $0x1a8] sm:$0xff] }
  0x26   : > { %922 = vmatprep.subr.bf16.mxu0 %v1155_v3  ;;  %954 = vmatprep.subr.bf16.mxu1 %v1155_v3 }
  0x29   : > { %924 = vmatpush1.bf16.msra.mxu0 %v923_v29  ;;  %970 = vmatpush1.bf16.msra.mxu1 %v923_v29  ;;  %v251_v29 = vld [vmem:[%s1222_s5 + $0xb8] sm:$0xff] }
  0x2a   : > { %925 = vmatprep.subr.bf16.mxu0 %v1155_v3  ;;  %955 = vmatprep.subr.bf16.mxu1 %v1155_v3 }
  0x2d   : > { %927 = vmatpush1.bf16.msra.mxu0 %v926_v32  ;;  %971 = vmatpush1.bf16.msra.mxu1 %v926_v32  ;;  %v282_v32 = vld [vmem:[%s1222_s5 + $0x1b0] sm:$0xff] }
  0x2e   : > { %928 = vmatprep.subr.bf16.mxu0 %v1155_v3  ;;  %956 = vmatprep.subr.bf16.mxu1 %v1155_v3 }
  0x31   : > { %930 = vmatpush1.bf16.msra.mxu0 %v929_v35  ;;  %972 = vmatpush1.bf16.msra.mxu1 %v929_v35  ;;  %v252_v35 = vld [vmem:[%s1222_s5 + $0xc0] sm:$0xff] }
  0x32   : > { %931 = vmatprep.subr.bf16.mxu0 %v1155_v3  ;;  %957 = vmatprep.subr.bf16.mxu1 %v1155_v3 }
  0x35   : > { %933 = vmatpush1.bf16.msra.mxu0 %v932_v38  ;;  %973 = vmatpush1.bf16.msra.mxu1 %v932_v38  ;;  %v287_v38 = vld [vmem:[%s1222_s5 + $0x1d8] sm:$0xff] }
  0x36   : > { %934 = vmatprep.subr.bf16.mxu0 %v1155_v3  ;;  %958 = vmatprep.subr.bf16.mxu1 %v1155_v3 }
  0x39   : > { %936 = vmatpush1.bf16.msra.mxu0 %v935_v41  ;;  %974 = vmatpush1.bf16.msra.mxu1 %v935_v41  ;;  %v257_v41 = vld [vmem:[%s1222_s5 + $0xe8] sm:$0xff] }
  0x3a   : > { %937 = vmatprep.subr.bf16.mxu0 %v1155_v3  ;;  %959 = vmatprep.subr.bf16.mxu1 %v1155_v3 }
  0x3d   : > { %939 = vmatpush1.bf16.msra.mxu0 %v938_v44  ;;  %975 = vmatpush1.bf16.msra.mxu1 %v938_v44  ;;  %v288_v44 = vld [vmem:[%s1222_s5 + $0x1e0] sm:$0xff] }
  0x3e   : > { %940 = vmatprep.subr.bf16.mxu0 %v1155_v3  ;;  %960 = vmatprep.subr.bf16.mxu1 %v1155_v3 }
  0x41   : > { %942 = vmatpush1.bf16.msra.mxu0 %v941_v47  ;;  %976 = vmatpush1.bf16.msra.mxu1 %v941_v47  ;;  %v258_v47 = vld [vmem:[%s1222_s5 + $0xf0] sm:$0xff] }
  0x42   : > { %943 = vmatprep.subr.bf16.mxu0 %v1155_v3  ;;  %961 = vmatprep.subr.bf16.mxu1 %v1155_v3  ;;  %v236_v3 = vld [vmem:[%s1222_s5 + $0x40] sm:$0xff]  ;;  %s893_s5 = sshll.u32 %s1487_s22, 3 }
  0x43   : > { %s1417_s22 = scalar_lea.vmem %s1481_s3, %s893_s5 }
  0x45   : > { %945 = vmatpush1.bf16.msra.mxu0 %v944_v50  ;;  %977 = vmatpush1.bf16.msra.mxu1 %v944_v50 }
  0x48   : > { %396 = vmatmul.mubr.f32.vlgmr.msra.gmra.mrb[0].mxu0 %v228_v51  ;;  %476 = vmatmul.mubr.f32.vlgmr.msra.gmra.mrb[0].mxu1 %v260_v52 }
  0x49   : > { %400 = vmatprep.mubr.f32.mxu0 %v231_v53  ;;  %480 = vmatprep.mubr.f32.mxu1 %v263_v54 }
  0x4c   : > { %401 = vmatmul.mubr.f32.gmra.mrb[2].mxu0 %v230_v55  ;;  %481 = vmatmul.mubr.f32.gmra.mrb[2].mxu1 %v262_v56 }
  0x4d   : > { %405 = vmatprep.mubr.f32.mxu0 %v233_v57  ;;  %485 = vmatprep.mubr.f32.mxu1 %v265_v58 }
  0x50   : > { %406 = vmatmul.mubr.f32.gmra.mrb[4].mxu0 %v232_v59  ;;  %486 = vmatmul.mubr.f32.gmra.mrb[4].mxu1 %v264_v60 }
  0x51   : > { %410 = vmatprep.mubr.f32.mxu0 %v235_v61  ;;  %490 = vmatprep.mubr.f32.mxu1 %v267_v62 }
  0x54   : > { %411 = vmatmul.mubr.f32.gmra.mrb[6].mxu0 %v234_v63  ;;  %491 = vmatmul.mubr.f32.gmra.mrb[6].mxu1 %v266_v0 }
  0x55   : > { %415 = vmatprep.mubr.f32.mxu0 %v237_v1  ;;  %495 = vmatprep.mubr.f32.mxu1 %v269_v2 }
  0x58   : > { %416 = vmatmul.mubr.f32.gmra.mrb[8].mxu0 %v236_v3  ;;  %496 = vmatmul.mubr.f32.gmra.mrb[8].mxu1 %v268_v4 }
  0x59   : > { %420 = vmatprep.mubr.f32.mxu0 %v239_v5  ;;  %500 = vmatprep.mubr.f32.mxu1 %v271_v6 }
  0x5c   : > { %421 = vmatmul.mubr.f32.gmra.mrb[10].mxu0 %v238_v7  ;;  %501 = vmatmul.mubr.f32.gmra.mrb[10].mxu1 %v270_v8 }
  0x5d   : > { %425 = vmatprep.mubr.f32.mxu0 %v241_v9  ;;  %505 = vmatprep.mubr.f32.mxu1 %v273_v10 }
  0x60   : > { %426 = vmatmul.mubr.f32.gmra.mrb[12].mxu0 %v240_v11  ;;  %506 = vmatmul.mubr.f32.gmra.mrb[12].mxu1 %v272_v12 }
  0x61   : > { %430 = vmatprep.mubr.f32.mxu0 %v243_v13  ;;  %510 = vmatprep.mubr.f32.mxu1 %v275_v14 }
  0x64   : > { %431 = vmatmul.mubr.f32.gmra.mrb[14].mxu0 %v242_v15  ;;  %511 = vmatmul.mubr.f32.gmra.mrb[14].mxu1 %v274_v16 }
  0x65   : > { %435 = vmatprep.mubr.f32.mxu0 %v245_v17  ;;  %515 = vmatprep.mubr.f32.mxu1 %v277_v18 }
  0x68   : > { %436 = vmatmul.mubr.f32.gmra.mrb[16].mxu0 %v244_v19  ;;  %516 = vmatmul.mubr.f32.gmra.mrb[16].mxu1 %v276_v20 }
  0x69   : > { %440 = vmatprep.mubr.f32.mxu0 %v247_v21  ;;  %520 = vmatprep.mubr.f32.mxu1 %v279_v22 }
  0x6c   : > { %441 = vmatmul.mubr.f32.gmra.mrb[18].mxu0 %v246_v23  ;;  %521 = vmatmul.mubr.f32.gmra.mrb[18].mxu1 %v278_v24 }
  0x6d   : > { %445 = vmatprep.mubr.f32.mxu0 %v249_v25  ;;  %525 = vmatprep.mubr.f32.mxu1 %v281_v26 }
  0x70   : > { %446 = vmatmul.mubr.f32.gmra.mrb[20].mxu0 %v248_v27  ;;  %526 = vmatmul.mubr.f32.gmra.mrb[20].mxu1 %v280_v28 }
  0x71   : > { %450 = vmatprep.mubr.f32.mxu0 %v251_v29  ;;  %530 = vmatprep.mubr.f32.mxu1 %v283_v30 }
  0x74   : > { %451 = vmatmul.mubr.f32.gmra.mrb[22].mxu0 %v250_v31  ;;  %531 = vmatmul.mubr.f32.gmra.mrb[22].mxu1 %v282_v32 }
  0x75   : > { %455 = vmatprep.mubr.f32.mxu0 %v253_v33  ;;  %535 = vmatprep.mubr.f32.mxu1 %v285_v34 }
  0x78   : > { %456 = vmatmul.mubr.f32.gmra.mrb[24].mxu0 %v252_v35  ;;  %536 = vmatmul.mubr.f32.gmra.mrb[24].mxu1 %v284_v36 }
  0x79   : > { %460 = vmatprep.mubr.f32.mxu0 %v255_v37  ;;  %540 = vmatprep.mubr.f32.mxu1 %v287_v38 }
  0x7c   : > { %461 = vmatmul.mubr.f32.gmra.mrb[26].mxu0 %v254_v39  ;;  %541 = vmatmul.mubr.f32.gmra.mrb[26].mxu1 %v286_v40 }
  0x7d   : > { %465 = vmatprep.mubr.f32.mxu0 %v257_v41  ;;  %545 = vmatprep.mubr.f32.mxu1 %v289_v42 }
  0x80   : > { %466 = vmatmul.mubr.f32.gmra.mrb[28].mxu0 %v256_v43  ;;  %546 = vmatmul.mubr.f32.gmra.mrb[28].mxu1 %v288_v44 }
  0x81   : > { %470 = vmatprep.mubr.f32.mxu0 %v259_v45  ;;  %550 = vmatprep.mubr.f32.mxu1 %v291_v46 }
  0x84   : > { %471 = vmatmul.mubr.f32.gmra.mrb[30].mxu0 %v258_v47  ;;  %551 = vmatmul.mubr.f32.gmra.mrb[30].mxu1 %v290_v48 }
 0x11b   : > { %v397_v50 = vpop.f32.mrb[0].mxu0  ;;  %v477_v51 = vpop.f32.mrb[0].mxu1 }
 0x11c   : > { %v398_v52 = vadd.f32 %v1397_v49, %v397_v50  ;;  %v478_v53 = vadd.f32 %v1397_v49, %v477_v51  ;;  %v399_v54 = vpop.f32.mrb[1].mxu0  ;;  %v479_v55 = vpop.f32.mrb[1].mxu1 }
 0x11e   : > { %v556_v56 = vsub.f32 0.0, %v398_v52  ;;  %v572_v57 = vsub.f32 0.0, %v478_v53 }
 0x11f   : > { %v402_v58 = vpop.f32.mrb[2].mxu0  ;;  %v482_v59 = vpop.f32.mrb[2].mxu1 }
 0x120   : > { %v588_v60 = vmul.f32 1.442695, %v556_v56  ;;  %v620_v61 = vmul.f32 1.442695, %v572_v57  ;;  %v403_v62 = vadd.f32 %v1397_v49, %v402_v58  ;;  %v483_v63 = vadd.f32 %v1397_v49, %v482_v59  ;;  %v404_v0 = vpop.f32.mrb[3].mxu0  ;;  %v484_v1 = vpop.f32.mrb[3].mxu1 }
 0x122   : > { %1003 = vpow2.f32 %v588_v60  ;;  %v557_v2 = vsub.f32 0.0, %v403_v62  ;;  %v573_v3 = vsub.f32 0.0, %v483_v63 }
 0x123   : > { %1005 = vpow2.f32 %v620_v61  ;;  %v407_v4 = vpop.f32.mrb[4].mxu0  ;;  %v487_v5 = vpop.f32.mrb[4].mxu1 }
 0x124   : > { %v590_v6 = vmul.f32 1.442695, %v557_v2  ;;  %v622_v7 = vmul.f32 1.442695, %v573_v3  ;;  %v408_v8 = vadd.f32 %v1397_v49, %v407_v4  ;;  %v488_v9 = vadd.f32 %v1397_v49, %v487_v5  ;;  %v409_v10 = vpop.f32.mrb[5].mxu0  ;;  %v489_v11 = vpop.f32.mrb[5].mxu1 }
 0x126   : > { %1007 = vpow2.f32 %v590_v6  ;;  %v558_v12 = vsub.f32 0.0, %v408_v8  ;;  %v574_v13 = vsub.f32 0.0, %v488_v9 }
 0x127   : > { %1009 = vpow2.f32 %v622_v7  ;;  %v412_v14 = vpop.f32.mrb[6].mxu0  ;;  %v492_v15 = vpop.f32.mrb[6].mxu1 }
 0x128   : > { %v592_v16 = vmul.f32 1.442695, %v558_v12  ;;  %v624_v17 = vmul.f32 1.442695, %v574_v13  ;;  %v413_v18 = vadd.f32 %v1397_v49, %v412_v14  ;;  %v493_v19 = vadd.f32 %v1397_v49, %v492_v15  ;;  %v414_v20 = vpop.f32.mrb[7].mxu0  ;;  %v494_v21 = vpop.f32.mrb[7].mxu1 }
 0x12a   : > { %1011 = vpow2.f32 %v592_v16  ;;  %v559_v22 = vsub.f32 0.0, %v413_v18  ;;  %v575_v23 = vsub.f32 0.0, %v493_v19 }
 0x12b   : > { %1013 = vpow2.f32 %v624_v17  ;;  %v417_v24 = vpop.f32.mrb[8].mxu0  ;;  %v497_v25 = vpop.f32.mrb[8].mxu1 }
 0x12c   : > { %v1004_v26 = vpop.eup %1003  ;;  %v594_v27 = vmul.f32 1.442695, %v559_v22  ;;  %v418_v28 = vadd.f32 %v1397_v49, %v417_v24  ;;  %v498_v29 = vadd.f32 %v1397_v49, %v497_v25  ;;  %v419_v30 = vpop.f32.mrb[9].mxu0  ;;  %v626_v34 = vmul.f32 1.442695, %v575_v23 }
 0x12d   : > { %v499_v31 = vpop.f32.mrb[9].mxu1  ;;  %v1006_v32 = vpop.eup %1005  ;;  %v652_v33 = vadd.f32 1.0, %v1004_v26 }
 0x12e   : > { %v668_v35 = vadd.f32 1.0, %v1006_v32  ;;  %1015 = vpow2.f32 %v594_v27  ;;  %v560_v36 = vsub.f32 0.0, %v418_v28  ;;  %v576_v37 = vsub.f32 0.0, %v498_v29 }
 0x12f   : > { %1017 = vrcp.f32 %v652_v33  ;;  %v422_v38 = vpop.f32.mrb[10].mxu0  ;;  %v502_v39 = vpop.f32.mrb[10].mxu1 }
 0x130   : > { %v1008_v40 = vpop.eup %1007  ;;  %1019 = vrcp.f32 %v668_v35  ;;  %v596_v41 = vmul.f32 1.442695, %v560_v36  ;;  %v423_v42 = vadd.f32 %v1397_v49, %v422_v38  ;;  %v424_v43 = vpop.f32.mrb[11].mxu0  ;;  %v628_v47 = vmul.f32 1.442695, %v576_v37 }
 0x131   : > { %v504_v44 = vpop.f32.mrb[11].mxu1  ;;  %v1010_v45 = vpop.eup %1009  ;;  %v653_v46 = vadd.f32 1.0, %v1008_v40  ;;  %1021 = vpow2.f32 %v626_v34  ;;  %v503_v48 = vadd.f32 %v1397_v49, %v502_v39 }
 0x132   : > { %v669_v50 = vadd.f32 1.0, %v1010_v45  ;;  %1023 = vpow2.f32 %v596_v41  ;;  %v561_v51 = vsub.f32 0.0, %v423_v42 }
 0x133   : > { %1025 = vrcp.f32 %v653_v46  ;;  %v577_v52 = vsub.f32 0.0, %v503_v48  ;;  %v427_v53 = vpop.f32.mrb[12].mxu0  ;;  %v507_v54 = vpop.f32.mrb[12].mxu1 }
 0x134   : > { %v1012_v55 = vpop.eup %1011  ;;  %1027 = vrcp.f32 %v669_v50  ;;  %v598_v56 = vmul.f32 1.442695, %v561_v51  ;;  %v428_v57 = vadd.f32 %v1397_v49, %v427_v53  ;;  %v508_v58 = vadd.f32 %v1397_v49, %v507_v54  ;;  %v429_v59 = vpop.f32.mrb[13].mxu0 }
 0x135   : > { %v509_v60 = vpop.f32.mrb[13].mxu1  ;;  %v1014_v61 = vpop.eup %1013  ;;  %v654_v62 = vadd.f32 1.0, %v1012_v55  ;;  %1029 = vpow2.f32 %v628_v47  ;;  %v630_v63 = vmul.f32 1.442695, %v577_v52 }
 0x136   : > { %v670_v0 = vadd.f32 1.0, %v1014_v61  ;;  %1031 = vpow2.f32 %v598_v56  ;;  %v562_v1 = vsub.f32 0.0, %v428_v57  ;;  %v578_v2 = vsub.f32 0.0, %v508_v58 }
 0x137   : > { %1033 = vrcp.f32 %v654_v62  ;;  %v432_v3 = vpop.f32.mrb[14].mxu0  ;;  %v512_v4 = vpop.f32.mrb[14].mxu1 }
 0x138   : > { %v1016_v5 = vpop.eup %1015  ;;  %1035 = vrcp.f32 %v670_v0  ;;  %v600_v6 = vmul.f32 1.442695, %v562_v1  ;;  %v632_v7 = vmul.f32 1.442695, %v578_v2  ;;  %v433_v8 = vadd.f32 %v1397_v49, %v432_v3  ;;  %v434_v9 = vpop.f32.mrb[15].mxu0 }
 0x139   : > { %v514_v10 = vpop.f32.mrb[15].mxu1  ;;  %v1018_v11 = vpop.eup %1017  ;;  %v655_v12 = vadd.f32 1.0, %v1016_v5  ;;  %1037 = vpow2.f32 %v630_v63  ;;  %v513_v13 = vadd.f32 %v1397_v49, %v512_v4 }
 0x13a   : > { %v1020_v14 = vpop.eup %1019  ;;  %748 = vst [vmem:[%s1417_s22] sm:$0xff] %v1018_v11  ;;  %1039 = vpow2.f32 %v600_v6  ;;  %v563_v15 = vsub.f32 0.0, %v433_v8 }
 0x13b   : > { %v1022_v16 = vpop.eup %1021  ;;  %764 = vst [vmem:[%s1417_s22 + $0x80] sm:$0xff] %v1020_v14  ;;  %1041 = vrcp.f32 %v655_v12  ;;  %v579_v17 = vsub.f32 0.0, %v513_v13  ;;  %v437_v18 = vpop.f32.mrb[16].mxu0 }
 0x13c   : > { %v517_v19 = vpop.f32.mrb[16].mxu1  ;;  %v1024_v20 = vpop.eup %1023  ;;  %v671_v21 = vadd.f32 1.0, %v1022_v16  ;;  %1043 = vpow2.f32 %v632_v7  ;;  %v602_v22 = vmul.f32 1.442695, %v563_v15  ;;  %v438_v23 = vadd.f32 %v1397_v49, %v437_v18 }
 0x13d   : > { %v439_v24 = vpop.f32.mrb[17].mxu0  ;;  %v519_v25 = vpop.f32.mrb[17].mxu1  ;;  %v656_v27 = vadd.f32 1.0, %v1024_v20  ;;  %v634_v28 = vmul.f32 1.442695, %v579_v17  ;;  %v518_v29 = vadd.f32 %v1397_v49, %v517_v19 }
 0x13e   : > { %v1026_v26 = vpop.eup %1025  ;;  %1045 = vrcp.f32 %v671_v21  ;;  %v564_v31 = vsub.f32 0.0, %v438_v23 }
 0x13f   : > { %v1028_v30 = vpop.eup %1027  ;;  %749 = vst [vmem:[%s1417_s22 + $0x8] sm:$0xff] %v1026_v26  ;;  %1047 = vrcp.f32 %v656_v27  ;;  %v580_v33 = vsub.f32 0.0, %v518_v29  ;;  %v442_v34 = vpop.f32.mrb[18].mxu0 }
 0x140   : > { %v1030_v32 = vpop.eup %1029  ;;  %765 = vst [vmem:[%s1417_s22 + $0x88] sm:$0xff] %v1028_v30  ;;  %v522_v35 = vpop.f32.mrb[18].mxu1  ;;  %1049 = vpow2.f32 %v602_v22  ;;  %v604_v38 = vmul.f32 1.442695, %v564_v31  ;;  %v443_v39 = vadd.f32 %v1397_v49, %v442_v34 }
 0x141   : > { %v1032_v36 = vpop.eup %1031  ;;  %v672_v37 = vadd.f32 1.0, %v1030_v32  ;;  %v444_v40 = vpop.f32.mrb[19].mxu0  ;;  %1051 = vpow2.f32 %v634_v28  ;;  %v636_v44 = vmul.f32 1.442695, %v580_v33  ;;  %v523_v45 = vadd.f32 %v1397_v49, %v522_v35 }
 0x142   : > { %v524_v41 = vpop.f32.mrb[19].mxu1  ;;  %v1034_v42 = vpop.eup %1033  ;;  %v657_v43 = vadd.f32 1.0, %v1032_v36  ;;  %v565_v47 = vsub.f32 0.0, %v443_v39 }
 0x143   : > { %v1036_v46 = vpop.eup %1035  ;;  %750 = vst [vmem:[%s1417_s22 + $0x10] sm:$0xff] %v1034_v42  ;;  %1053 = vrcp.f32 %v672_v37  ;;  %v581_v50 = vsub.f32 0.0, %v523_v45  ;;  %v447_v51 = vpop.f32.mrb[20].mxu0 }
 0x144   : > { %v1038_v48 = vpop.eup %1037  ;;  %766 = vst [vmem:[%s1417_s22 + $0x90] sm:$0xff] %v1036_v46  ;;  %1055 = vrcp.f32 %v657_v43  ;;  %v527_v52 = vpop.f32.mrb[20].mxu1  ;;  %v606_v55 = vmul.f32 1.442695, %v565_v47  ;;  %v448_v56 = vadd.f32 %v1397_v49, %v447_v51 }
 0x145   : > { %v1040_v53 = vpop.eup %1039  ;;  %v673_v54 = vadd.f32 1.0, %v1038_v48  ;;  %1057 = vpow2.f32 %v604_v38  ;;  %v449_v57 = vpop.f32.mrb[21].mxu0  ;;  %v528_v61 = vadd.f32 %v1397_v49, %v527_v52  ;;  %v638_v63 = vmul.f32 1.442695, %v581_v50 }
 0x146   : > { %v529_v58 = vpop.f32.mrb[21].mxu1  ;;  %v1042_v59 = vpop.eup %1041  ;;  %v658_v60 = vadd.f32 1.0, %v1040_v53  ;;  %1059 = vpow2.f32 %v636_v44  ;;  %v566_v0 = vsub.f32 0.0, %v448_v56 }
 0x147   : > { %v1044_v62 = vpop.eup %1043  ;;  %751 = vst [vmem:[%s1417_s22 + $0x18] sm:$0xff] %v1042_v59  ;;  %1061 = vrcp.f32 %v673_v54  ;;  %v582_v2 = vsub.f32 0.0, %v528_v61  ;;  %v452_v3 = vpop.f32.mrb[22].mxu0 }
 0x148   : > { %1063 = vrcp.f32 %v658_v60  ;;  %v674_v1 = vadd.f32 1.0, %v1044_v62  ;;  %v532_v4 = vpop.f32.mrb[22].mxu1  ;;  %v1046_v5 = vpop.eup %1045  ;;  %v608_v6 = vmul.f32 1.442695, %v566_v0  ;;  %v453_v7 = vadd.f32 %v1397_v49, %v452_v3 }
 0x149   : > { %1065 = vpow2.f32 %v606_v55  ;;  %v533_v8 = vadd.f32 %v1397_v49, %v532_v4  ;;  %v454_v9 = vpop.f32.mrb[23].mxu0  ;;  %v534_v10 = vpop.f32.mrb[23].mxu1  ;;  %767 = vst [vmem:[%s1417_s22 + $0x98] sm:$0xff] %v1046_v5  ;;  %v640_v12 = vmul.f32 1.442695, %v582_v2 }
 0x14a   : > { %v1048_v11 = vpop.eup %1047  ;;  %1067 = vrcp.f32 %v674_v1  ;;  %v567_v14 = vsub.f32 0.0, %v453_v7 }
 0x14b   : > { %v1050_v13 = vpop.eup %1049  ;;  %752 = vst [vmem:[%s1417_s22 + $0x20] sm:$0xff] %v1048_v11  ;;  %1069 = vpow2.f32 %v638_v63  ;;  %v583_v15 = vsub.f32 0.0, %v533_v8  ;;  %v457_v18 = vpop.f32.mrb[24].mxu0 }
 0x14c   : > { %v1052_v16 = vpop.eup %1051  ;;  %v659_v17 = vadd.f32 1.0, %v1050_v13  ;;  %1071 = vpow2.f32 %v608_v6  ;;  %v537_v19 = vpop.f32.mrb[24].mxu1  ;;  %v610_v22 = vmul.f32 1.442695, %v567_v14  ;;  %v458_v26 = vadd.f32 %v1397_v49, %v457_v18 }
 0x14d   : > { %v1054_v20 = vpop.eup %1053  ;;  %v675_v21 = vadd.f32 1.0, %v1052_v16  ;;  %1073 = vpow2.f32 %v640_v12  ;;  %v642_v23 = vmul.f32 1.442695, %v583_v15  ;;  %v459_v24 = vpop.f32.mrb[25].mxu0  ;;  %v538_v27 = vadd.f32 %v1397_v49, %v537_v19 }
 0x14e   : > { %v1056_v25 = vpop.eup %1055  ;;  %768 = vst [vmem:[%s1417_s22 + $0xa0] sm:$0xff] %v1054_v20  ;;  %1075 = vrcp.f32 %v659_v17  ;;  %v539_v28 = vpop.f32.mrb[25].mxu1  ;;  %v568_v32 = vsub.f32 0.0, %v458_v26 }
 0x14f   : > { %v1058_v29 = vpop.eup %1057  ;;  %753 = vst [vmem:[%s1417_s22 + $0x28] sm:$0xff] %v1056_v25  ;;  %1077 = vrcp.f32 %v675_v21  ;;  %v584_v33 = vsub.f32 0.0, %v538_v27  ;;  %v462_v34 = vpop.f32.mrb[26].mxu0 }
 0x150   : > { %v1060_v30 = vpop.eup %1059  ;;  %v660_v31 = vadd.f32 1.0, %v1058_v29  ;;  %1079 = vpow2.f32 %v610_v22  ;;  %v542_v35 = vpop.f32.mrb[26].mxu1  ;;  %v463_v38 = vadd.f32 %v1397_v49, %v462_v34  ;;  %v612_v43 = vmul.f32 1.442695, %v568_v32 }
 0x151   : > { %v1062_v36 = vpop.eup %1061  ;;  %v676_v37 = vadd.f32 1.0, %v1060_v30  ;;  %1081 = vpow2.f32 %v642_v23  ;;  %v543_v39 = vadd.f32 %v1397_v49, %v542_v35  ;;  %v464_v40 = vpop.f32.mrb[27].mxu0  ;;  %v644_v44 = vmul.f32 1.442695, %v584_v33 }
 0x152   : > { %v544_v41 = vpop.f32.mrb[27].mxu1  ;;  %v1064_v42 = vpop.eup %1063  ;;  %769 = vst [vmem:[%s1417_s22 + $0xa8] sm:$0xff] %v1062_v36  ;;  %1083 = vrcp.f32 %v660_v31  ;;  %v569_v46 = vsub.f32 0.0, %v463_v38 }
 0x153   : > { %v1066_v45 = vpop.eup %1065  ;;  %754 = vst [vmem:[%s1417_s22 + $0x30] sm:$0xff] %v1064_v42  ;;  %1085 = vrcp.f32 %v676_v37  ;;  %v585_v47 = vsub.f32 0.0, %v543_v39  ;;  %v467_v51 = vpop.f32.mrb[28].mxu0 }
 0x154   : > { %v1068_v48 = vpop.eup %1067  ;;  %v661_v50 = vadd.f32 1.0, %v1066_v45  ;;  %1087 = vpow2.f32 %v612_v43  ;;  %v547_v52 = vpop.f32.mrb[28].mxu1  ;;  %v614_v54 = vmul.f32 1.442695, %v569_v46  ;;  %v468_v55 = vadd.f32 %v1397_v49, %v467_v51 }
 0x155   : > { %v1070_v53 = vpop.eup %1069  ;;  %770 = vst [vmem:[%s1417_s22 + $0xb0] sm:$0xff] %v1068_v48  ;;  %1089 = vpow2.f32 %v644_v44  ;;  %v469_v56 = vpop.f32.mrb[29].mxu0  ;;  %v548_v60 = vadd.f32 %v1397_v49, %v547_v52  ;;  %v646_v63 = vmul.f32 1.442695, %v585_v47 }
 0x156   : > { %v549_v57 = vpop.f32.mrb[29].mxu1  ;;  %v1072_v58 = vpop.eup %1071  ;;  %1091 = vrcp.f32 %v661_v50  ;;  %v677_v59 = vadd.f32 1.0, %v1070_v53  ;;  %v570_v0 = vsub.f32 0.0, %v468_v55 }
 0x157   : > { %v1074_v61 = vpop.eup %1073  ;;  %v662_v62 = vadd.f32 1.0, %v1072_v58  ;;  %1093 = vpow2.f32 %v614_v54  ;;  %v586_v3 = vsub.f32 0.0, %v548_v60  ;;  %v472_v4 = vpop.f32.mrb[30].mxu0 }
 0x158   : > { %v1076_v1 = vpop.eup %1075  ;;  %1095 = vrcp.f32 %v677_v59  ;;  %v678_v2 = vadd.f32 1.0, %v1074_v61  ;;  %v552_v5 = vpop.f32.mrb[30].mxu1  ;;  %v616_v7 = vmul.f32 1.442695, %v570_v0  ;;  %v473_v8 = vadd.f32 %v1397_v49, %v472_v4 }
 0x159   : > { %v1078_v6 = vpop.eup %1077  ;;  %755 = vst [vmem:[%s1417_s22 + $0x38] sm:$0xff] %v1076_v1  ;;  %1097 = vrcp.f32 %v662_v62  ;;  %v553_v9 = vadd.f32 %v1397_v49, %v552_v5  ;;  %v474_v10 = vpop.f32.mrb[31].mxu0  ;;  %v648_v13 = vmul.f32 1.442695, %v586_v3 }
 0x15a   : > { %v554_v11 = vpop.f32.mrb[31].mxu1  ;;  %v1080_v12 = vpop.eup %1079  ;;  %771 = vst [vmem:[%s1417_s22 + $0xb8] sm:$0xff] %v1078_v6  ;;  %1099 = vrcp.f32 %v678_v2  ;;  %v571_v16 = vsub.f32 0.0, %v473_v8 }
 0x15b   : > { %v1082_v14 = vpop.eup %1081  ;;  %v663_v15 = vadd.f32 1.0, %v1080_v12  ;;  %1101 = vpow2.f32 %v646_v63  ;;  %v587_v17 = vsub.f32 0.0, %v553_v9 }
 0x15c   : > { %v1084_v18 = vpop.eup %1083  ;;  %v679_v19 = vadd.f32 1.0, %v1082_v14  ;;  %1103 = vpow2.f32 %v616_v7  ;;  %v618_v49 = vmul.f32 1.442695, %v571_v16 }
 0x15d   : > { %v1086_v20 = vpop.eup %1085  ;;  %756 = vst [vmem:[%s1417_s22 + $0x40] sm:$0xff] %v1084_v18  ;;  %1105 = vrcp.f32 %v663_v15  ;;  %v650_v24 = vmul.f32 1.442695, %v587_v17 }
 0x15e   : > { %v1088_v21 = vpop.eup %1087  ;;  %772 = vst [vmem:[%s1417_s22 + $0xc0] sm:$0xff] %v1086_v20  ;;  %1107 = vrcp.f32 %v679_v19 }
 0x15f   : > { %v1090_v22 = vpop.eup %1089  ;;  %v664_v23 = vadd.f32 1.0, %v1088_v21  ;;  %1109 = vpow2.f32 %v648_v13 }
 0x160   : > { %v1092_v25 = vpop.eup %1091  ;;  %v680_v26 = vadd.f32 1.0, %v1090_v22  ;;  %1111 = vpow2.f32 %v618_v49 }
 0x161   : > { %v1094_v27 = vpop.eup %1093  ;;  %757 = vst [vmem:[%s1417_s22 + $0x48] sm:$0xff] %v1092_v25  ;;  %1113 = vrcp.f32 %v664_v23 }
 0x162   : > { %v1096_v28 = vpop.eup %1095  ;;  %1115 = vrcp.f32 %v680_v26  ;;  %v665_v29 = vadd.f32 1.0, %v1094_v27 }
 0x163   : > { %v1098_v30 = vpop.eup %1097  ;;  %773 = vst [vmem:[%s1417_s22 + $0xc8] sm:$0xff] %v1096_v28  ;;  %1117 = vpow2.f32 %v650_v24 }
 0x164   : > { %v1100_v31 = vpop.eup %1099  ;;  %758 = vst [vmem:[%s1417_s22 + $0x50] sm:$0xff] %v1098_v30  ;;  %1119 = vrcp.f32 %v665_v29 }
 0x165   : > { %v1102_v32 = vpop.eup %1101  ;;  %774 = vst [vmem:[%s1417_s22 + $0xd0] sm:$0xff] %v1100_v31 }
 0x166   : > { %v1104_v33 = vpop.eup %1103  ;;  %v681_v34 = vadd.f32 1.0, %v1102_v32 }
 0x167   : > { %v1106_v35 = vpop.eup %1105  ;;  %v666_v36 = vadd.f32 1.0, %v1104_v33 }
 0x168   : > { %v1108_v37 = vpop.eup %1107  ;;  %759 = vst [vmem:[%s1417_s22 + $0x58] sm:$0xff] %v1106_v35  ;;  %1121 = vrcp.f32 %v681_v34 }
 0x169   : > { %v1110_v38 = vpop.eup %1109  ;;  %775 = vst [vmem:[%s1417_s22 + $0xd8] sm:$0xff] %v1108_v37  ;;  %1123 = vrcp.f32 %v666_v36 }
 0x16a   : > { %v1112_v39 = vpop.eup %1111  ;;  %v682_v40 = vadd.f32 1.0, %v1110_v38 }
 0x16b   : > { %v1114_v41 = vpop.eup %1113  ;;  %v667_v42 = vadd.f32 1.0, %v1112_v39 }
 0x16c   : > { %v1116_v43 = vpop.eup %1115  ;;  %760 = vst [vmem:[%s1417_s22 + $0x60] sm:$0xff] %v1114_v41  ;;  %1125 = vrcp.f32 %v682_v40 }
 0x16d   : > { %v1118_v44 = vpop.eup %1117  ;;  %776 = vst [vmem:[%s1417_s22 + $0xe0] sm:$0xff] %v1116_v43  ;;  %1127 = vrcp.f32 %v667_v42 }
 0x16e   : > { %v1120_v45 = vpop.eup %1119  ;;  %v683_v46 = vadd.f32 1.0, %v1118_v44 }
 0x16f   : > { %761 = vst [vmem:[%s1417_s22 + $0x68] sm:$0xff] %v1120_v45 }
 0x170   : > { %1129 = vrcp.f32 %v683_v46 }
 0x172   : > { %v1122_v47 = vpop.eup %1121 }
 0x173   : > { %v1124_v48 = vpop.eup %1123  ;;  %777 = vst [vmem:[%s1417_s22 + $0xe8] sm:$0xff] %v1122_v47 }
 0x174   : > { %762 = vst [vmem:[%s1417_s22 + $0x70] sm:$0xff] %v1124_v48 }
 0x176   : > { %v1126_v50 = vpop.eup %1125 }
 0x177   : > { %v1128_v51 = vpop.eup %1127  ;;  %778 = vst [vmem:[%s1417_s22 + $0xf0] sm:$0xff] %v1126_v50 }
 0x178   : > { %763 = vst [vmem:[%s1417_s22 + $0x78] sm:$0xff] %v1128_v51 }
 0x17a   : > { %v1130_v52 = vpop.eup %1129 }
 0x17b   : > { %779 = vst [vmem:[%s1417_s22 + $0xf8] sm:$0xff] %v1130_v52 }
 0x17c PF: > { %s13_s14 = sadd.s32 1, %s1153_s14   ;;  %s1482_s12 = smov %s1149_s13 }
 0x17d   : > { %p10_p5 = scmp.ge.s32.totalorder %s13_s14, 9   ;;  %s1483_s13 = smov %s1485_s15 }
 0x17f   :  { %12 = sbr.rel (!%p10_p5) target bundleno = 2 (0x2), region = 68 }

</bundles_post_ra>
